<compile_context>
chip_gen: v7x
topology: tpu7x:2x2x1
jax: 0.10.0
libtpu: 0.0.40
codegen_flags: <defaults>
</compile_context>

<pallas_src>
import functools

import jax
import jax.numpy as jnp
from jax.experimental import pallas as pl
from jax.experimental.pallas import tpu as pltpu

_SLOPE = 0.01        # PyTorch LeakyReLU default negative_slope
_H1 = 1024           # fc1 hidden
_H2 = 2048           # fc2 hidden
TN_OUT_MAX = 1024    # max column tile width for streaming w3
_SUBLANE = 16        # bf16 LHS: 2 rows per sublane -> pad batch to 16
_VMEM_LIMIT = 32 * 1024 * 1024


def _round_up(x, m):
    return ((x + m - 1) // m) * m


def _out_tile(out_dim):
    """Lane-dense (multiple of 128) column tile, capped at TN_OUT_MAX."""
    return min(TN_OUT_MAX, _round_up(out_dim, 128))


def _leaky(x):
    return jnp.where(x > 0, x, jnp.float32(_SLOPE) * x)


def decoder_kernel(x_ref, w1_ref, b1_ref, w2_ref, b2_ref, w3_ref, b3_ref,
                   o_ref, h2_ref):
    """Fused decoder forward.

    Grid axis j runs over w3 column tiles.  h2 (bf16) is computed once at
    j == 0 into the VMEM scratch `h2_ref` and reused for every output tile.
    """
    @pl.when(pl.program_id(0) == 0)
    def _():
        h1 = jnp.dot(x_ref[...], w1_ref[...],
                     preferred_element_type=jnp.float32)
        h1 = _leaky(h1 + b1_ref[...])
        h2 = jnp.dot(h1.astype(jnp.bfloat16), w2_ref[...],
                     preferred_element_type=jnp.float32)
        h2 = _leaky(h2 + b2_ref[...])
        h2_ref[...] = h2.astype(jnp.bfloat16)

    acc = jnp.dot(h2_ref[...], w3_ref[...],
                  preferred_element_type=jnp.float32)
    o_ref[...] = (acc + b3_ref[...]).astype(o_ref.dtype)


@functools.partial(jax.jit, static_argnames=("num_points",))
def decoder_forward(x, prepared_params, *, num_points):
    """x: (B, latent_dim) f32 -> (B, num_points, 3) f32."""
    w1, b1, w2, b2, w3, b3 = prepared_params
    B, L = x.shape
    out_dim = num_points * 3
    out_pad = w3.shape[1]                       # padded to a multiple of tn
    tn = min(TN_OUT_MAX, out_pad)
    assert out_pad % tn == 0
    n_o = out_pad // tn
    B_pad = _round_up(max(B, 1), _SUBLANE)

    xp = jnp.pad(x, ((0, B_pad - B), (0, 0))).astype(jnp.bfloat16)

    cost = pl.CostEstimate(
        flops=2 * B_pad * (L * _H1 + _H1 * _H2 + _H2 * out_pad),
        transcendentals=0,
        bytes_accessed=(xp.size * 2 + w1.size * 2 + b1.size * 4
                        + w2.size * 2 + b2.size * 4
                        + w3.size * 2 + b3.size * 4
                        + B_pad * out_pad * 4),
    )

    out_flat = pl.pallas_call(
        decoder_kernel,
        out_shape=jax.ShapeDtypeStruct((B_pad, out_pad), jnp.float32),
        grid=(n_o,),
        in_specs=[
            pl.BlockSpec((B_pad, L), lambda j: (0, 0)),    # x   (resident)
            pl.BlockSpec((L, _H1), lambda j: (0, 0)),      # w1  (resident)
            pl.BlockSpec((1, _H1), lambda j: (0, 0)),      # b1  (resident)
            pl.BlockSpec((_H1, _H2), lambda j: (0, 0)),    # w2  (resident)
            pl.BlockSpec((1, _H2), lambda j: (0, 0)),      # b2  (resident)
            pl.BlockSpec((_H2, tn), lambda j: (0, j)),     # w3 column tile
            pl.BlockSpec((1, tn), lambda j: (0, j)),       # b3 column tile
        ],
        out_specs=pl.BlockSpec((B_pad, tn), lambda j: (0, j)),
        scratch_shapes=[pltpu.VMEM((B_pad, _H2), jnp.bfloat16)],
        compiler_params=pltpu.CompilerParams(
            dimension_semantics=("arbitrary",),   # h2 scratch carries across j
            vmem_limit_bytes=_VMEM_LIMIT),
        cost_estimate=cost,
    )(xp, w1, b1, w2, b2, w3, b3)

    return out_flat[:B, :out_dim].reshape(B, num_points, 3)


def init_params(key, latent_dim, num_points):
    """Deterministic synthetic f32 parameters, layout (in, out) = torch W.T."""
    dims = [(latent_dim, _H1), (_H1, _H2), (_H2, num_points * 3)]
    keys = jax.random.split(key, 2 * len(dims))
    params = []
    for i, (din, dout) in enumerate(dims):
        scale = 1.0 / jnp.sqrt(jnp.float32(din))
        w = jax.random.uniform(keys[2 * i], (din, dout), jnp.float32, -scale, scale)
        b = jax.random.uniform(keys[2 * i + 1], (1, dout), jnp.float32, -scale, scale)
        params += [w, b]
    return tuple(params)


def prepare_params(params, num_points):
    """One-time prep: weights -> bf16 (MXU-native, halves HBM traffic);
    final-layer columns zero-padded up to a multiple of the column tile."""
    w1, b1, w2, b2, w3, b3 = params
    out_dim = num_points * 3
    tn = _out_tile(out_dim)
    pad = _round_up(out_dim, tn) - out_dim
    w3p = jnp.pad(w3, ((0, 0), (0, pad)))
    b3p = jnp.pad(b3, ((0, 0), (0, pad)))
    return (w1.astype(jnp.bfloat16), b1.astype(jnp.float32),
            w2.astype(jnp.bfloat16), b2.astype(jnp.float32),
            w3p.astype(jnp.bfloat16), b3p.astype(jnp.float32))


if __name__ == "__main__":
    # Small config consistent with the module.
    batch = 2
    latent_dim = 32
    num_points = 64      # flattened output dim = 192

    key = jax.random.PRNGKey(0)
    k_x, k_p = jax.random.split(key)
    x = jax.random.normal(k_x, (batch, latent_dim), jnp.float32)
    params = init_params(k_p, latent_dim, num_points)
    prepared = prepare_params(params, num_points)

    out = decoder_forward(x, prepared, num_points=num_points)
    out = jax.block_until_ready(out)

    assert out.shape == (batch, num_points, 3), out.shape
    assert out.dtype == jnp.float32

    # Pure-JAX reference using the same bf16-weight numerics (f32 accumulation).
    w1, b1, w2, b2, w3, b3 = params
    xb = x.astype(jnp.bfloat16)
    h = jnp.dot(xb, w1.astype(jnp.bfloat16),
                preferred_element_type=jnp.float32) + b1
    h = jnp.where(h > 0, h, 0.01 * h)
    h = jnp.dot(h.astype(jnp.bfloat16), w2.astype(jnp.bfloat16),
                preferred_element_type=jnp.float32) + b2
    h = jnp.where(h > 0, h, 0.01 * h)
    ref = (jnp.dot(h.astype(jnp.bfloat16), w3.astype(jnp.bfloat16),
                   preferred_element_type=jnp.float32)
           + b3).reshape(batch, num_points, 3)
    max_err = float(jnp.max(jnp.abs(out - ref)))
    assert jnp.allclose(out, ref, atol=2e-2, rtol=2e-2), max_err

    print("KERNEL_OK")
</pallas_src>

<mosaic_0001>
module attributes {stable_mosaic.version = 11 : i64} {
  func.func @decoder_kernel(%arg0: i32, %arg1: memref<16x32xbf16, #tpu.memory_space<vmem>>, %arg2: memref<32x1024xbf16, #tpu.memory_space<vmem>>, %arg3: memref<1x1024xf32, #tpu.memory_space<vmem>>, %arg4: memref<1024x2048xbf16, #tpu.memory_space<vmem>>, %arg5: memref<1x2048xf32, #tpu.memory_space<vmem>>, %arg6: memref<2048x256xbf16, #tpu.memory_space<vmem>>, %arg7: memref<1x256xf32, #tpu.memory_space<vmem>>, %arg8: memref<16x256xf32, #tpu.memory_space<vmem>>, %arg9: memref<16x2048xbf16, #tpu.memory_space<vmem>>) attributes {dimension_semantics = [#tpu.dimension_semantics<arbitrary>], iteration_bounds = array<i64: 1>, scalar_prefetch = 0 : i64, scratch_operands = 1 : i64, tpu.core_type = #tpu.core_type<tc>, window_params = [{pipeline_mode = #tpu.pipeline_mode<synchronous>, transform_indices = @transform_0, window_bounds = array<i64: 16, 32>}, {pipeline_mode = #tpu.pipeline_mode<synchronous>, transform_indices = @transform_1, window_bounds = array<i64: 32, 1024>}, {pipeline_mode = #tpu.pipeline_mode<synchronous>, transform_indices = @transform_2, window_bounds = array<i64: 1, 1024>}, {pipeline_mode = #tpu.pipeline_mode<synchronous>, transform_indices = @transform_3, window_bounds = array<i64: 1024, 2048>}, {pipeline_mode = #tpu.pipeline_mode<synchronous>, transform_indices = @transform_4, window_bounds = array<i64: 1, 2048>}, {transform_indices = @transform_5, window_bounds = array<i64: 2048, 256>}, {transform_indices = @transform_6, window_bounds = array<i64: 1, 256>}, {transform_indices = @transform_7, window_bounds = array<i64: 16, 256>}]} {
    %c0_i32 = arith.constant 0 : i32
    %0 = arith.cmpi eq, %arg0, %c0_i32 : i32
    %1 = arith.extui %0 : i1 to i32
    %c0_i32_0 = arith.constant 0 : i32
    %2 = arith.cmpi ne, %1, %c0_i32_0 : i32
    scf.if %2 {
      %c0_8 = arith.constant 0 : index
      %c0_9 = arith.constant 0 : index
      %10 = vector.load %arg1[%c0_8, %c0_9] : memref<16x32xbf16, #tpu.memory_space<vmem>>, vector<16x32xbf16>
      %c0_10 = arith.constant 0 : index
      %c0_11 = arith.constant 0 : index
      %11 = vector.load %arg2[%c0_10, %c0_11] : memref<32x1024xbf16, #tpu.memory_space<vmem>>, vector<32x1024xbf16>
      %cst_12 = arith.constant dense<0.000000e+00> : vector<16x1024xf32>
      %12 = tpu.matmul %10, %11, %cst_12 {dimension_numbers = #tpu.dot_dimension_numbers<[1], [0], [0], [1], [0, 0, 1, 1], [], []>} : vector<16x32xbf16>, vector<32x1024xbf16>, vector<16x1024xf32> -> vector<16x1024xf32>
      %c0_13 = arith.constant 0 : index
      %c0_14 = arith.constant 0 : index
      %13 = vector.load %arg3[%c0_13, %c0_14] : memref<1x1024xf32, #tpu.memory_space<vmem>>, vector<1x1024xf32>
      %14 = vector.broadcast %13 : vector<1x1024xf32> to vector<16x1024xf32>
      %15 = arith.addf %12, %14 : vector<16x1024xf32>
      %cst_15 = arith.constant 0.000000e+00 : f32
      %16 = vector.broadcast %cst_15 : f32 to vector<16x1024xf32>
      %17 = arith.cmpf ogt, %15, %16 : vector<16x1024xf32>
      %cst_16 = arith.constant 0.00999999977 : f32
      %18 = vector.broadcast %cst_16 : f32 to vector<16x1024xf32>
      %19 = arith.mulf %18, %15 : vector<16x1024xf32>
      %20 = arith.select %17, %15, %19 : vector<16x1024xi1>, vector<16x1024xf32>
      %21 = arith.truncf %20 : vector<16x1024xf32> to vector<16x1024xbf16>
      %c0_17 = arith.constant 0 : index
      %c0_18 = arith.constant 0 : index
      %22 = vector.load %arg4[%c0_17, %c0_18] : memref<1024x2048xbf16, #tpu.memory_space<vmem>>, vector<1024x2048xbf16>
      %cst_19 = arith.constant dense<0.000000e+00> : vector<16x2048xf32>
      %23 = tpu.matmul %21, %22, %cst_19 {dimension_numbers = #tpu.dot_dimension_numbers<[1], [0], [0], [1], [0, 0, 1, 1], [], []>} : vector<16x1024xbf16>, vector<1024x2048xbf16>, vector<16x2048xf32> -> vector<16x2048xf32>
      %c0_20 = arith.constant 0 : index
      %c0_21 = arith.constant 0 : index
      %24 = vector.load %arg5[%c0_20, %c0_21] : memref<1x2048xf32, #tpu.memory_space<vmem>>, vector<1x2048xf32>
      %25 = vector.broadcast %24 : vector<1x2048xf32> to vector<16x2048xf32>
      %26 = arith.addf %23, %25 : vector<16x2048xf32>
      %cst_22 = arith.constant 0.000000e+00 : f32
      %27 = vector.broadcast %cst_22 : f32 to vector<16x2048xf32>
      %28 = arith.cmpf ogt, %26, %27 : vector<16x2048xf32>
      %cst_23 = arith.constant 0.00999999977 : f32
      %29 = vector.broadcast %cst_23 : f32 to vector<16x2048xf32>
      %30 = arith.mulf %29, %26 : vector<16x2048xf32>
      %31 = arith.select %28, %26, %30 : vector<16x2048xi1>, vector<16x2048xf32>
      %32 = arith.truncf %31 : vector<16x2048xf32> to vector<16x2048xbf16>
      %c0_24 = arith.constant 0 : index
      %c0_25 = arith.constant 0 : index
      %33 = vector.load %arg9[%c0_24, %c0_25] : memref<16x2048xbf16, #tpu.memory_space<vmem>>, vector<16x2048xbf16>
      tpu.vector_store %arg9[%c0_24, %c0_25], %32 {strides = array<i32>} : memref<16x2048xbf16, #tpu.memory_space<vmem>>, vector<16x2048xbf16>,
    } else {
    }
    %c0 = arith.constant 0 : index
    %c0_1 = arith.constant 0 : index
    %3 = vector.load %arg9[%c0, %c0_1] : memref<16x2048xbf16, #tpu.memory_space<vmem>>, vector<16x2048xbf16>
    %c0_2 = arith.constant 0 : index
    %c0_3 = arith.constant 0 : index
    %4 = vector.load %arg6[%c0_2, %c0_3] : memref<2048x256xbf16, #tpu.memory_space<vmem>>, vector<2048x256xbf16>
    %cst = arith.constant dense<0.000000e+00> : vector<16x256xf32>
    %5 = tpu.matmul %3, %4, %cst {dimension_numbers = #tpu.dot_dimension_numbers<[1], [0], [0], [1], [0, 0, 1, 1], [], []>} : vector<16x2048xbf16>, vector<2048x256xbf16>, vector<16x256xf32> -> vector<16x256xf32>
    %c0_4 = arith.constant 0 : index
    %c0_5 = arith.constant 0 : index
    %6 = vector.load %arg7[%c0_4, %c0_5] : memref<1x256xf32, #tpu.memory_space<vmem>>, vector<1x256xf32>
    %7 = vector.broadcast %6 : vector<1x256xf32> to vector<16x256xf32>
    %8 = arith.addf %5, %7 : vector<16x256xf32>
    %c0_6 = arith.constant 0 : index
    %c0_7 = arith.constant 0 : index
    %9 = vector.load %arg8[%c0_6, %c0_7] : memref<16x256xf32, #tpu.memory_space<vmem>>, vector<16x256xf32>
    tpu.vector_store %arg8[%c0_6, %c0_7], %8 {strides = array<i32>} : memref<16x256xf32, #tpu.memory_space<vmem>>, vector<16x256xf32>,
    return
  }
  func.func @transform_0(%arg0: i32) -> (i32, i32) {
    %c0_i32 = arith.constant 0 : i32
    %c0_i32_0 = arith.constant 0 : i32
    %c0_i32_1 = arith.constant 0 : i32
    return %c0_i32, %c0_i32_0 : i32, i32
  }
  func.func @transform_1(%arg0: i32) -> (i32, i32) {
    %c0_i32 = arith.constant 0 : i32
    %c0_i32_0 = arith.constant 0 : i32
    %c0_i32_1 = arith.constant 0 : i32
    return %c0_i32, %c0_i32_0 : i32, i32
  }
  func.func @transform_2(%arg0: i32) -> (i32, i32) {
    %c0_i32 = arith.constant 0 : i32
    %c0_i32_0 = arith.constant 0 : i32
    %c0_i32_1 = arith.constant 0 : i32
    return %c0_i32, %c0_i32_0 : i32, i32
  }
  func.func @transform_3(%arg0: i32) -> (i32, i32) {
    %c0_i32 = arith.constant 0 : i32
    %c0_i32_0 = arith.constant 0 : i32
    %c0_i32_1 = arith.constant 0 : i32
    return %c0_i32, %c0_i32_0 : i32, i32
  }
  func.func @transform_4(%arg0: i32) -> (i32, i32) {
    %c0_i32 = arith.constant 0 : i32
    %c0_i32_0 = arith.constant 0 : i32
    %c0_i32_1 = arith.constant 0 : i32
    return %c0_i32, %c0_i32_0 : i32, i32
  }
  func.func @transform_5(%arg0: i32) -> (i32, i32) {
    %c0_i32 = arith.constant 0 : i32
    %c0_i32_0 = arith.constant 0 : i32
    return %c0_i32, %arg0 : i32, i32
  }
  func.func @transform_6(%arg0: i32) -> (i32, i32) {
    %c0_i32 = arith.constant 0 : i32
    %c0_i32_0 = arith.constant 0 : i32
    return %c0_i32, %arg0 : i32, i32
  }
  func.func @transform_7(%arg0: i32) -> (i32, i32) {
    %c0_i32 = arith.constant 0 : i32
    %c0_i32_0 = arith.constant 0 : i32
    return %c0_i32, %arg0 : i32, i32
  }
}

</mosaic_0001>

<bundles_post_ra>
// kernel: decoder_forward.1
= control target key start
LH: loop header
LB: loop body
LE: loop exit
PB: predicated region body
PF: predicated region fallthrough
CT: control target
= control target key end

     0   :  { %12 = vsyncpa [#allocation4], 0  ;;  %s12682_s0 = inlined_call_operand.vmem [shape: bf16[16,32], index: 0, kind: input, shape index: {}]   ;;  %s12683_s1 = inlined_call_operand.hbm [shape: bf16[32,1024], index: 1, kind: input, shape index: {}]   ;;  %s12684_s2 = inlined_call_operand.hbm [shape: f32[1,1024], index: 2, kind: input, shape index: {}]   ;;  %s12685_s3 = inlined_call_operand.hbm [shape: bf16[1024,2048], index: 3, kind: input, shape index: {}]   ;;  %s12686_s4 = inlined_call_operand.hbm [shape: f32[1,2048], index: 4, kind: input, shape index: {}]   ;;  %s12687_s5 = inlined_call_operand.hbm [shape: bf16[2048,256], index: 5, kind: input, shape index: {}]   ;;  %s12688_s6 = inlined_call_operand.hbm [shape: f32[1,256], index: 6, kind: input, shape index: {}]   ;;  %s12689_s7 = inlined_call_operand.vmem [shape: f32[16,256], index: 7, kind: output, shape index: {}]  }
   0x1   :  { %13 = vsyncpa [#allocation6], 0 }
   0x2   :  { %14 = vsyncpa [#allocation9], 0 }
   0x3   :  { %15 = vsyncpa [#allocation12], 0  ;;  %s12139_s24 = smov [#allocation5]   ;;  %s12140_s26 = smov [#allocation8]  }
   0x4   :  { %s36_s25 = sshll.u32 %s12139_s24, 4  ;;  %s58_s27 = sshll.u32 %s12140_s26, 4  ;;  %s37_s25 = int_to_ptr.vmem [resolvable:$true] %s36_s25  ;;  %s59_s27 = int_to_ptr.vmem [resolvable:$true] %s58_s27 }
   0x5   :  { %s11999_s30 = scalar_lea.hbm %s12684_s2, 128 }
   0x6   :  { %p12000_p0 = scmp.ne.s32.totalorder %s12684_s2, %s11999_s30  ;;  %p12003_p1 = scmp.lt.u32.totalorder %s11999_s30, %s12684_s2 }
   0x8   :  { %p12005_p2 = pnand %p12003_p1, %p12000_p0 }
   0xa   :  { %12008 = shalt.err (!%p12005_p2)
}
   0xb   :  { %s12009_s12 = scalar_lea.vmem %s37_s25, 128  ;;  %p12014_p4 = scmp.lt.s32.totalorder %s37_s25, %s37_s25 }
   0xc   :  { %p12010_p3 = scmp.ne.s32.totalorder %s37_s25, %s12009_s12  ;;  %p12015_p5 = scmp.lt.s32.totalorder %s12009_s12, %s12009_s12 }
   0xe   :  { %p12016_p6 = por %p12015_p5, %p12014_p4 }
  0x10   :  { %p12017_p7 = pnand %p12016_p6, %p12010_p3 }
  0x12   :  { %12020 = shalt.err (!%p12017_p7)
}
  0x13   :  { %39 = dma.hbm_to_vmem [thread:$0]  %s12684_s2, 128, %s37_s25, [#allocation6]  }
  0x14   :  { %s12021_s17 = scalar_lea.hbm %s12686_s4, 256 }
  0x15   :  { %p12022_p8 = scmp.ne.s32.totalorder %s12686_s4, %s12021_s17  ;;  %p12025_p9 = scmp.lt.u32.totalorder %s12021_s17, %s12686_s4 }
  0x17   :  { %p12027_p10 = pnand %p12025_p9, %p12022_p8 }
  0x19   :  { %12030 = shalt.err (!%p12027_p10)
}
  0x1a   :  { %s12031_s22 = scalar_lea.vmem %s59_s27, 256  ;;  %p12036_p12 = scmp.lt.s32.totalorder %s59_s27, %s59_s27 }
  0x1b   :  { %p12032_p11 = scmp.ne.s32.totalorder %s59_s27, %s12031_s22  ;;  %p12037_p13 = scmp.lt.s32.totalorder %s12031_s22, %s12031_s22 }
  0x1d   :  { %p12038_p0 = por %p12037_p13, %p12036_p12 }
  0x1f   :  { %p12039_p1 = pnand %p12038_p0, %p12032_p11 }
  0x21   :  { %12042 = shalt.err (!%p12039_p1)
}
  0x22   :  { %61 = dma.hbm_to_vmem [thread:$0]  %s12686_s4, 256, %s59_s27, [#allocation9]  }
  0x23   :  { %s12141_s24 = smov [#allocation3]   ;;  %s12043_s29 = scalar_lea.hbm %s12683_s1, 2048 }
  0x24   :  { %s23_s25 = sshll.u32 %s12141_s24, 4  ;;  %p12044_p2 = scmp.ne.s32.totalorder %s12683_s1, %s12043_s29  ;;  %s24_s25 = int_to_ptr.vmem [resolvable:$true] %s23_s25 }
  0x25   :  { %p12047_p3 = scmp.lt.u32.totalorder %s12043_s29, %s12683_s1 }
  0x27   :  { %p12049_p4 = pnand %p12047_p3, %p12044_p2 }
  0x29   :  { %12052 = shalt.err (!%p12049_p4)
}
  0x2a   :  { %s12053_s11 = scalar_lea.vmem %s24_s25, 2048  ;;  %p12058_p6 = scmp.lt.s32.totalorder %s24_s25, %s24_s25 }
  0x2b   :  { %p12054_p5 = scmp.ne.s32.totalorder %s24_s25, %s12053_s11  ;;  %p12059_p7 = scmp.lt.s32.totalorder %s12053_s11, %s12053_s11 }
  0x2d   :  { %p12060_p8 = por %p12059_p7, %p12058_p6 }
  0x2f   :  { %p12061_p9 = pnand %p12060_p8, %p12054_p5 }
  0x31   :  { %12064 = shalt.err (!%p12061_p9)
}
  0x32   :  { %s12142_s4 = smov 512   ;;  %s12143_s27 = smov 32  }
  0x33   :  { %29 = dma.hbm_to_vmem [thread:$0]  %s12683_s1, 2048, %s24_s25, [#allocation4], %s12142_s4, %s12142_s4, %s12143_s27  }
  0x34   :  { %s12144_s14 = smov [#allocation7]   ;;  %s12065_s18 = scalar_lea.hbm %s12685_s3, 131072 }
  0x35   :  { %s45_s15 = sshll.u32 %s12144_s14, 4  ;;  %p12066_p10 = scmp.ne.s32.totalorder %s12685_s3, %s12065_s18  ;;  %s46_s15 = int_to_ptr.vmem [resolvable:$true] %s45_s15 }
  0x36   :  { %p12069_p11 = scmp.lt.u32.totalorder %s12065_s18, %s12685_s3 }
  0x38   :  { %p12071_p12 = pnand %p12069_p11, %p12066_p10 }
  0x3a   :  { %12074 = shalt.err (!%p12071_p12)
}
  0x3b   :  { %s12075_s2 = scalar_lea.vmem %s46_s15, 131072  ;;  %p12080_p0 = scmp.lt.s32.totalorder %s46_s15, %s46_s15 }
  0x3c   :  { %p12076_p13 = scmp.ne.s32.totalorder %s46_s15, %s12075_s2  ;;  %p12081_p1 = scmp.lt.s32.totalorder %s12075_s2, %s12075_s2 }
  0x3e   :  { %p12082_p2 = por %p12081_p1, %p12080_p0 }
  0x40   :  { %p12083_p3 = pnand %p12082_p2, %p12076_p13 }
  0x42   :  { %12086 = shalt.err (!%p12083_p3)
}
  0x43   :  { %s12145_s1 = smov 1024   ;;  %s12146_s23 = smov 64  }
  0x44   :  { %51 = dma.hbm_to_vmem [thread:$0]  %s12685_s3, 131072, %s46_s15, [#allocation6], %s12145_s1, %s12145_s1, %s12146_s23  }
  0x45   :  { %s12147_s26 = smov [#allocation10]   ;;  %s12087_s8 = scalar_lea.hbm %s12687_s5, 32768 }
  0x46   :  { %s67_s28 = sshll.u32 %s12147_s26, 4  ;;  %p12088_p4 = scmp.ne.s32.totalorder %s12687_s5, %s12087_s8  ;;  %s68_s28 = int_to_ptr.vmem [resolvable:$true] %s67_s28 }
  0x47   :  { %p12091_p5 = scmp.lt.u32.totalorder %s12087_s8, %s12687_s5 }
  0x49   :  { %p12093_p6 = pnand %p12091_p5, %p12088_p4 }
  0x4b   :  { %12096 = shalt.err (!%p12093_p6)
}
  0x4c   :  { %s12097_s27 = scalar_lea.vmem %s68_s28, 32768  ;;  %p12102_p8 = scmp.lt.s32.totalorder %s68_s28, %s68_s28 }
  0x4d   :  { %p12098_p7 = scmp.ne.s32.totalorder %s68_s28, %s12097_s27  ;;  %p12103_p9 = scmp.lt.s32.totalorder %s12097_s27, %s12097_s27 }
  0x4f   :  { %p12104_p10 = por %p12103_p9, %p12102_p8 }
  0x51   :  { %p12105_p11 = pnand %p12104_p10, %p12098_p7 }
  0x53   :  { %12108 = shalt.err (!%p12105_p11)
}
  0x54   :  { %s12148_s3 = smov 128   ;;  %s12149_s12 = smov 8  }
  0x55   :  { %73 = dma.hbm_to_vmem [thread:$0]  %s12687_s5, 32768, %s68_s28, [#allocation9], %s12148_s3, %s12148_s3, %s12149_s12  }
  0x56   :  { %s12150_s15 = smov [#allocation11]   ;;  %s12109_s19 = scalar_lea.hbm %s12688_s6, 32 }
  0x57   :  { %s80_s16 = sshll.u32 %s12150_s15, 4  ;;  %p12110_p12 = scmp.ne.s32.totalorder %s12688_s6, %s12109_s19  ;;  %s81_s16 = int_to_ptr.vmem [resolvable:$true] %s80_s16 }
  0x58   :  { %p12113_p13 = scmp.lt.u32.totalorder %s12109_s19, %s12688_s6 }
  0x5a   :  { %p12115_p0 = pnand %p12113_p13, %p12110_p12 }
  0x5c   :  { %12118 = shalt.err (!%p12115_p0)
}
  0x5d   :  { %s12119_s1 = scalar_lea.vmem %s81_s16, 32  ;;  %p12124_p2 = scmp.lt.s32.totalorder %s81_s16, %s81_s16 }
  0x5e   :  { %p12120_p1 = scmp.ne.s32.totalorder %s81_s16, %s12119_s1  ;;  %p12125_p3 = scmp.lt.s32.totalorder %s12119_s1, %s12119_s1 }
  0x60   :  { %p12126_p4 = por %p12125_p3, %p12124_p2 }
  0x62   :  { %p12127_p5 = pnand %p12126_p4, %p12120_p1 }
  0x64   :  { %12130 = shalt.err (!%p12127_p5)
}
  0x65   :  { %83 = dma.hbm_to_vmem [thread:$0]  %s12688_s6, 32, %s81_s16, [#allocation12]  }
  0x66   :  { %12131 = dma.done.wait [#allocation4], 2048  }
  0x67   :  { %12132 = vsyncadd [#allocation4], 4294965248 }
  0x68   :  { %12133 = dma.done.wait [#allocation6], 131200  }
  0x69   :  { %12134 = vsyncadd [#allocation6], 4294836096 }
  0x6a   :  { %12135 = dma.done.wait [#allocation9], 33024  }
  0x6b   :  { %12136 = vsyncadd [#allocation9], 4294934272 }
  0x6c   :  { %12137 = dma.done.wait [#allocation12], 32  }
  0x6d   :  { %12138 = vsyncadd [#allocation12], 4294967264  ;;  %v12151_v0 = vmov 0   ;;  %v109_v1 = vld [vmem:[#allocation3] sm:$0xff]  ;;  %v110_v8 = vld [vmem:[#allocation3 + $0x8] sm:$0xff]  ;;  %vm252_vm0 = vcmask 261120  }
  0x6e   :  { %288 = vmatprep.mubr.bf16.mxu0 %v12151_v0  ;;  %331 = vmatprep.mubr.bf16.mxu1 %v12151_v0  ;;  %v113_v2 = vld [vmem:[#allocation3 + $0x20] sm:$0xff]  ;;  %v114_v9 = vld [vmem:[#allocation3 + $0x28] sm:$0xff]  ;;  %v111_v14 = vld [vmem:[#allocation3 + $0x10] sm:$0xff] }
  0x6f   :  { %v117_v3 = vld [vmem:[#allocation3 + $0x40] sm:$0xff]  ;;  %v10138_v4 = vcombine.high %v109_v1, %v113_v2  ;;  %v10137_v5 = vcombine.low %v109_v1, %v113_v2  ;;  %v10140_v10 = vcombine.high %v110_v8, %v114_v9  ;;  %v10139_v11 = vcombine.low %v110_v8, %v114_v9  ;;  %v118_v12 = vld [vmem:[#allocation3 + $0x48] sm:$0xff]  ;;  %v115_v17 = vld [vmem:[#allocation3 + $0x30] sm:$0xff] }
  0x70   :  { %v121_v6 = vld [vmem:[#allocation3 + $0x60] sm:$0xff]  ;;  %v122_v13 = vld [vmem:[#allocation3 + $0x68] sm:$0xff]  ;;  %v10142_v18 = vcombine.high %v111_v14, %v115_v17  ;;  %v112_v19 = vld [vmem:[#allocation3 + $0x18] sm:$0xff]  ;;  %v10141_v26 = vcombine.low %v111_v14, %v115_v17 }
  0x71   :  { %v10146_v7 = vcombine.high %v117_v3, %v121_v6  ;;  %256 = vmatprep.subr.bf16.mxu0 %v10138_v4  ;;  %v10145_v15 = vcombine.low %v117_v3, %v121_v6  ;;  %v10148_v16 = vcombine.high %v118_v12, %v122_v13  ;;  %299 = vmatprep.subr.bf16.mxu1 %v10140_v10  ;;  %v116_v20 = vld [vmem:[#allocation3 + $0x38] sm:$0xff]  ;;  %v119_v22 = vld [vmem:[#allocation3 + $0x50] sm:$0xff]  ;;  %v11610_v24 = vld [vmem:[%s12682_s0] sm:$0xff]  }
  0x72   :  { %257 = vmatpush1.bf16.msra.mxu0 %v10137_v5  ;;  %300 = vmatpush1.bf16.msra.mxu1 %v10139_v11  ;;  %v10147_v21 = vcombine.low %v118_v12, %v122_v13  ;;  %v123_v23 = vld [vmem:[#allocation3 + $0x70] sm:$0xff]  ;;  %v10144_v25 = vcombine.high %v112_v19, %v116_v20  ;;  %v120_v27 = vld [vmem:[#allocation3 + $0x58] sm:$0xff]  ;;  %v10143_v30 = vcombine.low %v112_v19, %v116_v20  ;;  %v484_v35 = vld [vmem:[#allocation7] sm:$0xff] }
  0x73   :  { %258 = vmatprep.subr.bf16.mxu0 %v10146_v7  ;;  %301 = vmatprep.subr.bf16.mxu1 %v10148_v16  ;;  %v124_v28 = vld [vmem:[#allocation3 + $0x78] sm:$0xff]  ;;  %v10150_v29 = vcombine.high %v119_v22, %v123_v23  ;;  %v10149_v34 = vcombine.low %v119_v22, %v123_v23  ;;  %v492_v36 = vld [vmem:[#allocation7 + $0x40] sm:$0xff] }
  0x74   :  { %v486_v31 = vld [vmem:[#allocation7 + $0x10] sm:$0xff]  ;;  %v10152_v33 = vcombine.high %v120_v27, %v124_v28  ;;  %v10151_v38 = vcombine.low %v120_v27, %v124_v28  ;;  %v10158_v41 = vcombine.high %v484_v35, %v492_v36  ;;  %v500_v43 = vld [vmem:[#allocation7 + $0x80] sm:$0xff]  ;;  %v10157_v46 = vcombine.low %v484_v35, %v492_v36 }
  0x75   :  { %v494_v32 = vld [vmem:[#allocation7 + $0x50] sm:$0xff]  ;;  %v508_v44 = vld [vmem:[#allocation7 + $0xc0] sm:$0xff] }
  0x76   :  { %259 = vmatpush1.bf16.msra.mxu0 %v10145_v15  ;;  %302 = vmatpush1.bf16.msra.mxu1 %v10147_v21  ;;  %v10162_v37 = vcombine.high %v486_v31, %v494_v32  ;;  %v502_v39 = vld [vmem:[#allocation7 + $0x90] sm:$0xff]  ;;  %v10161_v42 = vcombine.low %v486_v31, %v494_v32  ;;  %v10174_v49 = vcombine.high %v500_v43, %v508_v44  ;;  %v516_v51 = vld [vmem:[#allocation7 + $0x100] sm:$0xff] }
  0x77   :  { %342 = vmatprep.subr.bf16.mxu0 %v10142_v18  ;;  %385 = vmatprep.subr.bf16.mxu1 %v10144_v25  ;;  %v510_v40 = vld [vmem:[#allocation7 + $0xd0] sm:$0xff]  ;;  %v524_v52 = vld [vmem:[#allocation7 + $0x140] sm:$0xff]  ;;  %v10173_v54 = vcombine.low %v500_v43, %v508_v44 }
  0x78   :  { %v10178_v45 = vcombine.high %v502_v39, %v510_v40  ;;  %v518_v47 = vld [vmem:[#allocation7 + $0x110] sm:$0xff]  ;;  %v10177_v50 = vcombine.low %v502_v39, %v510_v40  ;;  %v10190_v57 = vcombine.high %v516_v51, %v524_v52  ;;  %v532_v59 = vld [vmem:[#allocation7 + $0x180] sm:$0xff] }
  0x79   :  { %10153 = vmatmul.mubr.msk.bf16.vlgmr.msra.gmra.mrb[0].mxu0 %vm252_vm0, %v11610_v24  ;;  %10154 = vmatmul.mubr.msk.bf16.vlgmr.msra.gmra.mrb[0].mxu1 %vm252_vm0, %v11610_v24  ;;  %v526_v48 = vld [vmem:[#allocation7 + $0x150] sm:$0xff]  ;;  %v540_v60 = vld [vmem:[#allocation7 + $0x1c0] sm:$0xff] }
  0x7a   :  { %343 = vmatpush1.bf16.msra.mxu0 %v10141_v26  ;;  %374 = vmatprep.mubr.bf16.mxu0 %v12151_v0  ;;  %v10194_v53 = vcombine.high %v518_v47, %v526_v48  ;;  %v534_v55 = vld [vmem:[#allocation7 + $0x190] sm:$0xff]  ;;  %v10193_v58 = vcombine.low %v518_v47, %v526_v48  ;;  %v548_v1 = vld [vmem:[#allocation7 + $0x200] sm:$0xff]  ;;  %v10206_v3 = vcombine.high %v532_v59, %v540_v60 }
  0x7b   :  { %344 = vmatprep.subr.bf16.mxu0 %v10150_v29  ;;  %386 = vmatpush1.bf16.msra.mxu1 %v10143_v30  ;;  %v542_v56 = vld [vmem:[#allocation7 + $0x1d0] sm:$0xff]  ;;  %v556_v2 = vld [vmem:[#allocation7 + $0x240] sm:$0xff]  ;;  %v10205_v8 = vcombine.low %v532_v59, %v540_v60 }
  0x7c   :  { %417 = vmatprep.mubr.bf16.mxu1 %v12151_v0  ;;  %387 = vmatprep.subr.bf16.mxu1 %v10152_v33  ;;  %v550_v61 = vld [vmem:[#allocation7 + $0x210] sm:$0xff]  ;;  %v10210_v62 = vcombine.high %v534_v55, %v542_v56  ;;  %v10189_v0 = vcombine.low %v516_v51, %v524_v52  ;;  %v10209_v4 = vcombine.low %v534_v55, %v542_v56  ;;  %v564_v9 = vld [vmem:[#allocation7 + $0x280] sm:$0xff] }
  0x7d   :  { %v558_v63 = vld [vmem:[#allocation7 + $0x250] sm:$0xff]  ;;  %v572_v10 = vld [vmem:[#allocation7 + $0x2c0] sm:$0xff]  ;;  %v10222_v11 = vcombine.high %v548_v1, %v556_v2  ;;  %v10221_v16 = vcombine.low %v548_v1, %v556_v2 }
  0x7e   :  { %345 = vmatpush1.bf16.msra.mxu0 %v10149_v34  ;;  %v566_v5 = vld [vmem:[#allocation7 + $0x290] sm:$0xff]  ;;  %v10226_v7 = vcombine.high %v550_v61, %v558_v63  ;;  %v10225_v12 = vcombine.low %v550_v61, %v558_v63  ;;  %v580_v17 = vld [vmem:[#allocation7 + $0x300] sm:$0xff]  ;;  %v10238_v19 = vcombine.high %v564_v9, %v572_v10 }
  0x7f   :  { %7056 = vmatprep.subr.bf16.mxu0 %v10162_v37  ;;  %388 = vmatpush1.bf16.msra.mxu1 %v10151_v38  ;;  %v574_v6 = vld [vmem:[#allocation7 + $0x2d0] sm:$0xff]  ;;  %v588_v18 = vld [vmem:[#allocation7 + $0x340] sm:$0xff] }
  0x80   :  { %6712 = vmatprep.subr.bf16.mxu1 %v10158_v41  ;;  %v582_v13 = vld [vmem:[#allocation7 + $0x310] sm:$0xff]  ;;  %v10242_v15 = vcombine.high %v566_v5, %v574_v6  ;;  %v10241_v20 = vcombine.low %v566_v5, %v574_v6  ;;  %v596_v25 = vld [vmem:[#allocation7 + $0x380] sm:$0xff]  ;;  %v10254_v27 = vcombine.high %v580_v17, %v588_v18  ;;  %v10253_v32 = vcombine.low %v580_v17, %v588_v18 }
  0x81   :  { %10155 = vmatmul.mubr.msk.bf16.vlgmr.msra.gmra.mrb[4].mxu0 %vm252_vm0, %v11610_v24  ;;  %v590_v14 = vld [vmem:[#allocation7 + $0x350] sm:$0xff]  ;;  %v604_v26 = vld [vmem:[#allocation7 + $0x3c0] sm:$0xff] }
  0x82   :  { %7057 = vmatpush1.bf16.msra.mxu0 %v10161_v42  ;;  %10156 = vmatmul.mubr.msk.bf16.vlgmr.msra.gmra.mrb[4].mxu1 %vm252_vm0, %v11610_v24  ;;  %v598_v21 = vld [vmem:[#allocation7 + $0x390] sm:$0xff]  ;;  %v10258_v23 = vcombine.high %v582_v13, %v590_v14  ;;  %v10237_v24 = vcombine.low %v564_v9, %v572_v10  ;;  %v10257_v28 = vcombine.low %v582_v13, %v590_v14  ;;  %v612_v33 = vld [vmem:[#allocation7 + $0x400] sm:$0xff] }
  0x83   :  { %7058 = vmatprep.subr.bf16.mxu0 %v10178_v45  ;;  %6713 = vmatpush1.bf16.msra.mxu1 %v10157_v46  ;;  %v606_v22 = vld [vmem:[#allocation7 + $0x3d0] sm:$0xff]  ;;  %v620_v34 = vld [vmem:[#allocation7 + $0x440] sm:$0xff]  ;;  %v10270_v35 = vcombine.high %v596_v25, %v604_v26  ;;  %v10269_v40 = vcombine.low %v596_v25, %v604_v26 }
  0x84   :  { %6714 = vmatprep.subr.bf16.mxu1 %v10174_v49  ;;  %v614_v29 = vld [vmem:[#allocation7 + $0x410] sm:$0xff]  ;;  %v10274_v31 = vcombine.high %v598_v21, %v606_v22  ;;  %v10273_v36 = vcombine.low %v598_v21, %v606_v22  ;;  %v628_v41 = vld [vmem:[#allocation7 + $0x480] sm:$0xff]  ;;  %v10286_v43 = vcombine.high %v612_v33, %v620_v34  ;;  %v10285_v48 = vcombine.low %v612_v33, %v620_v34 }
  0x85   :  { %v622_v30 = vld [vmem:[#allocation7 + $0x450] sm:$0xff]  ;;  %v636_v42 = vld [vmem:[#allocation7 + $0x4c0] sm:$0xff] }
  0x86   :  { %7059 = vmatpush1.bf16.msra.mxu0 %v10177_v50  ;;  %v630_v37 = vld [vmem:[#allocation7 + $0x490] sm:$0xff]  ;;  %v10290_v39 = vcombine.high %v614_v29, %v622_v30  ;;  %v10289_v44 = vcombine.low %v614_v29, %v622_v30  ;;  %v644_v49 = vld [vmem:[#allocation7 + $0x500] sm:$0xff]  ;;  %v10302_v51 = vcombine.high %v628_v41, %v636_v42  ;;  %v10301_v56 = vcombine.low %v628_v41, %v636_v42 }
  0x87   :  { %7060 = vmatprep.subr.bf16.mxu0 %v10194_v53  ;;  %6715 = vmatpush1.bf16.msra.mxu1 %v10173_v54  ;;  %v638_v38 = vld [vmem:[#allocation7 + $0x4d0] sm:$0xff]  ;;  %v652_v50 = vld [vmem:[#allocation7 + $0x540] sm:$0xff]  ;;  %v127_v42 = vlaneseq }
  0x88   :  { %6716 = vmatprep.subr.bf16.mxu1 %v10190_v57  ;;  %v646_v45 = vld [vmem:[#allocation7 + $0x510] sm:$0xff]  ;;  %v10306_v47 = vcombine.high %v630_v37, %v638_v38  ;;  %v10305_v52 = vcombine.low %v630_v37, %v638_v38  ;;  %v660_v57 = vld [vmem:[#allocation7 + $0x580] sm:$0xff]  ;;  %v10318_v59 = vcombine.high %v644_v49, %v652_v50 }
  0x89   :  { %v654_v46 = vld [vmem:[#allocation7 + $0x550] sm:$0xff]  ;;  %v676_v1 = vld [vmem:[#allocation7 + $0x600] sm:$0xff] }
  0x8a   :  { %7061 = vmatpush1.bf16.msra.mxu0 %v10193_v58  ;;  %v662_v53 = vld [vmem:[#allocation7 + $0x590] sm:$0xff]  ;;  %v10322_v55 = vcombine.high %v646_v45, %v654_v46  ;;  %v668_v58 = vld [vmem:[#allocation7 + $0x5c0] sm:$0xff]  ;;  %v10321_v60 = vcombine.low %v646_v45, %v654_v46  ;;  %v12292_v45 = vld [vmem:[#allocation5] sm:$0xff] }
  0x8b   :  { %7062 = vmatprep.subr.bf16.mxu0 %v10210_v62  ;;  %6717 = vmatpush1.bf16.msra.mxu1 %v10189_v0  ;;  %v670_v54 = vld [vmem:[#allocation7 + $0x5d0] sm:$0xff]  ;;  %v10317_v0 = vcombine.low %v644_v49, %v652_v50  ;;  %v684_v2 = vld [vmem:[#allocation7 + $0x640] sm:$0xff] }
  0x8c   :  { %6718 = vmatprep.subr.bf16.mxu1 %v10206_v3  ;;  %v678_v61 = vld [vmem:[#allocation7 + $0x610] sm:$0xff]  ;;  %v10338_v63 = vcombine.high %v662_v53, %v670_v54  ;;  %v10334_v3 = vcombine.high %v660_v57, %v668_v58  ;;  %v692_v9 = vld [vmem:[#allocation7 + $0x680] sm:$0xff]  ;;  %v10349_v14 = vcombine.low %v676_v1, %v684_v2 }
  0x8d   :  { %v686_v62 = vld [vmem:[#allocation7 + $0x650] sm:$0xff]  ;;  %v700_v10 = vld [vmem:[#allocation7 + $0x6c0] sm:$0xff] }
  0x8e   :  { %7063 = vmatpush1.bf16.msra.mxu0 %v10209_v4  ;;  %v10337_v4 = vcombine.low %v662_v53, %v670_v54  ;;  %v694_v5 = vld [vmem:[#allocation7 + $0x690] sm:$0xff]  ;;  %v10365_v17 = vcombine.low %v692_v9, %v700_v10  ;;  %v708_v18 = vld [vmem:[#allocation7 + $0x700] sm:$0xff] }
  0x8f   :  { %7064 = vmatprep.subr.bf16.mxu0 %v10226_v7  ;;  %6719 = vmatpush1.bf16.msra.mxu1 %v10205_v8  ;;  %v702_v6 = vld [vmem:[#allocation7 + $0x6d0] sm:$0xff]  ;;  %v10354_v7 = vcombine.high %v678_v61, %v686_v62  ;;  %v10333_v8 = vcombine.low %v660_v57, %v668_v58  ;;  %v724_v26 = vld [vmem:[#allocation7 + $0x780] sm:$0xff] }
  0x90   :  { %6720 = vmatprep.subr.bf16.mxu1 %v10222_v11  ;;  %v10350_v11 = vcombine.high %v676_v1, %v684_v2  ;;  %v10370_v13 = vcombine.high %v694_v5, %v702_v6  ;;  %v718_v22 = vld [vmem:[#allocation7 + $0x750] sm:$0xff]  ;;  %v12271_v34 = vld [vmem:[#allocation7 + $0x800] sm:$0xff] }
  0x91   :  { %v734_v30 = vld [vmem:[#allocation7 + $0x7d0] sm:$0xff]  ;;  %v12305_v50 = vld [vmem:[#allocation7 + $0x880] sm:$0xff] }
  0x92   :  { %7065 = vmatpush1.bf16.msra.mxu0 %v10225_v12  ;;  %v10353_v12 = vcombine.low %v678_v61, %v686_v62  ;;  %v12279_v38 = vld [vmem:[#allocation7 + $0x850] sm:$0xff] }
  0x93   :  { %7066 = vmatprep.subr.bf16.mxu0 %v10242_v15  ;;  %6721 = vmatpush1.bf16.msra.mxu1 %v10221_v16  ;;  %v10366_v15 = vcombine.high %v692_v9, %v700_v10  ;;  %v10369_v16 = vcombine.low %v694_v5, %v702_v6  ;;  %v12311_v53 = vld [vmem:[#allocation7 + $0x890] sm:$0xff] }
  0x94   :  { %6722 = vmatprep.subr.bf16.mxu1 %v10238_v19  ;;  %v716_v19 = vld [vmem:[#allocation7 + $0x740] sm:$0xff]  ;;  %v12313_v54 = vld [vmem:[#allocation7 + $0x8d0] sm:$0xff] }
  0x95   :  { %v10382_v21 = vcombine.high %v708_v18, %v716_v19 }
  0x96   :  { %7067 = vmatpush1.bf16.msra.mxu0 %v10241_v20  ;;  %v710_v20 = vld [vmem:[#allocation7 + $0x710] sm:$0xff] }
  0x97   :  { %7068 = vmatprep.subr.bf16.mxu0 %v10258_v23  ;;  %6723 = vmatpush1.bf16.msra.mxu1 %v10237_v24  ;;  %v10381_v23 = vcombine.low %v708_v18, %v716_v19  ;;  %v10385_v24 = vcombine.low %v710_v20, %v718_v22  ;;  %v10386_v25 = vcombine.high %v710_v20, %v718_v22 }
  0x98   :  { %6724 = vmatprep.subr.bf16.mxu1 %v10254_v27  ;;  %v732_v27 = vld [vmem:[#allocation7 + $0x7c0] sm:$0xff] }
  0x99   :  { %v10398_v29 = vcombine.high %v724_v26, %v732_v27 }
  0x9a   :  { %7069 = vmatpush1.bf16.msra.mxu0 %v10257_v28  ;;  %v726_v28 = vld [vmem:[#allocation7 + $0x790] sm:$0xff] }
  0x9b   :  { %7070 = vmatprep.subr.bf16.mxu0 %v10274_v31  ;;  %6725 = vmatpush1.bf16.msra.mxu1 %v10253_v32  ;;  %v10397_v31 = vcombine.low %v724_v26, %v732_v27  ;;  %v10401_v32 = vcombine.low %v726_v28, %v734_v30  ;;  %v10402_v33 = vcombine.high %v726_v28, %v734_v30  ;;  %v12341_v27 = vld [vmem:[#allocation7 + $0x900] sm:$0xff] }
  0x9c   :  { %6726 = vmatprep.subr.bf16.mxu1 %v10270_v35  ;;  %v12273_v35 = vld [vmem:[#allocation7 + $0x840] sm:$0xff] }
  0x9d   :  { %v10414_v37 = vcombine.high %v12271_v34, %v12273_v35  ;;  %v12343_v28 = vld [vmem:[#allocation7 + $0x940] sm:$0xff] }
  0x9e   :  { %7071 = vmatpush1.bf16.msra.mxu0 %v10273_v36  ;;  %v12275_v36 = vld [vmem:[#allocation7 + $0x810] sm:$0xff] }
  0x9f   :  { %7072 = vmatprep.subr.bf16.mxu0 %v10290_v39  ;;  %6727 = vmatpush1.bf16.msra.mxu1 %v10269_v40  ;;  %v10413_v39 = vcombine.low %v12271_v34, %v12273_v35  ;;  %v10417_v40 = vcombine.low %v12275_v36, %v12279_v38  ;;  %v10418_v41 = vcombine.high %v12275_v36, %v12279_v38  ;;  %v788_v34 = vld [vmem:[#allocation7 + $0x980] sm:$0xff] }
  0xa0   :  { %6728 = vmatprep.subr.bf16.mxu1 %v10286_v43  ;;  %v12287_v43 = vshrl.u32 %v127_v42, 7  ;;  %v796_v38 = vld [vmem:[#allocation7 + $0x9c0] sm:$0xff] }
  0xa2   :  { %7073 = vmatpush1.bf16.msra.mxu0 %v10289_v44  ;;  %v12290_v44 = vsub.s32 0, %v12287_v43  ;;  %v12295_v46 = vsub.s32 1, %v12287_v43 }
  0xa3   :  { %7074 = vmatprep.subr.bf16.mxu0 %v10306_v47  ;;  %6729 = vmatpush1.bf16.msra.mxu1 %v10285_v48  ;;  %v12298_v47 = vsub.s32 2, %v12287_v43  ;;  %v12301_v48 = vsub.s32 3, %v12287_v43 }
  0xa4   :  { %6730 = vmatprep.subr.bf16.mxu1 %v10302_v51  ;;  %v130_v49 = vrot.slane %v12292_v45, %v12290_v44  ;;  %v134_v51 = vrot.slane %v12292_v45, %v12295_v46 }
  0xa5   :  { %v138_v57 = vrot.slane %v12292_v45, %v12298_v47 }
  0xa6   :  { %7075 = vmatpush1.bf16.msra.mxu0 %v10305_v52  ;;  %v12309_v52 = vld [vmem:[#allocation7 + $0x8c0] sm:$0xff] }
  0xa7   :  { %7076 = vmatprep.subr.bf16.mxu0 %v10322_v55  ;;  %6731 = vmatpush1.bf16.msra.mxu1 %v10301_v56  ;;  %v12316_v55 = vsub.s32 4, %v12287_v43  ;;  %v12319_v56 = vsub.s32 5, %v12287_v43  ;;  %v10429_v62 = vcombine.low %v12305_v50, %v12309_v52 }
  0xa8   :  { %6732 = vmatprep.subr.bf16.mxu1 %v10318_v59  ;;  %v142_v59 = vrot.slane %v12292_v45, %v12301_v48 }
  0xa9   :  { %v146_v5 = vrot.slane %v12292_v45, %v12316_v55  ;;  %v12337_v6 = vrot.slane %v12292_v45, %v12319_v56 }
  0xaa   :  { %7077 = vmatpush1.bf16.msra.mxu0 %v10321_v60 }
  0xab   :  { %7078 = vmatprep.subr.bf16.mxu0 %v10338_v63  ;;  %6733 = vmatpush1.bf16.msra.mxu1 %v10317_v0  ;;  %v10430_v63 = vcombine.high %v12305_v50, %v12309_v52  ;;  %v10433_v0 = vcombine.low %v12311_v53, %v12313_v54  ;;  %v814_v50 = vld [vmem:[#allocation7 + $0xa50] sm:$0xff] }
  0xac   :  { %6734 = vmatprep.subr.bf16.mxu1 %v10334_v3  ;;  %v10434_v3 = vcombine.high %v12311_v53, %v12313_v54  ;;  %v10461_v53 = vcombine.low %v788_v34, %v796_v38 }
  0xae   :  { %7079 = vmatpush1.bf16.msra.mxu0 %v10337_v4 }
  0xaf   :  { %7080 = vmatprep.subr.bf16.mxu0 %v10354_v7  ;;  %6735 = vmatpush1.bf16.msra.mxu1 %v10333_v8 }
  0xb0   :  { %6736 = vmatprep.subr.bf16.mxu1 %v10350_v11 }
  0xb2   :  { %7081 = vmatpush1.bf16.msra.mxu0 %v10353_v12 }
  0xb3   :  { %7082 = vmatprep.subr.bf16.mxu0 %v10370_v13  ;;  %6737 = vmatpush1.bf16.msra.mxu1 %v10349_v14 }
  0xb4   :  { %6738 = vmatprep.subr.bf16.mxu1 %v10366_v15 }
  0xb6   :  { %7083 = vmatpush1.bf16.msra.mxu0 %v10369_v16 }
  0xb7   :  { %6739 = vmatpush1.bf16.msra.mxu1 %v10365_v17  ;;  %7084 = vmatprep.subr.bf16.mxu0 %v10386_v25 }
  0xb8   :  { %6740 = vmatprep.subr.bf16.mxu1 %v10382_v21 }
  0xba   :  { %7085 = vmatpush1.bf16.msra.mxu0 %v10385_v24 }
  0xbb   :  { %6741 = vmatpush1.bf16.msra.mxu1 %v10381_v23  ;;  %7086 = vmatprep.subr.bf16.mxu0 %v10402_v33 }
  0xbc   :  { %6742 = vmatprep.subr.bf16.mxu1 %v10398_v29 }
  0xbe   :  { %7087 = vmatpush1.bf16.msra.mxu0 %v10401_v32 }
  0xbf   :  { %6743 = vmatpush1.bf16.msra.mxu1 %v10397_v31  ;;  %7099 = vmatprep.subr.bf16.mxu0 %v10418_v41 }
  0xc0   :  { %6755 = vmatprep.subr.bf16.mxu1 %v10414_v37 }
 0x14c   :  { %v290_v58 = vpop.f32.mrb[0].mxu0  ;;  %v333_v4 = vpop.f32.mrb[0].mxu1 }
 0x14d   :  { %v291_v60 = vadd.f32 %v290_v58, %v130_v49  ;;  %v292_v61 = vpop.f32.mrb[1].mxu0  ;;  %v334_v10 = vadd.f32 %v333_v4, %v138_v57  ;;  %v335_v11 = vpop.f32.mrb[1].mxu1  ;;  %v10446_v58 = vcombine.high %v12341_v27, %v12343_v28 }
 0x14e   :  { %v293_v1 = vadd.f32 %v292_v61, %v134_v51  ;;  %v294_v2 = vpop.f32.mrb[2].mxu0  ;;  %v336_v14 = vadd.f32 %v335_v11, %v142_v59  ;;  %v337_v15 = vpop.f32.mrb[2].mxu1  ;;  %v798_v11 = vld [vmem:[#allocation7 + $0x9d0] sm:$0xff] }
 0x14f   :  { %vm428_vm1 = vcmp.gt.f32.partialorder %v291_v60, 0.0  ;;  %v444_v7 = vmul.f32 0.01, %v291_v60  ;;  %v295_v8 = vadd.f32 %v294_v2, %v130_v49  ;;  %v296_v9 = vpop.f32.mrb[3].mxu0  ;;  %vm430_vm4 = vcmp.gt.f32.partialorder %v334_v10, 0.0  ;;  %v339_v18 = vpop.f32.mrb[3].mxu1 }
 0x150   :  { %vm429_vm2 = vcmp.gt.f32.partialorder %v293_v1, 0.0  ;;  %v445_v12 = vmul.f32 0.01, %v293_v1  ;;  %v297_v13 = vadd.f32 %v296_v9, %v134_v51  ;;  %v446_v21 = vmul.f32 0.01, %v334_v10 }
 0x151   :  { %v460_v16 = vsel %vm428_vm1, %v291_v60, %v444_v7  ;;  %vm436_vm3 = vcmp.gt.f32.partialorder %v295_v8, 0.0  ;;  %v452_v17 = vmul.f32 0.01, %v295_v8  ;;  %vm431_vm6 = vcmp.gt.f32.partialorder %v336_v14, 0.0  ;;  %v782_v60 = vld [vmem:[#allocation7 + $0x950] sm:$0xff] }
 0x152   :  { %v461_v19 = vsel %vm429_vm2, %v293_v1, %v445_v12  ;;  %vm437_vm5 = vcmp.gt.f32.partialorder %v297_v13, 0.0  ;;  %v453_v20 = vmul.f32 0.01, %v297_v13  ;;  %v447_v23 = vmul.f32 0.01, %v336_v14 }
 0x153   :  { %v468_v22 = vsel %vm436_vm3, %v295_v8, %v452_v17  ;;  %v338_v24 = vadd.f32 %v337_v15, %v138_v57  ;;  %v462_v29 = vsel %vm430_vm4, %v334_v10, %v446_v21  ;;  %v340_v30 = vadd.f32 %v339_v18, %v142_v59  ;;  %v774_v59 = vld [vmem:[#allocation7 + $0x910] sm:$0xff]  ;;  %v804_v17 = vld [vmem:[#allocation7 + $0xa00] sm:$0xff] }
 0x154   :  { %v12339_v25 = vpack.c.bf16 %v468_v22, %v460_v16  ;;  %v469_v26 = vsel %vm437_vm5, %v297_v13, %v453_v20  ;;  %v376_v31 = vpop.f32.mrb[4].mxu0  ;;  %v463_v33 = vsel %vm431_vm6, %v336_v14, %v447_v23  ;;  %v10450_v10 = vcombine.high %v774_v59, %v782_v60  ;;  %v806_v20 = vld [vmem:[#allocation7 + $0xa10] sm:$0xff]  ;;  %v820_v21 = vld [vmem:[#allocation7 + $0xa80] sm:$0xff] }
 0x155   :  { %v12345_v32 = vpack.c.bf16 %v469_v26, %v461_v19  ;;  %vm438_vm7 = vcmp.gt.f32.partialorder %v338_v24, 0.0  ;;  %v454_v37 = vmul.f32 0.01, %v338_v24  ;;  %v378_v41 = vpop.f32.mrb[5].mxu0  ;;  %vm439_vm8 = vcmp.gt.f32.partialorder %v340_v30, 0.0  ;;  %v812_v19 = vld [vmem:[#allocation7 + $0xa40] sm:$0xff] }
 0x156   :  { %v455_v42 = vmul.f32 0.01, %v340_v30  ;;  %v377_v49 = vadd.f32 %v376_v31, %v146_v5  ;;  %v379_v51 = vadd.f32 %v378_v41, %v12337_v6  ;;  %v380_v57 = vpop.f32.mrb[6].mxu0  ;;  %v10462_v15 = vcombine.high %v788_v34, %v796_v38  ;;  %v828_v22 = vld [vmem:[#allocation7 + $0xac0] sm:$0xff]  ;;  %v822_v23 = vld [vmem:[#allocation7 + $0xa90] sm:$0xff]  ;;  %v419_v31 = vpop.f32.mrb[4].mxu1 }
 0x157   :  { %6744 = vmatprep.mubr.bf16.mxu1 %v12345_v32  ;;  %7088 = vmatprep.mubr.bf16.mxu0 %v12345_v32  ;;  %v470_v61 = vsel %vm438_vm7, %v338_v24, %v454_v37  ;;  %v381_v1 = vadd.f32 %v380_v57, %v146_v5  ;;  %v382_v2 = vpop.f32.mrb[7].mxu0  ;;  %v830_v24 = vld [vmem:[#allocation7 + $0xad0] sm:$0xff]  ;;  %v10477_v26 = vcombine.low %v804_v17, %v812_v19 }
 0x158   :  { %6745 = vmatmul.mubr.bf16.vlgmr.msra.gmra.mrb[8].mxu1 %v12339_v25  ;;  %7089 = vmatmul.mubr.bf16.vlgmr.msra.gmra.mrb[8].mxu0 %v12339_v25  ;;  %v12354_v4 = vpack.c.bf16 %v470_v61, %v462_v29  ;;  %v471_v7 = vsel %vm439_vm8, %v340_v30, %v455_v42  ;;  %vm432_vm9 = vcmp.gt.f32.partialorder %v377_v49, 0.0  ;;  %v448_v8 = vmul.f32 0.01, %v377_v49  ;;  %v844_v29 = vld [vmem:[#allocation7 + $0xb40] sm:$0xff]  ;;  %v421_v42 = vpop.f32.mrb[5].mxu1  ;;  %v862_v38 = vld [vmem:[#allocation7 + $0xbd0] sm:$0xff] }
 0x159   :  { %6756 = vmatpush1.bf16.msra.mxu1 %v10413_v39  ;;  %7100 = vmatpush1.bf16.msra.mxu0 %v10417_v40  ;;  %v12363_v5 = vpack.c.bf16 %v471_v7, %v463_v33  ;;  %vm433_vm10 = vcmp.gt.f32.partialorder %v379_v51, 0.0  ;;  %v449_v9 = vmul.f32 0.01, %v379_v51  ;;  %vm440_vm11 = vcmp.gt.f32.partialorder %v381_v1, 0.0  ;;  %v790_v40 = vld [vmem:[#allocation7 + $0x990] sm:$0xff] }
 0x15a   :  { %6757 = vmatprep.subr.bf16.mxu1 %v10430_v63  ;;  %7101 = vmatprep.subr.bf16.mxu0 %v10434_v3  ;;  %v464_v35 = vsel %vm432_vm9, %v377_v49, %v448_v8  ;;  %v456_v39 = vmul.f32 0.01, %v381_v1  ;;  %v383_v36 = vadd.f32 %v382_v2, %v12337_v6  ;;  %v10445_v3 = vcombine.low %v12341_v27, %v12343_v28  ;;  %v836_v28 = vld [vmem:[#allocation7 + $0xb00] sm:$0xff]  ;;  %v838_v49 = vld [vmem:[#allocation7 + $0xb10] sm:$0xff] }
 0x15b   :  { %6787 = vmatprep.mubr.bf16.mxu1 %v12363_v5  ;;  %7131 = vmatprep.mubr.bf16.mxu0 %v12363_v5  ;;  %v465_v12 = vsel %vm433_vm10, %v379_v51, %v449_v9  ;;  %v10449_v6 = vcombine.low %v774_v59, %v782_v60  ;;  %v10466_v16 = vcombine.high %v790_v40, %v798_v11  ;;  %v12387_v30 = vsub.s32 6, %v12287_v43  ;;  %v846_v51 = vld [vmem:[#allocation7 + $0xb50] sm:$0xff]  ;;  %v423_v59 = vpop.f32.mrb[6].mxu1 }
 0x15c   :  { %v472_v13 = vsel %vm440_vm11, %v381_v1, %v456_v39  ;;  %vm441_vm12 = vcmp.gt.f32.partialorder %v383_v36, 0.0  ;;  %v457_v63 = vmul.f32 0.01, %v383_v36  ;;  %v10465_v54 = vcombine.low %v790_v40, %v798_v11  ;;  %v860_v39 = vld [vmem:[#allocation7 + $0xbc0] sm:$0xff] }
 0x15d   :  { %6758 = vmatpush1.bf16.msra.mxu1 %v10429_v62  ;;  %7102 = vmatpush1.bf16.msra.mxu0 %v10433_v0  ;;  %v12382_v14 = vpack.c.bf16 %v472_v13, %v464_v35  ;;  %v10478_v62 = vcombine.high %v804_v17, %v812_v19  ;;  %v10482_v0 = vcombine.high %v806_v20, %v814_v50  ;;  %v12390_v33 = vsub.s32 7, %v12287_v43  ;;  %v852_v43 = vld [vmem:[#allocation7 + $0xb80] sm:$0xff] }
 0x15e   :  { %6759 = vmatprep.subr.bf16.mxu1 %v10446_v58  ;;  %7103 = vmatprep.subr.bf16.mxu0 %v10450_v10  ;;  %v473_v18 = vsel %vm441_vm12, %v383_v36, %v457_v63  ;;  %v10481_v27 = vcombine.low %v806_v20, %v814_v50  ;;  %v10494_v37 = vcombine.high %v820_v21, %v828_v22  ;;  %v425_v10 = vpop.f32.mrb[7].mxu1  ;;  %v854_v36 = vld [vmem:[#allocation7 + $0xb90] sm:$0xff]  ;;  %v876_v19 = vld [vmem:[#allocation7 + $0xc40] sm:$0xff] }
 0x15f   :  { %v12384_v52 = vpack.c.bf16 %v473_v18, %v465_v12  ;;  %v10498_v41 = vcombine.high %v822_v23, %v830_v24  ;;  %v154_v57 = vrot.slane %v12292_v45, %v12387_v30  ;;  %v158_v58 = vrot.slane %v12292_v45, %v12390_v33  ;;  %v870_v20 = vld [vmem:[#allocation7 + $0xc10] sm:$0xff] }
 0x160   :  { %v10493_v60 = vcombine.low %v820_v21, %v828_v22  ;;  %v10497_v61 = vcombine.low %v822_v23, %v830_v24  ;;  %v10509_v1 = vcombine.low %v836_v28, %v844_v29  ;;  %v10510_v2 = vcombine.high %v836_v28, %v844_v29  ;;  %v878_v50 = vld [vmem:[#allocation7 + $0xc50] sm:$0xff]  ;;  %v884_v23 = vld [vmem:[#allocation7 + $0xc80] sm:$0xff] }
 0x161   :  { %6760 = vmatpush1.bf16.msra.mxu1 %v10445_v3  ;;  %7104 = vmatpush1.bf16.msra.mxu0 %v10449_v6  ;;  %v420_v7 = vadd.f32 %v419_v31, %v154_v57  ;;  %v422_v8 = vadd.f32 %v421_v42, %v158_v58  ;;  %v424_v9 = vadd.f32 %v423_v59, %v154_v57  ;;  %v892_v24 = vld [vmem:[#allocation7 + $0xcc0] sm:$0xff] }
 0x162   :  { %6761 = vmatprep.subr.bf16.mxu1 %v10462_v15  ;;  %7105 = vmatprep.subr.bf16.mxu0 %v10466_v16  ;;  %v10513_v34 = vcombine.low %v838_v49, %v846_v51  ;;  %v10514_v35 = vcombine.high %v838_v49, %v846_v51  ;;  %v426_v45 = vadd.f32 %v425_v10, %v158_v58  ;;  %v868_v16 = vld [vmem:[#allocation7 + $0xc00] sm:$0xff]  ;;  %v902_v49 = vld [vmem:[#allocation7 + $0xd10] sm:$0xff] }
 0x163   :  { %vm434_vm13 = vcmp.gt.f32.partialorder %v420_v7, 0.0  ;;  %v450_v40 = vmul.f32 0.01, %v420_v7  ;;  %vm435_vm14 = vcmp.gt.f32.partialorder %v422_v8, 0.0  ;;  %v451_v11 = vmul.f32 0.01, %v422_v8 }
 0x164   :  { %vm442_vm15 = vcmp.gt.f32.partialorder %v424_v9, 0.0  ;;  %v458_v12 = vmul.f32 0.01, %v424_v9  ;;  %vm443_vm0 = vcmp.gt.f32.partialorder %v426_v45, 0.0  ;;  %v459_v13 = vmul.f32 0.01, %v426_v45 }
 0x165   :  { %6762 = vmatpush1.bf16.msra.mxu1 %v10461_v53  ;;  %7106 = vmatpush1.bf16.msra.mxu0 %v10465_v54  ;;  %v10526_v63 = vcombine.high %v852_v43, %v860_v39  ;;  %v466_v3 = vsel %vm434_vm13, %v420_v7, %v450_v40  ;;  %v467_v6 = vsel %vm435_vm14, %v422_v8, %v451_v11  ;;  %v908_v42 = vld [vmem:[#allocation7 + $0xd40] sm:$0xff]  ;;  %v910_v51 = vld [vmem:[#allocation7 + $0xd50] sm:$0xff] }
 0x166   :  { %6763 = vmatprep.subr.bf16.mxu1 %v10478_v62  ;;  %7107 = vmatprep.subr.bf16.mxu0 %v10482_v0  ;;  %v10530_v15 = vcombine.high %v854_v36, %v862_v38  ;;  %v474_v17 = vsel %vm442_vm15, %v424_v9, %v458_v12  ;;  %v475_v18 = vsel %vm443_vm0, %v426_v45, %v459_v13  ;;  %v948_v12 = vld [vmem:[#allocation7 + $0xe80] sm:$0xff] }
 0x167   :  { %v12396_v53 = vpack.c.bf16 %v474_v17, %v466_v3  ;;  %v12398_v54 = vpack.c.bf16 %v475_v18, %v467_v6  ;;  %v10525_v62 = vcombine.low %v852_v43, %v860_v39  ;;  %v10529_v0 = vcombine.low %v854_v36, %v862_v38  ;;  %v926_v43 = vld [vmem:[#allocation7 + $0xdd0] sm:$0xff]  ;;  %v956_v13 = vld [vmem:[#allocation7 + $0xec0] sm:$0xff] }
 0x168   :  { %v10542_v21 = vcombine.high %v868_v16, %v876_v19  ;;  %v10546_v22 = vcombine.high %v870_v20, %v878_v50  ;;  %v10541_v28 = vcombine.low %v868_v16, %v876_v19  ;;  %v10545_v29 = vcombine.low %v870_v20, %v878_v50  ;;  %v934_v39 = vld [vmem:[#allocation7 + $0xe10] sm:$0xff]  ;;  %v964_v18 = vld [vmem:[#allocation7 + $0xf00] sm:$0xff] }
 0x169   :  { %6764 = vmatpush1.bf16.msra.mxu1 %v10477_v26  ;;  %7108 = vmatpush1.bf16.msra.mxu0 %v10481_v27  ;;  %v886_v26 = vld [vmem:[#allocation7 + $0xc90] sm:$0xff]  ;;  %v10558_v31 = vcombine.high %v884_v23, %v892_v24  ;;  %v10557_v57 = vcombine.low %v884_v23, %v892_v24  ;;  %v10577_v8 = vcombine.low %v902_v49, %v910_v51  ;;  %v972_v19 = vld [vmem:[#allocation7 + $0xf40] sm:$0xff] }
 0x16a   :  { %6765 = vmatprep.subr.bf16.mxu1 %v10494_v37  ;;  %7109 = vmatprep.subr.bf16.mxu0 %v10498_v41  ;;  %v894_v27 = vld [vmem:[#allocation7 + $0xcd0] sm:$0xff]  ;;  %v900_v41 = vld [vmem:[#allocation7 + $0xd00] sm:$0xff]  ;;  %v10622_v16 = vcombine.high %v948_v12, %v956_v13 }
 0x16b   :  { %v10562_v37 = vcombine.high %v886_v26, %v894_v27  ;;  %v10561_v58 = vcombine.low %v886_v26, %v894_v27  ;;  %v10574_v59 = vcombine.high %v900_v41, %v908_v42  ;;  %v10573_v7 = vcombine.low %v900_v41, %v908_v42  ;;  %v942_v36 = vld [vmem:[#allocation7 + $0xe50] sm:$0xff]  ;;  %v980_v23 = vld [vmem:[#allocation7 + $0xf80] sm:$0xff] }
 0x16c   :  { %v10610_v11 = vcombine.high %v934_v39, %v942_v36  ;;  %v958_v3 = vld [vmem:[#allocation7 + $0xed0] sm:$0xff]  ;;  %v988_v24 = vld [vmem:[#allocation7 + $0xfc0] sm:$0xff] }
 0x16d   :  { %6766 = vmatpush1.bf16.msra.mxu1 %v10493_v60  ;;  %7110 = vmatpush1.bf16.msra.mxu0 %v10497_v61  ;;  %v10578_v60 = vcombine.high %v902_v49, %v910_v51  ;;  %v916_v61 = vld [vmem:[#allocation7 + $0xd80] sm:$0xff]  ;;  %v966_v20 = vld [vmem:[#allocation7 + $0xf10] sm:$0xff] }
 0x16e   :  { %6767 = vmatprep.subr.bf16.mxu1 %v10510_v2  ;;  %7111 = vmatprep.subr.bf16.mxu0 %v10514_v35  ;;  %v918_v2 = vld [vmem:[#allocation7 + $0xd90] sm:$0xff]  ;;  %v940_v35 = vld [vmem:[#allocation7 + $0xe40] sm:$0xff] }
 0x16f   :  { %v10594_v10 = vcombine.high %v918_v2, %v926_v43  ;;  %v10593_v45 = vcombine.low %v918_v2, %v926_v43  ;;  %v974_v50 = vld [vmem:[#allocation7 + $0xf50] sm:$0xff]  ;;  %v996_v41 = vld [vmem:[#allocation7 + $0x1000] sm:$0xff] }
 0x170   :  { %v982_v26 = vld [vmem:[#allocation7 + $0xf90] sm:$0xff]  ;;  %v1004_v42 = vld [vmem:[#allocation7 + $0x1040] sm:$0xff] }
 0x171   :  { %6768 = vmatpush1.bf16.msra.mxu1 %v10509_v1  ;;  %7112 = vmatpush1.bf16.msra.mxu0 %v10513_v34  ;;  %v924_v1 = vld [vmem:[#allocation7 + $0xdc0] sm:$0xff]  ;;  %v990_v27 = vld [vmem:[#allocation7 + $0xfd0] sm:$0xff] }
 0x172   :  { %6769 = vmatprep.subr.bf16.mxu1 %v10526_v63  ;;  %7113 = vmatprep.subr.bf16.mxu0 %v10530_v15  ;;  %v10590_v9 = vcombine.high %v916_v61, %v924_v1  ;;  %v932_v34 = vld [vmem:[#allocation7 + $0xe00] sm:$0xff]  ;;  %v10589_v38 = vcombine.low %v916_v61, %v924_v1  ;;  %v950_v63 = vld [vmem:[#allocation7 + $0xe90] sm:$0xff]  ;;  %v10609_v15 = vcombine.low %v934_v39, %v942_v36 }
 0x173   :  { %v10606_v40 = vcombine.high %v932_v34, %v940_v35  ;;  %v10605_v6 = vcombine.low %v932_v34, %v940_v35  ;;  %v10626_v17 = vcombine.high %v950_v63, %v958_v3  ;;  %v998_v49 = vld [vmem:[#allocation7 + $0x1010] sm:$0xff]  ;;  %v1012_v61 = vld [vmem:[#allocation7 + $0x1080] sm:$0xff] }
 0x174   :  { %v1006_v51 = vld [vmem:[#allocation7 + $0x1050] sm:$0xff]  ;;  %v1020_v1 = vld [vmem:[#allocation7 + $0x10c0] sm:$0xff] }
 0x175   :  { %6770 = vmatpush1.bf16.msra.mxu1 %v10525_v62  ;;  %7114 = vmatpush1.bf16.msra.mxu0 %v10529_v0  ;;  %v10621_v62 = vcombine.low %v948_v12, %v956_v13  ;;  %v10625_v0 = vcombine.low %v950_v63, %v958_v3  ;;  %v1014_v2 = vld [vmem:[#allocation7 + $0x1090] sm:$0xff]  ;;  %v1028_v34 = vld [vmem:[#allocation7 + $0x1100] sm:$0xff] }
 0x176   :  { %6771 = vmatprep.subr.bf16.mxu1 %v10542_v21  ;;  %7115 = vmatprep.subr.bf16.mxu0 %v10546_v22  ;;  %v10638_v21 = vcombine.high %v964_v18, %v972_v19  ;;  %v10642_v22 = vcombine.high %v966_v20, %v974_v50  ;;  %v1022_v43 = vld [vmem:[#allocation7 + $0x10d0] sm:$0xff]  ;;  %v1036_v35 = vld [vmem:[#allocation7 + $0x1140] sm:$0xff] }
 0x177   :  { %v1030_v39 = vld [vmem:[#allocation7 + $0x1110] sm:$0xff]  ;;  %v1044_v12 = vld [vmem:[#allocation7 + $0x1180] sm:$0xff] }
 0x178   :  { %v1038_v36 = vld [vmem:[#allocation7 + $0x1150] sm:$0xff]  ;;  %v1052_v13 = vld [vmem:[#allocation7 + $0x11c0] sm:$0xff] }
 0x179   :  { %6772 = vmatpush1.bf16.msra.mxu1 %v10541_v28  ;;  %7116 = vmatpush1.bf16.msra.mxu0 %v10545_v29  ;;  %v10637_v28 = vcombine.low %v964_v18, %v972_v19  ;;  %v10641_v29 = vcombine.low %v966_v20, %v974_v50  ;;  %v1046_v63 = vld [vmem:[#allocation7 + $0x1190] sm:$0xff]  ;;  %v1060_v18 = vld [vmem:[#allocation7 + $0x1200] sm:$0xff] }
 0x17a   :  { %6773 = vmatprep.subr.bf16.mxu1 %v10558_v31  ;;  %7117 = vmatprep.subr.bf16.mxu0 %v10562_v37  ;;  %v10654_v31 = vcombine.high %v980_v23, %v988_v24  ;;  %v10658_v37 = vcombine.high %v982_v26, %v990_v27  ;;  %v1054_v3 = vld [vmem:[#allocation7 + $0x11d0] sm:$0xff]  ;;  %v1068_v19 = vld [vmem:[#allocation7 + $0x1240] sm:$0xff] }
 0x17b   :  { %v1062_v20 = vld [vmem:[#allocation7 + $0x1210] sm:$0xff] }
 0x17c   :  { %v1070_v50 = vld [vmem:[#allocation7 + $0x1250] sm:$0xff] }
 0x17d   :  { %6774 = vmatpush1.bf16.msra.mxu1 %v10557_v57  ;;  %7118 = vmatpush1.bf16.msra.mxu0 %v10561_v58  ;;  %v10653_v57 = vcombine.low %v980_v23, %v988_v24  ;;  %v10657_v58 = vcombine.low %v982_v26, %v990_v27  ;;  %v1076_v23 = vld [vmem:[#allocation7 + $0x1280] sm:$0xff]  ;;  %v1078_v26 = vld [vmem:[#allocation7 + $0x1290] sm:$0xff] }
 0x17e   :  { %6775 = vmatprep.subr.bf16.mxu1 %v10574_v59  ;;  %7119 = vmatprep.subr.bf16.mxu0 %v10578_v60  ;;  %v10670_v59 = vcombine.high %v996_v41, %v1004_v42  ;;  %v10674_v60 = vcombine.high %v998_v49, %v1006_v51  ;;  %v1084_v24 = vld [vmem:[#allocation7 + $0x12c0] sm:$0xff]  ;;  %v1086_v27 = vld [vmem:[#allocation7 + $0x12d0] sm:$0xff] }
 0x181   :  { %6776 = vmatpush1.bf16.msra.mxu1 %v10573_v7  ;;  %7120 = vmatpush1.bf16.msra.mxu0 %v10577_v8  ;;  %v10669_v7 = vcombine.low %v996_v41, %v1004_v42  ;;  %v10673_v8 = vcombine.low %v998_v49, %v1006_v51  ;;  %v1092_v41 = vld [vmem:[#allocation7 + $0x1300] sm:$0xff]  ;;  %v1094_v49 = vld [vmem:[#allocation7 + $0x1310] sm:$0xff] }
 0x182   :  { %6777 = vmatprep.subr.bf16.mxu1 %v10590_v9  ;;  %7121 = vmatprep.subr.bf16.mxu0 %v10594_v10  ;;  %v10686_v9 = vcombine.high %v1012_v61, %v1020_v1  ;;  %v10690_v10 = vcombine.high %v1014_v2, %v1022_v43  ;;  %v1100_v42 = vld [vmem:[#allocation7 + $0x1340] sm:$0xff]  ;;  %v1102_v51 = vld [vmem:[#allocation7 + $0x1350] sm:$0xff] }
 0x185   :  { %6778 = vmatpush1.bf16.msra.mxu1 %v10589_v38  ;;  %7122 = vmatpush1.bf16.msra.mxu0 %v10593_v45  ;;  %v10685_v38 = vcombine.low %v1012_v61, %v1020_v1  ;;  %v10689_v45 = vcombine.low %v1014_v2, %v1022_v43  ;;  %v1108_v61 = vld [vmem:[#allocation7 + $0x1380] sm:$0xff]  ;;  %v1110_v2 = vld [vmem:[#allocation7 + $0x1390] sm:$0xff] }
 0x186   :  { %6779 = vmatprep.subr.bf16.mxu1 %v10606_v40  ;;  %7123 = vmatprep.subr.bf16.mxu0 %v10610_v11  ;;  %v10702_v40 = vcombine.high %v1028_v34, %v1036_v35  ;;  %v10706_v11 = vcombine.high %v1030_v39, %v1038_v36  ;;  %v1116_v1 = vld [vmem:[#allocation7 + $0x13c0] sm:$0xff]  ;;  %v1118_v43 = vld [vmem:[#allocation7 + $0x13d0] sm:$0xff] }
 0x189   :  { %6780 = vmatpush1.bf16.msra.mxu1 %v10605_v6  ;;  %7124 = vmatpush1.bf16.msra.mxu0 %v10609_v15  ;;  %v10701_v6 = vcombine.low %v1028_v34, %v1036_v35  ;;  %v10705_v15 = vcombine.low %v1030_v39, %v1038_v36  ;;  %v1124_v34 = vld [vmem:[#allocation7 + $0x1400] sm:$0xff]  ;;  %v1126_v39 = vld [vmem:[#allocation7 + $0x1410] sm:$0xff] }
 0x18a   :  { %6781 = vmatprep.subr.bf16.mxu1 %v10622_v16  ;;  %7125 = vmatprep.subr.bf16.mxu0 %v10626_v17  ;;  %v10718_v16 = vcombine.high %v1044_v12, %v1052_v13  ;;  %v10722_v17 = vcombine.high %v1046_v63, %v1054_v3  ;;  %v1132_v35 = vld [vmem:[#allocation7 + $0x1440] sm:$0xff]  ;;  %v1134_v36 = vld [vmem:[#allocation7 + $0x1450] sm:$0xff] }
 0x18d   :  { %6782 = vmatpush1.bf16.msra.mxu1 %v10621_v62  ;;  %7126 = vmatpush1.bf16.msra.mxu0 %v10625_v0  ;;  %v10717_v62 = vcombine.low %v1044_v12, %v1052_v13  ;;  %v10721_v0 = vcombine.low %v1046_v63, %v1054_v3  ;;  %v1140_v12 = vld [vmem:[#allocation7 + $0x1480] sm:$0xff]  ;;  %v1142_v63 = vld [vmem:[#allocation7 + $0x1490] sm:$0xff] }
 0x18e   :  { %6783 = vmatprep.subr.bf16.mxu1 %v10638_v21  ;;  %7127 = vmatprep.subr.bf16.mxu0 %v10642_v22  ;;  %v10734_v21 = vcombine.high %v1060_v18, %v1068_v19  ;;  %v10738_v22 = vcombine.high %v1062_v20, %v1070_v50  ;;  %v1148_v13 = vld [vmem:[#allocation7 + $0x14c0] sm:$0xff]  ;;  %v1150_v3 = vld [vmem:[#allocation7 + $0x14d0] sm:$0xff] }
 0x191   :  { %6784 = vmatpush1.bf16.msra.mxu1 %v10637_v28  ;;  %7128 = vmatpush1.bf16.msra.mxu0 %v10641_v29  ;;  %v10733_v28 = vcombine.low %v1060_v18, %v1068_v19  ;;  %v10737_v29 = vcombine.low %v1062_v20, %v1070_v50  ;;  %v1156_v18 = vld [vmem:[#allocation7 + $0x1500] sm:$0xff]  ;;  %v1158_v20 = vld [vmem:[#allocation7 + $0x1510] sm:$0xff] }
 0x192   :  { %6785 = vmatprep.subr.bf16.mxu1 %v10654_v31  ;;  %7129 = vmatprep.subr.bf16.mxu0 %v10658_v37  ;;  %v10750_v31 = vcombine.high %v1076_v23, %v1084_v24  ;;  %v10754_v37 = vcombine.high %v1078_v26, %v1086_v27  ;;  %v1164_v19 = vld [vmem:[#allocation7 + $0x1540] sm:$0xff]  ;;  %v1166_v50 = vld [vmem:[#allocation7 + $0x1550] sm:$0xff] }
 0x195   :  { %6786 = vmatpush1.bf16.msra.mxu1 %v10653_v57  ;;  %7130 = vmatpush1.bf16.msra.mxu0 %v10657_v58  ;;  %v10749_v57 = vcombine.low %v1076_v23, %v1084_v24  ;;  %v10753_v58 = vcombine.low %v1078_v26, %v1086_v27  ;;  %v1172_v23 = vld [vmem:[#allocation7 + $0x1580] sm:$0xff]  ;;  %v1174_v26 = vld [vmem:[#allocation7 + $0x1590] sm:$0xff] }
 0x196   :  { %6798 = vmatprep.subr.bf16.mxu1 %v10670_v59  ;;  %7142 = vmatprep.subr.bf16.mxu0 %v10674_v60  ;;  %v10766_v59 = vcombine.high %v1092_v41, %v1100_v42  ;;  %v10770_v60 = vcombine.high %v1094_v49, %v1102_v51  ;;  %v1180_v24 = vld [vmem:[#allocation7 + $0x15c0] sm:$0xff]  ;;  %v1182_v27 = vld [vmem:[#allocation7 + $0x15d0] sm:$0xff] }
 0x198   :  { %6788 = vmatmul.mubr.bf16.vlgmr.msra.gmra.mrb[8].mxu1 %v12354_v4  ;;  %7132 = vmatmul.mubr.bf16.vlgmr.msra.gmra.mrb[8].mxu0 %v12354_v4 }
 0x199   :  { %6799 = vmatpush1.bf16.msra.mxu1 %v10669_v7  ;;  %7143 = vmatpush1.bf16.msra.mxu0 %v10673_v8  ;;  %v10765_v7 = vcombine.low %v1092_v41, %v1100_v42  ;;  %v10769_v8 = vcombine.low %v1094_v49, %v1102_v51  ;;  %v1188_v41 = vld [vmem:[#allocation7 + $0x1600] sm:$0xff]  ;;  %v1190_v49 = vld [vmem:[#allocation7 + $0x1610] sm:$0xff] }
 0x19a   :  { %6800 = vmatprep.subr.bf16.mxu1 %v10686_v9  ;;  %7144 = vmatprep.subr.bf16.mxu0 %v10690_v10  ;;  %v10782_v9 = vcombine.high %v1108_v61, %v1116_v1  ;;  %v10786_v10 = vcombine.high %v1110_v2, %v1118_v43  ;;  %v1196_v42 = vld [vmem:[#allocation7 + $0x1640] sm:$0xff]  ;;  %v1198_v51 = vld [vmem:[#allocation7 + $0x1650] sm:$0xff] }
 0x19b   :  { %6830 = vmatprep.mubr.bf16.mxu1 %v12384_v52  ;;  %7174 = vmatprep.mubr.bf16.mxu0 %v12384_v52 }
 0x19d   :  { %6801 = vmatpush1.bf16.msra.mxu1 %v10685_v38  ;;  %7145 = vmatpush1.bf16.msra.mxu0 %v10689_v45  ;;  %v10781_v38 = vcombine.low %v1108_v61, %v1116_v1  ;;  %v10785_v45 = vcombine.low %v1110_v2, %v1118_v43  ;;  %v1204_v61 = vld [vmem:[#allocation7 + $0x1680] sm:$0xff]  ;;  %v1206_v2 = vld [vmem:[#allocation7 + $0x1690] sm:$0xff] }
 0x19e   :  { %6802 = vmatprep.subr.bf16.mxu1 %v10702_v40  ;;  %7146 = vmatprep.subr.bf16.mxu0 %v10706_v11  ;;  %v10798_v40 = vcombine.high %v1124_v34, %v1132_v35  ;;  %v10802_v11 = vcombine.high %v1126_v39, %v1134_v36  ;;  %v1212_v1 = vld [vmem:[#allocation7 + $0x16c0] sm:$0xff]  ;;  %v1214_v43 = vld [vmem:[#allocation7 + $0x16d0] sm:$0xff] }
 0x1a1   :  { %6803 = vmatpush1.bf16.msra.mxu1 %v10701_v6  ;;  %7147 = vmatpush1.bf16.msra.mxu0 %v10705_v15  ;;  %v10797_v6 = vcombine.low %v1124_v34, %v1132_v35  ;;  %v10801_v15 = vcombine.low %v1126_v39, %v1134_v36  ;;  %v1220_v34 = vld [vmem:[#allocation7 + $0x1700] sm:$0xff]  ;;  %v1222_v39 = vld [vmem:[#allocation7 + $0x1710] sm:$0xff] }
 0x1a2   :  { %6804 = vmatprep.subr.bf16.mxu1 %v10718_v16  ;;  %7148 = vmatprep.subr.bf16.mxu0 %v10722_v17  ;;  %v10814_v16 = vcombine.high %v1140_v12, %v1148_v13  ;;  %v10818_v17 = vcombine.high %v1142_v63, %v1150_v3  ;;  %v1228_v35 = vld [vmem:[#allocation7 + $0x1740] sm:$0xff]  ;;  %v1230_v36 = vld [vmem:[#allocation7 + $0x1750] sm:$0xff] }
 0x1a5   :  { %6805 = vmatpush1.bf16.msra.mxu1 %v10717_v62  ;;  %7149 = vmatpush1.bf16.msra.mxu0 %v10721_v0  ;;  %v10813_v62 = vcombine.low %v1140_v12, %v1148_v13  ;;  %v10817_v0 = vcombine.low %v1142_v63, %v1150_v3  ;;  %v1236_v12 = vld [vmem:[#allocation7 + $0x1780] sm:$0xff]  ;;  %v1238_v63 = vld [vmem:[#allocation7 + $0x1790] sm:$0xff] }
 0x1a6   :  { %6806 = vmatprep.subr.bf16.mxu1 %v10734_v21  ;;  %7150 = vmatprep.subr.bf16.mxu0 %v10738_v22  ;;  %v10830_v21 = vcombine.high %v1156_v18, %v1164_v19  ;;  %v10834_v22 = vcombine.high %v1158_v20, %v1166_v50  ;;  %v1244_v13 = vld [vmem:[#allocation7 + $0x17c0] sm:$0xff]  ;;  %v1246_v3 = vld [vmem:[#allocation7 + $0x17d0] sm:$0xff] }
 0x1a9   :  { %6807 = vmatpush1.bf16.msra.mxu1 %v10733_v28  ;;  %7151 = vmatpush1.bf16.msra.mxu0 %v10737_v29  ;;  %v10829_v28 = vcombine.low %v1156_v18, %v1164_v19  ;;  %v10833_v29 = vcombine.low %v1158_v20, %v1166_v50  ;;  %v1252_v18 = vld [vmem:[#allocation7 + $0x1800] sm:$0xff]  ;;  %v1254_v20 = vld [vmem:[#allocation7 + $0x1810] sm:$0xff] }
 0x1aa   :  { %6808 = vmatprep.subr.bf16.mxu1 %v10750_v31  ;;  %7152 = vmatprep.subr.bf16.mxu0 %v10754_v37  ;;  %v10846_v31 = vcombine.high %v1172_v23, %v1180_v24  ;;  %v10850_v37 = vcombine.high %v1174_v26, %v1182_v27  ;;  %v1260_v19 = vld [vmem:[#allocation7 + $0x1840] sm:$0xff]  ;;  %v1262_v50 = vld [vmem:[#allocation7 + $0x1850] sm:$0xff] }
 0x1ad   :  { %6809 = vmatpush1.bf16.msra.mxu1 %v10749_v57  ;;  %7153 = vmatpush1.bf16.msra.mxu0 %v10753_v58  ;;  %v10845_v57 = vcombine.low %v1172_v23, %v1180_v24  ;;  %v10849_v58 = vcombine.low %v1174_v26, %v1182_v27  ;;  %v1268_v23 = vld [vmem:[#allocation7 + $0x1880] sm:$0xff]  ;;  %v1270_v26 = vld [vmem:[#allocation7 + $0x1890] sm:$0xff] }
 0x1ae   :  { %6810 = vmatprep.subr.bf16.mxu1 %v10766_v59  ;;  %7154 = vmatprep.subr.bf16.mxu0 %v10770_v60  ;;  %v10862_v59 = vcombine.high %v1188_v41, %v1196_v42  ;;  %v10866_v60 = vcombine.high %v1190_v49, %v1198_v51  ;;  %v1276_v24 = vld [vmem:[#allocation7 + $0x18c0] sm:$0xff]  ;;  %v1278_v27 = vld [vmem:[#allocation7 + $0x18d0] sm:$0xff] }
 0x1b1   :  { %6811 = vmatpush1.bf16.msra.mxu1 %v10765_v7  ;;  %7155 = vmatpush1.bf16.msra.mxu0 %v10769_v8  ;;  %v10861_v7 = vcombine.low %v1188_v41, %v1196_v42  ;;  %v10865_v8 = vcombine.low %v1190_v49, %v1198_v51  ;;  %v1284_v41 = vld [vmem:[#allocation7 + $0x1900] sm:$0xff]  ;;  %v1286_v49 = vld [vmem:[#allocation7 + $0x1910] sm:$0xff] }
 0x1b2   :  { %6812 = vmatprep.subr.bf16.mxu1 %v10782_v9  ;;  %7156 = vmatprep.subr.bf16.mxu0 %v10786_v10  ;;  %v10878_v9 = vcombine.high %v1204_v61, %v1212_v1  ;;  %v10882_v10 = vcombine.high %v1206_v2, %v1214_v43  ;;  %v1292_v42 = vld [vmem:[#allocation7 + $0x1940] sm:$0xff]  ;;  %v1294_v51 = vld [vmem:[#allocation7 + $0x1950] sm:$0xff] }
 0x1b5   :  { %6813 = vmatpush1.bf16.msra.mxu1 %v10781_v38  ;;  %7157 = vmatpush1.bf16.msra.mxu0 %v10785_v45  ;;  %v10877_v38 = vcombine.low %v1204_v61, %v1212_v1  ;;  %v10881_v45 = vcombine.low %v1206_v2, %v1214_v43  ;;  %v1300_v61 = vld [vmem:[#allocation7 + $0x1980] sm:$0xff]  ;;  %v1302_v2 = vld [vmem:[#allocation7 + $0x1990] sm:$0xff] }
 0x1b6   :  { %6814 = vmatprep.subr.bf16.mxu1 %v10798_v40  ;;  %7158 = vmatprep.subr.bf16.mxu0 %v10802_v11  ;;  %v10894_v40 = vcombine.high %v1220_v34, %v1228_v35  ;;  %v10898_v11 = vcombine.high %v1222_v39, %v1230_v36  ;;  %v1308_v1 = vld [vmem:[#allocation7 + $0x19c0] sm:$0xff]  ;;  %v1310_v43 = vld [vmem:[#allocation7 + $0x19d0] sm:$0xff] }
 0x1b9   :  { %6815 = vmatpush1.bf16.msra.mxu1 %v10797_v6  ;;  %7159 = vmatpush1.bf16.msra.mxu0 %v10801_v15  ;;  %v10893_v6 = vcombine.low %v1220_v34, %v1228_v35  ;;  %v10897_v15 = vcombine.low %v1222_v39, %v1230_v36  ;;  %v1316_v34 = vld [vmem:[#allocation7 + $0x1a00] sm:$0xff]  ;;  %v1318_v39 = vld [vmem:[#allocation7 + $0x1a10] sm:$0xff] }
 0x1ba   :  { %6816 = vmatprep.subr.bf16.mxu1 %v10814_v16  ;;  %7160 = vmatprep.subr.bf16.mxu0 %v10818_v17  ;;  %v10910_v16 = vcombine.high %v1236_v12, %v1244_v13  ;;  %v10914_v17 = vcombine.high %v1238_v63, %v1246_v3  ;;  %v1324_v35 = vld [vmem:[#allocation7 + $0x1a40] sm:$0xff]  ;;  %v1326_v36 = vld [vmem:[#allocation7 + $0x1a50] sm:$0xff] }
 0x1bd   :  { %6817 = vmatpush1.bf16.msra.mxu1 %v10813_v62  ;;  %7161 = vmatpush1.bf16.msra.mxu0 %v10817_v0  ;;  %v10909_v62 = vcombine.low %v1236_v12, %v1244_v13  ;;  %v10913_v0 = vcombine.low %v1238_v63, %v1246_v3  ;;  %v1332_v12 = vld [vmem:[#allocation7 + $0x1a80] sm:$0xff]  ;;  %v1334_v63 = vld [vmem:[#allocation7 + $0x1a90] sm:$0xff] }
 0x1be   :  { %6818 = vmatprep.subr.bf16.mxu1 %v10830_v21  ;;  %7162 = vmatprep.subr.bf16.mxu0 %v10834_v22  ;;  %v10926_v21 = vcombine.high %v1252_v18, %v1260_v19  ;;  %v10930_v22 = vcombine.high %v1254_v20, %v1262_v50  ;;  %v1340_v13 = vld [vmem:[#allocation7 + $0x1ac0] sm:$0xff]  ;;  %v1342_v3 = vld [vmem:[#allocation7 + $0x1ad0] sm:$0xff] }
 0x1c1   :  { %6819 = vmatpush1.bf16.msra.mxu1 %v10829_v28  ;;  %7163 = vmatpush1.bf16.msra.mxu0 %v10833_v29  ;;  %v10925_v28 = vcombine.low %v1252_v18, %v1260_v19  ;;  %v10929_v29 = vcombine.low %v1254_v20, %v1262_v50  ;;  %v1348_v18 = vld [vmem:[#allocation7 + $0x1b00] sm:$0xff]  ;;  %v1350_v20 = vld [vmem:[#allocation7 + $0x1b10] sm:$0xff] }
 0x1c2   :  { %6820 = vmatprep.subr.bf16.mxu1 %v10846_v31  ;;  %7164 = vmatprep.subr.bf16.mxu0 %v10850_v37  ;;  %v10942_v31 = vcombine.high %v1268_v23, %v1276_v24  ;;  %v10946_v37 = vcombine.high %v1270_v26, %v1278_v27  ;;  %v1356_v19 = vld [vmem:[#allocation7 + $0x1b40] sm:$0xff]  ;;  %v1358_v50 = vld [vmem:[#allocation7 + $0x1b50] sm:$0xff] }
 0x1c5   :  { %6821 = vmatpush1.bf16.msra.mxu1 %v10845_v57  ;;  %7165 = vmatpush1.bf16.msra.mxu0 %v10849_v58  ;;  %v10941_v57 = vcombine.low %v1268_v23, %v1276_v24  ;;  %v10945_v58 = vcombine.low %v1270_v26, %v1278_v27  ;;  %v1364_v23 = vld [vmem:[#allocation7 + $0x1b80] sm:$0xff]  ;;  %v1366_v26 = vld [vmem:[#allocation7 + $0x1b90] sm:$0xff] }
 0x1c6   :  { %6822 = vmatprep.subr.bf16.mxu1 %v10862_v59  ;;  %7166 = vmatprep.subr.bf16.mxu0 %v10866_v60  ;;  %v10958_v59 = vcombine.high %v1284_v41, %v1292_v42  ;;  %v10962_v60 = vcombine.high %v1286_v49, %v1294_v51  ;;  %v1372_v24 = vld [vmem:[#allocation7 + $0x1bc0] sm:$0xff]  ;;  %v1374_v27 = vld [vmem:[#allocation7 + $0x1bd0] sm:$0xff] }
 0x1c9   :  { %6823 = vmatpush1.bf16.msra.mxu1 %v10861_v7  ;;  %7167 = vmatpush1.bf16.msra.mxu0 %v10865_v8  ;;  %v10957_v7 = vcombine.low %v1284_v41, %v1292_v42  ;;  %v10961_v8 = vcombine.low %v1286_v49, %v1294_v51  ;;  %v1380_v41 = vld [vmem:[#allocation7 + $0x1c00] sm:$0xff]  ;;  %v1382_v49 = vld [vmem:[#allocation7 + $0x1c10] sm:$0xff] }
 0x1ca   :  { %6824 = vmatprep.subr.bf16.mxu1 %v10878_v9  ;;  %7168 = vmatprep.subr.bf16.mxu0 %v10882_v10  ;;  %v10974_v9 = vcombine.high %v1300_v61, %v1308_v1  ;;  %v10978_v10 = vcombine.high %v1302_v2, %v1310_v43  ;;  %v1388_v42 = vld [vmem:[#allocation7 + $0x1c40] sm:$0xff]  ;;  %v1390_v51 = vld [vmem:[#allocation7 + $0x1c50] sm:$0xff] }
 0x1cd   :  { %6825 = vmatpush1.bf16.msra.mxu1 %v10877_v38  ;;  %7169 = vmatpush1.bf16.msra.mxu0 %v10881_v45  ;;  %v10973_v38 = vcombine.low %v1300_v61, %v1308_v1  ;;  %v10977_v45 = vcombine.low %v1302_v2, %v1310_v43  ;;  %v1396_v61 = vld [vmem:[#allocation7 + $0x1c80] sm:$0xff]  ;;  %v1398_v2 = vld [vmem:[#allocation7 + $0x1c90] sm:$0xff] }
 0x1ce   :  { %6826 = vmatprep.subr.bf16.mxu1 %v10894_v40  ;;  %7170 = vmatprep.subr.bf16.mxu0 %v10898_v11  ;;  %v10990_v40 = vcombine.high %v1316_v34, %v1324_v35  ;;  %v10994_v11 = vcombine.high %v1318_v39, %v1326_v36  ;;  %v1404_v1 = vld [vmem:[#allocation7 + $0x1cc0] sm:$0xff]  ;;  %v1406_v43 = vld [vmem:[#allocation7 + $0x1cd0] sm:$0xff] }
 0x1d1   :  { %6827 = vmatpush1.bf16.msra.mxu1 %v10893_v6  ;;  %7171 = vmatpush1.bf16.msra.mxu0 %v10897_v15  ;;  %v10989_v6 = vcombine.low %v1316_v34, %v1324_v35  ;;  %v10993_v15 = vcombine.low %v1318_v39, %v1326_v36  ;;  %v1412_v34 = vld [vmem:[#allocation7 + $0x1d00] sm:$0xff]  ;;  %v1414_v39 = vld [vmem:[#allocation7 + $0x1d10] sm:$0xff] }
 0x1d2   :  { %6828 = vmatprep.subr.bf16.mxu1 %v10910_v16  ;;  %7172 = vmatprep.subr.bf16.mxu0 %v10914_v17  ;;  %v11006_v16 = vcombine.high %v1332_v12, %v1340_v13  ;;  %v11010_v17 = vcombine.high %v1334_v63, %v1342_v3  ;;  %v1420_v35 = vld [vmem:[#allocation7 + $0x1d40] sm:$0xff]  ;;  %v1422_v36 = vld [vmem:[#allocation7 + $0x1d50] sm:$0xff] }
 0x1d5   :  { %6829 = vmatpush1.bf16.msra.mxu1 %v10909_v62  ;;  %7173 = vmatpush1.bf16.msra.mxu0 %v10913_v0  ;;  %v11005_v62 = vcombine.low %v1332_v12, %v1340_v13  ;;  %v11009_v0 = vcombine.low %v1334_v63, %v1342_v3  ;;  %v1428_v12 = vld [vmem:[#allocation7 + $0x1d80] sm:$0xff]  ;;  %v1430_v63 = vld [vmem:[#allocation7 + $0x1d90] sm:$0xff] }
 0x1d6   :  { %6841 = vmatprep.subr.bf16.mxu1 %v10926_v21  ;;  %7185 = vmatprep.subr.bf16.mxu0 %v10930_v22  ;;  %v11022_v21 = vcombine.high %v1348_v18, %v1356_v19  ;;  %v11026_v22 = vcombine.high %v1350_v20, %v1358_v50  ;;  %v1436_v13 = vld [vmem:[#allocation7 + $0x1dc0] sm:$0xff]  ;;  %v1438_v3 = vld [vmem:[#allocation7 + $0x1dd0] sm:$0xff] }
 0x1d8   :  { %6831 = vmatmul.mubr.bf16.vlgmr.msra.gmra.mrb[8].mxu1 %v12382_v14  ;;  %7175 = vmatmul.mubr.bf16.vlgmr.msra.gmra.mrb[8].mxu0 %v12382_v14 }
 0x1d9   :  { %6842 = vmatpush1.bf16.msra.mxu1 %v10925_v28  ;;  %7186 = vmatpush1.bf16.msra.mxu0 %v10929_v29  ;;  %v11021_v28 = vcombine.low %v1348_v18, %v1356_v19  ;;  %v11025_v29 = vcombine.low %v1350_v20, %v1358_v50  ;;  %v1444_v18 = vld [vmem:[#allocation7 + $0x1e00] sm:$0xff]  ;;  %v1446_v20 = vld [vmem:[#allocation7 + $0x1e10] sm:$0xff] }
 0x1da   :  { %6843 = vmatprep.subr.bf16.mxu1 %v10942_v31  ;;  %7187 = vmatprep.subr.bf16.mxu0 %v10946_v37  ;;  %v11038_v31 = vcombine.high %v1364_v23, %v1372_v24  ;;  %v11042_v37 = vcombine.high %v1366_v26, %v1374_v27  ;;  %v1452_v19 = vld [vmem:[#allocation7 + $0x1e40] sm:$0xff]  ;;  %v1454_v50 = vld [vmem:[#allocation7 + $0x1e50] sm:$0xff] }
 0x1db   :  { %6873 = vmatprep.mubr.bf16.mxu1 %v12398_v54  ;;  %7217 = vmatprep.mubr.bf16.mxu0 %v12398_v54 }
 0x1dd   :  { %6844 = vmatpush1.bf16.msra.mxu1 %v10941_v57  ;;  %7188 = vmatpush1.bf16.msra.mxu0 %v10945_v58  ;;  %v11037_v57 = vcombine.low %v1364_v23, %v1372_v24  ;;  %v11041_v58 = vcombine.low %v1366_v26, %v1374_v27  ;;  %v1460_v23 = vld [vmem:[#allocation7 + $0x1e80] sm:$0xff]  ;;  %v1462_v26 = vld [vmem:[#allocation7 + $0x1e90] sm:$0xff] }
 0x1de   :  { %6845 = vmatprep.subr.bf16.mxu1 %v10958_v59  ;;  %7189 = vmatprep.subr.bf16.mxu0 %v10962_v60  ;;  %v11054_v59 = vcombine.high %v1380_v41, %v1388_v42  ;;  %v11058_v60 = vcombine.high %v1382_v49, %v1390_v51  ;;  %v1468_v24 = vld [vmem:[#allocation7 + $0x1ec0] sm:$0xff]  ;;  %v1470_v27 = vld [vmem:[#allocation7 + $0x1ed0] sm:$0xff] }
 0x1e1   :  { %6846 = vmatpush1.bf16.msra.mxu1 %v10957_v7  ;;  %7190 = vmatpush1.bf16.msra.mxu0 %v10961_v8  ;;  %v11053_v7 = vcombine.low %v1380_v41, %v1388_v42  ;;  %v11057_v8 = vcombine.low %v1382_v49, %v1390_v51  ;;  %v1476_v41 = vld [vmem:[#allocation7 + $0x1f00] sm:$0xff]  ;;  %v1478_v49 = vld [vmem:[#allocation7 + $0x1f10] sm:$0xff] }
 0x1e2   :  { %6847 = vmatprep.subr.bf16.mxu1 %v10974_v9  ;;  %7191 = vmatprep.subr.bf16.mxu0 %v10978_v10  ;;  %v11070_v9 = vcombine.high %v1396_v61, %v1404_v1  ;;  %v11074_v10 = vcombine.high %v1398_v2, %v1406_v43  ;;  %v1484_v42 = vld [vmem:[#allocation7 + $0x1f40] sm:$0xff]  ;;  %v1486_v51 = vld [vmem:[#allocation7 + $0x1f50] sm:$0xff] }
 0x1e5   :  { %6848 = vmatpush1.bf16.msra.mxu1 %v10973_v38  ;;  %7192 = vmatpush1.bf16.msra.mxu0 %v10977_v45  ;;  %v11069_v38 = vcombine.low %v1396_v61, %v1404_v1  ;;  %v11073_v45 = vcombine.low %v1398_v2, %v1406_v43  ;;  %v1492_v61 = vld [vmem:[#allocation7 + $0x1f80] sm:$0xff]  ;;  %v1494_v2 = vld [vmem:[#allocation7 + $0x1f90] sm:$0xff] }
 0x1e6   :  { %6849 = vmatprep.subr.bf16.mxu1 %v10990_v40  ;;  %7193 = vmatprep.subr.bf16.mxu0 %v10994_v11  ;;  %v11086_v40 = vcombine.high %v1412_v34, %v1420_v35  ;;  %v11090_v11 = vcombine.high %v1414_v39, %v1422_v36  ;;  %v1500_v1 = vld [vmem:[#allocation7 + $0x1fc0] sm:$0xff]  ;;  %v1502_v43 = vld [vmem:[#allocation7 + $0x1fd0] sm:$0xff] }
 0x1e9   :  { %6850 = vmatpush1.bf16.msra.mxu1 %v10989_v6  ;;  %7194 = vmatpush1.bf16.msra.mxu0 %v10993_v15  ;;  %v11085_v6 = vcombine.low %v1412_v34, %v1420_v35  ;;  %v11089_v15 = vcombine.low %v1414_v39, %v1422_v36  ;;  %v485_v34 = vld [vmem:[#allocation7 + $0x8] sm:$0xff]  ;;  %v488_v39 = vld [vmem:[#allocation7 + $0x20] sm:$0xff] }
 0x1ea   :  { %6851 = vmatprep.subr.bf16.mxu1 %v11006_v16  ;;  %7195 = vmatprep.subr.bf16.mxu0 %v11010_v17  ;;  %v11102_v16 = vcombine.high %v1428_v12, %v1436_v13  ;;  %v11106_v17 = vcombine.high %v1430_v63, %v1438_v3  ;;  %v493_v35 = vld [vmem:[#allocation7 + $0x48] sm:$0xff]  ;;  %v496_v36 = vld [vmem:[#allocation7 + $0x60] sm:$0xff] }
 0x1ed   :  { %6852 = vmatpush1.bf16.msra.mxu1 %v11005_v62  ;;  %7196 = vmatpush1.bf16.msra.mxu0 %v11009_v0  ;;  %v11101_v62 = vcombine.low %v1428_v12, %v1436_v13  ;;  %v11105_v0 = vcombine.low %v1430_v63, %v1438_v3  ;;  %v501_v12 = vld [vmem:[#allocation7 + $0x88] sm:$0xff]  ;;  %v504_v63 = vld [vmem:[#allocation7 + $0xa0] sm:$0xff] }
 0x1ee   :  { %6853 = vmatprep.subr.bf16.mxu1 %v11022_v21  ;;  %7197 = vmatprep.subr.bf16.mxu0 %v11026_v22  ;;  %v11118_v21 = vcombine.high %v1444_v18, %v1452_v19  ;;  %v11122_v22 = vcombine.high %v1446_v20, %v1454_v50  ;;  %v509_v13 = vld [vmem:[#allocation7 + $0xc8] sm:$0xff]  ;;  %v512_v3 = vld [vmem:[#allocation7 + $0xe0] sm:$0xff] }
 0x1f1   :  { %6854 = vmatpush1.bf16.msra.mxu1 %v11021_v28  ;;  %7198 = vmatpush1.bf16.msra.mxu0 %v11025_v29  ;;  %v11117_v28 = vcombine.low %v1444_v18, %v1452_v19  ;;  %v11121_v29 = vcombine.low %v1446_v20, %v1454_v50  ;;  %v517_v18 = vld [vmem:[#allocation7 + $0x108] sm:$0xff]  ;;  %v520_v20 = vld [vmem:[#allocation7 + $0x120] sm:$0xff] }
 0x1f2   :  { %6855 = vmatprep.subr.bf16.mxu1 %v11038_v31  ;;  %7199 = vmatprep.subr.bf16.mxu0 %v11042_v37  ;;  %v11134_v31 = vcombine.high %v1460_v23, %v1468_v24  ;;  %v11138_v37 = vcombine.high %v1462_v26, %v1470_v27  ;;  %v525_v19 = vld [vmem:[#allocation7 + $0x148] sm:$0xff]  ;;  %v528_v50 = vld [vmem:[#allocation7 + $0x160] sm:$0xff] }
 0x1f5   :  { %6856 = vmatpush1.bf16.msra.mxu1 %v11037_v57  ;;  %7200 = vmatpush1.bf16.msra.mxu0 %v11041_v58  ;;  %v11133_v57 = vcombine.low %v1460_v23, %v1468_v24  ;;  %v11137_v58 = vcombine.low %v1462_v26, %v1470_v27  ;;  %v533_v23 = vld [vmem:[#allocation7 + $0x188] sm:$0xff]  ;;  %v536_v26 = vld [vmem:[#allocation7 + $0x1a0] sm:$0xff] }
 0x1f6   :  { %6857 = vmatprep.subr.bf16.mxu1 %v11054_v59  ;;  %7201 = vmatprep.subr.bf16.mxu0 %v11058_v60  ;;  %v11150_v59 = vcombine.high %v1476_v41, %v1484_v42  ;;  %v11154_v60 = vcombine.high %v1478_v49, %v1486_v51  ;;  %v541_v24 = vld [vmem:[#allocation7 + $0x1c8] sm:$0xff]  ;;  %v544_v27 = vld [vmem:[#allocation7 + $0x1e0] sm:$0xff] }
 0x1f9   :  { %6858 = vmatpush1.bf16.msra.mxu1 %v11053_v7  ;;  %7202 = vmatpush1.bf16.msra.mxu0 %v11057_v8  ;;  %v11149_v7 = vcombine.low %v1476_v41, %v1484_v42  ;;  %v11153_v8 = vcombine.low %v1478_v49, %v1486_v51  ;;  %v549_v41 = vld [vmem:[#allocation7 + $0x208] sm:$0xff]  ;;  %v552_v49 = vld [vmem:[#allocation7 + $0x220] sm:$0xff] }
 0x1fa   :  { %6859 = vmatprep.subr.bf16.mxu1 %v11070_v9  ;;  %7203 = vmatprep.subr.bf16.mxu0 %v11074_v10  ;;  %v11166_v9 = vcombine.high %v1492_v61, %v1500_v1  ;;  %v11170_v10 = vcombine.high %v1494_v2, %v1502_v43  ;;  %v557_v42 = vld [vmem:[#allocation7 + $0x248] sm:$0xff]  ;;  %v560_v51 = vld [vmem:[#allocation7 + $0x260] sm:$0xff] }
 0x1fd   :  { %6860 = vmatpush1.bf16.msra.mxu1 %v11069_v38  ;;  %7204 = vmatpush1.bf16.msra.mxu0 %v11073_v45  ;;  %v11165_v38 = vcombine.low %v1492_v61, %v1500_v1  ;;  %v11169_v45 = vcombine.low %v1494_v2, %v1502_v43  ;;  %v565_v61 = vld [vmem:[#allocation7 + $0x288] sm:$0xff]  ;;  %v568_v2 = vld [vmem:[#allocation7 + $0x2a0] sm:$0xff] }
 0x1fe   :  { %6861 = vmatprep.subr.bf16.mxu1 %v11086_v40  ;;  %7205 = vmatprep.subr.bf16.mxu0 %v11090_v11  ;;  %v10160_v40 = vcombine.high %v485_v34, %v493_v35  ;;  %v10166_v11 = vcombine.high %v488_v39, %v496_v36  ;;  %v573_v1 = vld [vmem:[#allocation7 + $0x2c8] sm:$0xff]  ;;  %v576_v43 = vld [vmem:[#allocation7 + $0x2e0] sm:$0xff] }
 0x201   :  { %6862 = vmatpush1.bf16.msra.mxu1 %v11085_v6  ;;  %7206 = vmatpush1.bf16.msra.mxu0 %v11089_v15  ;;  %v10159_v6 = vcombine.low %v485_v34, %v493_v35  ;;  %v10165_v15 = vcombine.low %v488_v39, %v496_v36  ;;  %v581_v34 = vld [vmem:[#allocation7 + $0x308] sm:$0xff]  ;;  %v584_v39 = vld [vmem:[#allocation7 + $0x320] sm:$0xff] }
 0x202   :  { %6863 = vmatprep.subr.bf16.mxu1 %v11102_v16  ;;  %7207 = vmatprep.subr.bf16.mxu0 %v11106_v17  ;;  %v10176_v16 = vcombine.high %v501_v12, %v509_v13  ;;  %v10182_v17 = vcombine.high %v504_v63, %v512_v3  ;;  %v589_v35 = vld [vmem:[#allocation7 + $0x348] sm:$0xff]  ;;  %v592_v36 = vld [vmem:[#allocation7 + $0x360] sm:$0xff] }
 0x205   :  { %6864 = vmatpush1.bf16.msra.mxu1 %v11101_v62  ;;  %7208 = vmatpush1.bf16.msra.mxu0 %v11105_v0  ;;  %v10175_v62 = vcombine.low %v501_v12, %v509_v13  ;;  %v10181_v0 = vcombine.low %v504_v63, %v512_v3  ;;  %v597_v12 = vld [vmem:[#allocation7 + $0x388] sm:$0xff]  ;;  %v600_v63 = vld [vmem:[#allocation7 + $0x3a0] sm:$0xff] }
 0x206   :  { %6865 = vmatprep.subr.bf16.mxu1 %v11118_v21  ;;  %7209 = vmatprep.subr.bf16.mxu0 %v11122_v22  ;;  %v10192_v21 = vcombine.high %v517_v18, %v525_v19  ;;  %v10198_v22 = vcombine.high %v520_v20, %v528_v50  ;;  %v605_v13 = vld [vmem:[#allocation7 + $0x3c8] sm:$0xff]  ;;  %v608_v3 = vld [vmem:[#allocation7 + $0x3e0] sm:$0xff] }
 0x209   :  { %6866 = vmatpush1.bf16.msra.mxu1 %v11117_v28  ;;  %7210 = vmatpush1.bf16.msra.mxu0 %v11121_v29  ;;  %v10191_v28 = vcombine.low %v517_v18, %v525_v19  ;;  %v10197_v29 = vcombine.low %v520_v20, %v528_v50  ;;  %v613_v18 = vld [vmem:[#allocation7 + $0x408] sm:$0xff]  ;;  %v616_v20 = vld [vmem:[#allocation7 + $0x420] sm:$0xff] }
 0x20a   :  { %6867 = vmatprep.subr.bf16.mxu1 %v11134_v31  ;;  %7211 = vmatprep.subr.bf16.mxu0 %v11138_v37  ;;  %v10208_v31 = vcombine.high %v533_v23, %v541_v24  ;;  %v10214_v37 = vcombine.high %v536_v26, %v544_v27  ;;  %v621_v19 = vld [vmem:[#allocation7 + $0x448] sm:$0xff]  ;;  %v624_v50 = vld [vmem:[#allocation7 + $0x460] sm:$0xff] }
 0x20d   :  { %6868 = vmatpush1.bf16.msra.mxu1 %v11133_v57  ;;  %7212 = vmatpush1.bf16.msra.mxu0 %v11137_v58  ;;  %v10207_v57 = vcombine.low %v533_v23, %v541_v24  ;;  %v10213_v58 = vcombine.low %v536_v26, %v544_v27  ;;  %v629_v23 = vld [vmem:[#allocation7 + $0x488] sm:$0xff]  ;;  %v632_v26 = vld [vmem:[#allocation7 + $0x4a0] sm:$0xff] }
 0x20e   :  { %6869 = vmatprep.subr.bf16.mxu1 %v11150_v59  ;;  %7213 = vmatprep.subr.bf16.mxu0 %v11154_v60  ;;  %v10224_v59 = vcombine.high %v549_v41, %v557_v42  ;;  %v10230_v60 = vcombine.high %v552_v49, %v560_v51  ;;  %v637_v24 = vld [vmem:[#allocation7 + $0x4c8] sm:$0xff]  ;;  %v640_v27 = vld [vmem:[#allocation7 + $0x4e0] sm:$0xff] }
 0x211   :  { %6870 = vmatpush1.bf16.msra.mxu1 %v11149_v7  ;;  %7214 = vmatpush1.bf16.msra.mxu0 %v11153_v8  ;;  %v10223_v7 = vcombine.low %v549_v41, %v557_v42  ;;  %v10229_v8 = vcombine.low %v552_v49, %v560_v51  ;;  %v645_v41 = vld [vmem:[#allocation7 + $0x508] sm:$0xff]  ;;  %v648_v49 = vld [vmem:[#allocation7 + $0x520] sm:$0xff] }
 0x212   :  { %6871 = vmatprep.subr.bf16.mxu1 %v11166_v9  ;;  %7215 = vmatprep.subr.bf16.mxu0 %v11170_v10  ;;  %v10240_v9 = vcombine.high %v565_v61, %v573_v1  ;;  %v10246_v10 = vcombine.high %v568_v2, %v576_v43  ;;  %v653_v42 = vld [vmem:[#allocation7 + $0x548] sm:$0xff]  ;;  %v656_v51 = vld [vmem:[#allocation7 + $0x560] sm:$0xff] }
 0x215   :  { %6872 = vmatpush1.bf16.msra.mxu1 %v11165_v38  ;;  %7216 = vmatpush1.bf16.msra.mxu0 %v11169_v45  ;;  %v10239_v38 = vcombine.low %v565_v61, %v573_v1  ;;  %v10245_v45 = vcombine.low %v568_v2, %v576_v43  ;;  %v661_v61 = vld [vmem:[#allocation7 + $0x588] sm:$0xff]  ;;  %v664_v2 = vld [vmem:[#allocation7 + $0x5a0] sm:$0xff] }
 0x216   :  { %6884 = vmatprep.subr.bf16.mxu1 %v10160_v40  ;;  %7400 = vmatprep.subr.bf16.mxu0 %v10166_v11  ;;  %v10256_v40 = vcombine.high %v581_v34, %v589_v35  ;;  %v10262_v11 = vcombine.high %v584_v39, %v592_v36  ;;  %v669_v1 = vld [vmem:[#allocation7 + $0x5c8] sm:$0xff]  ;;  %v672_v43 = vld [vmem:[#allocation7 + $0x5e0] sm:$0xff] }
 0x218   :  { %6874 = vmatmul.mubr.bf16.vlgmr.msra.gmra.mrb[8].mxu1 %v12396_v53  ;;  %7218 = vmatmul.mubr.bf16.vlgmr.msra.gmra.mrb[8].mxu0 %v12396_v53 }
 0x219   :  { %6885 = vmatpush1.bf16.msra.mxu1 %v10159_v6  ;;  %6916 = vmatprep.mubr.bf16.mxu1 %v12345_v32  ;;  %v10255_v6 = vcombine.low %v581_v34, %v589_v35  ;;  %v677_v34 = vld [vmem:[#allocation7 + $0x608] sm:$0xff] }
 0x21a   :  { %7401 = vmatpush1.bf16.msra.mxu0 %v10165_v15  ;;  %7432 = vmatprep.mubr.bf16.mxu0 %v12345_v32  ;;  %v10261_v15 = vcombine.low %v584_v39, %v592_v36  ;;  %v685_v35 = vld [vmem:[#allocation7 + $0x648] sm:$0xff]  ;;  %v680_v39 = vld [vmem:[#allocation7 + $0x620] sm:$0xff] }
 0x21b   :  { %6886 = vmatprep.subr.bf16.mxu1 %v10176_v16  ;;  %7402 = vmatprep.subr.bf16.mxu0 %v10182_v17  ;;  %v10272_v16 = vcombine.high %v597_v12, %v605_v13  ;;  %v10278_v17 = vcombine.high %v600_v63, %v608_v3  ;;  %v688_v36 = vld [vmem:[#allocation7 + $0x660] sm:$0xff] }
 0x21d   :  { %6887 = vmatpush1.bf16.msra.mxu1 %v10175_v62  ;;  %v10271_v62 = vcombine.low %v597_v12, %v605_v13  ;;  %v693_v12 = vld [vmem:[#allocation7 + $0x688] sm:$0xff] }
 0x21e   :  { %7403 = vmatpush1.bf16.msra.mxu0 %v10181_v0  ;;  %6888 = vmatprep.subr.bf16.mxu1 %v10192_v21  ;;  %v10277_v0 = vcombine.low %v600_v63, %v608_v3  ;;  %v10288_v21 = vcombine.high %v613_v18, %v621_v19  ;;  %v701_v13 = vld [vmem:[#allocation7 + $0x6c8] sm:$0xff]  ;;  %v696_v63 = vld [vmem:[#allocation7 + $0x6a0] sm:$0xff] }
 0x21f   :  { %7404 = vmatprep.subr.bf16.mxu0 %v10198_v22  ;;  %v10294_v22 = vcombine.high %v616_v20, %v624_v50  ;;  %v704_v3 = vld [vmem:[#allocation7 + $0x6e0] sm:$0xff] }
 0x221   :  { %6889 = vmatpush1.bf16.msra.mxu1 %v10191_v28  ;;  %v10287_v28 = vcombine.low %v613_v18, %v621_v19  ;;  %v709_v18 = vld [vmem:[#allocation7 + $0x708] sm:$0xff] }
 0x222   :  { %7405 = vmatpush1.bf16.msra.mxu0 %v10197_v29  ;;  %6890 = vmatprep.subr.bf16.mxu1 %v10208_v31  ;;  %v10293_v29 = vcombine.low %v616_v20, %v624_v50  ;;  %v10304_v31 = vcombine.high %v629_v23, %v637_v24  ;;  %v717_v19 = vld [vmem:[#allocation7 + $0x748] sm:$0xff]  ;;  %v712_v20 = vld [vmem:[#allocation7 + $0x720] sm:$0xff] }
 0x223   :  { %7406 = vmatprep.subr.bf16.mxu0 %v10214_v37  ;;  %v10310_v37 = vcombine.high %v632_v26, %v640_v27  ;;  %v720_v50 = vld [vmem:[#allocation7 + $0x760] sm:$0xff] }
 0x225   :  { %6891 = vmatpush1.bf16.msra.mxu1 %v10207_v57  ;;  %v10303_v57 = vcombine.low %v629_v23, %v637_v24  ;;  %v725_v23 = vld [vmem:[#allocation7 + $0x788] sm:$0xff] }
 0x226   :  { %7407 = vmatpush1.bf16.msra.mxu0 %v10213_v58  ;;  %6892 = vmatprep.subr.bf16.mxu1 %v10224_v59  ;;  %v10309_v58 = vcombine.low %v632_v26, %v640_v27  ;;  %v10320_v59 = vcombine.high %v645_v41, %v653_v42  ;;  %v733_v24 = vld [vmem:[#allocation7 + $0x7c8] sm:$0xff]  ;;  %v728_v26 = vld [vmem:[#allocation7 + $0x7a0] sm:$0xff] }
 0x227   :  { %7408 = vmatprep.subr.bf16.mxu0 %v10230_v60  ;;  %v10326_v60 = vcombine.high %v648_v49, %v656_v51  ;;  %v736_v27 = vld [vmem:[#allocation7 + $0x7e0] sm:$0xff] }
 0x229   :  { %6893 = vmatpush1.bf16.msra.mxu1 %v10223_v7  ;;  %v10319_v7 = vcombine.low %v645_v41, %v653_v42  ;;  %v741_v41 = vld [vmem:[#allocation7 + $0x808] sm:$0xff] }
 0x22a   :  { %7409 = vmatpush1.bf16.msra.mxu0 %v10229_v8  ;;  %6894 = vmatprep.subr.bf16.mxu1 %v10240_v9  ;;  %v10325_v8 = vcombine.low %v648_v49, %v656_v51  ;;  %v10336_v9 = vcombine.high %v661_v61, %v669_v1  ;;  %v749_v42 = vld [vmem:[#allocation7 + $0x848] sm:$0xff]  ;;  %v744_v49 = vld [vmem:[#allocation7 + $0x820] sm:$0xff] }
 0x22b   :  { %7410 = vmatprep.subr.bf16.mxu0 %v10246_v10  ;;  %v10342_v10 = vcombine.high %v664_v2, %v672_v43  ;;  %v752_v51 = vld [vmem:[#allocation7 + $0x860] sm:$0xff] }
 0x22d   :  { %6895 = vmatpush1.bf16.msra.mxu1 %v10239_v38  ;;  %v10335_v38 = vcombine.low %v661_v61, %v669_v1  ;;  %v757_v61 = vld [vmem:[#allocation7 + $0x888] sm:$0xff] }
 0x22e   :  { %7411 = vmatpush1.bf16.msra.mxu0 %v10245_v45  ;;  %6896 = vmatprep.subr.bf16.mxu1 %v10256_v40  ;;  %v10341_v45 = vcombine.low %v664_v2, %v672_v43  ;;  %v10352_v40 = vcombine.high %v677_v34, %v685_v35  ;;  %v765_v1 = vld [vmem:[#allocation7 + $0x8c8] sm:$0xff]  ;;  %v10415_v2 = vcombine.low %v741_v41, %v749_v42  ;;  %v760_v43 = vld [vmem:[#allocation7 + $0x8a0] sm:$0xff] }
 0x22f   :  { %7412 = vmatprep.subr.bf16.mxu0 %v10262_v11  ;;  %v10358_v11 = vcombine.high %v680_v39, %v688_v36 }
 0x231   :  { %6897 = vmatpush1.bf16.msra.mxu1 %v10255_v6  ;;  %v10351_v6 = vcombine.low %v677_v34, %v685_v35  ;;  %v781_v34 = vld [vmem:[#allocation7 + $0x948] sm:$0xff] }
 0x232   :  { %7413 = vmatpush1.bf16.msra.mxu0 %v10261_v15  ;;  %6898 = vmatprep.subr.bf16.mxu1 %v10272_v16  ;;  %v10357_v15 = vcombine.low %v680_v39, %v688_v36  ;;  %v10368_v16 = vcombine.high %v693_v12, %v701_v13  ;;  %v776_v39 = vld [vmem:[#allocation7 + $0x920] sm:$0xff] }
 0x233   :  { %7414 = vmatprep.subr.bf16.mxu0 %v10278_v17  ;;  %v10374_v17 = vcombine.high %v696_v63, %v704_v3  ;;  %v784_v36 = vld [vmem:[#allocation7 + $0x960] sm:$0xff] }
 0x235   :  { %6899 = vmatpush1.bf16.msra.mxu1 %v10271_v62  ;;  %v10367_v62 = vcombine.low %v693_v12, %v701_v13  ;;  %v789_v12 = vld [vmem:[#allocation7 + $0x988] sm:$0xff] }
 0x236   :  { %7415 = vmatpush1.bf16.msra.mxu0 %v10277_v0  ;;  %6900 = vmatprep.subr.bf16.mxu1 %v10288_v21  ;;  %v10373_v0 = vcombine.low %v696_v63, %v704_v3  ;;  %v10384_v21 = vcombine.high %v709_v18, %v717_v19  ;;  %v797_v13 = vld [vmem:[#allocation7 + $0x9c8] sm:$0xff]  ;;  %v792_v63 = vld [vmem:[#allocation7 + $0x9a0] sm:$0xff] }
 0x237   :  { %7416 = vmatprep.subr.bf16.mxu0 %v10294_v22  ;;  %v10390_v22 = vcombine.high %v712_v20, %v720_v50  ;;  %v800_v3 = vld [vmem:[#allocation7 + $0x9e0] sm:$0xff] }
 0x239   :  { %6901 = vmatpush1.bf16.msra.mxu1 %v10287_v28  ;;  %v10383_v28 = vcombine.low %v709_v18, %v717_v19  ;;  %v805_v18 = vld [vmem:[#allocation7 + $0xa08] sm:$0xff] }
 0x23a   :  { %7417 = vmatpush1.bf16.msra.mxu0 %v10293_v29  ;;  %6902 = vmatprep.subr.bf16.mxu1 %v10304_v31  ;;  %v10389_v29 = vcombine.low %v712_v20, %v720_v50  ;;  %v10400_v31 = vcombine.high %v725_v23, %v733_v24  ;;  %v813_v19 = vld [vmem:[#allocation7 + $0xa48] sm:$0xff]  ;;  %v808_v20 = vld [vmem:[#allocation7 + $0xa20] sm:$0xff] }
 0x23b   :  { %7418 = vmatprep.subr.bf16.mxu0 %v10310_v37  ;;  %v10406_v37 = vcombine.high %v728_v26, %v736_v27  ;;  %v816_v50 = vld [vmem:[#allocation7 + $0xa60] sm:$0xff] }
 0x23d   :  { %6903 = vmatpush1.bf16.msra.mxu1 %v10303_v57  ;;  %v10399_v57 = vcombine.low %v725_v23, %v733_v24  ;;  %v821_v23 = vld [vmem:[#allocation7 + $0xa88] sm:$0xff] }
 0x23e   :  { %7419 = vmatpush1.bf16.msra.mxu0 %v10309_v58  ;;  %6904 = vmatprep.subr.bf16.mxu1 %v10320_v59  ;;  %v10405_v58 = vcombine.low %v728_v26, %v736_v27  ;;  %v10416_v59 = vcombine.high %v741_v41, %v749_v42  ;;  %v829_v24 = vld [vmem:[#allocation7 + $0xac8] sm:$0xff]  ;;  %v824_v26 = vld [vmem:[#allocation7 + $0xaa0] sm:$0xff] }
 0x23f   :  { %7420 = vmatprep.subr.bf16.mxu0 %v10326_v60  ;;  %v10422_v60 = vcombine.high %v744_v49, %v752_v51  ;;  %v832_v27 = vld [vmem:[#allocation7 + $0xae0] sm:$0xff]  ;;  %v837_v41 = vld [vmem:[#allocation7 + $0xb08] sm:$0xff] }
 0x240   :  { %v845_v42 = vld [vmem:[#allocation7 + $0xb48] sm:$0xff] }
 0x241   :  { %6905 = vmatpush1.bf16.msra.mxu1 %v10319_v7  ;;  %v768_v7 = vld [vmem:[#allocation7 + $0x8e0] sm:$0xff] }
 0x242   :  { %7421 = vmatpush1.bf16.msra.mxu0 %v10325_v8  ;;  %6906 = vmatprep.subr.bf16.mxu1 %v10336_v9  ;;  %v10421_v8 = vcombine.low %v744_v49, %v752_v51  ;;  %v10432_v9 = vcombine.high %v757_v61, %v765_v1  ;;  %v10438_v35 = vcombine.high %v760_v43, %v768_v7  ;;  %v840_v49 = vld [vmem:[#allocation7 + $0xb20] sm:$0xff] }
 0x243   :  { %7422 = vmatprep.subr.bf16.mxu0 %v10342_v10  ;;  %v773_v10 = vld [vmem:[#allocation7 + $0x908] sm:$0xff]  ;;  %v848_v51 = vld [vmem:[#allocation7 + $0xb60] sm:$0xff] }
 0x245   :  { %6907 = vmatpush1.bf16.msra.mxu1 %v10335_v38  ;;  %v10431_v38 = vcombine.low %v757_v61, %v765_v1  ;;  %v853_v61 = vld [vmem:[#allocation7 + $0xb88] sm:$0xff] }
 0x246   :  { %7423 = vmatpush1.bf16.msra.mxu0 %v10341_v45  ;;  %6908 = vmatprep.subr.bf16.mxu1 %v10352_v40  ;;  %v10437_v45 = vcombine.low %v760_v43, %v768_v7  ;;  %v10448_v40 = vcombine.high %v773_v10, %v781_v34  ;;  %v861_v1 = vld [vmem:[#allocation7 + $0xbc8] sm:$0xff]  ;;  %v864_v43 = vld [vmem:[#allocation7 + $0xbe0] sm:$0xff]  ;;  %v10511_v7 = vcombine.low %v837_v41, %v845_v42 }
 0x247   :  { %7424 = vmatprep.subr.bf16.mxu0 %v10358_v11  ;;  %v10454_v11 = vcombine.high %v776_v39, %v784_v36 }
 0x249   :  { %6909 = vmatpush1.bf16.msra.mxu1 %v10351_v6  ;;  %v10447_v6 = vcombine.low %v773_v10, %v781_v34  ;;  %v869_v34 = vld [vmem:[#allocation7 + $0xc08] sm:$0xff] }
 0x24a   :  { %7425 = vmatpush1.bf16.msra.mxu0 %v10357_v15  ;;  %6910 = vmatprep.subr.bf16.mxu1 %v10368_v16  ;;  %v10453_v15 = vcombine.low %v776_v39, %v784_v36  ;;  %v10464_v16 = vcombine.high %v789_v12, %v797_v13  ;;  %v872_v39 = vld [vmem:[#allocation7 + $0xc20] sm:$0xff] }
 0x24b   :  { %7426 = vmatprep.subr.bf16.mxu0 %v10374_v17  ;;  %v10470_v17 = vcombine.high %v792_v63, %v800_v3  ;;  %v880_v36 = vld [vmem:[#allocation7 + $0xc60] sm:$0xff] }
 0x24d   :  { %6911 = vmatpush1.bf16.msra.mxu1 %v10367_v62  ;;  %v10463_v62 = vcombine.low %v789_v12, %v797_v13  ;;  %v885_v12 = vld [vmem:[#allocation7 + $0xc88] sm:$0xff] }
 0x24e   :  { %7427 = vmatpush1.bf16.msra.mxu0 %v10373_v0  ;;  %6912 = vmatprep.subr.bf16.mxu1 %v10384_v21  ;;  %v10469_v0 = vcombine.low %v792_v63, %v800_v3  ;;  %v10480_v21 = vcombine.high %v805_v18, %v813_v19  ;;  %v893_v13 = vld [vmem:[#allocation7 + $0xcc8] sm:$0xff]  ;;  %v888_v63 = vld [vmem:[#allocation7 + $0xca0] sm:$0xff] }
 0x24f   :  { %7428 = vmatprep.subr.bf16.mxu0 %v10390_v22  ;;  %v10486_v22 = vcombine.high %v808_v20, %v816_v50  ;;  %v896_v3 = vld [vmem:[#allocation7 + $0xce0] sm:$0xff] }
 0x251   :  { %6913 = vmatpush1.bf16.msra.mxu1 %v10383_v28  ;;  %v10479_v28 = vcombine.low %v805_v18, %v813_v19  ;;  %v901_v18 = vld [vmem:[#allocation7 + $0xd08] sm:$0xff] }
 0x252   :  { %7429 = vmatpush1.bf16.msra.mxu0 %v10389_v29  ;;  %6914 = vmatprep.subr.bf16.mxu1 %v10400_v31  ;;  %v10485_v29 = vcombine.low %v808_v20, %v816_v50  ;;  %v10496_v31 = vcombine.high %v821_v23, %v829_v24  ;;  %v909_v19 = vld [vmem:[#allocation7 + $0xd48] sm:$0xff]  ;;  %v904_v20 = vld [vmem:[#allocation7 + $0xd20] sm:$0xff] }
 0x253   :  { %7430 = vmatprep.subr.bf16.mxu0 %v10406_v37  ;;  %v10502_v37 = vcombine.high %v824_v26, %v832_v27  ;;  %v912_v50 = vld [vmem:[#allocation7 + $0xd60] sm:$0xff] }
 0x255   :  { %6915 = vmatpush1.bf16.msra.mxu1 %v10399_v57  ;;  %v10495_v57 = vcombine.low %v821_v23, %v829_v24  ;;  %v917_v23 = vld [vmem:[#allocation7 + $0xd88] sm:$0xff] }
 0x256   :  { %7431 = vmatpush1.bf16.msra.mxu0 %v10405_v58  ;;  %6927 = vmatprep.subr.bf16.mxu1 %v10416_v59  ;;  %v10501_v58 = vcombine.low %v824_v26, %v832_v27  ;;  %v10512_v59 = vcombine.high %v837_v41, %v845_v42  ;;  %v925_v24 = vld [vmem:[#allocation7 + $0xdc8] sm:$0xff]  ;;  %v920_v26 = vld [vmem:[#allocation7 + $0xda0] sm:$0xff] }
 0x257   :  { %7443 = vmatprep.subr.bf16.mxu0 %v10422_v60  ;;  %v10518_v60 = vcombine.high %v840_v49, %v848_v51  ;;  %v928_v27 = vld [vmem:[#allocation7 + $0xde0] sm:$0xff]  ;;  %v933_v41 = vld [vmem:[#allocation7 + $0xe08] sm:$0xff] }
 0x258   :  { %6917 = vmatmul.mubr.bf16.vlgmr.msra.gmra.mrb[12].mxu1 %v12339_v25  ;;  %v941_v42 = vld [vmem:[#allocation7 + $0xe48] sm:$0xff] }
 0x259   :  { %7433 = vmatmul.mubr.bf16.vlgmr.msra.gmra.mrb[12].mxu0 %v12339_v25  ;;  %6928 = vmatpush1.bf16.msra.mxu1 %v10415_v2  ;;  %v856_v2 = vld [vmem:[#allocation7 + $0xba0] sm:$0xff] }
 0x25a   :  { %6959 = vmatprep.mubr.bf16.mxu1 %v12363_v5  ;;  %7444 = vmatpush1.bf16.msra.mxu0 %v10421_v8  ;;  %v10517_v8 = vcombine.low %v840_v49, %v848_v51  ;;  %v10534_v10 = vcombine.high %v856_v2, %v864_v43  ;;  %v936_v49 = vld [vmem:[#allocation7 + $0xe20] sm:$0xff] }
 0x25b   :  { %7475 = vmatprep.mubr.bf16.mxu0 %v12363_v5  ;;  %6929 = vmatprep.subr.bf16.mxu1 %v10432_v9  ;;  %v10528_v9 = vcombine.high %v853_v61, %v861_v1  ;;  %v944_v51 = vld [vmem:[#allocation7 + $0xe60] sm:$0xff] }
 0x25c   :  { %7445 = vmatprep.subr.bf16.mxu0 %v10438_v35  ;;  %v877_v35 = vld [vmem:[#allocation7 + $0xc48] sm:$0xff] }
 0x25d   :  { %6930 = vmatpush1.bf16.msra.mxu1 %v10431_v38  ;;  %v10527_v38 = vcombine.low %v853_v61, %v861_v1  ;;  %v949_v61 = vld [vmem:[#allocation7 + $0xe88] sm:$0xff] }
 0x25e   :  { %7446 = vmatpush1.bf16.msra.mxu0 %v10437_v45  ;;  %6931 = vmatprep.subr.bf16.mxu1 %v10448_v40  ;;  %v10533_v45 = vcombine.low %v856_v2, %v864_v43  ;;  %v10544_v40 = vcombine.high %v869_v34, %v877_v35  ;;  %v957_v1 = vld [vmem:[#allocation7 + $0xec8] sm:$0xff]  ;;  %v952_v2 = vld [vmem:[#allocation7 + $0xea0] sm:$0xff] }
 0x25f   :  { %7447 = vmatprep.subr.bf16.mxu0 %v10454_v11  ;;  %v10550_v11 = vcombine.high %v872_v39, %v880_v36  ;;  %v960_v43 = vld [vmem:[#allocation7 + $0xee0] sm:$0xff] }
 0x261   :  { %6932 = vmatpush1.bf16.msra.mxu1 %v10447_v6  ;;  %v10543_v6 = vcombine.low %v869_v34, %v877_v35  ;;  %v965_v34 = vld [vmem:[#allocation7 + $0xf08] sm:$0xff] }
 0x262   :  { %7448 = vmatpush1.bf16.msra.mxu0 %v10453_v15  ;;  %6933 = vmatprep.subr.bf16.mxu1 %v10464_v16  ;;  %v10549_v15 = vcombine.low %v872_v39, %v880_v36  ;;  %v10560_v16 = vcombine.high %v885_v12, %v893_v13  ;;  %v973_v35 = vld [vmem:[#allocation7 + $0xf48] sm:$0xff]  ;;  %v968_v39 = vld [vmem:[#allocation7 + $0xf20] sm:$0xff] }
 0x263   :  { %7449 = vmatprep.subr.bf16.mxu0 %v10470_v17  ;;  %v10566_v17 = vcombine.high %v888_v63, %v896_v3  ;;  %v976_v36 = vld [vmem:[#allocation7 + $0xf60] sm:$0xff] }
 0x265   :  { %6934 = vmatpush1.bf16.msra.mxu1 %v10463_v62  ;;  %v10559_v62 = vcombine.low %v885_v12, %v893_v13  ;;  %v981_v12 = vld [vmem:[#allocation7 + $0xf88] sm:$0xff] }
 0x266   :  { %7450 = vmatpush1.bf16.msra.mxu0 %v10469_v0  ;;  %6935 = vmatprep.subr.bf16.mxu1 %v10480_v21  ;;  %v10565_v0 = vcombine.low %v888_v63, %v896_v3  ;;  %v10576_v21 = vcombine.high %v901_v18, %v909_v19  ;;  %v989_v13 = vld [vmem:[#allocation7 + $0xfc8] sm:$0xff]  ;;  %v984_v63 = vld [vmem:[#allocation7 + $0xfa0] sm:$0xff] }
 0x267   :  { %7451 = vmatprep.subr.bf16.mxu0 %v10486_v22  ;;  %v10582_v22 = vcombine.high %v904_v20, %v912_v50  ;;  %v992_v3 = vld [vmem:[#allocation7 + $0xfe0] sm:$0xff] }
 0x269   :  { %6936 = vmatpush1.bf16.msra.mxu1 %v10479_v28  ;;  %v10575_v28 = vcombine.low %v901_v18, %v909_v19  ;;  %v997_v18 = vld [vmem:[#allocation7 + $0x1008] sm:$0xff] }
 0x26a   :  { %7452 = vmatpush1.bf16.msra.mxu0 %v10485_v29  ;;  %6937 = vmatprep.subr.bf16.mxu1 %v10496_v31  ;;  %v10581_v29 = vcombine.low %v904_v20, %v912_v50  ;;  %v10592_v31 = vcombine.high %v917_v23, %v925_v24  ;;  %v1005_v19 = vld [vmem:[#allocation7 + $0x1048] sm:$0xff]  ;;  %v1000_v20 = vld [vmem:[#allocation7 + $0x1020] sm:$0xff] }
 0x26b   :  { %7453 = vmatprep.subr.bf16.mxu0 %v10502_v37  ;;  %v10598_v37 = vcombine.high %v920_v26, %v928_v27  ;;  %v1008_v50 = vld [vmem:[#allocation7 + $0x1060] sm:$0xff] }
 0x26d   :  { %6938 = vmatpush1.bf16.msra.mxu1 %v10495_v57  ;;  %v10591_v57 = vcombine.low %v917_v23, %v925_v24  ;;  %v1013_v23 = vld [vmem:[#allocation7 + $0x1088] sm:$0xff] }
 0x26e   :  { %7454 = vmatpush1.bf16.msra.mxu0 %v10501_v58  ;;  %6939 = vmatprep.subr.bf16.mxu1 %v10512_v59  ;;  %v10597_v58 = vcombine.low %v920_v26, %v928_v27  ;;  %v10608_v59 = vcombine.high %v933_v41, %v941_v42  ;;  %v1021_v24 = vld [vmem:[#allocation7 + $0x10c8] sm:$0xff]  ;;  %v10671_v26 = vcombine.low %v997_v18, %v1005_v19  ;;  %v1016_v27 = vld [vmem:[#allocation7 + $0x10a0] sm:$0xff] }
 0x26f   :  { %7455 = vmatprep.subr.bf16.mxu0 %v10518_v60  ;;  %v10614_v60 = vcombine.high %v936_v49, %v944_v51 }
 0x271   :  { %6940 = vmatpush1.bf16.msra.mxu1 %v10511_v7  ;;  %v10607_v7 = vcombine.low %v933_v41, %v941_v42  ;;  %v1037_v41 = vld [vmem:[#allocation7 + $0x1148] sm:$0xff] }
 0x272   :  { %7456 = vmatpush1.bf16.msra.mxu0 %v10517_v8  ;;  %6941 = vmatprep.subr.bf16.mxu1 %v10528_v9  ;;  %v10613_v8 = vcombine.low %v936_v49, %v944_v51  ;;  %v10624_v9 = vcombine.high %v949_v61, %v957_v1  ;;  %v1032_v49 = vld [vmem:[#allocation7 + $0x1120] sm:$0xff] }
 0x273   :  { %7457 = vmatprep.subr.bf16.mxu0 %v10534_v10  ;;  %v10630_v10 = vcombine.high %v952_v2, %v960_v43  ;;  %v1040_v51 = vld [vmem:[#allocation7 + $0x1160] sm:$0xff] }
 0x275   :  { %6942 = vmatpush1.bf16.msra.mxu1 %v10527_v38  ;;  %v10623_v38 = vcombine.low %v949_v61, %v957_v1  ;;  %v1045_v61 = vld [vmem:[#allocation7 + $0x1188] sm:$0xff] }
 0x276   :  { %7458 = vmatpush1.bf16.msra.mxu0 %v10533_v45  ;;  %6943 = vmatprep.subr.bf16.mxu1 %v10544_v40  ;;  %v10629_v45 = vcombine.low %v952_v2, %v960_v43  ;;  %v10640_v40 = vcombine.high %v965_v34, %v973_v35  ;;  %v1053_v1 = vld [vmem:[#allocation7 + $0x11c8] sm:$0xff]  ;;  %v1048_v2 = vld [vmem:[#allocation7 + $0x11a0] sm:$0xff] }
 0x277   :  { %7459 = vmatprep.subr.bf16.mxu0 %v10550_v11  ;;  %v10646_v11 = vcombine.high %v968_v39, %v976_v36  ;;  %v1056_v43 = vld [vmem:[#allocation7 + $0x11e0] sm:$0xff] }
 0x279   :  { %6944 = vmatpush1.bf16.msra.mxu1 %v10543_v6  ;;  %v10639_v6 = vcombine.low %v965_v34, %v973_v35  ;;  %v1061_v34 = vld [vmem:[#allocation7 + $0x1208] sm:$0xff] }
 0x27a   :  { %7460 = vmatpush1.bf16.msra.mxu0 %v10549_v15  ;;  %6945 = vmatprep.subr.bf16.mxu1 %v10560_v16  ;;  %v10645_v15 = vcombine.low %v968_v39, %v976_v36  ;;  %v10656_v16 = vcombine.high %v981_v12, %v989_v13  ;;  %v1069_v35 = vld [vmem:[#allocation7 + $0x1248] sm:$0xff]  ;;  %v1064_v39 = vld [vmem:[#allocation7 + $0x1220] sm:$0xff] }
 0x27b   :  { %7461 = vmatprep.subr.bf16.mxu0 %v10566_v17  ;;  %v10662_v17 = vcombine.high %v984_v63, %v992_v3  ;;  %v1072_v36 = vld [vmem:[#allocation7 + $0x1260] sm:$0xff] }
 0x27d   :  { %6946 = vmatpush1.bf16.msra.mxu1 %v10559_v62  ;;  %v10655_v62 = vcombine.low %v981_v12, %v989_v13  ;;  %v1077_v12 = vld [vmem:[#allocation7 + $0x1288] sm:$0xff] }
 0x27e   :  { %7462 = vmatpush1.bf16.msra.mxu0 %v10565_v0  ;;  %6947 = vmatprep.subr.bf16.mxu1 %v10576_v21  ;;  %v10661_v0 = vcombine.low %v984_v63, %v992_v3  ;;  %v10672_v21 = vcombine.high %v997_v18, %v1005_v19  ;;  %v1085_v13 = vld [vmem:[#allocation7 + $0x12c8] sm:$0xff]  ;;  %v1080_v63 = vld [vmem:[#allocation7 + $0x12a0] sm:$0xff] }
 0x27f   :  { %7463 = vmatprep.subr.bf16.mxu0 %v10582_v22  ;;  %v10678_v22 = vcombine.high %v1000_v20, %v1008_v50  ;;  %v1088_v3 = vld [vmem:[#allocation7 + $0x12e0] sm:$0xff]  ;;  %v1093_v18 = vld [vmem:[#allocation7 + $0x1308] sm:$0xff] }
 0x280   :  { %v1101_v19 = vld [vmem:[#allocation7 + $0x1348] sm:$0xff] }
 0x281   :  { %6948 = vmatpush1.bf16.msra.mxu1 %v10575_v28  ;;  %v1024_v28 = vld [vmem:[#allocation7 + $0x10e0] sm:$0xff] }
 0x282   :  { %7464 = vmatpush1.bf16.msra.mxu0 %v10581_v29  ;;  %6949 = vmatprep.subr.bf16.mxu1 %v10592_v31  ;;  %v10677_v29 = vcombine.low %v1000_v20, %v1008_v50  ;;  %v10688_v31 = vcombine.high %v1013_v23, %v1021_v24  ;;  %v10694_v42 = vcombine.high %v1016_v27, %v1024_v28  ;;  %v1096_v20 = vld [vmem:[#allocation7 + $0x1320] sm:$0xff] }
 0x283   :  { %7465 = vmatprep.subr.bf16.mxu0 %v10598_v37  ;;  %v1029_v37 = vld [vmem:[#allocation7 + $0x1108] sm:$0xff]  ;;  %v1104_v50 = vld [vmem:[#allocation7 + $0x1360] sm:$0xff] }
 0x285   :  { %6950 = vmatpush1.bf16.msra.mxu1 %v10591_v57  ;;  %v10687_v57 = vcombine.low %v1013_v23, %v1021_v24  ;;  %v1109_v23 = vld [vmem:[#allocation7 + $0x1388] sm:$0xff] }
 0x286   :  { %7466 = vmatpush1.bf16.msra.mxu0 %v10597_v58  ;;  %6951 = vmatprep.subr.bf16.mxu1 %v10608_v59  ;;  %v10693_v58 = vcombine.low %v1016_v27, %v1024_v28  ;;  %v10704_v59 = vcombine.high %v1029_v37, %v1037_v41  ;;  %v1117_v24 = vld [vmem:[#allocation7 + $0x13c8] sm:$0xff]  ;;  %v1120_v27 = vld [vmem:[#allocation7 + $0x13e0] sm:$0xff]  ;;  %v10767_v28 = vcombine.low %v1093_v18, %v1101_v19 }
 0x287   :  { %7467 = vmatprep.subr.bf16.mxu0 %v10614_v60  ;;  %v10710_v60 = vcombine.high %v1032_v49, %v1040_v51 }
 0x289   :  { %6952 = vmatpush1.bf16.msra.mxu1 %v10607_v7  ;;  %v10703_v7 = vcombine.low %v1029_v37, %v1037_v41  ;;  %v1125_v41 = vld [vmem:[#allocation7 + $0x1408] sm:$0xff] }
 0x28a   :  { %7468 = vmatpush1.bf16.msra.mxu0 %v10613_v8  ;;  %6953 = vmatprep.subr.bf16.mxu1 %v10624_v9  ;;  %v10709_v8 = vcombine.low %v1032_v49, %v1040_v51  ;;  %v10720_v9 = vcombine.high %v1045_v61, %v1053_v1  ;;  %v1128_v49 = vld [vmem:[#allocation7 + $0x1420] sm:$0xff] }
 0x28b   :  { %7469 = vmatprep.subr.bf16.mxu0 %v10630_v10  ;;  %v10726_v10 = vcombine.high %v1048_v2, %v1056_v43  ;;  %v1136_v51 = vld [vmem:[#allocation7 + $0x1460] sm:$0xff] }
 0x28d   :  { %6954 = vmatpush1.bf16.msra.mxu1 %v10623_v38  ;;  %v10719_v38 = vcombine.low %v1045_v61, %v1053_v1  ;;  %v1141_v61 = vld [vmem:[#allocation7 + $0x1488] sm:$0xff] }
 0x28e   :  { %7470 = vmatpush1.bf16.msra.mxu0 %v10629_v45  ;;  %6955 = vmatprep.subr.bf16.mxu1 %v10640_v40  ;;  %v10725_v45 = vcombine.low %v1048_v2, %v1056_v43  ;;  %v10736_v40 = vcombine.high %v1061_v34, %v1069_v35  ;;  %v1149_v1 = vld [vmem:[#allocation7 + $0x14c8] sm:$0xff]  ;;  %v1144_v2 = vld [vmem:[#allocation7 + $0x14a0] sm:$0xff] }
 0x28f   :  { %7471 = vmatprep.subr.bf16.mxu0 %v10646_v11  ;;  %v10742_v11 = vcombine.high %v1064_v39, %v1072_v36  ;;  %v1152_v43 = vld [vmem:[#allocation7 + $0x14e0] sm:$0xff] }
 0x291   :  { %6956 = vmatpush1.bf16.msra.mxu1 %v10639_v6  ;;  %v10735_v6 = vcombine.low %v1061_v34, %v1069_v35  ;;  %v1157_v34 = vld [vmem:[#allocation7 + $0x1508] sm:$0xff] }
 0x292   :  { %7472 = vmatpush1.bf16.msra.mxu0 %v10645_v15  ;;  %6957 = vmatprep.subr.bf16.mxu1 %v10656_v16  ;;  %v10741_v15 = vcombine.low %v1064_v39, %v1072_v36  ;;  %v10752_v16 = vcombine.high %v1077_v12, %v1085_v13  ;;  %v1165_v35 = vld [vmem:[#allocation7 + $0x1548] sm:$0xff]  ;;  %v1160_v39 = vld [vmem:[#allocation7 + $0x1520] sm:$0xff] }
 0x293   :  { %7473 = vmatprep.subr.bf16.mxu0 %v10662_v17  ;;  %v10758_v17 = vcombine.high %v1080_v63, %v1088_v3  ;;  %v1168_v36 = vld [vmem:[#allocation7 + $0x1560] sm:$0xff] }
 0x295   :  { %6958 = vmatpush1.bf16.msra.mxu1 %v10655_v62  ;;  %v10751_v62 = vcombine.low %v1077_v12, %v1085_v13  ;;  %v1173_v12 = vld [vmem:[#allocation7 + $0x1588] sm:$0xff] }
 0x296   :  { %7474 = vmatpush1.bf16.msra.mxu0 %v10661_v0  ;;  %6970 = vmatprep.subr.bf16.mxu1 %v10672_v21  ;;  %v10757_v0 = vcombine.low %v1080_v63, %v1088_v3  ;;  %v10768_v21 = vcombine.high %v1093_v18, %v1101_v19  ;;  %v1181_v13 = vld [vmem:[#allocation7 + $0x15c8] sm:$0xff]  ;;  %v1176_v63 = vld [vmem:[#allocation7 + $0x15a0] sm:$0xff] }
 0x297   :  { %7486 = vmatprep.subr.bf16.mxu0 %v10678_v22  ;;  %v10774_v22 = vcombine.high %v1096_v20, %v1104_v50  ;;  %v1184_v3 = vld [vmem:[#allocation7 + $0x15e0] sm:$0xff]  ;;  %v1189_v18 = vld [vmem:[#allocation7 + $0x1608] sm:$0xff] }
 0x298   :  { %6960 = vmatmul.mubr.bf16.vlgmr.msra.gmra.mrb[12].mxu1 %v12354_v4  ;;  %v1197_v19 = vld [vmem:[#allocation7 + $0x1648] sm:$0xff] }
 0x299   :  { %7476 = vmatmul.mubr.bf16.vlgmr.msra.gmra.mrb[12].mxu0 %v12354_v4  ;;  %6971 = vmatpush1.bf16.msra.mxu1 %v10671_v26  ;;  %v1112_v26 = vld [vmem:[#allocation7 + $0x13a0] sm:$0xff] }
 0x29a   :  { %7002 = vmatprep.mubr.bf16.mxu1 %v12384_v52  ;;  %7487 = vmatpush1.bf16.msra.mxu0 %v10677_v29  ;;  %v10773_v29 = vcombine.low %v1096_v20, %v1104_v50  ;;  %v10790_v37 = vcombine.high %v1112_v26, %v1120_v27  ;;  %v1192_v20 = vld [vmem:[#allocation7 + $0x1620] sm:$0xff] }
 0x29b   :  { %7518 = vmatprep.mubr.bf16.mxu0 %v12384_v52  ;;  %6972 = vmatprep.subr.bf16.mxu1 %v10688_v31  ;;  %v10784_v31 = vcombine.high %v1109_v23, %v1117_v24  ;;  %v1200_v50 = vld [vmem:[#allocation7 + $0x1660] sm:$0xff] }
 0x29c   :  { %7488 = vmatprep.subr.bf16.mxu0 %v10694_v42  ;;  %v1133_v42 = vld [vmem:[#allocation7 + $0x1448] sm:$0xff] }
 0x29d   :  { %6973 = vmatpush1.bf16.msra.mxu1 %v10687_v57  ;;  %v10783_v57 = vcombine.low %v1109_v23, %v1117_v24  ;;  %v1205_v23 = vld [vmem:[#allocation7 + $0x1688] sm:$0xff] }
 0x29e   :  { %7489 = vmatpush1.bf16.msra.mxu0 %v10693_v58  ;;  %6974 = vmatprep.subr.bf16.mxu1 %v10704_v59  ;;  %v10789_v58 = vcombine.low %v1112_v26, %v1120_v27  ;;  %v10800_v59 = vcombine.high %v1125_v41, %v1133_v42  ;;  %v1213_v24 = vld [vmem:[#allocation7 + $0x16c8] sm:$0xff]  ;;  %v1208_v26 = vld [vmem:[#allocation7 + $0x16a0] sm:$0xff] }
 0x29f   :  { %7490 = vmatprep.subr.bf16.mxu0 %v10710_v60  ;;  %v10806_v60 = vcombine.high %v1128_v49, %v1136_v51  ;;  %v1216_v27 = vld [vmem:[#allocation7 + $0x16e0] sm:$0xff] }
 0x2a1   :  { %6975 = vmatpush1.bf16.msra.mxu1 %v10703_v7  ;;  %v10799_v7 = vcombine.low %v1125_v41, %v1133_v42  ;;  %v1221_v41 = vld [vmem:[#allocation7 + $0x1708] sm:$0xff] }
 0x2a2   :  { %7491 = vmatpush1.bf16.msra.mxu0 %v10709_v8  ;;  %6976 = vmatprep.subr.bf16.mxu1 %v10720_v9  ;;  %v10805_v8 = vcombine.low %v1128_v49, %v1136_v51  ;;  %v10816_v9 = vcombine.high %v1141_v61, %v1149_v1  ;;  %v1229_v42 = vld [vmem:[#allocation7 + $0x1748] sm:$0xff]  ;;  %v1224_v49 = vld [vmem:[#allocation7 + $0x1720] sm:$0xff] }
 0x2a3   :  { %7492 = vmatprep.subr.bf16.mxu0 %v10726_v10  ;;  %v10822_v10 = vcombine.high %v1144_v2, %v1152_v43  ;;  %v1232_v51 = vld [vmem:[#allocation7 + $0x1760] sm:$0xff] }
 0x2a5   :  { %6977 = vmatpush1.bf16.msra.mxu1 %v10719_v38  ;;  %v10815_v38 = vcombine.low %v1141_v61, %v1149_v1  ;;  %v1237_v61 = vld [vmem:[#allocation7 + $0x1788] sm:$0xff] }
 0x2a6   :  { %7493 = vmatpush1.bf16.msra.mxu0 %v10725_v45  ;;  %6978 = vmatprep.subr.bf16.mxu1 %v10736_v40  ;;  %v10821_v45 = vcombine.low %v1144_v2, %v1152_v43  ;;  %v10832_v40 = vcombine.high %v1157_v34, %v1165_v35  ;;  %v1245_v1 = vld [vmem:[#allocation7 + $0x17c8] sm:$0xff]  ;;  %v1240_v2 = vld [vmem:[#allocation7 + $0x17a0] sm:$0xff] }
 0x2a7   :  { %7494 = vmatprep.subr.bf16.mxu0 %v10742_v11  ;;  %v10838_v11 = vcombine.high %v1160_v39, %v1168_v36  ;;  %v1248_v43 = vld [vmem:[#allocation7 + $0x17e0] sm:$0xff] }
 0x2a9   :  { %6979 = vmatpush1.bf16.msra.mxu1 %v10735_v6  ;;  %v10831_v6 = vcombine.low %v1157_v34, %v1165_v35  ;;  %v1253_v34 = vld [vmem:[#allocation7 + $0x1808] sm:$0xff] }
 0x2aa   :  { %7495 = vmatpush1.bf16.msra.mxu0 %v10741_v15  ;;  %6980 = vmatprep.subr.bf16.mxu1 %v10752_v16  ;;  %v10837_v15 = vcombine.low %v1160_v39, %v1168_v36  ;;  %v10848_v16 = vcombine.high %v1173_v12, %v1181_v13  ;;  %v1261_v35 = vld [vmem:[#allocation7 + $0x1848] sm:$0xff]  ;;  %v1256_v39 = vld [vmem:[#allocation7 + $0x1820] sm:$0xff] }
 0x2ab   :  { %7496 = vmatprep.subr.bf16.mxu0 %v10758_v17  ;;  %v10854_v17 = vcombine.high %v1176_v63, %v1184_v3  ;;  %v1264_v36 = vld [vmem:[#allocation7 + $0x1860] sm:$0xff] }
 0x2ad   :  { %6981 = vmatpush1.bf16.msra.mxu1 %v10751_v62  ;;  %v10847_v62 = vcombine.low %v1173_v12, %v1181_v13  ;;  %v1269_v12 = vld [vmem:[#allocation7 + $0x1888] sm:$0xff] }
 0x2ae   :  { %7497 = vmatpush1.bf16.msra.mxu0 %v10757_v0  ;;  %6982 = vmatprep.subr.bf16.mxu1 %v10768_v21  ;;  %v10853_v0 = vcombine.low %v1176_v63, %v1184_v3  ;;  %v10864_v21 = vcombine.high %v1189_v18, %v1197_v19  ;;  %v1277_v13 = vld [vmem:[#allocation7 + $0x18c8] sm:$0xff]  ;;  %v10927_v63 = vcombine.low %v1253_v34, %v1261_v35  ;;  %v1272_v3 = vld [vmem:[#allocation7 + $0x18a0] sm:$0xff] }
 0x2af   :  { %7498 = vmatprep.subr.bf16.mxu0 %v10774_v22  ;;  %v10870_v22 = vcombine.high %v1192_v20, %v1200_v50 }
 0x2b1   :  { %6983 = vmatpush1.bf16.msra.mxu1 %v10767_v28  ;;  %v10863_v28 = vcombine.low %v1189_v18, %v1197_v19  ;;  %v1293_v18 = vld [vmem:[#allocation7 + $0x1948] sm:$0xff] }
 0x2b2   :  { %7499 = vmatpush1.bf16.msra.mxu0 %v10773_v29  ;;  %6984 = vmatprep.subr.bf16.mxu1 %v10784_v31  ;;  %v10869_v29 = vcombine.low %v1192_v20, %v1200_v50  ;;  %v10880_v31 = vcombine.high %v1205_v23, %v1213_v24  ;;  %v1288_v20 = vld [vmem:[#allocation7 + $0x1920] sm:$0xff] }
 0x2b3   :  { %7500 = vmatprep.subr.bf16.mxu0 %v10790_v37  ;;  %v10886_v37 = vcombine.high %v1208_v26, %v1216_v27  ;;  %v1296_v50 = vld [vmem:[#allocation7 + $0x1960] sm:$0xff] }
 0x2b5   :  { %6985 = vmatpush1.bf16.msra.mxu1 %v10783_v57  ;;  %v10879_v57 = vcombine.low %v1205_v23, %v1213_v24  ;;  %v1301_v23 = vld [vmem:[#allocation7 + $0x1988] sm:$0xff] }
 0x2b6   :  { %7501 = vmatpush1.bf16.msra.mxu0 %v10789_v58  ;;  %6986 = vmatprep.subr.bf16.mxu1 %v10800_v59  ;;  %v10885_v58 = vcombine.low %v1208_v26, %v1216_v27  ;;  %v10896_v59 = vcombine.high %v1221_v41, %v1229_v42  ;;  %v1309_v24 = vld [vmem:[#allocation7 + $0x19c8] sm:$0xff]  ;;  %v1304_v26 = vld [vmem:[#allocation7 + $0x19a0] sm:$0xff] }
 0x2b7   :  { %7502 = vmatprep.subr.bf16.mxu0 %v10806_v60  ;;  %v10902_v60 = vcombine.high %v1224_v49, %v1232_v51  ;;  %v1312_v27 = vld [vmem:[#allocation7 + $0x19e0] sm:$0xff] }
 0x2b9   :  { %6987 = vmatpush1.bf16.msra.mxu1 %v10799_v7  ;;  %v10895_v7 = vcombine.low %v1221_v41, %v1229_v42  ;;  %v1317_v41 = vld [vmem:[#allocation7 + $0x1a08] sm:$0xff] }
 0x2ba   :  { %7503 = vmatpush1.bf16.msra.mxu0 %v10805_v8  ;;  %6988 = vmatprep.subr.bf16.mxu1 %v10816_v9  ;;  %v10901_v8 = vcombine.low %v1224_v49, %v1232_v51  ;;  %v10912_v9 = vcombine.high %v1237_v61, %v1245_v1  ;;  %v1325_v42 = vld [vmem:[#allocation7 + $0x1a48] sm:$0xff]  ;;  %v1320_v49 = vld [vmem:[#allocation7 + $0x1a20] sm:$0xff] }
 0x2bb   :  { %7504 = vmatprep.subr.bf16.mxu0 %v10822_v10  ;;  %v10918_v10 = vcombine.high %v1240_v2, %v1248_v43  ;;  %v1328_v51 = vld [vmem:[#allocation7 + $0x1a60] sm:$0xff] }
 0x2bd   :  { %6989 = vmatpush1.bf16.msra.mxu1 %v10815_v38  ;;  %v10911_v38 = vcombine.low %v1237_v61, %v1245_v1  ;;  %v1333_v61 = vld [vmem:[#allocation7 + $0x1a88] sm:$0xff] }
 0x2be   :  { %7505 = vmatpush1.bf16.msra.mxu0 %v10821_v45  ;;  %6990 = vmatprep.subr.bf16.mxu1 %v10832_v40  ;;  %v10917_v45 = vcombine.low %v1240_v2, %v1248_v43  ;;  %v10928_v40 = vcombine.high %v1253_v34, %v1261_v35  ;;  %v1341_v1 = vld [vmem:[#allocation7 + $0x1ac8] sm:$0xff]  ;;  %v1336_v2 = vld [vmem:[#allocation7 + $0x1aa0] sm:$0xff] }
 0x2bf   :  { %7506 = vmatprep.subr.bf16.mxu0 %v10838_v11  ;;  %v10934_v11 = vcombine.high %v1256_v39, %v1264_v36  ;;  %v1344_v43 = vld [vmem:[#allocation7 + $0x1ae0] sm:$0xff]  ;;  %v1349_v35 = vld [vmem:[#allocation7 + $0x1b08] sm:$0xff] }
 0x2c0   :  { %v11014_v34 = vcombine.high %v1336_v2, %v1344_v43 }
 0x2c1   :  { %6991 = vmatpush1.bf16.msra.mxu1 %v10831_v6  ;;  %v1280_v6 = vld [vmem:[#allocation7 + $0x18e0] sm:$0xff] }
 0x2c2   :  { %7507 = vmatpush1.bf16.msra.mxu0 %v10837_v15  ;;  %6992 = vmatprep.subr.bf16.mxu1 %v10848_v16  ;;  %v10933_v15 = vcombine.low %v1256_v39, %v1264_v36  ;;  %v10944_v16 = vcombine.high %v1269_v12, %v1277_v13  ;;  %v10950_v19 = vcombine.high %v1272_v3, %v1280_v6  ;;  %v1357_v39 = vld [vmem:[#allocation7 + $0x1b48] sm:$0xff] }
 0x2c3   :  { %7508 = vmatprep.subr.bf16.mxu0 %v10854_v17  ;;  %v1285_v17 = vld [vmem:[#allocation7 + $0x1908] sm:$0xff] }
 0x2c5   :  { %6993 = vmatpush1.bf16.msra.mxu1 %v10847_v62  ;;  %v10943_v62 = vcombine.low %v1269_v12, %v1277_v13  ;;  %v11007_v12 = vcombine.low %v1333_v61, %v1341_v1  ;;  %v12427_v13 = vld [vmem:[#allocation7 + $0x1b88] sm:$0xff] }
 0x2c6   :  { %7509 = vmatpush1.bf16.msra.mxu0 %v10853_v0  ;;  %6994 = vmatprep.subr.bf16.mxu1 %v10864_v21  ;;  %v10949_v0 = vcombine.low %v1272_v3, %v1280_v6  ;;  %v10960_v21 = vcombine.high %v1285_v17, %v1293_v18  ;;  %v11024_v3 = vcombine.high %v1349_v35, %v1357_v39  ;;  %v12429_v6 = vld [vmem:[#allocation7 + $0x1bc8] sm:$0xff] }
 0x2c7   :  { %7510 = vmatprep.subr.bf16.mxu0 %v10870_v22  ;;  %v10966_v22 = vcombine.high %v1288_v20, %v1296_v50 }
 0x2c9   :  { %6995 = vmatpush1.bf16.msra.mxu1 %v10863_v28  ;;  %v10959_v28 = vcombine.low %v1285_v17, %v1293_v18 }
 0x2ca   :  { %7511 = vmatpush1.bf16.msra.mxu0 %v10869_v29  ;;  %6996 = vmatprep.subr.bf16.mxu1 %v10880_v31  ;;  %v10965_v29 = vcombine.low %v1288_v20, %v1296_v50  ;;  %v10976_v31 = vcombine.high %v1301_v23, %v1309_v24  ;;  %v12436_v50 = vld [vmem:[#allocation7 + $0x1c08] sm:$0xff] }
 0x2cb   :  { %7512 = vmatprep.subr.bf16.mxu0 %v10886_v37  ;;  %v10982_v37 = vcombine.high %v1304_v26, %v1312_v27 }
 0x2cd   :  { %6997 = vmatpush1.bf16.msra.mxu1 %v10879_v57  ;;  %v10975_v57 = vcombine.low %v1301_v23, %v1309_v24  ;;  %v11023_v24 = vcombine.low %v1349_v35, %v1357_v39 }
 0x2ce   :  { %7513 = vmatpush1.bf16.msra.mxu0 %v10885_v58  ;;  %6998 = vmatprep.subr.bf16.mxu1 %v10896_v59  ;;  %v10981_v58 = vcombine.low %v1304_v26, %v1312_v27  ;;  %v10992_v59 = vcombine.high %v1317_v41, %v1325_v42  ;;  %v12440_v27 = vld [vmem:[#allocation7 + $0x1c20] sm:$0xff] }
 0x2cf   :  { %7514 = vmatprep.subr.bf16.mxu0 %v10902_v60  ;;  %v10998_v60 = vcombine.high %v1320_v49, %v1328_v51 }
 0x2d1   :  { %6999 = vmatpush1.bf16.msra.mxu1 %v10895_v7  ;;  %v10991_v7 = vcombine.low %v1317_v41, %v1325_v42  ;;  %v11039_v41 = vcombine.low %v12427_v13, %v12429_v6  ;;  %v11040_v42 = vcombine.high %v12427_v13, %v12429_v6  ;;  %v1405_v13 = vld [vmem:[#allocation7 + $0x1cc8] sm:$0xff]  ;;  %v1400_v6 = vld [vmem:[#allocation7 + $0x1ca0] sm:$0xff] }
 0x2d2   :  { %7515 = vmatpush1.bf16.msra.mxu0 %v10901_v8  ;;  %7000 = vmatprep.subr.bf16.mxu1 %v10912_v9  ;;  %v1508_v8 = vld [vmem:[#allocation8] sm:$0xff]  ;;  %v10997_v9 = vcombine.low %v1320_v49, %v1328_v51 }
 0x2d3   :  { %7516 = vmatprep.subr.bf16.mxu0 %v10918_v10  ;;  %v11008_v10 = vcombine.high %v1333_v61, %v1341_v1  ;;  %v1515_v36 = vrot.slane %v1508_v8, %v12290_v44 }
 0x2d5   :  { %7001 = vmatpush1.bf16.msra.mxu1 %v10911_v38  ;;  %v1531_v38 = vrot.slane %v1508_v8, %v12316_v55 }
 0x2d6   :  { %7517 = vmatpush1.bf16.msra.mxu0 %v10917_v45  ;;  %7013 = vmatprep.subr.bf16.mxu1 %v10928_v40  ;;  %v1352_v45 = vld [vmem:[#allocation7 + $0x1b20] sm:$0xff] }
 0x2d7   :  { %7529 = vmatprep.subr.bf16.mxu0 %v10934_v11  ;;  %v1360_v40 = vld [vmem:[#allocation7 + $0x1b60] sm:$0xff]  ;;  %v1519_v11 = vrot.slane %v1508_v8, %v12295_v46 }
 0x2d8   :  { %7003 = vmatmul.mubr.bf16.vlgmr.msra.gmra.mrb[12].mxu1 %v12382_v14  ;;  %v11030_v20 = vcombine.high %v1352_v45, %v1360_v40  ;;  %v11029_v26 = vcombine.low %v1352_v45, %v1360_v40 }
 0x2d9   :  { %7519 = vmatmul.mubr.bf16.vlgmr.msra.gmra.mrb[12].mxu0 %v12382_v14  ;;  %7014 = vmatpush1.bf16.msra.mxu1 %v10927_v63  ;;  %v11013_v63 = vcombine.low %v1336_v2, %v1344_v43 }
 0x2da   :  { %7045 = vmatprep.mubr.bf16.mxu1 %v12398_v54  ;;  %7530 = vmatpush1.bf16.msra.mxu0 %v10933_v15  ;;  %v12431_v15 = vld [vmem:[#allocation7 + $0x1ba0] sm:$0xff] }
 0x2db   :  { %7561 = vmatprep.mubr.bf16.mxu0 %v12398_v54  ;;  %7015 = vmatprep.subr.bf16.mxu1 %v10944_v16  ;;  %v12433_v16 = vld [vmem:[#allocation7 + $0x1be0] sm:$0xff] }
 0x2dc   :  { %7531 = vmatprep.subr.bf16.mxu0 %v10950_v19  ;;  %v1535_v19 = vrot.slane %v1508_v8, %v12319_v56  ;;  %v11045_v49 = vcombine.low %v12431_v15, %v12433_v16  ;;  %v11046_v51 = vcombine.high %v12431_v15, %v12433_v16  ;;  %v1408_v15 = vld [vmem:[#allocation7 + $0x1ce0] sm:$0xff] }
 0x2dd   :  { %7016 = vmatpush1.bf16.msra.mxu1 %v10943_v62  ;;  %v12438_v62 = vld [vmem:[#allocation7 + $0x1c48] sm:$0xff] }
 0x2de   :  { %7532 = vmatpush1.bf16.msra.mxu0 %v10949_v0  ;;  %7017 = vmatprep.subr.bf16.mxu1 %v10960_v21 }
 0x2df   :  { %7533 = vmatprep.subr.bf16.mxu0 %v10966_v22 }
 0x2e1   :  { %7018 = vmatpush1.bf16.msra.mxu1 %v10959_v28  ;;  %v12442_v28 = vld [vmem:[#allocation7 + $0x1c60] sm:$0xff] }
 0x2e2   :  { %7534 = vmatpush1.bf16.msra.mxu0 %v10965_v29  ;;  %7019 = vmatprep.subr.bf16.mxu1 %v10976_v31  ;;  %v11062_v1 = vcombine.high %v12440_v27, %v12442_v28 }
 0x2e3   :  { %7535 = vmatprep.subr.bf16.mxu0 %v10982_v37 }
 0x2e5   :  { %7020 = vmatpush1.bf16.msra.mxu1 %v10975_v57  ;;  %v11055_v57 = vcombine.low %v12436_v50, %v12438_v62 }
 0x2e6   :  { %7536 = vmatpush1.bf16.msra.mxu0 %v10981_v58  ;;  %7021 = vmatprep.subr.bf16.mxu1 %v10992_v59  ;;  %v11056_v58 = vcombine.high %v12436_v50, %v12438_v62  ;;  %v1413_v50 = vld [vmem:[#allocation7 + $0x1d08] sm:$0xff] }
 0x2e7   :  { %7537 = vmatprep.subr.bf16.mxu0 %v10998_v60  ;;  %v1421_v62 = vld [vmem:[#allocation7 + $0x1d48] sm:$0xff] }
 0x2e9   :  { %7022 = vmatpush1.bf16.msra.mxu1 %v10991_v7 }
 0x2ea   :  { %7538 = vmatpush1.bf16.msra.mxu0 %v10997_v9  ;;  %7023 = vmatprep.subr.bf16.mxu1 %v11008_v10 }
 0x2eb   :  { %v6875_v17 = vpop.f32.mrb[8].mxu1  ;;  %v7219_v18 = vpop.f32.mrb[8].mxu0  ;;  %7539 = vmatprep.subr.bf16.mxu0 %v11014_v34 }
 0x2ec   :  { %v11437_v0 = vadd.f32 %v6875_v17, %v1515_v36  ;;  %v11445_v21 = vadd.f32 %v7219_v18, %v1531_v38  ;;  %v6877_v22 = vpop.f32.mrb[9].mxu1  ;;  %v7221_v23 = vpop.f32.mrb[9].mxu0  ;;  %v11061_v18 = vcombine.low %v12440_v27, %v12442_v28 }
 0x2ed   :  { %v11438_v29 = vadd.f32 %v6877_v22, %v1519_v11  ;;  %v6879_v31 = vpop.f32.mrb[10].mxu1  ;;  %7024 = vmatpush1.bf16.msra.mxu1 %v11007_v12  ;;  %v7223_v37 = vpop.f32.mrb[10].mxu0  ;;  %v11446_v61 = vadd.f32 %v7221_v23, %v1535_v19  ;;  %v1397_v12 = vld [vmem:[#allocation7 + $0x1c88] sm:$0xff]  ;;  %v1416_v22 = vld [vmem:[#allocation7 + $0x1d20] sm:$0xff] }
 0x2ee   :  { %7540 = vmatpush1.bf16.msra.mxu0 %v11013_v63  ;;  %7025 = vmatprep.subr.bf16.mxu1 %v11024_v3  ;;  %v8120_v59 = vmul.f32 0.01, %v11437_v0  ;;  %v8124_v60 = vmul.f32 0.01, %v11445_v21  ;;  %vm8088_vm1 = vcmp.gt.f32.partialorder %v11437_v0, 0.0  ;;  %vm8092_vm2 = vcmp.gt.f32.partialorder %v11445_v21, 0.0 }
 0x2ef   :  { %7541 = vmatprep.subr.bf16.mxu0 %v11030_v20  ;;  %v11439_v2 = vadd.f32 %v6879_v31, %v1515_v36  ;;  %v11447_v43 = vadd.f32 %v7223_v37, %v1531_v38  ;;  %v6881_v7 = vpop.f32.mrb[11].mxu1  ;;  %v7225_v8 = vpop.f32.mrb[11].mxu0  ;;  %vm8089_vm3 = vcmp.gt.f32.partialorder %v11438_v29, 0.0  ;;  %v8121_v9 = vmul.f32 0.01, %v11438_v29  ;;  %v1424_v23 = vld [vmem:[#allocation7 + $0x1d60] sm:$0xff] }
 0x2f0   :  { %v11440_v10 = vadd.f32 %v6881_v7, %v1519_v11  ;;  %v11448_v34 = vadd.f32 %v7225_v8, %v1535_v19  ;;  %v12459_v45 = vsel %vm8088_vm1, %v11437_v0, %v8120_v59  ;;  %v12462_v40 = vsel %vm8092_vm2, %v11445_v21, %v8124_v60  ;;  %v1456_v7 = vld [vmem:[#allocation7 + $0x1e60] sm:$0xff] }
 0x2f1   :  { %7026 = vmatpush1.bf16.msra.mxu1 %v11023_v24  ;;  %vm8104_vm4 = vcmp.gt.f32.partialorder %v11439_v2, 0.0  ;;  %v8136_v35 = vmul.f32 0.01, %v11439_v2  ;;  %vm8108_vm5 = vcmp.gt.f32.partialorder %v11447_v43, 0.0  ;;  %v8140_v39 = vmul.f32 0.01, %v11447_v43 }
 0x2f2   :  { %7542 = vmatpush1.bf16.msra.mxu0 %v11029_v26  ;;  %7027 = vmatprep.subr.bf16.mxu1 %v11040_v42  ;;  %v8125_v36 = vmul.f32 0.01, %v11446_v61  ;;  %v8137_v38 = vmul.f32 0.01, %v11440_v10  ;;  %vm8105_vm6 = vcmp.gt.f32.partialorder %v11440_v10, 0.0  ;;  %vm8093_vm7 = vcmp.gt.f32.partialorder %v11446_v61, 0.0 }
 0x2f3   :  { %7543 = vmatprep.subr.bf16.mxu0 %v11046_v51  ;;  %v12464_v11 = vsel %vm8104_vm4, %v11439_v2, %v8136_v35  ;;  %v12466_v63 = vsel %vm8108_vm5, %v11447_v43, %v8140_v39  ;;  %v8141_v3 = vmul.f32 0.01, %v11448_v34  ;;  %vm8109_vm8 = vcmp.gt.f32.partialorder %v11448_v34, 0.0  ;;  %v1429_v42 = vld [vmem:[#allocation7 + $0x1d88] sm:$0xff]  ;;  %v1432_v51 = vld [vmem:[#allocation7 + $0x1da0] sm:$0xff] }
 0x2f4   :  { %v8184_v16 = vpack.c.bf16 %v12464_v11, %v12459_v45  ;;  %v8188_v17 = vpack.c.bf16 %v12466_v63, %v12462_v40  ;;  %v11072_v19 = vcombine.high %v1397_v12, %v1405_v13  ;;  %v11078_v20 = vcombine.high %v1400_v6, %v1408_v15  ;;  %v1453_v2 = vld [vmem:[#allocation7 + $0x1e48] sm:$0xff]  ;;  %v1448_v43 = vld [vmem:[#allocation7 + $0x1e20] sm:$0xff]  ;;  %v11665_v45 = vld [vmem:[#allocation10 + $0x120] ss:$8 sps:$4 sm:$0xff]  }
 0x2f5   :  { %7028 = vmatpush1.bf16.msra.mxu1 %v11039_v41  ;;  %v12475_v0 = vsel %vm8089_vm3, %v11438_v29, %v8121_v9  ;;  %v12478_v21 = vsel %vm8105_vm6, %v11440_v10, %v8137_v38  ;;  %v12483_v26 = vsel %vm8093_vm7, %v11446_v61, %v8125_v36  ;;  %v12486_v27 = vsel %vm8109_vm8, %v11448_v34, %v8141_v3  ;;  %v1461_v35 = vld [vmem:[#allocation7 + $0x1e88] sm:$0xff]  ;;  %v1464_v36 = vld [vmem:[#allocation7 + $0x1ea0] sm:$0xff] }
 0x2f6   :  { %7544 = vmatpush1.bf16.msra.mxu0 %v11045_v49  ;;  %7029 = vmatprep.subr.bf16.mxu1 %v11056_v58  ;;  %v8185_v24 = vpack.c.bf16 %v12478_v21, %v12475_v0  ;;  %v11071_v28 = vcombine.low %v1397_v12, %v1405_v13  ;;  %v8189_v29 = vpack.c.bf16 %v12486_v27, %v12483_v26  ;;  %v1437_v49 = vld [vmem:[#allocation7 + $0x1dc8] sm:$0xff]  ;;  %v1440_v58 = vld [vmem:[#allocation7 + $0x1de0] sm:$0xff] }
 0x2f7   :  { %7545 = vmatprep.subr.bf16.mxu0 %v11062_v1  ;;  %v11077_v31 = vcombine.low %v1400_v6, %v1408_v15  ;;  %v11088_v37 = vcombine.high %v1413_v50, %v1421_v62  ;;  %v11094_v41 = vcombine.high %v1416_v22, %v1424_v23  ;;  %v11087_v59 = vcombine.low %v1413_v50, %v1421_v62  ;;  %v1445_v1 = vld [vmem:[#allocation7 + $0x1e08] sm:$0xff]  ;;  %v1472_v38 = vld [vmem:[#allocation7 + $0x1ee0] sm:$0xff] }
 0x2f8   :  { %v11093_v60 = vcombine.low %v1416_v22, %v1424_v23  ;;  %v11110_v61 = vcombine.high %v1432_v51, %v1440_v58  ;;  %v11103_v8 = vcombine.low %v1429_v42, %v1437_v49  ;;  %v11109_v9 = vcombine.low %v1432_v51, %v1440_v58  ;;  %v1469_v39 = vld [vmem:[#allocation7 + $0x1ec8] sm:$0xff] }
 0x2f9   :  { %7030 = vmatpush1.bf16.msra.mxu1 %v11055_v57  ;;  %v11104_v57 = vcombine.high %v1429_v42, %v1437_v49  ;;  %v11120_v10 = vcombine.high %v1445_v1, %v1453_v2  ;;  %v11126_v34 = vcombine.high %v1448_v43, %v1456_v7  ;;  %v11119_v12 = vcombine.low %v1445_v1, %v1453_v2  ;;  %v1477_v15 = vld [vmem:[#allocation7 + $0x1f08] sm:$0xff] }
 0x2fa   :  { %7546 = vmatpush1.bf16.msra.mxu0 %v11061_v18  ;;  %7031 = vmatprep.subr.bf16.mxu1 %v11072_v19  ;;  %v11125_v13 = vcombine.low %v1448_v43, %v1456_v7  ;;  %v11136_v3 = vcombine.high %v1461_v35, %v1469_v39  ;;  %v11142_v6 = vcombine.high %v1464_v36, %v1472_v38  ;;  %v1485_v18 = vld [vmem:[#allocation7 + $0x1f48] sm:$0xff]  ;;  %v1480_v19 = vld [vmem:[#allocation7 + $0x1f20] sm:$0xff] }
 0x2fb   :  { %7547 = vmatprep.subr.bf16.mxu0 %v11078_v20  ;;  %v1488_v20 = vld [vmem:[#allocation7 + $0x1f60] sm:$0xff]  ;;  %v11135_v50 = vcombine.low %v1461_v35, %v1469_v39  ;;  %v11141_v62 = vcombine.low %v1464_v36, %v1472_v38  ;;  %v11152_v22 = vcombine.high %v1477_v15, %v1485_v18  ;;  %v11151_v42 = vcombine.low %v1477_v15, %v1485_v18  ;;  %v514_v35 = vld [vmem:[#allocation7 + $0xf0] sm:$0xff]  ;;  %v519_v38 = vld [vmem:[#allocation7 + $0x118] sm:$0xff] }
 0x2fc   :  { %v11158_v23 = vcombine.high %v1480_v19, %v1488_v20  ;;  %v11157_v49 = vcombine.low %v1480_v19, %v1488_v20  ;;  %v11620_v0 = vld [vmem:[#allocation10 + $0x30] ss:$8 sps:$4 sm:$0xff]   ;;  %v11766_v40 = vld [vmem:[#allocation10 + $0x334] ss:$8 sps:$4 sm:$0xff]  }
 0x2fd   :  { %7032 = vmatpush1.bf16.msra.mxu1 %v11071_v28  ;;  %v1493_v28 = vld [vmem:[#allocation7 + $0x1f88] sm:$0xff] }
 0x2fe   :  { %7548 = vmatpush1.bf16.msra.mxu0 %v11077_v31  ;;  %7033 = vmatprep.subr.bf16.mxu1 %v11088_v37  ;;  %v1501_v31 = vld [vmem:[#allocation7 + $0x1fc8] sm:$0xff]  ;;  %v1496_v37 = vld [vmem:[#allocation7 + $0x1fa0] sm:$0xff] }
 0x2ff   :  { %7549 = vmatprep.subr.bf16.mxu0 %v11094_v41  ;;  %v1504_v41 = vld [vmem:[#allocation7 + $0x1fe0] sm:$0xff]  ;;  %v11168_v51 = vcombine.high %v1493_v28, %v1501_v31  ;;  %v11167_v1 = vcombine.low %v1493_v28, %v1501_v31  ;;  %v1321_v63 = vld [vmem:[#allocation7 + $0x1a28] sm:$0xff] }
 0x300   :  { %v11174_v58 = vcombine.high %v1496_v37, %v1504_v41  ;;  %v11173_v2 = vcombine.low %v1496_v37, %v1504_v41  ;;  %v11716_v26 = vld [vmem:[#allocation10 + $0x230] ss:$8 sps:$4 sm:$0xff]  }
 0x301   :  { %7034 = vmatpush1.bf16.msra.mxu1 %v11087_v59  ;;  %v487_v59 = vld [vmem:[#allocation7 + $0x18] sm:$0xff] }
 0x302   :  { %7550 = vmatpush1.bf16.msra.mxu0 %v11093_v60  ;;  %7035 = vmatprep.subr.bf16.mxu1 %v11104_v57  ;;  %v495_v60 = vld [vmem:[#allocation7 + $0x58] sm:$0xff]  ;;  %v490_v57 = vld [vmem:[#allocation7 + $0x30] sm:$0xff] }
 0x303   :  { %7551 = vmatprep.subr.bf16.mxu0 %v11110_v61  ;;  %v498_v61 = vld [vmem:[#allocation7 + $0x70] sm:$0xff]  ;;  %v10164_v43 = vcombine.high %v487_v59, %v495_v60 }
 0x304   :  { %v10170_v7 = vcombine.high %v490_v57, %v498_v61  ;;  %v10169_v39 = vcombine.low %v490_v57, %v498_v61 }
 0x305   :  { %7036 = vmatpush1.bf16.msra.mxu1 %v11103_v8  ;;  %v503_v8 = vld [vmem:[#allocation7 + $0x98] sm:$0xff] }
 0x306   :  { %7552 = vmatpush1.bf16.msra.mxu0 %v11109_v9  ;;  %7037 = vmatprep.subr.bf16.mxu1 %v11120_v10  ;;  %v511_v9 = vld [vmem:[#allocation7 + $0xd8] sm:$0xff]  ;;  %v10163_v10 = vcombine.low %v487_v59, %v495_v60 }
 0x307   :  { %7553 = vmatprep.subr.bf16.mxu0 %v11126_v34  ;;  %v506_v34 = vld [vmem:[#allocation7 + $0xb0] sm:$0xff]  ;;  %v10180_v36 = vcombine.high %v503_v8, %v511_v9  ;;  %v10179_v15 = vcombine.low %v503_v8, %v511_v9 }
 0x308   :  { %v10185_v18 = vcombine.low %v506_v34, %v514_v35 }
 0x309   :  { %7038 = vmatpush1.bf16.msra.mxu1 %v11119_v12  ;;  %v527_v12 = vld [vmem:[#allocation7 + $0x158] sm:$0xff] }
 0x30a   :  { %7554 = vmatpush1.bf16.msra.mxu0 %v11125_v13  ;;  %7039 = vmatprep.subr.bf16.mxu1 %v11136_v3  ;;  %v10186_v13 = vcombine.high %v506_v34, %v514_v35  ;;  %v522_v3 = vld [vmem:[#allocation7 + $0x130] sm:$0xff]  ;;  %v10196_v19 = vcombine.high %v519_v38, %v527_v12  ;;  %v10195_v28 = vcombine.low %v519_v38, %v527_v12  ;;  %v583_v35 = vld [vmem:[#allocation7 + $0x318] sm:$0xff] }
 0x30b   :  { %7555 = vmatprep.subr.bf16.mxu0 %v11142_v6  ;;  %v530_v6 = vld [vmem:[#allocation7 + $0x170] sm:$0xff] }
 0x30c   :  { %v10202_v20 = vcombine.high %v522_v3, %v530_v6  ;;  %v10201_v31 = vcombine.low %v522_v3, %v530_v6  ;;  %v594_v38 = vld [vmem:[#allocation7 + $0x370] sm:$0xff] }
 0x30d   :  { %7040 = vmatpush1.bf16.msra.mxu1 %v11135_v50  ;;  %v535_v50 = vld [vmem:[#allocation7 + $0x198] sm:$0xff] }
 0x30e   :  { %7556 = vmatpush1.bf16.msra.mxu0 %v11141_v62  ;;  %7041 = vmatprep.subr.bf16.mxu1 %v11152_v22  ;;  %v543_v62 = vld [vmem:[#allocation7 + $0x1d8] sm:$0xff]  ;;  %v538_v22 = vld [vmem:[#allocation7 + $0x1b0] sm:$0xff] }
 0x30f   :  { %7557 = vmatprep.subr.bf16.mxu0 %v11158_v23  ;;  %v546_v23 = vld [vmem:[#allocation7 + $0x1f0] sm:$0xff]  ;;  %v10212_v37 = vcombine.high %v535_v50, %v543_v62  ;;  %v10211_v59 = vcombine.low %v535_v50, %v543_v62 }
 0x310   :  { %v10218_v41 = vcombine.high %v538_v22, %v546_v23  ;;  %v10217_v60 = vcombine.low %v538_v22, %v546_v23 }
 0x311   :  { %7042 = vmatpush1.bf16.msra.mxu1 %v11151_v42  ;;  %v551_v42 = vld [vmem:[#allocation7 + $0x218] sm:$0xff] }
 0x312   :  { %7558 = vmatpush1.bf16.msra.mxu0 %v11157_v49  ;;  %7043 = vmatprep.subr.bf16.mxu1 %v11168_v51  ;;  %v559_v49 = vld [vmem:[#allocation7 + $0x258] sm:$0xff]  ;;  %v554_v51 = vld [vmem:[#allocation7 + $0x230] sm:$0xff] }
 0x313   :  { %7559 = vmatprep.subr.bf16.mxu0 %v11174_v58  ;;  %v562_v58 = vld [vmem:[#allocation7 + $0x270] sm:$0xff]  ;;  %v10228_v57 = vcombine.high %v551_v42, %v559_v49  ;;  %v10227_v8 = vcombine.low %v551_v42, %v559_v49 }
 0x314   :  { %v10234_v61 = vcombine.high %v554_v51, %v562_v58  ;;  %v10233_v9 = vcombine.low %v554_v51, %v562_v58 }
 0x315   :  { %7044 = vmatpush1.bf16.msra.mxu1 %v11167_v1  ;;  %v567_v1 = vld [vmem:[#allocation7 + $0x298] sm:$0xff] }
 0x316   :  { %7560 = vmatpush1.bf16.msra.mxu0 %v11173_v2  ;;  %7228 = vmatprep.subr.bf16.mxu1 %v10164_v43  ;;  %v575_v2 = vld [vmem:[#allocation7 + $0x2d8] sm:$0xff]  ;;  %v570_v43 = vld [vmem:[#allocation7 + $0x2b0] sm:$0xff] }
 0x317   :  { %7744 = vmatprep.subr.bf16.mxu0 %v10170_v7  ;;  %v578_v7 = vld [vmem:[#allocation7 + $0x2f0] sm:$0xff]  ;;  %v10243_v12 = vcombine.low %v567_v1, %v575_v2 }
 0x318   :  { %7046 = vmatmul.mubr.bf16.vlgmr.msra.gmra.mrb[12].mxu1 %v12396_v53  ;;  %v10250_v34 = vcombine.high %v570_v43, %v578_v7 }
 0x319   :  { %7562 = vmatmul.mubr.bf16.vlgmr.msra.gmra.mrb[12].mxu0 %v12396_v53  ;;  %7229 = vmatpush1.bf16.msra.mxu1 %v10163_v10  ;;  %v10244_v10 = vcombine.high %v567_v1, %v575_v2 }
 0x31a   :  { %7260 = vmatprep.mubr.bf16.mxu1 %v12345_v32  ;;  %7745 = vmatpush1.bf16.msra.mxu0 %v10169_v39  ;;  %v591_v39 = vld [vmem:[#allocation7 + $0x358] sm:$0xff] }
 0x31b   :  { %7776 = vmatprep.mubr.bf16.mxu0 %v12345_v32  ;;  %7230 = vmatprep.subr.bf16.mxu1 %v10180_v36  ;;  %v586_v36 = vld [vmem:[#allocation7 + $0x330] sm:$0xff]  ;;  %v10260_v3 = vcombine.high %v583_v35, %v591_v39  ;;  %v10259_v50 = vcombine.low %v583_v35, %v591_v39 }
 0x31c   :  { %7746 = vmatprep.subr.bf16.mxu0 %v10186_v13  ;;  %v10249_v13 = vcombine.low %v570_v43, %v578_v7  ;;  %v10266_v6 = vcombine.high %v586_v36, %v594_v38  ;;  %v10265_v62 = vcombine.low %v586_v36, %v594_v38 }
 0x31d   :  { %7231 = vmatpush1.bf16.msra.mxu1 %v10179_v15  ;;  %v599_v15 = vld [vmem:[#allocation7 + $0x398] sm:$0xff] }
 0x31e   :  { %7747 = vmatpush1.bf16.msra.mxu0 %v10185_v18  ;;  %7232 = vmatprep.subr.bf16.mxu1 %v10196_v19  ;;  %v607_v18 = vld [vmem:[#allocation7 + $0x3d8] sm:$0xff]  ;;  %v602_v19 = vld [vmem:[#allocation7 + $0x3b0] sm:$0xff] }
 0x31f   :  { %7748 = vmatprep.subr.bf16.mxu0 %v10202_v20  ;;  %v610_v20 = vld [vmem:[#allocation7 + $0x3f0] sm:$0xff]  ;;  %v10276_v22 = vcombine.high %v599_v15, %v607_v18  ;;  %v10275_v42 = vcombine.low %v599_v15, %v607_v18 }
 0x320   :  { %v10282_v23 = vcombine.high %v602_v19, %v610_v20  ;;  %v10281_v49 = vcombine.low %v602_v19, %v610_v20 }
 0x321   :  { %7233 = vmatpush1.bf16.msra.mxu1 %v10195_v28  ;;  %v615_v28 = vld [vmem:[#allocation7 + $0x418] sm:$0xff] }
 0x322   :  { %7749 = vmatpush1.bf16.msra.mxu0 %v10201_v31  ;;  %7234 = vmatprep.subr.bf16.mxu1 %v10212_v37  ;;  %v623_v31 = vld [vmem:[#allocation7 + $0x458] sm:$0xff]  ;;  %v618_v37 = vld [vmem:[#allocation7 + $0x430] sm:$0xff] }
 0x323   :  { %7750 = vmatprep.subr.bf16.mxu0 %v10218_v41  ;;  %v626_v41 = vld [vmem:[#allocation7 + $0x470] sm:$0xff]  ;;  %v10292_v51 = vcombine.high %v615_v28, %v623_v31  ;;  %v10291_v1 = vcombine.low %v615_v28, %v623_v31 }
 0x324   :  { %v10298_v58 = vcombine.high %v618_v37, %v626_v41  ;;  %v10297_v2 = vcombine.low %v618_v37, %v626_v41 }
 0x325   :  { %7235 = vmatpush1.bf16.msra.mxu1 %v10211_v59  ;;  %v631_v59 = vld [vmem:[#allocation7 + $0x498] sm:$0xff] }
 0x326   :  { %7751 = vmatpush1.bf16.msra.mxu0 %v10217_v60  ;;  %7236 = vmatprep.subr.bf16.mxu1 %v10228_v57  ;;  %v639_v60 = vld [vmem:[#allocation7 + $0x4d8] sm:$0xff]  ;;  %v634_v57 = vld [vmem:[#allocation7 + $0x4b0] sm:$0xff] }
 0x327   :  { %7752 = vmatprep.subr.bf16.mxu0 %v10234_v61  ;;  %v642_v61 = vld [vmem:[#allocation7 + $0x4f0] sm:$0xff]  ;;  %v10308_v43 = vcombine.high %v631_v59, %v639_v60  ;;  %v10307_v35 = vcombine.low %v631_v59, %v639_v60 }
 0x328   :  { %v10314_v7 = vcombine.high %v634_v57, %v642_v61  ;;  %v10313_v39 = vcombine.low %v634_v57, %v642_v61 }
 0x329   :  { %7237 = vmatpush1.bf16.msra.mxu1 %v10227_v8  ;;  %v647_v8 = vld [vmem:[#allocation7 + $0x518] sm:$0xff] }
 0x32a   :  { %7753 = vmatpush1.bf16.msra.mxu0 %v10233_v9  ;;  %7238 = vmatprep.subr.bf16.mxu1 %v10244_v10  ;;  %v655_v9 = vld [vmem:[#allocation7 + $0x558] sm:$0xff]  ;;  %v650_v10 = vld [vmem:[#allocation7 + $0x530] sm:$0xff] }
 0x32b   :  { %7754 = vmatprep.subr.bf16.mxu0 %v10250_v34  ;;  %v658_v34 = vld [vmem:[#allocation7 + $0x570] sm:$0xff]  ;;  %v10324_v36 = vcombine.high %v647_v8, %v655_v9  ;;  %v10323_v15 = vcombine.low %v647_v8, %v655_v9 }
 0x32c   :  { %v10330_v38 = vcombine.high %v650_v10, %v658_v34  ;;  %v10329_v18 = vcombine.low %v650_v10, %v658_v34 }
 0x32d   :  { %7239 = vmatpush1.bf16.msra.mxu1 %v10243_v12  ;;  %v663_v12 = vld [vmem:[#allocation7 + $0x598] sm:$0xff] }
 0x32e   :  { %7755 = vmatpush1.bf16.msra.mxu0 %v10249_v13  ;;  %7240 = vmatprep.subr.bf16.mxu1 %v10260_v3  ;;  %v671_v13 = vld [vmem:[#allocation7 + $0x5d8] sm:$0xff]  ;;  %v666_v3 = vld [vmem:[#allocation7 + $0x5b0] sm:$0xff] }
 0x32f   :  { %7756 = vmatprep.subr.bf16.mxu0 %v10266_v6  ;;  %v674_v6 = vld [vmem:[#allocation7 + $0x5f0] sm:$0xff]  ;;  %v10340_v19 = vcombine.high %v663_v12, %v671_v13  ;;  %v10339_v28 = vcombine.low %v663_v12, %v671_v13 }
 0x330   :  { %v10346_v20 = vcombine.high %v666_v3, %v674_v6  ;;  %v10345_v31 = vcombine.low %v666_v3, %v674_v6 }
 0x331   :  { %7241 = vmatpush1.bf16.msra.mxu1 %v10259_v50  ;;  %v679_v50 = vld [vmem:[#allocation7 + $0x618] sm:$0xff] }
 0x332   :  { %7757 = vmatpush1.bf16.msra.mxu0 %v10265_v62  ;;  %7242 = vmatprep.subr.bf16.mxu1 %v10276_v22  ;;  %v687_v62 = vld [vmem:[#allocation7 + $0x658] sm:$0xff]  ;;  %v682_v22 = vld [vmem:[#allocation7 + $0x630] sm:$0xff] }
 0x333   :  { %7758 = vmatprep.subr.bf16.mxu0 %v10282_v23  ;;  %v690_v23 = vld [vmem:[#allocation7 + $0x670] sm:$0xff]  ;;  %v10356_v37 = vcombine.high %v679_v50, %v687_v62  ;;  %v10355_v59 = vcombine.low %v679_v50, %v687_v62 }
 0x334   :  { %v10362_v41 = vcombine.high %v682_v22, %v690_v23  ;;  %v10361_v60 = vcombine.low %v682_v22, %v690_v23 }
 0x335   :  { %7243 = vmatpush1.bf16.msra.mxu1 %v10275_v42  ;;  %v695_v42 = vld [vmem:[#allocation7 + $0x698] sm:$0xff] }
 0x336   :  { %7759 = vmatpush1.bf16.msra.mxu0 %v10281_v49  ;;  %7244 = vmatprep.subr.bf16.mxu1 %v10292_v51  ;;  %v703_v49 = vld [vmem:[#allocation7 + $0x6d8] sm:$0xff]  ;;  %v698_v51 = vld [vmem:[#allocation7 + $0x6b0] sm:$0xff] }
 0x337   :  { %7760 = vmatprep.subr.bf16.mxu0 %v10298_v58  ;;  %v706_v58 = vld [vmem:[#allocation7 + $0x6f0] sm:$0xff]  ;;  %v10372_v57 = vcombine.high %v695_v42, %v703_v49  ;;  %v10371_v8 = vcombine.low %v695_v42, %v703_v49 }
 0x338   :  { %v10378_v61 = vcombine.high %v698_v51, %v706_v58  ;;  %v10377_v9 = vcombine.low %v698_v51, %v706_v58  ;;  %v770_v42 = vld [vmem:[#allocation7 + $0x8f0] sm:$0xff]  ;;  %v775_v58 = vld [vmem:[#allocation7 + $0x918] sm:$0xff] }
 0x339   :  { %7245 = vmatpush1.bf16.msra.mxu1 %v10291_v1  ;;  %v711_v1 = vld [vmem:[#allocation7 + $0x718] sm:$0xff] }
 0x33a   :  { %7761 = vmatpush1.bf16.msra.mxu0 %v10297_v2  ;;  %7246 = vmatprep.subr.bf16.mxu1 %v10308_v43  ;;  %v719_v2 = vld [vmem:[#allocation7 + $0x758] sm:$0xff]  ;;  %v714_v43 = vld [vmem:[#allocation7 + $0x730] sm:$0xff] }
 0x33b   :  { %7762 = vmatprep.subr.bf16.mxu0 %v10314_v7  ;;  %v722_v7 = vld [vmem:[#allocation7 + $0x770] sm:$0xff]  ;;  %v10388_v10 = vcombine.high %v711_v1, %v719_v2  ;;  %v10387_v12 = vcombine.low %v711_v1, %v719_v2 }
 0x33c   :  { %v10394_v34 = vcombine.high %v714_v43, %v722_v7  ;;  %v10393_v13 = vcombine.low %v714_v43, %v722_v7 }
 0x33d   :  { %7247 = vmatpush1.bf16.msra.mxu1 %v10307_v35  ;;  %v727_v35 = vld [vmem:[#allocation7 + $0x798] sm:$0xff] }
 0x33e   :  { %7763 = vmatpush1.bf16.msra.mxu0 %v10313_v39  ;;  %7248 = vmatprep.subr.bf16.mxu1 %v10324_v36  ;;  %v735_v39 = vld [vmem:[#allocation7 + $0x7d8] sm:$0xff]  ;;  %v730_v36 = vld [vmem:[#allocation7 + $0x7b0] sm:$0xff] }
 0x33f   :  { %7764 = vmatprep.subr.bf16.mxu0 %v10330_v38  ;;  %v738_v38 = vld [vmem:[#allocation7 + $0x7f0] sm:$0xff]  ;;  %v10404_v3 = vcombine.high %v727_v35, %v735_v39  ;;  %v10403_v50 = vcombine.low %v727_v35, %v735_v39 }
 0x340   :  { %v10410_v6 = vcombine.high %v730_v36, %v738_v38  ;;  %v10409_v62 = vcombine.low %v730_v36, %v738_v38 }
 0x341   :  { %7249 = vmatpush1.bf16.msra.mxu1 %v10323_v15  ;;  %v743_v15 = vld [vmem:[#allocation7 + $0x818] sm:$0xff] }
 0x342   :  { %7765 = vmatpush1.bf16.msra.mxu0 %v10329_v18  ;;  %7250 = vmatprep.subr.bf16.mxu1 %v10340_v19  ;;  %v751_v18 = vld [vmem:[#allocation7 + $0x858] sm:$0xff]  ;;  %v746_v19 = vld [vmem:[#allocation7 + $0x830] sm:$0xff] }
 0x343   :  { %7766 = vmatprep.subr.bf16.mxu0 %v10346_v20  ;;  %v754_v20 = vld [vmem:[#allocation7 + $0x870] sm:$0xff]  ;;  %v10420_v22 = vcombine.high %v743_v15, %v751_v18 }
 0x344   :  { %v10426_v23 = vcombine.high %v746_v19, %v754_v20  ;;  %v10425_v49 = vcombine.low %v746_v19, %v754_v20 }
 0x345   :  { %7251 = vmatpush1.bf16.msra.mxu1 %v10339_v28  ;;  %v759_v28 = vld [vmem:[#allocation7 + $0x898] sm:$0xff] }
 0x346   :  { %7767 = vmatpush1.bf16.msra.mxu0 %v10345_v31  ;;  %7252 = vmatprep.subr.bf16.mxu1 %v10356_v37  ;;  %v767_v31 = vld [vmem:[#allocation7 + $0x8d8] sm:$0xff]  ;;  %v10419_v37 = vcombine.low %v743_v15, %v751_v18 }
 0x347   :  { %7768 = vmatprep.subr.bf16.mxu0 %v10362_v41  ;;  %v762_v41 = vld [vmem:[#allocation7 + $0x8b0] sm:$0xff]  ;;  %v10436_v51 = vcombine.high %v759_v28, %v767_v31  ;;  %v10435_v1 = vcombine.low %v759_v28, %v767_v31 }
 0x348   :  { %v10441_v2 = vcombine.low %v762_v41, %v770_v42 }
 0x349   :  { %7253 = vmatpush1.bf16.msra.mxu1 %v10355_v59  ;;  %v783_v59 = vld [vmem:[#allocation7 + $0x958] sm:$0xff] }
 0x34a   :  { %7769 = vmatpush1.bf16.msra.mxu0 %v10361_v60  ;;  %7254 = vmatprep.subr.bf16.mxu1 %v10372_v57  ;;  %v10442_v60 = vcombine.high %v762_v41, %v770_v42  ;;  %v778_v57 = vld [vmem:[#allocation7 + $0x930] sm:$0xff]  ;;  %v10452_v43 = vcombine.high %v775_v58, %v783_v59  ;;  %v10451_v35 = vcombine.low %v775_v58, %v783_v59  ;;  %v839_v42 = vld [vmem:[#allocation7 + $0xb18] sm:$0xff] }
 0x34b   :  { %7770 = vmatprep.subr.bf16.mxu0 %v10378_v61  ;;  %v786_v61 = vld [vmem:[#allocation7 + $0x970] sm:$0xff] }
 0x34c   :  { %v10458_v7 = vcombine.high %v778_v57, %v786_v61  ;;  %v10457_v39 = vcombine.low %v778_v57, %v786_v61  ;;  %v850_v58 = vld [vmem:[#allocation7 + $0xb70] sm:$0xff] }
 0x34d   :  { %7255 = vmatpush1.bf16.msra.mxu1 %v10371_v8  ;;  %v791_v8 = vld [vmem:[#allocation7 + $0x998] sm:$0xff] }
 0x34e   :  { %7771 = vmatpush1.bf16.msra.mxu0 %v10377_v9  ;;  %7256 = vmatprep.subr.bf16.mxu1 %v10388_v10  ;;  %v799_v9 = vld [vmem:[#allocation7 + $0x9d8] sm:$0xff]  ;;  %v794_v10 = vld [vmem:[#allocation7 + $0x9b0] sm:$0xff] }
 0x34f   :  { %7772 = vmatprep.subr.bf16.mxu0 %v10394_v34  ;;  %v802_v34 = vld [vmem:[#allocation7 + $0x9f0] sm:$0xff]  ;;  %v10468_v36 = vcombine.high %v791_v8, %v799_v9  ;;  %v10467_v15 = vcombine.low %v791_v8, %v799_v9 }
 0x350   :  { %v10474_v38 = vcombine.high %v794_v10, %v802_v34  ;;  %v10473_v18 = vcombine.low %v794_v10, %v802_v34 }
 0x351   :  { %7257 = vmatpush1.bf16.msra.mxu1 %v10387_v12  ;;  %v807_v12 = vld [vmem:[#allocation7 + $0xa18] sm:$0xff] }
 0x352   :  { %7773 = vmatpush1.bf16.msra.mxu0 %v10393_v13  ;;  %7258 = vmatprep.subr.bf16.mxu1 %v10404_v3  ;;  %v815_v13 = vld [vmem:[#allocation7 + $0xa58] sm:$0xff]  ;;  %v810_v3 = vld [vmem:[#allocation7 + $0xa30] sm:$0xff] }
 0x353   :  { %7774 = vmatprep.subr.bf16.mxu0 %v10410_v6  ;;  %v818_v6 = vld [vmem:[#allocation7 + $0xa70] sm:$0xff]  ;;  %v10484_v19 = vcombine.high %v807_v12, %v815_v13  ;;  %v10483_v28 = vcombine.low %v807_v12, %v815_v13 }
 0x354   :  { %v10490_v20 = vcombine.high %v810_v3, %v818_v6  ;;  %v10489_v31 = vcombine.low %v810_v3, %v818_v6 }
 0x355   :  { %7259 = vmatpush1.bf16.msra.mxu1 %v10403_v50  ;;  %v823_v50 = vld [vmem:[#allocation7 + $0xa98] sm:$0xff] }
 0x356   :  { %7775 = vmatpush1.bf16.msra.mxu0 %v10409_v62  ;;  %7271 = vmatprep.subr.bf16.mxu1 %v10420_v22  ;;  %v831_v62 = vld [vmem:[#allocation7 + $0xad8] sm:$0xff]  ;;  %v826_v22 = vld [vmem:[#allocation7 + $0xab0] sm:$0xff] }
 0x357   :  { %7787 = vmatprep.subr.bf16.mxu0 %v10426_v23  ;;  %v834_v23 = vld [vmem:[#allocation7 + $0xaf0] sm:$0xff]  ;;  %v10499_v59 = vcombine.low %v823_v50, %v831_v62 }
 0x358   :  { %7261 = vmatmul.mubr.bf16.vlgmr.msra.gmra.mrb[16].mxu1 %v12339_v25  ;;  %v10506_v41 = vcombine.high %v826_v22, %v834_v23 }
 0x359   :  { %7777 = vmatmul.mubr.bf16.vlgmr.msra.gmra.mrb[16].mxu0 %v12339_v25  ;;  %7272 = vmatpush1.bf16.msra.mxu1 %v10419_v37  ;;  %v10500_v37 = vcombine.high %v823_v50, %v831_v62 }
 0x35a   :  { %7303 = vmatprep.mubr.bf16.mxu1 %v12363_v5  ;;  %7788 = vmatpush1.bf16.msra.mxu0 %v10425_v49  ;;  %v847_v49 = vld [vmem:[#allocation7 + $0xb58] sm:$0xff] }
 0x35b   :  { %7819 = vmatprep.mubr.bf16.mxu0 %v12363_v5  ;;  %7273 = vmatprep.subr.bf16.mxu1 %v10436_v51  ;;  %v842_v51 = vld [vmem:[#allocation7 + $0xb30] sm:$0xff]  ;;  %v10516_v57 = vcombine.high %v839_v42, %v847_v49  ;;  %v10515_v8 = vcombine.low %v839_v42, %v847_v49 }
 0x35c   :  { %7789 = vmatprep.subr.bf16.mxu0 %v10442_v60  ;;  %v10505_v60 = vcombine.low %v826_v22, %v834_v23  ;;  %v10522_v61 = vcombine.high %v842_v51, %v850_v58  ;;  %v10521_v9 = vcombine.low %v842_v51, %v850_v58 }
 0x35d   :  { %7274 = vmatpush1.bf16.msra.mxu1 %v10435_v1  ;;  %v855_v1 = vld [vmem:[#allocation7 + $0xb98] sm:$0xff] }
 0x35e   :  { %7790 = vmatpush1.bf16.msra.mxu0 %v10441_v2  ;;  %7275 = vmatprep.subr.bf16.mxu1 %v10452_v43  ;;  %v863_v2 = vld [vmem:[#allocation7 + $0xbd8] sm:$0xff]  ;;  %v858_v43 = vld [vmem:[#allocation7 + $0xbb0] sm:$0xff] }
 0x35f   :  { %7791 = vmatprep.subr.bf16.mxu0 %v10458_v7  ;;  %v866_v7 = vld [vmem:[#allocation7 + $0xbf0] sm:$0xff]  ;;  %v10532_v10 = vcombine.high %v855_v1, %v863_v2  ;;  %v10531_v12 = vcombine.low %v855_v1, %v863_v2 }
 0x360   :  { %v10538_v34 = vcombine.high %v858_v43, %v866_v7  ;;  %v10537_v13 = vcombine.low %v858_v43, %v866_v7 }
 0x361   :  { %7276 = vmatpush1.bf16.msra.mxu1 %v10451_v35  ;;  %v871_v35 = vld [vmem:[#allocation7 + $0xc18] sm:$0xff] }
 0x362   :  { %7792 = vmatpush1.bf16.msra.mxu0 %v10457_v39  ;;  %7277 = vmatprep.subr.bf16.mxu1 %v10468_v36  ;;  %v879_v39 = vld [vmem:[#allocation7 + $0xc58] sm:$0xff]  ;;  %v874_v36 = vld [vmem:[#allocation7 + $0xc30] sm:$0xff] }
 0x363   :  { %7793 = vmatprep.subr.bf16.mxu0 %v10474_v38  ;;  %v882_v38 = vld [vmem:[#allocation7 + $0xc70] sm:$0xff]  ;;  %v10548_v3 = vcombine.high %v871_v35, %v879_v39  ;;  %v10547_v50 = vcombine.low %v871_v35, %v879_v39 }
 0x364   :  { %v10554_v6 = vcombine.high %v874_v36, %v882_v38  ;;  %v10553_v62 = vcombine.low %v874_v36, %v882_v38 }
 0x365   :  { %7278 = vmatpush1.bf16.msra.mxu1 %v10467_v15  ;;  %v887_v15 = vld [vmem:[#allocation7 + $0xc98] sm:$0xff] }
 0x366   :  { %7794 = vmatpush1.bf16.msra.mxu0 %v10473_v18  ;;  %7279 = vmatprep.subr.bf16.mxu1 %v10484_v19  ;;  %v895_v18 = vld [vmem:[#allocation7 + $0xcd8] sm:$0xff]  ;;  %v890_v19 = vld [vmem:[#allocation7 + $0xcb0] sm:$0xff] }
 0x367   :  { %7795 = vmatprep.subr.bf16.mxu0 %v10490_v20  ;;  %v898_v20 = vld [vmem:[#allocation7 + $0xcf0] sm:$0xff]  ;;  %v10564_v22 = vcombine.high %v887_v15, %v895_v18  ;;  %v10563_v42 = vcombine.low %v887_v15, %v895_v18 }
 0x368   :  { %v10570_v23 = vcombine.high %v890_v19, %v898_v20  ;;  %v10569_v49 = vcombine.low %v890_v19, %v898_v20 }
 0x369   :  { %7280 = vmatpush1.bf16.msra.mxu1 %v10483_v28  ;;  %v903_v28 = vld [vmem:[#allocation7 + $0xd18] sm:$0xff] }
 0x36a   :  { %7796 = vmatpush1.bf16.msra.mxu0 %v10489_v31  ;;  %7281 = vmatprep.subr.bf16.mxu1 %v10500_v37  ;;  %v911_v31 = vld [vmem:[#allocation7 + $0xd58] sm:$0xff]  ;;  %v906_v37 = vld [vmem:[#allocation7 + $0xd30] sm:$0xff] }
 0x36b   :  { %7797 = vmatprep.subr.bf16.mxu0 %v10506_v41  ;;  %v914_v41 = vld [vmem:[#allocation7 + $0xd70] sm:$0xff]  ;;  %v10580_v51 = vcombine.high %v903_v28, %v911_v31  ;;  %v10579_v1 = vcombine.low %v903_v28, %v911_v31 }
 0x36c   :  { %v10586_v58 = vcombine.high %v906_v37, %v914_v41  ;;  %v10585_v2 = vcombine.low %v906_v37, %v914_v41 }
 0x36d   :  { %7282 = vmatpush1.bf16.msra.mxu1 %v10499_v59  ;;  %v919_v59 = vld [vmem:[#allocation7 + $0xd98] sm:$0xff] }
 0x36e   :  { %7798 = vmatpush1.bf16.msra.mxu0 %v10505_v60  ;;  %7283 = vmatprep.subr.bf16.mxu1 %v10516_v57  ;;  %v927_v60 = vld [vmem:[#allocation7 + $0xdd8] sm:$0xff]  ;;  %v922_v57 = vld [vmem:[#allocation7 + $0xdb0] sm:$0xff] }
 0x36f   :  { %7799 = vmatprep.subr.bf16.mxu0 %v10522_v61  ;;  %v930_v61 = vld [vmem:[#allocation7 + $0xdf0] sm:$0xff]  ;;  %v10596_v43 = vcombine.high %v919_v59, %v927_v60  ;;  %v10595_v35 = vcombine.low %v919_v59, %v927_v60 }
 0x370   :  { %v10602_v7 = vcombine.high %v922_v57, %v930_v61  ;;  %v10601_v39 = vcombine.low %v922_v57, %v930_v61 }
 0x371   :  { %7284 = vmatpush1.bf16.msra.mxu1 %v10515_v8  ;;  %v935_v8 = vld [vmem:[#allocation7 + $0xe18] sm:$0xff] }
 0x372   :  { %7800 = vmatpush1.bf16.msra.mxu0 %v10521_v9  ;;  %7285 = vmatprep.subr.bf16.mxu1 %v10532_v10  ;;  %v943_v9 = vld [vmem:[#allocation7 + $0xe58] sm:$0xff]  ;;  %v938_v10 = vld [vmem:[#allocation7 + $0xe30] sm:$0xff] }
 0x373   :  { %7801 = vmatprep.subr.bf16.mxu0 %v10538_v34  ;;  %v946_v34 = vld [vmem:[#allocation7 + $0xe70] sm:$0xff]  ;;  %v10612_v36 = vcombine.high %v935_v8, %v943_v9  ;;  %v10611_v15 = vcombine.low %v935_v8, %v943_v9 }
 0x374   :  { %v10618_v38 = vcombine.high %v938_v10, %v946_v34  ;;  %v10617_v18 = vcombine.low %v938_v10, %v946_v34 }
 0x375   :  { %7286 = vmatpush1.bf16.msra.mxu1 %v10531_v12  ;;  %v951_v12 = vld [vmem:[#allocation7 + $0xe98] sm:$0xff] }
 0x376   :  { %7802 = vmatpush1.bf16.msra.mxu0 %v10537_v13  ;;  %7287 = vmatprep.subr.bf16.mxu1 %v10548_v3  ;;  %v959_v13 = vld [vmem:[#allocation7 + $0xed8] sm:$0xff]  ;;  %v954_v3 = vld [vmem:[#allocation7 + $0xeb0] sm:$0xff] }
 0x377   :  { %7803 = vmatprep.subr.bf16.mxu0 %v10554_v6  ;;  %v962_v6 = vld [vmem:[#allocation7 + $0xef0] sm:$0xff]  ;;  %v10628_v19 = vcombine.high %v951_v12, %v959_v13  ;;  %v10627_v28 = vcombine.low %v951_v12, %v959_v13 }
 0x378   :  { %v10634_v20 = vcombine.high %v954_v3, %v962_v6  ;;  %v10633_v31 = vcombine.low %v954_v3, %v962_v6  ;;  %v1026_v12 = vld [vmem:[#allocation7 + $0x10f0] sm:$0xff]  ;;  %v1031_v6 = vld [vmem:[#allocation7 + $0x1118] sm:$0xff] }
 0x379   :  { %7288 = vmatpush1.bf16.msra.mxu1 %v10547_v50  ;;  %v967_v50 = vld [vmem:[#allocation7 + $0xf18] sm:$0xff] }
 0x37a   :  { %7804 = vmatpush1.bf16.msra.mxu0 %v10553_v62  ;;  %7289 = vmatprep.subr.bf16.mxu1 %v10564_v22  ;;  %v975_v62 = vld [vmem:[#allocation7 + $0xf58] sm:$0xff]  ;;  %v970_v22 = vld [vmem:[#allocation7 + $0xf30] sm:$0xff] }
 0x37b   :  { %7805 = vmatprep.subr.bf16.mxu0 %v10570_v23  ;;  %v978_v23 = vld [vmem:[#allocation7 + $0xf70] sm:$0xff]  ;;  %v10644_v37 = vcombine.high %v967_v50, %v975_v62  ;;  %v10643_v59 = vcombine.low %v967_v50, %v975_v62 }
 0x37c   :  { %v10650_v41 = vcombine.high %v970_v22, %v978_v23  ;;  %v10649_v60 = vcombine.low %v970_v22, %v978_v23 }
 0x37d   :  { %7290 = vmatpush1.bf16.msra.mxu1 %v10563_v42  ;;  %v983_v42 = vld [vmem:[#allocation7 + $0xf98] sm:$0xff] }
 0x37e   :  { %7806 = vmatpush1.bf16.msra.mxu0 %v10569_v49  ;;  %7291 = vmatprep.subr.bf16.mxu1 %v10580_v51  ;;  %v991_v49 = vld [vmem:[#allocation7 + $0xfd8] sm:$0xff]  ;;  %v986_v51 = vld [vmem:[#allocation7 + $0xfb0] sm:$0xff] }
 0x37f   :  { %7807 = vmatprep.subr.bf16.mxu0 %v10586_v58  ;;  %v994_v58 = vld [vmem:[#allocation7 + $0xff0] sm:$0xff]  ;;  %v10660_v57 = vcombine.high %v983_v42, %v991_v49  ;;  %v10659_v8 = vcombine.low %v983_v42, %v991_v49 }
 0x380   :  { %v10666_v61 = vcombine.high %v986_v51, %v994_v58  ;;  %v10665_v9 = vcombine.low %v986_v51, %v994_v58 }
 0x381   :  { %7292 = vmatpush1.bf16.msra.mxu1 %v10579_v1  ;;  %v999_v1 = vld [vmem:[#allocation7 + $0x1018] sm:$0xff] }
 0x382   :  { %7808 = vmatpush1.bf16.msra.mxu0 %v10585_v2  ;;  %7293 = vmatprep.subr.bf16.mxu1 %v10596_v43  ;;  %v1007_v2 = vld [vmem:[#allocation7 + $0x1058] sm:$0xff]  ;;  %v1002_v43 = vld [vmem:[#allocation7 + $0x1030] sm:$0xff] }
 0x383   :  { %7809 = vmatprep.subr.bf16.mxu0 %v10602_v7  ;;  %v1010_v7 = vld [vmem:[#allocation7 + $0x1070] sm:$0xff]  ;;  %v10676_v10 = vcombine.high %v999_v1, %v1007_v2 }
 0x384   :  { %v10682_v34 = vcombine.high %v1002_v43, %v1010_v7  ;;  %v10681_v13 = vcombine.low %v1002_v43, %v1010_v7 }
 0x385   :  { %7294 = vmatpush1.bf16.msra.mxu1 %v10595_v35  ;;  %v1015_v35 = vld [vmem:[#allocation7 + $0x1098] sm:$0xff] }
 0x386   :  { %7810 = vmatpush1.bf16.msra.mxu0 %v10601_v39  ;;  %7295 = vmatprep.subr.bf16.mxu1 %v10612_v36  ;;  %v1023_v39 = vld [vmem:[#allocation7 + $0x10d8] sm:$0xff]  ;;  %v10675_v36 = vcombine.low %v999_v1, %v1007_v2 }
 0x387   :  { %7811 = vmatprep.subr.bf16.mxu0 %v10618_v38  ;;  %v1018_v38 = vld [vmem:[#allocation7 + $0x10b0] sm:$0xff]  ;;  %v10692_v3 = vcombine.high %v1015_v35, %v1023_v39  ;;  %v10691_v50 = vcombine.low %v1015_v35, %v1023_v39 }
 0x388   :  { %v10697_v62 = vcombine.low %v1018_v38, %v1026_v12 }
 0x389   :  { %7296 = vmatpush1.bf16.msra.mxu1 %v10611_v15  ;;  %v1039_v15 = vld [vmem:[#allocation7 + $0x1158] sm:$0xff] }
 0x38a   :  { %7812 = vmatpush1.bf16.msra.mxu0 %v10617_v18  ;;  %7297 = vmatprep.subr.bf16.mxu1 %v10628_v19  ;;  %v10698_v18 = vcombine.high %v1018_v38, %v1026_v12  ;;  %v1034_v19 = vld [vmem:[#allocation7 + $0x1130] sm:$0xff]  ;;  %v10708_v22 = vcombine.high %v1031_v6, %v1039_v15  ;;  %v10707_v42 = vcombine.low %v1031_v6, %v1039_v15  ;;  %v1095_v12 = vld [vmem:[#allocation7 + $0x1318] sm:$0xff] }
 0x38b   :  { %7813 = vmatprep.subr.bf16.mxu0 %v10634_v20  ;;  %v1042_v20 = vld [vmem:[#allocation7 + $0x1170] sm:$0xff] }
 0x38c   :  { %v10714_v23 = vcombine.high %v1034_v19, %v1042_v20  ;;  %v10713_v49 = vcombine.low %v1034_v19, %v1042_v20  ;;  %v1106_v6 = vld [vmem:[#allocation7 + $0x1370] sm:$0xff] }
 0x38d   :  { %7298 = vmatpush1.bf16.msra.mxu1 %v10627_v28  ;;  %v1047_v28 = vld [vmem:[#allocation7 + $0x1198] sm:$0xff] }
 0x38e   :  { %7814 = vmatpush1.bf16.msra.mxu0 %v10633_v31  ;;  %7299 = vmatprep.subr.bf16.mxu1 %v10644_v37  ;;  %v1055_v31 = vld [vmem:[#allocation7 + $0x11d8] sm:$0xff]  ;;  %v1050_v37 = vld [vmem:[#allocation7 + $0x11b0] sm:$0xff] }
 0x38f   :  { %7815 = vmatprep.subr.bf16.mxu0 %v10650_v41  ;;  %v1058_v41 = vld [vmem:[#allocation7 + $0x11f0] sm:$0xff]  ;;  %v10724_v51 = vcombine.high %v1047_v28, %v1055_v31  ;;  %v10723_v1 = vcombine.low %v1047_v28, %v1055_v31 }
 0x390   :  { %v10730_v58 = vcombine.high %v1050_v37, %v1058_v41  ;;  %v10729_v2 = vcombine.low %v1050_v37, %v1058_v41 }
 0x391   :  { %7300 = vmatpush1.bf16.msra.mxu1 %v10643_v59  ;;  %v1063_v59 = vld [vmem:[#allocation7 + $0x1218] sm:$0xff] }
 0x392   :  { %7816 = vmatpush1.bf16.msra.mxu0 %v10649_v60  ;;  %7301 = vmatprep.subr.bf16.mxu1 %v10660_v57  ;;  %v1071_v60 = vld [vmem:[#allocation7 + $0x1258] sm:$0xff]  ;;  %v1066_v57 = vld [vmem:[#allocation7 + $0x1230] sm:$0xff] }
 0x393   :  { %7817 = vmatprep.subr.bf16.mxu0 %v10666_v61  ;;  %v1074_v61 = vld [vmem:[#allocation7 + $0x1270] sm:$0xff]  ;;  %v10740_v43 = vcombine.high %v1063_v59, %v1071_v60  ;;  %v10739_v35 = vcombine.low %v1063_v59, %v1071_v60 }
 0x394   :  { %v10746_v7 = vcombine.high %v1066_v57, %v1074_v61  ;;  %v10745_v39 = vcombine.low %v1066_v57, %v1074_v61 }
 0x395   :  { %7302 = vmatpush1.bf16.msra.mxu1 %v10659_v8  ;;  %v1079_v8 = vld [vmem:[#allocation7 + $0x1298] sm:$0xff] }
 0x396   :  { %7818 = vmatpush1.bf16.msra.mxu0 %v10665_v9  ;;  %7314 = vmatprep.subr.bf16.mxu1 %v10676_v10  ;;  %v1087_v9 = vld [vmem:[#allocation7 + $0x12d8] sm:$0xff]  ;;  %v1082_v10 = vld [vmem:[#allocation7 + $0x12b0] sm:$0xff] }
 0x397   :  { %7830 = vmatprep.subr.bf16.mxu0 %v10682_v34  ;;  %v1090_v34 = vld [vmem:[#allocation7 + $0x12f0] sm:$0xff]  ;;  %v10755_v15 = vcombine.low %v1079_v8, %v1087_v9 }
 0x398   :  { %7304 = vmatmul.mubr.bf16.vlgmr.msra.gmra.mrb[16].mxu1 %v12354_v4  ;;  %v10762_v38 = vcombine.high %v1082_v10, %v1090_v34 }
 0x399   :  { %7820 = vmatmul.mubr.bf16.vlgmr.msra.gmra.mrb[16].mxu0 %v12354_v4  ;;  %7315 = vmatpush1.bf16.msra.mxu1 %v10675_v36  ;;  %v10756_v36 = vcombine.high %v1079_v8, %v1087_v9 }
 0x39a   :  { %7346 = vmatprep.mubr.bf16.mxu1 %v12384_v52  ;;  %7831 = vmatpush1.bf16.msra.mxu0 %v10681_v13  ;;  %v1103_v13 = vld [vmem:[#allocation7 + $0x1358] sm:$0xff] }
 0x39b   :  { %7862 = vmatprep.mubr.bf16.mxu0 %v12384_v52  ;;  %7316 = vmatprep.subr.bf16.mxu1 %v10692_v3  ;;  %v1098_v3 = vld [vmem:[#allocation7 + $0x1330] sm:$0xff]  ;;  %v10772_v19 = vcombine.high %v1095_v12, %v1103_v13  ;;  %v10771_v28 = vcombine.low %v1095_v12, %v1103_v13 }
 0x39c   :  { %7832 = vmatprep.subr.bf16.mxu0 %v10698_v18  ;;  %v10761_v18 = vcombine.low %v1082_v10, %v1090_v34  ;;  %v10778_v20 = vcombine.high %v1098_v3, %v1106_v6  ;;  %v10777_v31 = vcombine.low %v1098_v3, %v1106_v6 }
 0x39d   :  { %7317 = vmatpush1.bf16.msra.mxu1 %v10691_v50  ;;  %v1111_v50 = vld [vmem:[#allocation7 + $0x1398] sm:$0xff] }
 0x39e   :  { %7833 = vmatpush1.bf16.msra.mxu0 %v10697_v62  ;;  %7318 = vmatprep.subr.bf16.mxu1 %v10708_v22  ;;  %v1119_v62 = vld [vmem:[#allocation7 + $0x13d8] sm:$0xff]  ;;  %v1114_v22 = vld [vmem:[#allocation7 + $0x13b0] sm:$0xff] }
 0x39f   :  { %7834 = vmatprep.subr.bf16.mxu0 %v10714_v23  ;;  %v1122_v23 = vld [vmem:[#allocation7 + $0x13f0] sm:$0xff]  ;;  %v10788_v37 = vcombine.high %v1111_v50, %v1119_v62  ;;  %v10787_v59 = vcombine.low %v1111_v50, %v1119_v62 }
 0x3a0   :  { %v10794_v41 = vcombine.high %v1114_v22, %v1122_v23  ;;  %v10793_v60 = vcombine.low %v1114_v22, %v1122_v23 }
 0x3a1   :  { %7319 = vmatpush1.bf16.msra.mxu1 %v10707_v42  ;;  %v1127_v42 = vld [vmem:[#allocation7 + $0x1418] sm:$0xff] }
 0x3a2   :  { %7835 = vmatpush1.bf16.msra.mxu0 %v10713_v49  ;;  %7320 = vmatprep.subr.bf16.mxu1 %v10724_v51  ;;  %v1135_v49 = vld [vmem:[#allocation7 + $0x1458] sm:$0xff]  ;;  %v1130_v51 = vld [vmem:[#allocation7 + $0x1430] sm:$0xff] }
 0x3a3   :  { %7836 = vmatprep.subr.bf16.mxu0 %v10730_v58  ;;  %v1138_v58 = vld [vmem:[#allocation7 + $0x1470] sm:$0xff]  ;;  %v10804_v57 = vcombine.high %v1127_v42, %v1135_v49  ;;  %v10803_v8 = vcombine.low %v1127_v42, %v1135_v49 }
 0x3a4   :  { %v10810_v61 = vcombine.high %v1130_v51, %v1138_v58  ;;  %v10809_v9 = vcombine.low %v1130_v51, %v1138_v58 }
 0x3a5   :  { %7321 = vmatpush1.bf16.msra.mxu1 %v10723_v1  ;;  %v1143_v1 = vld [vmem:[#allocation7 + $0x1498] sm:$0xff] }
 0x3a6   :  { %7837 = vmatpush1.bf16.msra.mxu0 %v10729_v2  ;;  %7322 = vmatprep.subr.bf16.mxu1 %v10740_v43  ;;  %v1151_v2 = vld [vmem:[#allocation7 + $0x14d8] sm:$0xff]  ;;  %v1146_v43 = vld [vmem:[#allocation7 + $0x14b0] sm:$0xff] }
 0x3a7   :  { %7838 = vmatprep.subr.bf16.mxu0 %v10746_v7  ;;  %v1154_v7 = vld [vmem:[#allocation7 + $0x14f0] sm:$0xff]  ;;  %v10820_v10 = vcombine.high %v1143_v1, %v1151_v2  ;;  %v10819_v12 = vcombine.low %v1143_v1, %v1151_v2 }
 0x3a8   :  { %v10826_v34 = vcombine.high %v1146_v43, %v1154_v7  ;;  %v10825_v13 = vcombine.low %v1146_v43, %v1154_v7 }
 0x3a9   :  { %7323 = vmatpush1.bf16.msra.mxu1 %v10739_v35  ;;  %v1159_v35 = vld [vmem:[#allocation7 + $0x1518] sm:$0xff] }
 0x3aa   :  { %7839 = vmatpush1.bf16.msra.mxu0 %v10745_v39  ;;  %7324 = vmatprep.subr.bf16.mxu1 %v10756_v36  ;;  %v1167_v39 = vld [vmem:[#allocation7 + $0x1558] sm:$0xff]  ;;  %v1162_v36 = vld [vmem:[#allocation7 + $0x1530] sm:$0xff] }
 0x3ab   :  { %7840 = vmatprep.subr.bf16.mxu0 %v10762_v38  ;;  %v1170_v38 = vld [vmem:[#allocation7 + $0x1570] sm:$0xff]  ;;  %v10836_v3 = vcombine.high %v1159_v35, %v1167_v39  ;;  %v10835_v50 = vcombine.low %v1159_v35, %v1167_v39 }
 0x3ac   :  { %v10842_v6 = vcombine.high %v1162_v36, %v1170_v38  ;;  %v10841_v62 = vcombine.low %v1162_v36, %v1170_v38 }
 0x3ad   :  { %7325 = vmatpush1.bf16.msra.mxu1 %v10755_v15  ;;  %v1175_v15 = vld [vmem:[#allocation7 + $0x1598] sm:$0xff] }
 0x3ae   :  { %7841 = vmatpush1.bf16.msra.mxu0 %v10761_v18  ;;  %7326 = vmatprep.subr.bf16.mxu1 %v10772_v19  ;;  %v1183_v18 = vld [vmem:[#allocation7 + $0x15d8] sm:$0xff]  ;;  %v1178_v19 = vld [vmem:[#allocation7 + $0x15b0] sm:$0xff] }
 0x3af   :  { %7842 = vmatprep.subr.bf16.mxu0 %v10778_v20  ;;  %v1186_v20 = vld [vmem:[#allocation7 + $0x15f0] sm:$0xff]  ;;  %v10852_v22 = vcombine.high %v1175_v15, %v1183_v18  ;;  %v10851_v42 = vcombine.low %v1175_v15, %v1183_v18 }
 0x3b0   :  { %v10858_v23 = vcombine.high %v1178_v19, %v1186_v20  ;;  %v10857_v49 = vcombine.low %v1178_v19, %v1186_v20 }
 0x3b1   :  { %7327 = vmatpush1.bf16.msra.mxu1 %v10771_v28  ;;  %v1191_v28 = vld [vmem:[#allocation7 + $0x1618] sm:$0xff] }
 0x3b2   :  { %7843 = vmatpush1.bf16.msra.mxu0 %v10777_v31  ;;  %7328 = vmatprep.subr.bf16.mxu1 %v10788_v37  ;;  %v1199_v31 = vld [vmem:[#allocation7 + $0x1658] sm:$0xff]  ;;  %v1194_v37 = vld [vmem:[#allocation7 + $0x1630] sm:$0xff] }
 0x3b3   :  { %7844 = vmatprep.subr.bf16.mxu0 %v10794_v41  ;;  %v1202_v41 = vld [vmem:[#allocation7 + $0x1670] sm:$0xff]  ;;  %v10868_v51 = vcombine.high %v1191_v28, %v1199_v31  ;;  %v10867_v1 = vcombine.low %v1191_v28, %v1199_v31 }
 0x3b4   :  { %v10874_v58 = vcombine.high %v1194_v37, %v1202_v41  ;;  %v10873_v2 = vcombine.low %v1194_v37, %v1202_v41 }
 0x3b5   :  { %7329 = vmatpush1.bf16.msra.mxu1 %v10787_v59  ;;  %v1207_v59 = vld [vmem:[#allocation7 + $0x1698] sm:$0xff] }
 0x3b6   :  { %7845 = vmatpush1.bf16.msra.mxu0 %v10793_v60  ;;  %7330 = vmatprep.subr.bf16.mxu1 %v10804_v57  ;;  %v1215_v60 = vld [vmem:[#allocation7 + $0x16d8] sm:$0xff]  ;;  %v1210_v57 = vld [vmem:[#allocation7 + $0x16b0] sm:$0xff] }
 0x3b7   :  { %7846 = vmatprep.subr.bf16.mxu0 %v10810_v61  ;;  %v1218_v61 = vld [vmem:[#allocation7 + $0x16f0] sm:$0xff]  ;;  %v10884_v43 = vcombine.high %v1207_v59, %v1215_v60  ;;  %v10883_v35 = vcombine.low %v1207_v59, %v1215_v60 }
 0x3b8   :  { %v10890_v7 = vcombine.high %v1210_v57, %v1218_v61  ;;  %v10889_v39 = vcombine.low %v1210_v57, %v1218_v61  ;;  %v1282_v59 = vld [vmem:[#allocation7 + $0x18f0] sm:$0xff]  ;;  %v1287_v61 = vld [vmem:[#allocation7 + $0x1918] sm:$0xff] }
 0x3b9   :  { %7331 = vmatpush1.bf16.msra.mxu1 %v10803_v8  ;;  %v1223_v8 = vld [vmem:[#allocation7 + $0x1718] sm:$0xff] }
 0x3ba   :  { %7847 = vmatpush1.bf16.msra.mxu0 %v10809_v9  ;;  %7332 = vmatprep.subr.bf16.mxu1 %v10820_v10  ;;  %v1231_v9 = vld [vmem:[#allocation7 + $0x1758] sm:$0xff]  ;;  %v1226_v10 = vld [vmem:[#allocation7 + $0x1730] sm:$0xff] }
 0x3bb   :  { %7848 = vmatprep.subr.bf16.mxu0 %v10826_v34  ;;  %v1234_v34 = vld [vmem:[#allocation7 + $0x1770] sm:$0xff]  ;;  %v10900_v36 = vcombine.high %v1223_v8, %v1231_v9  ;;  %v10899_v15 = vcombine.low %v1223_v8, %v1231_v9 }
 0x3bc   :  { %v10906_v38 = vcombine.high %v1226_v10, %v1234_v34  ;;  %v10905_v18 = vcombine.low %v1226_v10, %v1234_v34 }
 0x3bd   :  { %7333 = vmatpush1.bf16.msra.mxu1 %v10819_v12  ;;  %v1239_v12 = vld [vmem:[#allocation7 + $0x1798] sm:$0xff] }
 0x3be   :  { %7849 = vmatpush1.bf16.msra.mxu0 %v10825_v13  ;;  %7334 = vmatprep.subr.bf16.mxu1 %v10836_v3  ;;  %v1247_v13 = vld [vmem:[#allocation7 + $0x17d8] sm:$0xff]  ;;  %v1242_v3 = vld [vmem:[#allocation7 + $0x17b0] sm:$0xff] }
 0x3bf   :  { %7850 = vmatprep.subr.bf16.mxu0 %v10842_v6  ;;  %v1250_v6 = vld [vmem:[#allocation7 + $0x17f0] sm:$0xff]  ;;  %v10916_v19 = vcombine.high %v1239_v12, %v1247_v13  ;;  %v10915_v28 = vcombine.low %v1239_v12, %v1247_v13 }
 0x3c0   :  { %v10922_v20 = vcombine.high %v1242_v3, %v1250_v6  ;;  %v10921_v31 = vcombine.low %v1242_v3, %v1250_v6 }
 0x3c1   :  { %7335 = vmatpush1.bf16.msra.mxu1 %v10835_v50  ;;  %v1255_v50 = vld [vmem:[#allocation7 + $0x1818] sm:$0xff] }
 0x3c2   :  { %7851 = vmatpush1.bf16.msra.mxu0 %v10841_v62  ;;  %7336 = vmatprep.subr.bf16.mxu1 %v10852_v22  ;;  %v1263_v62 = vld [vmem:[#allocation7 + $0x1858] sm:$0xff]  ;;  %v1258_v22 = vld [vmem:[#allocation7 + $0x1830] sm:$0xff] }
 0x3c3   :  { %7852 = vmatprep.subr.bf16.mxu0 %v10858_v23  ;;  %v1266_v23 = vld [vmem:[#allocation7 + $0x1870] sm:$0xff]  ;;  %v10932_v37 = vcombine.high %v1255_v50, %v1263_v62 }
 0x3c4   :  { %v10938_v41 = vcombine.high %v1258_v22, %v1266_v23  ;;  %v10937_v60 = vcombine.low %v1258_v22, %v1266_v23 }
 0x3c5   :  { %7337 = vmatpush1.bf16.msra.mxu1 %v10851_v42  ;;  %v1271_v42 = vld [vmem:[#allocation7 + $0x1898] sm:$0xff] }
 0x3c6   :  { %7853 = vmatpush1.bf16.msra.mxu0 %v10857_v49  ;;  %7338 = vmatprep.subr.bf16.mxu1 %v10868_v51  ;;  %v1279_v49 = vld [vmem:[#allocation7 + $0x18d8] sm:$0xff]  ;;  %v10931_v51 = vcombine.low %v1255_v50, %v1263_v62 }
 0x3c7   :  { %7854 = vmatprep.subr.bf16.mxu0 %v10874_v58  ;;  %v1274_v58 = vld [vmem:[#allocation7 + $0x18b0] sm:$0xff]  ;;  %v10948_v57 = vcombine.high %v1271_v42, %v1279_v49  ;;  %v10947_v8 = vcombine.low %v1271_v42, %v1279_v49 }
 0x3c8   :  { %v10953_v9 = vcombine.low %v1274_v58, %v1282_v59 }
 0x3c9   :  { %7339 = vmatpush1.bf16.msra.mxu1 %v10867_v1  ;;  %v1295_v1 = vld [vmem:[#allocation7 + $0x1958] sm:$0xff] }
 0x3ca   :  { %7855 = vmatpush1.bf16.msra.mxu0 %v10873_v2  ;;  %7340 = vmatprep.subr.bf16.mxu1 %v10884_v43  ;;  %v10954_v2 = vcombine.high %v1274_v58, %v1282_v59  ;;  %v1290_v43 = vld [vmem:[#allocation7 + $0x1930] sm:$0xff]  ;;  %v10964_v10 = vcombine.high %v1287_v61, %v1295_v1  ;;  %v10963_v12 = vcombine.low %v1287_v61, %v1295_v1  ;;  %v11995_v61 = vld [vmem:[#allocation8] sm:$0xff] }
 0x3cb   :  { %7856 = vmatprep.subr.bf16.mxu0 %v10890_v7  ;;  %v1298_v7 = vld [vmem:[#allocation7 + $0x1970] sm:$0xff]  ;;  %v1523_v1 = vrot.slane %v11995_v61, %v12298_v47 }
 0x3cc   :  { %v10970_v34 = vcombine.high %v1290_v43, %v1298_v7  ;;  %v10969_v13 = vcombine.low %v1290_v43, %v1298_v7  ;;  %v1362_v43 = vld [vmem:[#allocation7 + $0x1b70] sm:$0xff] }
 0x3cd   :  { %7341 = vmatpush1.bf16.msra.mxu1 %v10883_v35  ;;  %v1303_v35 = vld [vmem:[#allocation7 + $0x1998] sm:$0xff] }
 0x3ce   :  { %7857 = vmatpush1.bf16.msra.mxu0 %v10889_v39  ;;  %7342 = vmatprep.subr.bf16.mxu1 %v10900_v36  ;;  %v1311_v39 = vld [vmem:[#allocation7 + $0x19d8] sm:$0xff]  ;;  %v1306_v36 = vld [vmem:[#allocation7 + $0x19b0] sm:$0xff] }
 0x3cf   :  { %7858 = vmatprep.subr.bf16.mxu0 %v10906_v38  ;;  %v1314_v38 = vld [vmem:[#allocation7 + $0x19f0] sm:$0xff]  ;;  %v10980_v3 = vcombine.high %v1303_v35, %v1311_v39  ;;  %v10979_v50 = vcombine.low %v1303_v35, %v1311_v39 }
 0x3d0   :  { %v10986_v6 = vcombine.high %v1306_v36, %v1314_v38  ;;  %v10985_v62 = vcombine.low %v1306_v36, %v1314_v38  ;;  %v12514_v38 = vld [vmem:[#allocation7 + $0x1bb0] sm:$0xff] }
 0x3d1   :  { %7343 = vmatpush1.bf16.msra.mxu1 %v10899_v15  ;;  %v1319_v15 = vld [vmem:[#allocation7 + $0x1a18] sm:$0xff] }
 0x3d2   :  { %7859 = vmatpush1.bf16.msra.mxu0 %v10905_v18  ;;  %7344 = vmatprep.subr.bf16.mxu1 %v10916_v19  ;;  %v1327_v18 = vld [vmem:[#allocation7 + $0x1a58] sm:$0xff]  ;;  %v1322_v19 = vld [vmem:[#allocation7 + $0x1a30] sm:$0xff] }
 0x3d3   :  { %7860 = vmatprep.subr.bf16.mxu0 %v10922_v20  ;;  %v1330_v20 = vld [vmem:[#allocation7 + $0x1a70] sm:$0xff]  ;;  %v10996_v22 = vcombine.high %v1319_v15, %v1327_v18  ;;  %v10995_v42 = vcombine.low %v1319_v15, %v1327_v18 }
 0x3d4   :  { %v11002_v23 = vcombine.high %v1322_v19, %v1330_v20  ;;  %v11001_v49 = vcombine.low %v1322_v19, %v1330_v20 }
 0x3d5   :  { %7345 = vmatpush1.bf16.msra.mxu1 %v10915_v28  ;;  %v1335_v28 = vld [vmem:[#allocation7 + $0x1a98] sm:$0xff] }
 0x3d6   :  { %7861 = vmatpush1.bf16.msra.mxu0 %v10921_v31  ;;  %7357 = vmatprep.subr.bf16.mxu1 %v10932_v37  ;;  %v1343_v31 = vld [vmem:[#allocation7 + $0x1ad8] sm:$0xff]  ;;  %v1338_v37 = vld [vmem:[#allocation7 + $0x1ab0] sm:$0xff] }
 0x3d7   :  { %7873 = vmatprep.subr.bf16.mxu0 %v10938_v41  ;;  %v1346_v41 = vld [vmem:[#allocation7 + $0x1af0] sm:$0xff]  ;;  %v11012_v58 = vcombine.high %v1335_v28, %v1343_v31 }
 0x3d8   :  { %7347 = vmatmul.mubr.bf16.vlgmr.msra.gmra.mrb[16].mxu1 %v12382_v14  ;;  %v11018_v59 = vcombine.high %v1338_v37, %v1346_v41  ;;  %v11017_v39 = vcombine.low %v1338_v37, %v1346_v41 }
 0x3d9   :  { %7863 = vmatmul.mubr.bf16.vlgmr.msra.gmra.mrb[16].mxu0 %v12382_v14  ;;  %7358 = vmatpush1.bf16.msra.mxu1 %v10931_v51  ;;  %v1509_v51 = vld [vmem:[#allocation8 + $0x8] sm:$0xff] }
 0x3da   :  { %7389 = vmatprep.mubr.bf16.mxu1 %v12398_v54  ;;  %7874 = vmatpush1.bf16.msra.mxu0 %v10937_v60  ;;  %v1351_v60 = vld [vmem:[#allocation7 + $0x1b18] sm:$0xff]  ;;  %v1547_v7 = vrot.slane %v1509_v51, %v12290_v44  ;;  %v1551_v35 = vrot.slane %v1509_v51, %v12295_v46 }
 0x3db   :  { %7905 = vmatprep.mubr.bf16.mxu0 %v12398_v54  ;;  %7359 = vmatprep.subr.bf16.mxu1 %v10948_v57  ;;  %v1359_v57 = vld [vmem:[#allocation7 + $0x1b58] sm:$0xff] }
 0x3dc   :  { %7875 = vmatprep.subr.bf16.mxu0 %v10954_v2  ;;  %v1354_v2 = vld [vmem:[#allocation7 + $0x1b30] sm:$0xff]  ;;  %v11028_v36 = vcombine.high %v1351_v60, %v1359_v57  ;;  %v11027_v20 = vcombine.low %v1351_v60, %v1359_v57 }
 0x3dd   :  { %7360 = vmatpush1.bf16.msra.mxu1 %v10947_v8  ;;  %v1527_v8 = vrot.slane %v11995_v61, %v12301_v48 }
 0x3de   :  { %7876 = vmatpush1.bf16.msra.mxu0 %v10953_v9  ;;  %7361 = vmatprep.subr.bf16.mxu1 %v10964_v10  ;;  %v11011_v9 = vcombine.low %v1335_v28, %v1343_v31  ;;  %v12509_v10 = vld [vmem:[#allocation7 + $0x1b98] sm:$0xff]  ;;  %v12526_v28 = vld [vmem:[#allocation7 + $0x1c70] sm:$0xff] }
 0x3df   :  { %7877 = vmatprep.subr.bf16.mxu0 %v10970_v34  ;;  %v12511_v34 = vld [vmem:[#allocation7 + $0x1bd8] sm:$0xff] }
 0x3e1   :  { %7362 = vmatpush1.bf16.msra.mxu1 %v10963_v12  ;;  %v12516_v12 = vld [vmem:[#allocation7 + $0x1bf0] sm:$0xff] }
 0x3e2   :  { %7878 = vmatpush1.bf16.msra.mxu0 %v10969_v13  ;;  %7363 = vmatprep.subr.bf16.mxu1 %v10980_v3  ;;  %v11034_v3 = vcombine.high %v1354_v2, %v1362_v43  ;;  %v11049_v51 = vcombine.low %v12514_v38, %v12516_v12 }
 0x3e3   :  { %7879 = vmatprep.subr.bf16.mxu0 %v10986_v6  ;;  %v12518_v6 = vld [vmem:[#allocation7 + $0x1c18] sm:$0xff] }
 0x3e5   :  { %7364 = vmatpush1.bf16.msra.mxu1 %v10979_v50  ;;  %v11033_v50 = vcombine.low %v1354_v2, %v1362_v43  ;;  %v11050_v2 = vcombine.high %v12514_v38, %v12516_v12 }
 0x3e6   :  { %7880 = vmatpush1.bf16.msra.mxu0 %v10985_v62  ;;  %7365 = vmatprep.subr.bf16.mxu1 %v10996_v22  ;;  %v11044_v62 = vcombine.high %v12509_v10, %v12511_v34  ;;  %v12522_v22 = vld [vmem:[#allocation7 + $0x1c58] sm:$0xff] }
 0x3e7   :  { %7881 = vmatprep.subr.bf16.mxu0 %v11002_v23  ;;  %v12524_v23 = vld [vmem:[#allocation7 + $0x1c30] sm:$0xff]  ;;  %v11059_v43 = vcombine.low %v12518_v6, %v12522_v22 }
 0x3e9   :  { %7366 = vmatpush1.bf16.msra.mxu1 %v10995_v42 }
 0x3ea   :  { %7882 = vmatpush1.bf16.msra.mxu0 %v11001_v49  ;;  %7367 = vmatprep.subr.bf16.mxu1 %v11012_v58  ;;  %v11043_v49 = vcombine.low %v12509_v10, %v12511_v34  ;;  %v11066_v10 = vcombine.high %v12524_v23, %v12526_v28 }
 0x3eb   :  { %v7047_v13 = vpop.f32.mrb[12].mxu1  ;;  %7883 = vmatprep.subr.bf16.mxu0 %v11018_v59 }
 0x3ec   :  { %v11441_v15 = vadd.f32 %v7047_v13, %v1523_v1  ;;  %v7563_v18 = vpop.f32.mrb[12].mxu0  ;;  %v7049_v19 = vpop.f32.mrb[13].mxu1 }
 0x3ed   :  { %v11453_v31 = vadd.f32 %v7563_v18, %v1547_v7  ;;  %v11442_v37 = vadd.f32 %v7049_v19, %v1527_v8  ;;  %v7565_v41 = vpop.f32.mrb[13].mxu0  ;;  %v7051_v42 = vpop.f32.mrb[14].mxu1  ;;  %7368 = vmatpush1.bf16.msra.mxu1 %v11011_v9  ;;  %v11060_v9 = vcombine.high %v12518_v6, %v12522_v22  ;;  %v1399_v6 = vld [vmem:[#allocation7 + $0x1c98] sm:$0xff] }
 0x3ee   :  { %v8122_v58 = vmul.f32 0.01, %v11441_v15  ;;  %v11454_v59 = vadd.f32 %v7565_v41, %v1551_v35  ;;  %v11443_v60 = vadd.f32 %v7051_v42, %v1523_v1  ;;  %v7567_v57 = vpop.f32.mrb[14].mxu0  ;;  %7884 = vmatpush1.bf16.msra.mxu0 %v11017_v39  ;;  %v7053_v61 = vpop.f32.mrb[15].mxu1  ;;  %7369 = vmatprep.subr.bf16.mxu1 %v11028_v36  ;;  %vm8090_vm9 = vcmp.gt.f32.partialorder %v11441_v15, 0.0  ;;  %v1407_v19 = vld [vmem:[#allocation7 + $0x1cd8] sm:$0xff] }
 0x3ef   :  { %7885 = vmatprep.subr.bf16.mxu0 %v11034_v3  ;;  %vm8096_vm10 = vcmp.gt.f32.partialorder %v11453_v31, 0.0  ;;  %v8128_v1 = vmul.f32 0.01, %v11453_v31  ;;  %vm8091_vm11 = vcmp.gt.f32.partialorder %v11442_v37, 0.0  ;;  %v7569_v34 = vpop.f32.mrb[15].mxu0  ;;  %v11455_v13 = vadd.f32 %v7567_v57, %v1547_v7  ;;  %v1402_v42 = vld [vmem:[#allocation7 + $0x1cb0] sm:$0xff] }
 0x3f0   :  { %vm8106_vm12 = vcmp.gt.f32.partialorder %v11443_v60, 0.0  ;;  %v8123_v39 = vmul.f32 0.01, %v11442_v37  ;;  %v8138_v36 = vmul.f32 0.01, %v11443_v60  ;;  %v11444_v38 = vadd.f32 %v7053_v61, %v1527_v8 }
 0x3f1   :  { %7370 = vmatpush1.bf16.msra.mxu1 %v11027_v20  ;;  %v12540_v12 = vsel %vm8090_vm9, %v11441_v15, %v8122_v58  ;;  %vm8097_vm13 = vcmp.gt.f32.partialorder %v11454_v59, 0.0  ;;  %v8129_v3 = vmul.f32 0.01, %v11454_v59  ;;  %v11456_v18 = vadd.f32 %v7569_v34, %v1551_v35  ;;  %v1410_v20 = vld [vmem:[#allocation7 + $0x1cf0] sm:$0xff] }
 0x3f2   :  { %7886 = vmatpush1.bf16.msra.mxu0 %v11033_v50  ;;  %7371 = vmatprep.subr.bf16.mxu1 %v11044_v62  ;;  %v12542_v22 = vsel %vm8106_vm12, %v11443_v60, %v8138_v36  ;;  %vm8112_vm14 = vcmp.gt.f32.partialorder %v11455_v13, 0.0  ;;  %v8144_v41 = vmul.f32 0.01, %v11455_v13  ;;  %vm8107_vm15 = vcmp.gt.f32.partialorder %v11444_v38, 0.0 }
 0x3f3   :  { %7887 = vmatprep.subr.bf16.mxu0 %v11050_v2  ;;  %v8186_v7 = vpack.c.bf16 %v12542_v22, %v12540_v12  ;;  %v8139_v8 = vmul.f32 0.01, %v11444_v38  ;;  %vm8113_vm0 = vcmp.gt.f32.partialorder %v11456_v18, 0.0  ;;  %v8145_v15 = vmul.f32 0.01, %v11456_v18  ;;  %v1415_v2 = vld [vmem:[#allocation7 + $0x1d18] sm:$0xff] }
 0x3f4   :  { %v12547_v35 = vsel %vm8096_vm10, %v11453_v31, %v8128_v1  ;;  %v12549_v50 = vsel %vm8112_vm14, %v11455_v13, %v8144_v41  ;;  %v11065_v62 = vcombine.low %v12524_v23, %v12526_v28  ;;  %v11076_v58 = vcombine.high %v1399_v6, %v1407_v19  ;;  %v1423_v1 = vld [vmem:[#allocation7 + $0x1d58] sm:$0xff] }
 0x3f5   :  { %7372 = vmatpush1.bf16.msra.mxu1 %v11043_v49  ;;  %v8192_v60 = vpack.c.bf16 %v12549_v50, %v12547_v35  ;;  %v12556_v57 = vsel %vm8091_vm11, %v11442_v37, %v8123_v39  ;;  %v12559_v61 = vsel %vm8107_vm15, %v11444_v38, %v8139_v8  ;;  %v11082_v31 = vcombine.high %v1402_v42, %v1410_v20  ;;  %v1431_v13 = vld [vmem:[#allocation7 + $0x1d98] sm:$0xff]  ;;  %v11862_v50 = vld [vmem:[#allocation10 + $0x534] ss:$8 sps:$4 sm:$0xff]  }
 0x3f6   :  { %7888 = vmatpush1.bf16.msra.mxu0 %v11049_v51  ;;  %7373 = vmatprep.subr.bf16.mxu1 %v11060_v9  ;;  %v8187_v49 = vpack.c.bf16 %v12559_v61, %v12556_v57  ;;  %v12564_v23 = vsel %vm8097_vm13, %v11454_v59, %v8129_v3  ;;  %v12567_v28 = vsel %vm8113_vm0, %v11456_v18, %v8145_v15  ;;  %v1418_v51 = vld [vmem:[#allocation7 + $0x1d30] sm:$0xff]  ;;  %v1439_v38 = vld [vmem:[#allocation7 + $0x1dd8] sm:$0xff]  ;;  %v11668_v57 = vld [vmem:[#allocation10 + $0x130] ss:$8 sps:$4 sm:$0xff]  }
 0x3f7   :  { %7889 = vmatprep.subr.bf16.mxu0 %v11066_v10  ;;  %v1426_v9 = vld [vmem:[#allocation7 + $0x1d70] sm:$0xff]  ;;  %v8193_v37 = vpack.c.bf16 %v12567_v28, %v12564_v23  ;;  %v11075_v34 = vcombine.low %v1399_v6, %v1407_v19  ;;  %v11081_v10 = vcombine.low %v1402_v42, %v1410_v20  ;;  %v11092_v39 = vcombine.high %v1415_v2, %v1423_v1  ;;  %v1455_v6 = vld [vmem:[#allocation7 + $0x1e58] sm:$0xff]  ;;  %v11812_v23 = vld [vmem:[#allocation10 + $0x430] ss:$8 sps:$4 sm:$0xff]  }
 0x3f8   :  { %v11098_v36 = vcombine.high %v1418_v51, %v1426_v9  ;;  %v1434_v59 = vld [vmem:[#allocation7 + $0x1db0] sm:$0xff]  ;;  %v11091_v18 = vcombine.low %v1415_v2, %v1423_v1  ;;  %v11097_v41 = vcombine.low %v1418_v51, %v1426_v9  ;;  %v11108_v8 = vcombine.high %v1431_v13, %v1439_v38  ;;  %v1471_v2 = vld [vmem:[#allocation7 + $0x1ed8] sm:$0xff] }
 0x3f9   :  { %7374 = vmatpush1.bf16.msra.mxu1 %v11059_v43  ;;  %v1442_v3 = vld [vmem:[#allocation7 + $0x1df0] sm:$0xff]  ;;  %v1447_v43 = vld [vmem:[#allocation7 + $0x1e18] sm:$0xff]  ;;  %v11107_v42 = vcombine.low %v1431_v13, %v1439_v38 }
 0x3fa   :  { %7890 = vmatpush1.bf16.msra.mxu0 %v11065_v62  ;;  %7375 = vmatprep.subr.bf16.mxu1 %v11076_v58  ;;  %v11114_v15 = vcombine.high %v1434_v59, %v1442_v3  ;;  %v1450_v19 = vld [vmem:[#allocation7 + $0x1e30] sm:$0xff]  ;;  %v11113_v20 = vcombine.low %v1434_v59, %v1442_v3  ;;  %v11124_v58 = vcombine.high %v1447_v43, %v1455_v6  ;;  %v1487_v13 = vld [vmem:[#allocation7 + $0x1f58] sm:$0xff] }
 0x3fb   :  { %7891 = vmatprep.subr.bf16.mxu0 %v11082_v31  ;;  %v1458_v62 = vld [vmem:[#allocation7 + $0x1e70] sm:$0xff]  ;;  %v11123_v51 = vcombine.low %v1447_v43, %v1455_v6  ;;  %v1503_v43 = vld [vmem:[#allocation7 + $0x1fd8] sm:$0xff] }
 0x3fc   :  { %v11130_v31 = vcombine.high %v1450_v19, %v1458_v62  ;;  %v1466_v1 = vld [vmem:[#allocation7 + $0x1eb0] sm:$0xff]  ;;  %v11129_v9 = vcombine.low %v1450_v19, %v1458_v62 }
 0x3fd   :  { %7376 = vmatpush1.bf16.msra.mxu1 %v11075_v34  ;;  %v1463_v34 = vld [vmem:[#allocation7 + $0x1e98] sm:$0xff]  ;;  %v1482_v38 = vld [vmem:[#allocation7 + $0x1f30] sm:$0xff] }
 0x3fe   :  { %7892 = vmatpush1.bf16.msra.mxu0 %v11081_v10  ;;  %7377 = vmatprep.subr.bf16.mxu1 %v11092_v39  ;;  %v1474_v10 = vld [vmem:[#allocation7 + $0x1ef0] sm:$0xff]  ;;  %v11140_v39 = vcombine.high %v1463_v34, %v1471_v2  ;;  %v11139_v59 = vcombine.low %v1463_v34, %v1471_v2  ;;  %v497_v34 = vld [vmem:[#allocation7 + $0x68] sm:$0xff] }
 0x3ff   :  { %7893 = vmatprep.subr.bf16.mxu0 %v11098_v36  ;;  %v11146_v36 = vcombine.high %v1466_v1, %v1474_v10  ;;  %v11145_v3 = vcombine.low %v1466_v1, %v1474_v10  ;;  %v1498_v6 = vld [vmem:[#allocation7 + $0x1fb0] sm:$0xff] }
 0x400   :  { %v11713_v12 = vld [vmem:[#allocation10 + $0x220] ss:$8 sps:$4 sm:$0xff]  }
 0x401   :  { %7378 = vmatpush1.bf16.msra.mxu1 %v11091_v18  ;;  %v1479_v18 = vld [vmem:[#allocation7 + $0x1f18] sm:$0xff] }
 0x402   :  { %7894 = vmatpush1.bf16.msra.mxu0 %v11097_v41  ;;  %7379 = vmatprep.subr.bf16.mxu1 %v11108_v8  ;;  %v1490_v41 = vld [vmem:[#allocation7 + $0x1f70] sm:$0xff]  ;;  %v11156_v8 = vcombine.high %v1479_v18, %v1487_v13  ;;  %v11155_v19 = vcombine.low %v1479_v18, %v1487_v13 }
 0x403   :  { %7895 = vmatprep.subr.bf16.mxu0 %v11114_v15  ;;  %v11162_v15 = vcombine.high %v1482_v38, %v1490_v41  ;;  %v11161_v62 = vcombine.low %v1482_v38, %v1490_v41  ;;  %v11611_v13 = vld [vmem:[#allocation10] ss:$8 sps:$4 sm:$0xff]   ;;  %v521_v41 = vld [vmem:[#allocation7 + $0x128] sm:$0xff] }
 0x404   :  { %v11857_v35 = vld [vmem:[#allocation10 + $0x520] ss:$8 sps:$4 sm:$0xff]  }
 0x405   :  { %7380 = vmatpush1.bf16.msra.mxu1 %v11107_v42  ;;  %v1495_v42 = vld [vmem:[#allocation7 + $0x1f98] sm:$0xff] }
 0x406   :  { %7896 = vmatpush1.bf16.msra.mxu0 %v11113_v20  ;;  %7381 = vmatprep.subr.bf16.mxu1 %v11124_v58  ;;  %v1506_v20 = vld [vmem:[#allocation7 + $0x1ff0] sm:$0xff]  ;;  %v11172_v58 = vcombine.high %v1495_v42, %v1503_v43  ;;  %v11171_v2 = vcombine.low %v1495_v42, %v1503_v43 }
 0x407   :  { %7897 = vmatprep.subr.bf16.mxu0 %v11130_v31  ;;  %v11178_v31 = vcombine.high %v1498_v6, %v1506_v20  ;;  %v11177_v1 = vcombine.low %v1498_v6, %v1506_v20  ;;  %v11619_v43 = vld [vmem:[#allocation10 + $0x24] ss:$8 sps:$4 sm:$0xff]   ;;  %v537_v6 = vld [vmem:[#allocation7 + $0x1a8] sm:$0xff] }
 0x408   :  { %v545_v20 = vld [vmem:[#allocation7 + $0x1e8] sm:$0xff] }
 0x409   :  { %7382 = vmatpush1.bf16.msra.mxu1 %v11123_v51  ;;  %v489_v51 = vld [vmem:[#allocation7 + $0x28] sm:$0xff] }
 0x40a   :  { %7898 = vmatpush1.bf16.msra.mxu0 %v11129_v9  ;;  %7383 = vmatprep.subr.bf16.mxu1 %v11140_v39  ;;  %v10168_v10 = vcombine.high %v489_v51, %v497_v34  ;;  %v11613_v9 = vld [vmem:[#allocation10 + $0x4] ss:$8 sps:$4 sm:$0xff]   ;;  %v505_v39 = vld [vmem:[#allocation7 + $0xa8] sm:$0xff]  ;;  %v10167_v18 = vcombine.low %v489_v51, %v497_v34 }
 0x40b   :  { %7899 = vmatprep.subr.bf16.mxu0 %v11146_v36  ;;  %v513_v36 = vld [vmem:[#allocation7 + $0xe8] sm:$0xff] }
 0x40c   :  { %v10184_v38 = vcombine.high %v505_v39, %v513_v36  ;;  %v553_v51 = vld [vmem:[#allocation7 + $0x228] sm:$0xff] }
 0x40d   :  { %7384 = vmatpush1.bf16.msra.mxu1 %v11139_v59  ;;  %v529_v59 = vld [vmem:[#allocation7 + $0x168] sm:$0xff] }
 0x40e   :  { %7900 = vmatpush1.bf16.msra.mxu0 %v11145_v3  ;;  %7385 = vmatprep.subr.bf16.mxu1 %v11156_v8  ;;  %v11616_v3 = vld [vmem:[#allocation10 + $0x14] ss:$8 sps:$4 sm:$0xff]   ;;  %v10183_v8 = vcombine.low %v505_v39, %v513_v36  ;;  %v10200_v42 = vcombine.high %v521_v41, %v529_v59  ;;  %v11623_v39 = vld [vmem:[#allocation10 + $0x40] ss:$8 sps:$4 sm:$0xff]  }
 0x40f   :  { %7901 = vmatprep.subr.bf16.mxu0 %v11162_v15  ;;  %v11614_v15 = vld [vmem:[#allocation10 + $0x10] ss:$8 sps:$4 sm:$0xff]  }
 0x410   :  { %v561_v34 = vld [vmem:[#allocation7 + $0x268] sm:$0xff] }
 0x411   :  { %7386 = vmatpush1.bf16.msra.mxu1 %v11155_v19  ;;  %v10199_v19 = vcombine.low %v521_v41, %v529_v59  ;;  %v10232_v21 = vcombine.high %v553_v51, %v561_v34  ;;  %v11626_v59 = vld [vmem:[#allocation10 + $0x50] ss:$8 sps:$4 sm:$0xff]  }
 0x412   :  { %7902 = vmatpush1.bf16.msra.mxu0 %v11161_v62  ;;  %7387 = vmatprep.subr.bf16.mxu1 %v11172_v58  ;;  %v11617_v62 = vld [vmem:[#allocation10 + $0x20] ss:$8 sps:$4 sm:$0xff]   ;;  %v10216_v58 = vcombine.high %v537_v6, %v545_v20 }
 0x413   :  { %7903 = vmatprep.subr.bf16.mxu0 %v11178_v31  ;;  %v11622_v31 = vld [vmem:[#allocation10 + $0x34] ss:$8 sps:$4 sm:$0xff]  }
 0x415   :  { %7388 = vmatpush1.bf16.msra.mxu1 %v11171_v2  ;;  %v10215_v2 = vcombine.low %v537_v6, %v545_v20  ;;  %v11629_v6 = vld [vmem:[#allocation10 + $0x60] ss:$8 sps:$4 sm:$0xff]  }
 0x416   :  { %7904 = vmatpush1.bf16.msra.mxu0 %v11177_v1  ;;  %7572 = vmatprep.subr.bf16.mxu1 %v10168_v10  ;;  %v569_v1 = vld [vmem:[#allocation7 + $0x2a8] sm:$0xff] }
 0x417   :  { %9780 = vmatprep.subr.bf16.mxu0 %v11613_v9  ;;  %v577_v10 = vld [vmem:[#allocation7 + $0x2e8] sm:$0xff]  ;;  %v10231_v9 = vcombine.low %v553_v51, %v561_v34 }
 0x418   :  { %7390 = vmatmul.mubr.bf16.vlgmr.msra.gmra.mrb[16].mxu1 %v12396_v53  ;;  %v10248_v36 = vcombine.high %v569_v1, %v577_v10  ;;  %v10247_v41 = vcombine.low %v569_v1, %v577_v10  ;;  %v11632_v51 = vld [vmem:[#allocation10 + $0x70] ss:$8 sps:$4 sm:$0xff]   ;;  %v11635_v1 = vld [vmem:[#allocation10 + $0x80] ss:$8 sps:$4 sm:$0xff]  }
 0x419   :  { %7906 = vmatmul.mubr.bf16.vlgmr.msra.gmra.mrb[16].mxu0 %v12396_v53  ;;  %7573 = vmatpush1.bf16.msra.mxu1 %v10167_v18  ;;  %v11628_v18 = vld [vmem:[#allocation10 + $0x54] ss:$8 sps:$4 sm:$0xff]  }
 0x41a   :  { %7604 = vmatprep.mubr.bf16.mxu1 %v12345_v32  ;;  %9781 = vmatpush1.bf16.msra.mxu0 %v11611_v13  ;;  %v585_v13 = vld [vmem:[#allocation7 + $0x328] sm:$0xff] }
 0x41b   :  { %9812 = vmatprep.mubr.bf16.mxu0 %v8185_v24  ;;  %7574 = vmatprep.subr.bf16.mxu1 %v10184_v38  ;;  %v11625_v24 = vld [vmem:[#allocation10 + $0x44] ss:$8 sps:$4 sm:$0xff]   ;;  %v593_v38 = vld [vmem:[#allocation7 + $0x368] sm:$0xff] }
 0x41c   :  { %9782 = vmatprep.subr.bf16.mxu0 %v11616_v3  ;;  %v10264_v3 = vcombine.high %v585_v13, %v593_v38 }
 0x41d   :  { %7575 = vmatpush1.bf16.msra.mxu1 %v10183_v8  ;;  %v11631_v8 = vld [vmem:[#allocation10 + $0x64] ss:$8 sps:$4 sm:$0xff]  }
 0x41e   :  { %9783 = vmatpush1.bf16.msra.mxu0 %v11614_v15  ;;  %7576 = vmatprep.subr.bf16.mxu1 %v10200_v42  ;;  %v601_v15 = vld [vmem:[#allocation7 + $0x3a8] sm:$0xff] }
 0x41f   :  { %9784 = vmatprep.subr.bf16.mxu0 %v11619_v43  ;;  %v609_v42 = vld [vmem:[#allocation7 + $0x3e8] sm:$0xff]  ;;  %v10263_v43 = vcombine.low %v585_v13, %v593_v38 }
 0x420   :  { %v10280_v20 = vcombine.high %v601_v15, %v609_v42  ;;  %v11638_v13 = vld [vmem:[#allocation10 + $0x90] ss:$8 sps:$4 sm:$0xff]  }
 0x421   :  { %7577 = vmatpush1.bf16.msra.mxu1 %v10199_v19  ;;  %v11634_v19 = vld [vmem:[#allocation10 + $0x74] ss:$8 sps:$4 sm:$0xff]  }
 0x422   :  { %9785 = vmatpush1.bf16.msra.mxu0 %v11617_v62  ;;  %7578 = vmatprep.subr.bf16.mxu1 %v10216_v58  ;;  %v617_v62 = vld [vmem:[#allocation7 + $0x428] sm:$0xff] }
 0x423   :  { %9786 = vmatprep.subr.bf16.mxu0 %v11622_v31  ;;  %v625_v58 = vld [vmem:[#allocation7 + $0x468] sm:$0xff]  ;;  %v10279_v31 = vcombine.low %v601_v15, %v609_v42  ;;  %v11641_v15 = vld [vmem:[#allocation10 + $0xa0] ss:$8 sps:$4 sm:$0xff]  }
 0x424   :  { %v10296_v34 = vcombine.high %v617_v62, %v625_v58 }
 0x425   :  { %7579 = vmatpush1.bf16.msra.mxu1 %v10215_v2  ;;  %v11637_v2 = vld [vmem:[#allocation10 + $0x84] ss:$8 sps:$4 sm:$0xff]  }
 0x426   :  { %9787 = vmatpush1.bf16.msra.mxu0 %v11620_v0  ;;  %7580 = vmatprep.subr.bf16.mxu1 %v10232_v21  ;;  %v633_v0 = vld [vmem:[#allocation7 + $0x4a8] sm:$0xff] }
 0x427   :  { %9788 = vmatprep.subr.bf16.mxu0 %v11625_v24  ;;  %v641_v21 = vld [vmem:[#allocation7 + $0x4e8] sm:$0xff]  ;;  %v10295_v24 = vcombine.low %v617_v62, %v625_v58 }
 0x428   :  { %v10312_v10 = vcombine.high %v633_v0, %v641_v21  ;;  %v11644_v62 = vld [vmem:[#allocation10 + $0xb0] ss:$8 sps:$4 sm:$0xff]  }
 0x429   :  { %7581 = vmatpush1.bf16.msra.mxu1 %v10231_v9  ;;  %v11640_v9 = vld [vmem:[#allocation10 + $0x94] ss:$8 sps:$4 sm:$0xff]  }
 0x42a   :  { %9789 = vmatpush1.bf16.msra.mxu0 %v11623_v39  ;;  %7582 = vmatprep.subr.bf16.mxu1 %v10248_v36  ;;  %v649_v39 = vld [vmem:[#allocation7 + $0x528] sm:$0xff] }
 0x42b   :  { %9790 = vmatprep.subr.bf16.mxu0 %v11628_v18  ;;  %v657_v36 = vld [vmem:[#allocation7 + $0x568] sm:$0xff]  ;;  %v10311_v18 = vcombine.low %v633_v0, %v641_v21  ;;  %v11647_v0 = vld [vmem:[#allocation10 + $0xc0] ss:$8 sps:$4 sm:$0xff]  }
 0x42c   :  { %v10328_v38 = vcombine.high %v649_v39, %v657_v36 }
 0x42d   :  { %7583 = vmatpush1.bf16.msra.mxu1 %v10247_v41  ;;  %v11643_v41 = vld [vmem:[#allocation10 + $0xa4] ss:$8 sps:$4 sm:$0xff]  }
 0x42e   :  { %9791 = vmatpush1.bf16.msra.mxu0 %v11626_v59  ;;  %7584 = vmatprep.subr.bf16.mxu1 %v10264_v3  ;;  %v665_v59 = vld [vmem:[#allocation7 + $0x5a8] sm:$0xff] }
 0x42f   :  { %9792 = vmatprep.subr.bf16.mxu0 %v11631_v8  ;;  %v673_v3 = vld [vmem:[#allocation7 + $0x5e8] sm:$0xff]  ;;  %v10327_v8 = vcombine.low %v649_v39, %v657_v36 }
 0x430   :  { %v10344_v42 = vcombine.high %v665_v59, %v673_v3  ;;  %v11650_v39 = vld [vmem:[#allocation10 + $0xd0] ss:$8 sps:$4 sm:$0xff]  }
 0x431   :  { %7585 = vmatpush1.bf16.msra.mxu1 %v10263_v43  ;;  %v11646_v43 = vld [vmem:[#allocation10 + $0xb4] ss:$8 sps:$4 sm:$0xff]  }
 0x432   :  { %9793 = vmatpush1.bf16.msra.mxu0 %v11629_v6  ;;  %7586 = vmatprep.subr.bf16.mxu1 %v10280_v20  ;;  %v681_v6 = vld [vmem:[#allocation7 + $0x628] sm:$0xff] }
 0x433   :  { %9794 = vmatprep.subr.bf16.mxu0 %v11634_v19  ;;  %v689_v20 = vld [vmem:[#allocation7 + $0x668] sm:$0xff]  ;;  %v10343_v19 = vcombine.low %v665_v59, %v673_v3  ;;  %v11653_v59 = vld [vmem:[#allocation10 + $0xe0] ss:$8 sps:$4 sm:$0xff]  }
 0x434   :  { %v10360_v58 = vcombine.high %v681_v6, %v689_v20 }
 0x435   :  { %7587 = vmatpush1.bf16.msra.mxu1 %v10279_v31  ;;  %v11649_v31 = vld [vmem:[#allocation10 + $0xc4] ss:$8 sps:$4 sm:$0xff]  }
 0x436   :  { %9795 = vmatpush1.bf16.msra.mxu0 %v11632_v51  ;;  %7588 = vmatprep.subr.bf16.mxu1 %v10296_v34  ;;  %v697_v51 = vld [vmem:[#allocation7 + $0x6a8] sm:$0xff] }
 0x437   :  { %9796 = vmatprep.subr.bf16.mxu0 %v11637_v2  ;;  %v705_v34 = vld [vmem:[#allocation7 + $0x6e8] sm:$0xff]  ;;  %v10359_v2 = vcombine.low %v681_v6, %v689_v20 }
 0x438   :  { %v10376_v21 = vcombine.high %v697_v51, %v705_v34  ;;  %v11656_v6 = vld [vmem:[#allocation10 + $0xf0] ss:$8 sps:$4 sm:$0xff]  }
 0x439   :  { %7589 = vmatpush1.bf16.msra.mxu1 %v10295_v24  ;;  %v11652_v24 = vld [vmem:[#allocation10 + $0xd4] ss:$8 sps:$4 sm:$0xff]  }
 0x43a   :  { %9797 = vmatpush1.bf16.msra.mxu0 %v11635_v1  ;;  %7590 = vmatprep.subr.bf16.mxu1 %v10312_v10  ;;  %v713_v1 = vld [vmem:[#allocation7 + $0x728] sm:$0xff] }
 0x43b   :  { %9798 = vmatprep.subr.bf16.mxu0 %v11640_v9  ;;  %v721_v10 = vld [vmem:[#allocation7 + $0x768] sm:$0xff]  ;;  %v10375_v9 = vcombine.low %v697_v51, %v705_v34  ;;  %v11659_v51 = vld [vmem:[#allocation10 + $0x100] ss:$8 sps:$4 sm:$0xff]  }
 0x43c   :  { %v10392_v36 = vcombine.high %v713_v1, %v721_v10 }
 0x43d   :  { %7591 = vmatpush1.bf16.msra.mxu1 %v10311_v18  ;;  %v11655_v18 = vld [vmem:[#allocation10 + $0xe4] ss:$8 sps:$4 sm:$0xff]  }
 0x43e   :  { %9799 = vmatpush1.bf16.msra.mxu0 %v11638_v13  ;;  %7592 = vmatprep.subr.bf16.mxu1 %v10328_v38  ;;  %v729_v13 = vld [vmem:[#allocation7 + $0x7a8] sm:$0xff] }
 0x43f   :  { %9800 = vmatprep.subr.bf16.mxu0 %v11643_v41  ;;  %v737_v38 = vld [vmem:[#allocation7 + $0x7e8] sm:$0xff]  ;;  %v10391_v41 = vcombine.low %v713_v1, %v721_v10 }
 0x440   :  { %v10408_v3 = vcombine.high %v729_v13, %v737_v38  ;;  %v11662_v1 = vld [vmem:[#allocation10 + $0x110] ss:$8 sps:$4 sm:$0xff]  }
 0x441   :  { %7593 = vmatpush1.bf16.msra.mxu1 %v10327_v8  ;;  %v11658_v8 = vld [vmem:[#allocation10 + $0xf4] ss:$8 sps:$4 sm:$0xff]  }
 0x442   :  { %9801 = vmatpush1.bf16.msra.mxu0 %v11641_v15  ;;  %7594 = vmatprep.subr.bf16.mxu1 %v10344_v42  ;;  %v745_v15 = vld [vmem:[#allocation7 + $0x828] sm:$0xff] }
 0x443   :  { %9802 = vmatprep.subr.bf16.mxu0 %v11646_v43  ;;  %v753_v42 = vld [vmem:[#allocation7 + $0x868] sm:$0xff]  ;;  %v10407_v43 = vcombine.low %v729_v13, %v737_v38 }
 0x444   :  { %v10424_v20 = vcombine.high %v745_v15, %v753_v42  ;;  %v809_v13 = vld [vmem:[#allocation7 + $0xa28] sm:$0xff] }
 0x445   :  { %7595 = vmatpush1.bf16.msra.mxu1 %v10343_v19  ;;  %v11661_v19 = vld [vmem:[#allocation10 + $0x104] ss:$8 sps:$4 sm:$0xff]   ;;  %v817_v38 = vld [vmem:[#allocation7 + $0xa68] sm:$0xff] }
 0x446   :  { %9803 = vmatpush1.bf16.msra.mxu0 %v11644_v62  ;;  %7596 = vmatprep.subr.bf16.mxu1 %v10360_v58  ;;  %v761_v62 = vld [vmem:[#allocation7 + $0x8a8] sm:$0xff]  ;;  %v10488_v61 = vcombine.high %v809_v13, %v817_v38 }
 0x447   :  { %9804 = vmatprep.subr.bf16.mxu0 %v11649_v31  ;;  %v769_v58 = vld [vmem:[#allocation7 + $0x8e8] sm:$0xff]  ;;  %v10423_v31 = vcombine.low %v745_v15, %v753_v42  ;;  %v11671_v15 = vld [vmem:[#allocation10 + $0x140] ss:$8 sps:$4 sm:$0xff]  }
 0x448   :  { %v10440_v34 = vcombine.high %v761_v62, %v769_v58 }
 0x449   :  { %7597 = vmatpush1.bf16.msra.mxu1 %v10359_v2  ;;  %v777_v2 = vld [vmem:[#allocation7 + $0x928] sm:$0xff] }
 0x44a   :  { %9805 = vmatpush1.bf16.msra.mxu0 %v11647_v0  ;;  %7598 = vmatprep.subr.bf16.mxu1 %v10376_v21  ;;  %v785_v0 = vld [vmem:[#allocation7 + $0x968] sm:$0xff] }
 0x44b   :  { %9806 = vmatprep.subr.bf16.mxu0 %v11652_v24  ;;  %v11664_v21 = vld [vmem:[#allocation10 + $0x114] ss:$8 sps:$4 sm:$0xff]   ;;  %v10439_v24 = vcombine.low %v761_v62, %v769_v58  ;;  %v10456_v10 = vcombine.high %v777_v2, %v785_v0  ;;  %v11674_v62 = vld [vmem:[#allocation10 + $0x150] ss:$8 sps:$4 sm:$0xff]  }
 0x44d   :  { %7599 = vmatpush1.bf16.msra.mxu1 %v10375_v9  ;;  %v11667_v9 = vld [vmem:[#allocation10 + $0x124] ss:$8 sps:$4 sm:$0xff]  }
 0x44e   :  { %9807 = vmatpush1.bf16.msra.mxu0 %v11650_v39  ;;  %7600 = vmatprep.subr.bf16.mxu1 %v10392_v36  ;;  %v793_v39 = vld [vmem:[#allocation7 + $0x9a8] sm:$0xff] }
 0x44f   :  { %9808 = vmatprep.subr.bf16.mxu0 %v11655_v18  ;;  %v801_v36 = vld [vmem:[#allocation7 + $0x9e8] sm:$0xff]  ;;  %v10455_v18 = vcombine.low %v777_v2, %v785_v0  ;;  %v11677_v0 = vld [vmem:[#allocation10 + $0x160] ss:$8 sps:$4 sm:$0xff]  }
 0x450   :  { %v10472_v11 = vcombine.high %v793_v39, %v801_v36 }
 0x451   :  { %7601 = vmatpush1.bf16.msra.mxu1 %v10391_v41  ;;  %v10471_v41 = vcombine.low %v793_v39, %v801_v36  ;;  %v11680_v39 = vld [vmem:[#allocation10 + $0x170] ss:$8 sps:$4 sm:$0xff]  }
 0x452   :  { %9809 = vmatpush1.bf16.msra.mxu0 %v11653_v59  ;;  %7602 = vmatprep.subr.bf16.mxu1 %v10408_v3  ;;  %v825_v59 = vld [vmem:[#allocation7 + $0xaa8] sm:$0xff] }
 0x453   :  { %9810 = vmatprep.subr.bf16.mxu0 %v11658_v8  ;;  %v833_v3 = vld [vmem:[#allocation7 + $0xae8] sm:$0xff]  ;;  %v10487_v8 = vcombine.low %v809_v13, %v817_v38  ;;  %v11683_v13 = vld [vmem:[#allocation10 + $0x180] ss:$8 sps:$4 sm:$0xff]  }
 0x454   :  { %v10504_v42 = vcombine.high %v825_v59, %v833_v3 }
 0x455   :  { %7603 = vmatpush1.bf16.msra.mxu1 %v10407_v43  ;;  %v11676_v43 = vld [vmem:[#allocation10 + $0x154] ss:$8 sps:$4 sm:$0xff]  }
 0x456   :  { %9811 = vmatpush1.bf16.msra.mxu0 %v11656_v6  ;;  %7615 = vmatprep.subr.bf16.mxu1 %v10424_v20  ;;  %v841_v6 = vld [vmem:[#allocation7 + $0xb28] sm:$0xff] }
 0x457   :  { %9823 = vmatprep.subr.bf16.mxu0 %v11661_v19  ;;  %v849_v20 = vld [vmem:[#allocation7 + $0xb68] sm:$0xff]  ;;  %v10503_v19 = vcombine.low %v825_v59, %v833_v3 }
 0x458   :  { %7605 = vmatmul.mubr.bf16.vlgmr.msra.gmra.mrb[20].mxu1 %v12339_v25  ;;  %v10520_v58 = vcombine.high %v841_v6, %v849_v20  ;;  %v10519_v2 = vcombine.low %v841_v6, %v849_v20  ;;  %v11686_v59 = vld [vmem:[#allocation10 + $0x190] ss:$8 sps:$4 sm:$0xff]   ;;  %v11689_v6 = vld [vmem:[#allocation10 + $0x1a0] ss:$8 sps:$4 sm:$0xff]  }
 0x459   :  { %9813 = vmatmul.mubr.bf16.vlgmr.msra.gmra.mrb[20].mxu0 %v8184_v16  ;;  %7616 = vmatpush1.bf16.msra.mxu1 %v10423_v31  ;;  %v11670_v16 = vld [vmem:[#allocation10 + $0x134] ss:$8 sps:$4 sm:$0xff]   ;;  %v11679_v31 = vld [vmem:[#allocation10 + $0x164] ss:$8 sps:$4 sm:$0xff]  }
 0x45a   :  { %7647 = vmatprep.mubr.bf16.mxu1 %v12363_v5  ;;  %9824 = vmatpush1.bf16.msra.mxu0 %v11659_v51  ;;  %v857_v51 = vld [vmem:[#allocation7 + $0xba8] sm:$0xff] }
 0x45b   :  { %9855 = vmatprep.mubr.bf16.mxu0 %v8187_v49  ;;  %7617 = vmatprep.subr.bf16.mxu1 %v10440_v34  ;;  %v11673_v49 = vld [vmem:[#allocation10 + $0x144] ss:$8 sps:$4 sm:$0xff]   ;;  %v865_v34 = vld [vmem:[#allocation7 + $0xbe8] sm:$0xff] }
 0x45c   :  { %9825 = vmatprep.subr.bf16.mxu0 %v11664_v21  ;;  %v10536_v21 = vcombine.high %v857_v51, %v865_v34 }
 0x45d   :  { %7618 = vmatpush1.bf16.msra.mxu1 %v10439_v24  ;;  %v11682_v24 = vld [vmem:[#allocation10 + $0x174] ss:$8 sps:$4 sm:$0xff]  }
 0x45e   :  { %9826 = vmatpush1.bf16.msra.mxu0 %v11662_v1  ;;  %7619 = vmatprep.subr.bf16.mxu1 %v10456_v10  ;;  %v873_v1 = vld [vmem:[#allocation7 + $0xc28] sm:$0xff] }
 0x45f   :  { %9827 = vmatprep.subr.bf16.mxu0 %v11667_v9  ;;  %v881_v10 = vld [vmem:[#allocation7 + $0xc68] sm:$0xff]  ;;  %v10535_v9 = vcombine.low %v857_v51, %v865_v34 }
 0x460   :  { %v10552_v36 = vcombine.high %v873_v1, %v881_v10  ;;  %v11692_v51 = vld [vmem:[#allocation10 + $0x1b0] ss:$8 sps:$4 sm:$0xff]  }
 0x461   :  { %7620 = vmatpush1.bf16.msra.mxu1 %v10455_v18  ;;  %v11685_v18 = vld [vmem:[#allocation10 + $0x184] ss:$8 sps:$4 sm:$0xff]  }
 0x462   :  { %9828 = vmatpush1.bf16.msra.mxu0 %v11665_v45  ;;  %7621 = vmatprep.subr.bf16.mxu1 %v10472_v11  ;;  %v889_v45 = vld [vmem:[#allocation7 + $0xca8] sm:$0xff] }
 0x463   :  { %9829 = vmatprep.subr.bf16.mxu0 %v11670_v16  ;;  %v897_v11 = vld [vmem:[#allocation7 + $0xce8] sm:$0xff]  ;;  %v10551_v16 = vcombine.low %v873_v1, %v881_v10  ;;  %v11695_v1 = vld [vmem:[#allocation10 + $0x1c0] ss:$8 sps:$4 sm:$0xff]  }
 0x464   :  { %v10568_v38 = vcombine.high %v889_v45, %v897_v11 }
 0x465   :  { %7622 = vmatpush1.bf16.msra.mxu1 %v10471_v41  ;;  %v11688_v41 = vld [vmem:[#allocation10 + $0x194] ss:$8 sps:$4 sm:$0xff]  }
 0x466   :  { %9830 = vmatpush1.bf16.msra.mxu0 %v11668_v57  ;;  %7623 = vmatprep.subr.bf16.mxu1 %v10488_v61  ;;  %v905_v57 = vld [vmem:[#allocation7 + $0xd28] sm:$0xff] }
 0x467   :  { %9831 = vmatprep.subr.bf16.mxu0 %v11673_v49  ;;  %v913_v61 = vld [vmem:[#allocation7 + $0xd68] sm:$0xff]  ;;  %v10567_v49 = vcombine.low %v889_v45, %v897_v11 }
 0x468   :  { %v10584_v3 = vcombine.high %v905_v57, %v913_v61  ;;  %v11698_v45 = vld [vmem:[#allocation10 + $0x1d0] ss:$8 sps:$4 sm:$0xff]  }
 0x469   :  { %7624 = vmatpush1.bf16.msra.mxu1 %v10487_v8  ;;  %v11691_v8 = vld [vmem:[#allocation10 + $0x1a4] ss:$8 sps:$4 sm:$0xff]  }
 0x46a   :  { %9832 = vmatpush1.bf16.msra.mxu0 %v11671_v15  ;;  %7625 = vmatprep.subr.bf16.mxu1 %v10504_v42  ;;  %v921_v15 = vld [vmem:[#allocation7 + $0xda8] sm:$0xff] }
 0x46b   :  { %9833 = vmatprep.subr.bf16.mxu0 %v11676_v43  ;;  %v929_v42 = vld [vmem:[#allocation7 + $0xde8] sm:$0xff]  ;;  %v10583_v43 = vcombine.low %v905_v57, %v913_v61  ;;  %v11701_v57 = vld [vmem:[#allocation10 + $0x1e0] ss:$8 sps:$4 sm:$0xff]  }
 0x46c   :  { %v10600_v20 = vcombine.high %v921_v15, %v929_v42 }
 0x46d   :  { %7626 = vmatpush1.bf16.msra.mxu1 %v10503_v19  ;;  %v11694_v19 = vld [vmem:[#allocation10 + $0x1b4] ss:$8 sps:$4 sm:$0xff]  }
 0x46e   :  { %9834 = vmatpush1.bf16.msra.mxu0 %v11674_v62  ;;  %7627 = vmatprep.subr.bf16.mxu1 %v10520_v58  ;;  %v937_v62 = vld [vmem:[#allocation7 + $0xe28] sm:$0xff] }
 0x46f   :  { %9835 = vmatprep.subr.bf16.mxu0 %v11679_v31  ;;  %v945_v58 = vld [vmem:[#allocation7 + $0xe68] sm:$0xff]  ;;  %v10599_v31 = vcombine.low %v921_v15, %v929_v42 }
 0x470   :  { %v10616_v34 = vcombine.high %v937_v62, %v945_v58  ;;  %v11704_v15 = vld [vmem:[#allocation10 + $0x1f0] ss:$8 sps:$4 sm:$0xff]  }
 0x471   :  { %7628 = vmatpush1.bf16.msra.mxu1 %v10519_v2  ;;  %v11697_v2 = vld [vmem:[#allocation10 + $0x1c4] ss:$8 sps:$4 sm:$0xff]  }
 0x472   :  { %9836 = vmatpush1.bf16.msra.mxu0 %v11677_v0  ;;  %7629 = vmatprep.subr.bf16.mxu1 %v10536_v21  ;;  %v953_v0 = vld [vmem:[#allocation7 + $0xea8] sm:$0xff] }
 0x473   :  { %9837 = vmatprep.subr.bf16.mxu0 %v11682_v24  ;;  %v961_v21 = vld [vmem:[#allocation7 + $0xee8] sm:$0xff]  ;;  %v10615_v24 = vcombine.low %v937_v62, %v945_v58  ;;  %v11707_v62 = vld [vmem:[#allocation10 + $0x200] ss:$8 sps:$4 sm:$0xff]  }
 0x474   :  { %v10632_v10 = vcombine.high %v953_v0, %v961_v21 }
 0x475   :  { %7630 = vmatpush1.bf16.msra.mxu1 %v10535_v9  ;;  %v11700_v9 = vld [vmem:[#allocation10 + $0x1d4] ss:$8 sps:$4 sm:$0xff]  }
 0x476   :  { %9838 = vmatpush1.bf16.msra.mxu0 %v11680_v39  ;;  %7631 = vmatprep.subr.bf16.mxu1 %v10552_v36  ;;  %v969_v39 = vld [vmem:[#allocation7 + $0xf28] sm:$0xff] }
 0x477   :  { %9839 = vmatprep.subr.bf16.mxu0 %v11685_v18  ;;  %v977_v36 = vld [vmem:[#allocation7 + $0xf68] sm:$0xff]  ;;  %v10631_v18 = vcombine.low %v953_v0, %v961_v21 }
 0x478   :  { %v10648_v11 = vcombine.high %v969_v39, %v977_v36  ;;  %v11710_v0 = vld [vmem:[#allocation10 + $0x210] ss:$8 sps:$4 sm:$0xff]  }
 0x479   :  { %7632 = vmatpush1.bf16.msra.mxu1 %v10551_v16  ;;  %v11703_v16 = vld [vmem:[#allocation10 + $0x1e4] ss:$8 sps:$4 sm:$0xff]  }
 0x47a   :  { %9840 = vmatpush1.bf16.msra.mxu0 %v11683_v13  ;;  %7633 = vmatprep.subr.bf16.mxu1 %v10568_v38  ;;  %v985_v13 = vld [vmem:[#allocation7 + $0xfa8] sm:$0xff] }
 0x47b   :  { %9841 = vmatprep.subr.bf16.mxu0 %v11688_v41  ;;  %v993_v38 = vld [vmem:[#allocation7 + $0xfe8] sm:$0xff]  ;;  %v10647_v41 = vcombine.low %v969_v39, %v977_v36 }
 0x47c   :  { %v10664_v61 = vcombine.high %v985_v13, %v993_v38  ;;  %v1065_v39 = vld [vmem:[#allocation7 + $0x1228] sm:$0xff] }
 0x47d   :  { %7634 = vmatpush1.bf16.msra.mxu1 %v10567_v49  ;;  %v11706_v49 = vld [vmem:[#allocation10 + $0x1f4] ss:$8 sps:$4 sm:$0xff]  }
 0x47e   :  { %9842 = vmatpush1.bf16.msra.mxu0 %v11686_v59  ;;  %7635 = vmatprep.subr.bf16.mxu1 %v10584_v3  ;;  %v1001_v59 = vld [vmem:[#allocation7 + $0x1028] sm:$0xff] }
 0x47f   :  { %9843 = vmatprep.subr.bf16.mxu0 %v11691_v8  ;;  %v1009_v3 = vld [vmem:[#allocation7 + $0x1068] sm:$0xff]  ;;  %v10663_v8 = vcombine.low %v985_v13, %v993_v38  ;;  %v11719_v13 = vld [vmem:[#allocation10 + $0x240] ss:$8 sps:$4 sm:$0xff]  }
 0x480   :  { %v10680_v42 = vcombine.high %v1001_v59, %v1009_v3  ;;  %v1073_v36 = vld [vmem:[#allocation7 + $0x1268] sm:$0xff] }
 0x481   :  { %7636 = vmatpush1.bf16.msra.mxu1 %v10583_v43  ;;  %v11709_v43 = vld [vmem:[#allocation10 + $0x204] ss:$8 sps:$4 sm:$0xff]   ;;  %v10744_v27 = vcombine.high %v1065_v39, %v1073_v36 }
 0x482   :  { %9844 = vmatpush1.bf16.msra.mxu0 %v11689_v6  ;;  %7637 = vmatprep.subr.bf16.mxu1 %v10600_v20  ;;  %v1017_v6 = vld [vmem:[#allocation7 + $0x10a8] sm:$0xff] }
 0x483   :  { %9845 = vmatprep.subr.bf16.mxu0 %v11694_v19  ;;  %v1025_v20 = vld [vmem:[#allocation7 + $0x10e8] sm:$0xff]  ;;  %v10679_v19 = vcombine.low %v1001_v59, %v1009_v3 }
 0x484   :  { %v10696_v58 = vcombine.high %v1017_v6, %v1025_v20  ;;  %v11722_v59 = vld [vmem:[#allocation10 + $0x250] ss:$8 sps:$4 sm:$0xff]  }
 0x485   :  { %7638 = vmatpush1.bf16.msra.mxu1 %v10599_v31  ;;  %v1033_v31 = vld [vmem:[#allocation7 + $0x1128] sm:$0xff] }
 0x486   :  { %9846 = vmatpush1.bf16.msra.mxu0 %v11692_v51  ;;  %7639 = vmatprep.subr.bf16.mxu1 %v10616_v34  ;;  %v1041_v51 = vld [vmem:[#allocation7 + $0x1168] sm:$0xff] }
 0x487   :  { %9847 = vmatprep.subr.bf16.mxu0 %v11697_v2  ;;  %v11712_v34 = vld [vmem:[#allocation10 + $0x214] ss:$8 sps:$4 sm:$0xff]   ;;  %v10695_v2 = vcombine.low %v1017_v6, %v1025_v20  ;;  %v10712_v21 = vcombine.high %v1033_v31, %v1041_v51  ;;  %v11725_v6 = vld [vmem:[#allocation10 + $0x260] ss:$8 sps:$4 sm:$0xff]  }
 0x489   :  { %7640 = vmatpush1.bf16.msra.mxu1 %v10615_v24  ;;  %v11715_v24 = vld [vmem:[#allocation10 + $0x224] ss:$8 sps:$4 sm:$0xff]  }
 0x48a   :  { %9848 = vmatpush1.bf16.msra.mxu0 %v11695_v1  ;;  %7641 = vmatprep.subr.bf16.mxu1 %v10632_v10  ;;  %v1049_v1 = vld [vmem:[#allocation7 + $0x11a8] sm:$0xff] }
 0x48b   :  { %9849 = vmatprep.subr.bf16.mxu0 %v11700_v9  ;;  %v1057_v10 = vld [vmem:[#allocation7 + $0x11e8] sm:$0xff]  ;;  %v10711_v9 = vcombine.low %v1033_v31, %v1041_v51 }
 0x48c   :  { %v10728_v22 = vcombine.high %v1049_v1, %v1057_v10  ;;  %v11728_v51 = vld [vmem:[#allocation10 + $0x270] ss:$8 sps:$4 sm:$0xff]  }
 0x48d   :  { %7642 = vmatpush1.bf16.msra.mxu1 %v10631_v18  ;;  %v10727_v18 = vcombine.low %v1049_v1, %v1057_v10  ;;  %v11731_v1 = vld [vmem:[#allocation10 + $0x280] ss:$8 sps:$4 sm:$0xff]  }
 0x48e   :  { %9850 = vmatpush1.bf16.msra.mxu0 %v11698_v45  ;;  %7643 = vmatprep.subr.bf16.mxu1 %v10648_v11  ;;  %v1081_v45 = vld [vmem:[#allocation7 + $0x12a8] sm:$0xff] }
 0x48f   :  { %9851 = vmatprep.subr.bf16.mxu0 %v11703_v16  ;;  %v1089_v11 = vld [vmem:[#allocation7 + $0x12e8] sm:$0xff]  ;;  %v10743_v16 = vcombine.low %v1065_v39, %v1073_v36 }
 0x490   :  { %v10760_v38 = vcombine.high %v1081_v45, %v1089_v11  ;;  %v11734_v39 = vld [vmem:[#allocation10 + $0x290] ss:$8 sps:$4 sm:$0xff]  }
 0x491   :  { %7644 = vmatpush1.bf16.msra.mxu1 %v10647_v41  ;;  %v11724_v41 = vld [vmem:[#allocation10 + $0x254] ss:$8 sps:$4 sm:$0xff]  }
 0x492   :  { %9852 = vmatpush1.bf16.msra.mxu0 %v11701_v57  ;;  %7645 = vmatprep.subr.bf16.mxu1 %v10664_v61  ;;  %v1097_v57 = vld [vmem:[#allocation7 + $0x1328] sm:$0xff] }
 0x493   :  { %9853 = vmatprep.subr.bf16.mxu0 %v11706_v49  ;;  %v1105_v61 = vld [vmem:[#allocation7 + $0x1368] sm:$0xff]  ;;  %v10759_v49 = vcombine.low %v1081_v45, %v1089_v11  ;;  %v11737_v45 = vld [vmem:[#allocation10 + $0x2a0] ss:$8 sps:$4 sm:$0xff]  }
 0x494   :  { %v10776_v3 = vcombine.high %v1097_v57, %v1105_v61 }
 0x495   :  { %7646 = vmatpush1.bf16.msra.mxu1 %v10663_v8  ;;  %v11727_v8 = vld [vmem:[#allocation10 + $0x264] ss:$8 sps:$4 sm:$0xff]  }
 0x496   :  { %9854 = vmatpush1.bf16.msra.mxu0 %v11704_v15  ;;  %7658 = vmatprep.subr.bf16.mxu1 %v10680_v42  ;;  %v1113_v15 = vld [vmem:[#allocation7 + $0x13a8] sm:$0xff] }
 0x497   :  { %9866 = vmatprep.subr.bf16.mxu0 %v11709_v43  ;;  %v1121_v42 = vld [vmem:[#allocation7 + $0x13e8] sm:$0xff]  ;;  %v10775_v43 = vcombine.low %v1097_v57, %v1105_v61 }
 0x498   :  { %7648 = vmatmul.mubr.bf16.vlgmr.msra.gmra.mrb[20].mxu1 %v12354_v4  ;;  %v10792_v20 = vcombine.high %v1113_v15, %v1121_v42  ;;  %v10791_v31 = vcombine.low %v1113_v15, %v1121_v42  ;;  %v11740_v57 = vld [vmem:[#allocation10 + $0x2b0] ss:$8 sps:$4 sm:$0xff]   ;;  %v11743_v15 = vld [vmem:[#allocation10 + $0x2c0] ss:$8 sps:$4 sm:$0xff]  }
 0x499   :  { %9856 = vmatmul.mubr.bf16.vlgmr.msra.gmra.mrb[20].mxu0 %v8186_v7  ;;  %7659 = vmatpush1.bf16.msra.mxu1 %v10679_v19  ;;  %v11718_v7 = vld [vmem:[#allocation10 + $0x234] ss:$8 sps:$4 sm:$0xff]  }
 0x49a   :  { %7690 = vmatprep.mubr.bf16.mxu1 %v12384_v52  ;;  %9867 = vmatpush1.bf16.msra.mxu0 %v11707_v62  ;;  %v11730_v19 = vld [vmem:[#allocation10 + $0x274] ss:$8 sps:$4 sm:$0xff]  }
 0x49b   :  { %9898 = vmatprep.mubr.bf16.mxu0 %v8189_v29  ;;  %7660 = vmatprep.subr.bf16.mxu1 %v10696_v58  ;;  %v11721_v29 = vld [vmem:[#allocation10 + $0x244] ss:$8 sps:$4 sm:$0xff]   ;;  %v1129_v62 = vld [vmem:[#allocation7 + $0x1428] sm:$0xff] }
 0x49c   :  { %9868 = vmatprep.subr.bf16.mxu0 %v11712_v34  ;;  %v1137_v58 = vld [vmem:[#allocation7 + $0x1468] sm:$0xff] }
 0x49d   :  { %7661 = vmatpush1.bf16.msra.mxu1 %v10695_v2  ;;  %v10808_v34 = vcombine.high %v1129_v62, %v1137_v58  ;;  %v11733_v2 = vld [vmem:[#allocation10 + $0x284] ss:$8 sps:$4 sm:$0xff]  }
 0x49e   :  { %9869 = vmatpush1.bf16.msra.mxu0 %v11710_v0  ;;  %7662 = vmatprep.subr.bf16.mxu1 %v10712_v21  ;;  %v1145_v0 = vld [vmem:[#allocation7 + $0x14a8] sm:$0xff] }
 0x49f   :  { %9870 = vmatprep.subr.bf16.mxu0 %v11715_v24  ;;  %v1153_v21 = vld [vmem:[#allocation7 + $0x14e8] sm:$0xff]  ;;  %v10807_v24 = vcombine.low %v1129_v62, %v1137_v58 }
 0x4a0   :  { %v10824_v10 = vcombine.high %v1145_v0, %v1153_v21  ;;  %v11746_v62 = vld [vmem:[#allocation10 + $0x2d0] ss:$8 sps:$4 sm:$0xff]  }
 0x4a1   :  { %7663 = vmatpush1.bf16.msra.mxu1 %v10711_v9  ;;  %v11736_v9 = vld [vmem:[#allocation10 + $0x294] ss:$8 sps:$4 sm:$0xff]  }
 0x4a2   :  { %9871 = vmatpush1.bf16.msra.mxu0 %v11713_v12  ;;  %7664 = vmatprep.subr.bf16.mxu1 %v10728_v22  ;;  %v1161_v12 = vld [vmem:[#allocation7 + $0x1528] sm:$0xff] }
 0x4a3   :  { %9872 = vmatprep.subr.bf16.mxu0 %v11718_v7  ;;  %v1169_v22 = vld [vmem:[#allocation7 + $0x1568] sm:$0xff]  ;;  %v10823_v7 = vcombine.low %v1145_v0, %v1153_v21  ;;  %v11749_v0 = vld [vmem:[#allocation10 + $0x2e0] ss:$8 sps:$4 sm:$0xff]  }
 0x4a4   :  { %v10840_v36 = vcombine.high %v1161_v12, %v1169_v22 }
 0x4a5   :  { %7665 = vmatpush1.bf16.msra.mxu1 %v10727_v18  ;;  %v11739_v18 = vld [vmem:[#allocation10 + $0x2a4] ss:$8 sps:$4 sm:$0xff]  }
 0x4a6   :  { %9873 = vmatpush1.bf16.msra.mxu0 %v11716_v26  ;;  %7666 = vmatprep.subr.bf16.mxu1 %v10744_v27  ;;  %v1177_v26 = vld [vmem:[#allocation7 + $0x15a8] sm:$0xff] }
 0x4a7   :  { %9874 = vmatprep.subr.bf16.mxu0 %v11721_v29  ;;  %v1185_v27 = vld [vmem:[#allocation7 + $0x15e8] sm:$0xff]  ;;  %v10839_v29 = vcombine.low %v1161_v12, %v1169_v22 }
 0x4a8   :  { %v10856_v11 = vcombine.high %v1177_v26, %v1185_v27  ;;  %v11752_v12 = vld [vmem:[#allocation10 + $0x2f0] ss:$8 sps:$4 sm:$0xff]  }
 0x4a9   :  { %7667 = vmatpush1.bf16.msra.mxu1 %v10743_v16  ;;  %v11742_v16 = vld [vmem:[#allocation10 + $0x2b4] ss:$8 sps:$4 sm:$0xff]  }
 0x4aa   :  { %9875 = vmatpush1.bf16.msra.mxu0 %v11719_v13  ;;  %7668 = vmatprep.subr.bf16.mxu1 %v10760_v38  ;;  %v1193_v13 = vld [vmem:[#allocation7 + $0x1628] sm:$0xff] }
 0x4ab   :  { %9876 = vmatprep.subr.bf16.mxu0 %v11724_v41  ;;  %v1201_v38 = vld [vmem:[#allocation7 + $0x1668] sm:$0xff]  ;;  %v10855_v41 = vcombine.low %v1177_v26, %v1185_v27  ;;  %v11755_v26 = vld [vmem:[#allocation10 + $0x300] ss:$8 sps:$4 sm:$0xff]  }
 0x4ac   :  { %v10872_v61 = vcombine.high %v1193_v13, %v1201_v38 }
 0x4ad   :  { %7669 = vmatpush1.bf16.msra.mxu1 %v10759_v49  ;;  %v11745_v49 = vld [vmem:[#allocation10 + $0x2c4] ss:$8 sps:$4 sm:$0xff]  }
 0x4ae   :  { %9877 = vmatpush1.bf16.msra.mxu0 %v11722_v59  ;;  %7670 = vmatprep.subr.bf16.mxu1 %v10776_v3  ;;  %v1209_v59 = vld [vmem:[#allocation7 + $0x16a8] sm:$0xff] }
 0x4af   :  { %9878 = vmatprep.subr.bf16.mxu0 %v11727_v8  ;;  %v1217_v3 = vld [vmem:[#allocation7 + $0x16e8] sm:$0xff]  ;;  %v10871_v8 = vcombine.low %v1193_v13, %v1201_v38 }
 0x4b0   :  { %v10888_v42 = vcombine.high %v1209_v59, %v1217_v3  ;;  %v11758_v13 = vld [vmem:[#allocation10 + $0x310] ss:$8 sps:$4 sm:$0xff]  }
 0x4b1   :  { %7671 = vmatpush1.bf16.msra.mxu1 %v10775_v43  ;;  %v11748_v43 = vld [vmem:[#allocation10 + $0x2d4] ss:$8 sps:$4 sm:$0xff]  }
 0x4b2   :  { %9879 = vmatpush1.bf16.msra.mxu0 %v11725_v6  ;;  %7672 = vmatprep.subr.bf16.mxu1 %v10792_v20  ;;  %v1225_v6 = vld [vmem:[#allocation7 + $0x1728] sm:$0xff] }
 0x4b3   :  { %9880 = vmatprep.subr.bf16.mxu0 %v11730_v19  ;;  %v1233_v20 = vld [vmem:[#allocation7 + $0x1768] sm:$0xff]  ;;  %v10887_v19 = vcombine.low %v1209_v59, %v1217_v3  ;;  %v11761_v59 = vld [vmem:[#allocation10 + $0x320] ss:$8 sps:$4 sm:$0xff]  }
 0x4b4   :  { %v10904_v58 = vcombine.high %v1225_v6, %v1233_v20 }
 0x4b5   :  { %7673 = vmatpush1.bf16.msra.mxu1 %v10791_v31  ;;  %v11751_v31 = vld [vmem:[#allocation10 + $0x2e4] ss:$8 sps:$4 sm:$0xff]  }
 0x4b6   :  { %9881 = vmatpush1.bf16.msra.mxu0 %v11728_v51  ;;  %7674 = vmatprep.subr.bf16.mxu1 %v10808_v34  ;;  %v1241_v51 = vld [vmem:[#allocation7 + $0x17a8] sm:$0xff] }
 0x4b7   :  { %9882 = vmatprep.subr.bf16.mxu0 %v11733_v2  ;;  %v1249_v34 = vld [vmem:[#allocation7 + $0x17e8] sm:$0xff]  ;;  %v10903_v2 = vcombine.low %v1225_v6, %v1233_v20 }
 0x4b8   :  { %v10920_v21 = vcombine.high %v1241_v51, %v1249_v34  ;;  %v1337_v6 = vld [vmem:[#allocation7 + $0x1aa8] sm:$0xff] }
 0x4b9   :  { %7675 = vmatpush1.bf16.msra.mxu1 %v10807_v24  ;;  %v11754_v24 = vld [vmem:[#allocation10 + $0x2f4] ss:$8 sps:$4 sm:$0xff]  }
 0x4ba   :  { %9883 = vmatpush1.bf16.msra.mxu0 %v11731_v1  ;;  %7676 = vmatprep.subr.bf16.mxu1 %v10824_v10  ;;  %v1257_v1 = vld [vmem:[#allocation7 + $0x1828] sm:$0xff] }
 0x4bb   :  { %9884 = vmatprep.subr.bf16.mxu0 %v11736_v9  ;;  %v1265_v10 = vld [vmem:[#allocation7 + $0x1868] sm:$0xff]  ;;  %v10919_v9 = vcombine.low %v1241_v51, %v1249_v34 }
 0x4bc   :  { %v10936_v22 = vcombine.high %v1257_v1, %v1265_v10  ;;  %v1345_v20 = vld [vmem:[#allocation7 + $0x1ae8] sm:$0xff] }
 0x4bd   :  { %7677 = vmatpush1.bf16.msra.mxu1 %v10823_v7  ;;  %v11757_v7 = vld [vmem:[#allocation10 + $0x304] ss:$8 sps:$4 sm:$0xff]   ;;  %v1353_v51 = vld [vmem:[#allocation7 + $0x1b28] sm:$0xff] }
 0x4be   :  { %9885 = vmatpush1.bf16.msra.mxu0 %v11734_v39  ;;  %7678 = vmatprep.subr.bf16.mxu1 %v10840_v36  ;;  %v1273_v39 = vld [vmem:[#allocation7 + $0x18a8] sm:$0xff] }
 0x4bf   :  { %9886 = vmatprep.subr.bf16.mxu0 %v11739_v18  ;;  %v1281_v36 = vld [vmem:[#allocation7 + $0x18e8] sm:$0xff]  ;;  %v10935_v18 = vcombine.low %v1257_v1, %v1265_v10  ;;  %v11015_v10 = vcombine.low %v1337_v6, %v1345_v20 }
 0x4c0   :  { %v10952_v27 = vcombine.high %v1273_v39, %v1281_v36  ;;  %v1361_v34 = vld [vmem:[#allocation7 + $0x1b68] sm:$0xff] }
 0x4c1   :  { %7679 = vmatpush1.bf16.msra.mxu1 %v10839_v29  ;;  %v11760_v29 = vld [vmem:[#allocation10 + $0x314] ss:$8 sps:$4 sm:$0xff]  }
 0x4c2   :  { %9887 = vmatpush1.bf16.msra.mxu0 %v11737_v45  ;;  %7680 = vmatprep.subr.bf16.mxu1 %v10856_v11  ;;  %v1289_v45 = vld [vmem:[#allocation7 + $0x1928] sm:$0xff] }
 0x4c3   :  { %9888 = vmatprep.subr.bf16.mxu0 %v11742_v16  ;;  %v1297_v11 = vld [vmem:[#allocation7 + $0x1968] sm:$0xff]  ;;  %v10951_v16 = vcombine.low %v1273_v39, %v1281_v36  ;;  %v11775_v39 = vld [vmem:[#allocation10 + $0x364] ss:$8 sps:$4 sm:$0xff]  }
 0x4c4   :  { %v10968_v38 = vcombine.high %v1289_v45, %v1297_v11  ;;  %v1369_v36 = vld [vmem:[#allocation7 + $0x1ba8] sm:$0xff] }
 0x4c5   :  { %7681 = vmatpush1.bf16.msra.mxu1 %v10855_v41  ;;  %v11763_v41 = vld [vmem:[#allocation10 + $0x324] ss:$8 sps:$4 sm:$0xff]  }
 0x4c6   :  { %9889 = vmatpush1.bf16.msra.mxu0 %v11740_v57  ;;  %7682 = vmatprep.subr.bf16.mxu1 %v10872_v61  ;;  %v1305_v57 = vld [vmem:[#allocation7 + $0x19a8] sm:$0xff] }
 0x4c7   :  { %9890 = vmatprep.subr.bf16.mxu0 %v11745_v49  ;;  %v1313_v61 = vld [vmem:[#allocation7 + $0x19e8] sm:$0xff]  ;;  %v10967_v49 = vcombine.low %v1289_v45, %v1297_v11 }
 0x4c8   :  { %v10984_v3 = vcombine.high %v1305_v57, %v1313_v61  ;;  %v12602_v45 = vld [vmem:[#allocation7 + $0x1c28] sm:$0xff] }
 0x4c9   :  { %7683 = vmatpush1.bf16.msra.mxu1 %v10871_v8  ;;  %v10983_v8 = vcombine.low %v1305_v57, %v1313_v61 }
 0x4ca   :  { %9891 = vmatpush1.bf16.msra.mxu0 %v11743_v15  ;;  %7684 = vmatprep.subr.bf16.mxu1 %v10888_v42  ;;  %v11764_v15 = vld [vmem:[#allocation10 + $0x330] ss:$8 sps:$4 sm:$0xff]  }
 0x4cb   :  { %9892 = vmatprep.subr.bf16.mxu0 %v11748_v43  ;;  %v11769_v43 = vld [vmem:[#allocation10 + $0x344] ss:$8 sps:$4 sm:$0xff]  }
 0x4cd   :  { %7685 = vmatpush1.bf16.msra.mxu1 %v10887_v19 }
 0x4ce   :  { %9893 = vmatpush1.bf16.msra.mxu0 %v11746_v62  ;;  %7686 = vmatprep.subr.bf16.mxu1 %v10904_v58  ;;  %v11767_v62 = vld [vmem:[#allocation10 + $0x340] ss:$8 sps:$4 sm:$0xff]   ;;  %v11016_v58 = vcombine.high %v1337_v6, %v1345_v20 }
 0x4cf   :  { %9894 = vmatprep.subr.bf16.mxu0 %v11751_v31  ;;  %v11772_v31 = vld [vmem:[#allocation10 + $0x354] ss:$8 sps:$4 sm:$0xff]  }
 0x4d1   :  { %7687 = vmatpush1.bf16.msra.mxu1 %v10903_v2  ;;  %v11996_v2 = vld [vmem:[#allocation8] sm:$0xff] }
 0x4d2   :  { %9895 = vmatpush1.bf16.msra.mxu0 %v11749_v0  ;;  %7688 = vmatprep.subr.bf16.mxu1 %v10920_v21  ;;  %v1539_v0 = vrot.slane %v11996_v2, %v12387_v30  ;;  %v11997_v21 = vld [vmem:[#allocation8 + $0x8] sm:$0xff]  ;;  %v1543_v1 = vrot.slane %v11996_v2, %v12390_v33 }
 0x4d3   :  { %9896 = vmatprep.subr.bf16.mxu0 %v11754_v24  ;;  %v1563_v24 = vrot.slane %v11997_v21, %v12316_v55  ;;  %v12604_v55 = vld [vmem:[#allocation7 + $0x1c68] sm:$0xff] }
 0x4d4   :  { %v1409_v2 = vld [vmem:[#allocation7 + $0x1ce8] sm:$0xff] }
 0x4d5   :  { %7689 = vmatpush1.bf16.msra.mxu1 %v10919_v9  ;;  %v1567_v9 = vrot.slane %v11997_v21, %v12319_v56  ;;  %v11031_v56 = vcombine.low %v1353_v51, %v1361_v34 }
 0x4d6   :  { %9897 = vmatpush1.bf16.msra.mxu0 %v11752_v12  ;;  %7701 = vmatprep.subr.bf16.mxu1 %v10936_v22  ;;  %v11770_v12 = vld [vmem:[#allocation10 + $0x350] ss:$8 sps:$4 sm:$0xff]   ;;  %v11032_v22 = vcombine.high %v1353_v51, %v1361_v34 }
 0x4d7   :  { %9909 = vmatprep.subr.bf16.mxu0 %v11757_v7  ;;  %v1401_v34 = vld [vmem:[#allocation7 + $0x1ca8] sm:$0xff] }
 0x4d8   :  { %7691 = vmatmul.mubr.bf16.vlgmr.msra.gmra.mrb[20].mxu1 %v12382_v14 }
 0x4d9   :  { %9899 = vmatmul.mubr.bf16.vlgmr.msra.gmra.mrb[20].mxu0 %v8188_v17  ;;  %7702 = vmatpush1.bf16.msra.mxu1 %v10935_v18  ;;  %v1329_v17 = vld [vmem:[#allocation7 + $0x1a68] sm:$0xff] }
 0x4da   :  { %7733 = vmatprep.mubr.bf16.mxu1 %v12398_v54  ;;  %9910 = vmatpush1.bf16.msra.mxu0 %v11755_v26  ;;  %v11000_v42 = vcombine.high %v1321_v63, %v1329_v17  ;;  %v10999_v19 = vcombine.low %v1321_v63, %v1329_v17  ;;  %v1377_v18 = vld [vmem:[#allocation7 + $0x1be8] sm:$0xff] }
 0x4db   :  { %7703 = vmatprep.subr.bf16.mxu1 %v10952_v27  ;;  %9911 = vmatprep.subr.bf16.mxu0 %v11760_v29  ;;  %v11047_v63 = vcombine.low %v1369_v36, %v1377_v18  ;;  %v11778_v17 = vld [vmem:[#allocation10 + $0x374] ss:$8 sps:$4 sm:$0xff]  }
 0x4dd   :  { %7704 = vmatpush1.bf16.msra.mxu1 %v10951_v16 }
 0x4de   :  { %9912 = vmatpush1.bf16.msra.mxu0 %v11758_v13  ;;  %7705 = vmatprep.subr.bf16.mxu1 %v10968_v38 }
 0x4df   :  { %9913 = vmatprep.subr.bf16.mxu0 %v11763_v41 }
 0x4e1   :  { %7706 = vmatpush1.bf16.msra.mxu1 %v10967_v49 }
 0x4e2   :  { %9914 = vmatpush1.bf16.msra.mxu0 %v11761_v59  ;;  %7707 = vmatprep.subr.bf16.mxu1 %v10984_v3  ;;  %v11773_v3 = vld [vmem:[#allocation10 + $0x360] ss:$8 sps:$4 sm:$0xff]  }
 0x4e3   :  { %9915 = vmatprep.subr.bf16.mxu0 %v11766_v40  ;;  %v11048_v40 = vcombine.high %v1369_v36, %v1377_v18 }
 0x4e5   :  { %7708 = vmatpush1.bf16.msra.mxu1 %v10983_v8  ;;  %v11064_v8 = vcombine.high %v12602_v45, %v12604_v55 }
 0x4e6   :  { %9916 = vmatpush1.bf16.msra.mxu0 %v11764_v15  ;;  %7709 = vmatprep.subr.bf16.mxu1 %v11000_v42 }
 0x4e7   :  { %9917 = vmatprep.subr.bf16.mxu0 %v11769_v43 }
 0x4e9   :  { %7710 = vmatpush1.bf16.msra.mxu1 %v10999_v19 }
 0x4ea   :  { %9918 = vmatpush1.bf16.msra.mxu0 %v11767_v62  ;;  %7711 = vmatprep.subr.bf16.mxu1 %v11016_v58  ;;  %v11776_v62 = vld [vmem:[#allocation10 + $0x370] ss:$8 sps:$4 sm:$0xff]  }
 0x4eb   :  { %v7391_v7 = vpop.f32.mrb[16].mxu1  ;;  %9919 = vmatprep.subr.bf16.mxu0 %v11772_v31 }
 0x4ec   :  { %v11449_v26 = vadd.f32 %v7391_v7, %v1539_v0  ;;  %v7907_v27 = vpop.f32.mrb[16].mxu0  ;;  %v7393_v29 = vpop.f32.mrb[17].mxu1  ;;  %v11063_v7 = vcombine.low %v12602_v45, %v12604_v55 }
 0x4ed   :  { %v11461_v11 = vadd.f32 %v7907_v27, %v1563_v24  ;;  %v11450_v16 = vadd.f32 %v7393_v29, %v1543_v1  ;;  %v7909_v13 = vpop.f32.mrb[17].mxu0  ;;  %v7395_v38 = vpop.f32.mrb[18].mxu1  ;;  %7712 = vmatpush1.bf16.msra.mxu1 %v11015_v10  ;;  %v11779_v27 = vld [vmem:[#allocation10 + $0x380] ss:$8 sps:$4 sm:$0xff]  }
 0x4ee   :  { %v8126_v41 = vmul.f32 0.01, %v11449_v26  ;;  %v11462_v57 = vadd.f32 %v7909_v13, %v1567_v9  ;;  %v11451_v61 = vadd.f32 %v7395_v38, %v1539_v0  ;;  %v7911_v49 = vpop.f32.mrb[18].mxu0  ;;  %9920 = vmatpush1.bf16.msra.mxu0 %v11770_v12  ;;  %v7397_v59 = vpop.f32.mrb[19].mxu1  ;;  %7713 = vmatprep.subr.bf16.mxu1 %v11032_v22  ;;  %vm8094_vm1 = vcmp.gt.f32.partialorder %v11449_v26, 0.0  ;;  %v1417_v13 = vld [vmem:[#allocation7 + $0x1d28] sm:$0xff] }
 0x4ef   :  { %9921 = vmatprep.subr.bf16.mxu0 %v11775_v39  ;;  %vm8100_vm2 = vcmp.gt.f32.partialorder %v11461_v11, 0.0  ;;  %v8132_v15 = vmul.f32 0.01, %v11461_v11  ;;  %vm8095_vm3 = vcmp.gt.f32.partialorder %v11450_v16, 0.0  ;;  %v7913_v42 = vpop.f32.mrb[19].mxu0  ;;  %v11463_v20 = vadd.f32 %v7911_v49, %v1563_v24  ;;  %v1425_v38 = vld [vmem:[#allocation7 + $0x1d68] sm:$0xff] }
 0x4f0   :  { %vm8110_vm4 = vcmp.gt.f32.partialorder %v11451_v61, 0.0  ;;  %v8127_v43 = vmul.f32 0.01, %v11450_v16  ;;  %v8142_v6 = vmul.f32 0.01, %v11451_v61  ;;  %v11452_v19 = vadd.f32 %v7397_v59, %v1543_v1  ;;  %v1433_v59 = vld [vmem:[#allocation7 + $0x1da8] sm:$0xff] }
 0x4f1   :  { %7714 = vmatpush1.bf16.msra.mxu1 %v11031_v56  ;;  %v12609_v58 = vsel %vm8094_vm1, %v11449_v26, %v8126_v41  ;;  %vm8101_vm5 = vcmp.gt.f32.partialorder %v11462_v57, 0.0  ;;  %v8133_v31 = vmul.f32 0.01, %v11462_v57  ;;  %v11464_v51 = vadd.f32 %v7913_v42, %v1567_v9  ;;  %v11781_v24 = vld [vmem:[#allocation10 + $0x384] ss:$8 sps:$4 sm:$0xff]  }
 0x4f2   :  { %9922 = vmatpush1.bf16.msra.mxu0 %v11773_v3  ;;  %7715 = vmatprep.subr.bf16.mxu1 %v11048_v40  ;;  %v12612_v0 = vsel %vm8110_vm4, %v11451_v61, %v8142_v6  ;;  %vm8116_vm6 = vcmp.gt.f32.partialorder %v11463_v20, 0.0  ;;  %v8148_v21 = vmul.f32 0.01, %v11463_v20  ;;  %vm8111_vm7 = vcmp.gt.f32.partialorder %v11452_v19, 0.0  ;;  %v11782_v41 = vld [vmem:[#allocation10 + $0x390] ss:$8 sps:$4 sm:$0xff]  }
 0x4f3   :  { %9923 = vmatprep.subr.bf16.mxu0 %v11778_v17  ;;  %v8190_v1 = vpack.c.bf16 %v12612_v0, %v12609_v58  ;;  %v8143_v10 = vmul.f32 0.01, %v11452_v19  ;;  %vm8117_vm8 = vcmp.gt.f32.partialorder %v11464_v51, 0.0  ;;  %v8149_v12 = vmul.f32 0.01, %v11464_v51  ;;  %v1441_v3 = vld [vmem:[#allocation7 + $0x1de8] sm:$0xff] }
 0x4f4   :  { %v12617_v9 = vsel %vm8100_vm2, %v11461_v11, %v8132_v15  ;;  %v12619_v22 = vsel %vm8116_vm6, %v11463_v20, %v8148_v21  ;;  %v11080_v39 = vcombine.high %v1401_v34, %v1409_v2  ;;  %v8159_v18 = vsel %vm8095_vm3, %v11450_v16, %v8127_v43  ;;  %v11784_v11 = vld [vmem:[#allocation10 + $0x394] ss:$8 sps:$4 sm:$0xff]   ;;  %v11787_v49 = vld [vmem:[#allocation10 + $0x3a4] ss:$8 sps:$4 sm:$0xff]   ;;  %v11785_v40 = vld [vmem:[#allocation10 + $0x3a0] ss:$8 sps:$4 sm:$0xff]  }
 0x4f5   :  { %7716 = vmatpush1.bf16.msra.mxu1 %v11047_v63  ;;  %v8196_v36 = vpack.c.bf16 %v12619_v22, %v12617_v9  ;;  %v8175_v26 = vsel %vm8111_vm7, %v11452_v19, %v8143_v10  ;;  %v12627_v56 = vsel %vm8101_vm5, %v11462_v57, %v8133_v31  ;;  %v12630_v45 = vsel %vm8117_vm8, %v11464_v51, %v8149_v12  ;;  %v11790_v17 = vld [vmem:[#allocation10 + $0x3b4] ss:$8 sps:$4 sm:$0xff]   ;;  %v11788_v43 = vld [vmem:[#allocation10 + $0x3b0] ss:$8 sps:$4 sm:$0xff]   ;;  %v11793_v20 = vld [vmem:[#allocation10 + $0x3c4] ss:$8 sps:$4 sm:$0xff]  }
 0x4f6   :  { %9924 = vmatpush1.bf16.msra.mxu0 %v11776_v62  ;;  %7717 = vmatprep.subr.bf16.mxu1 %v11064_v8  ;;  %v8191_v29 = vpack.c.bf16 %v8175_v26, %v8159_v18  ;;  %v8197_v55 = vpack.c.bf16 %v12630_v45, %v12627_v56  ;;  %v11079_v16 = vcombine.low %v1401_v34, %v1409_v2  ;;  %v1449_v8 = vld [vmem:[#allocation7 + $0x1e28] sm:$0xff]  ;;  %v11791_v51 = vld [vmem:[#allocation10 + $0x3c0] ss:$8 sps:$4 sm:$0xff]   ;;  %v11967_v9 = vld [vmem:[#allocation10 + $0x764] ss:$8 sps:$4 sm:$0xff]  }
 0x4f7   :  { %9925 = vmatprep.subr.bf16.mxu0 %v11781_v24  ;;  %v11096_v61 = vcombine.high %v1417_v13, %v1425_v38  ;;  %v11095_v57 = vcombine.low %v1417_v13, %v1425_v38  ;;  %v11112_v63 = vcombine.high %v1433_v59, %v1441_v3  ;;  %v1457_v15 = vld [vmem:[#allocation7 + $0x1e68] sm:$0xff]  ;;  %v11111_v42 = vcombine.low %v1433_v59, %v1441_v3  ;;  %v491_v38 = vld [vmem:[#allocation7 + $0x38] sm:$0xff] }
 0x4f8   :  { %9941 = vmatprep.mubr.bf16.mxu0 %v8191_v29  ;;  %v11128_v6 = vcombine.high %v1449_v8, %v1457_v15  ;;  %v1465_v19 = vld [vmem:[#allocation7 + $0x1ea8] sm:$0xff]  ;;  %v11127_v31 = vcombine.low %v1449_v8, %v1457_v15  ;;  %v11797_v29 = vld [vmem:[#allocation10 + $0x3e0] ss:$8 sps:$4 sm:$0xff]   ;;  %v11805_v59 = vld [vmem:[#allocation10 + $0x404] ss:$8 sps:$4 sm:$0xff]  }
 0x4f9   :  { %7718 = vmatpush1.bf16.msra.mxu1 %v11063_v7  ;;  %v1473_v62 = vld [vmem:[#allocation7 + $0x1ee8] sm:$0xff]  ;;  %v507_v3 = vld [vmem:[#allocation7 + $0xb8] sm:$0xff] }
 0x4fa   :  { %9926 = vmatpush1.bf16.msra.mxu0 %v11779_v27  ;;  %7719 = vmatprep.subr.bf16.mxu1 %v11080_v39  ;;  %v11144_v34 = vcombine.high %v1465_v19, %v1473_v62  ;;  %v11796_v2 = vld [vmem:[#allocation10 + $0x3d4] ss:$8 sps:$4 sm:$0xff]   ;;  %v11143_v10 = vcombine.low %v1465_v19, %v1473_v62  ;;  %v11794_v12 = vld [vmem:[#allocation10 + $0x3d0] ss:$8 sps:$4 sm:$0xff]   ;;  %v11799_v39 = vld [vmem:[#allocation10 + $0x3e4] ss:$8 sps:$4 sm:$0xff]  }
 0x4fb   :  { %9927 = vmatprep.subr.bf16.mxu0 %v11784_v11  ;;  %v1481_v21 = vld [vmem:[#allocation7 + $0x1f28] sm:$0xff]  ;;  %v523_v8 = vld [vmem:[#allocation7 + $0x138] sm:$0xff] }
 0x4fc   :  { %v1489_v24 = vld [vmem:[#allocation7 + $0x1f68] sm:$0xff]  ;;  %v531_v15 = vld [vmem:[#allocation7 + $0x178] sm:$0xff] }
 0x4fd   :  { %7720 = vmatpush1.bf16.msra.mxu1 %v11079_v16  ;;  %v11160_v7 = vcombine.high %v1481_v21, %v1489_v24  ;;  %v1497_v18 = vld [vmem:[#allocation7 + $0x1fa8] sm:$0xff]  ;;  %v11159_v27 = vcombine.low %v1481_v21, %v1489_v24  ;;  %v499_v16 = vld [vmem:[#allocation7 + $0x78] sm:$0xff] }
 0x4fe   :  { %9928 = vmatpush1.bf16.msra.mxu0 %v11782_v41  ;;  %7721 = vmatprep.subr.bf16.mxu1 %v11096_v61  ;;  %v1505_v26 = vld [vmem:[#allocation7 + $0x1fe8] sm:$0xff]  ;;  %v11811_v19 = vld [vmem:[#allocation10 + $0x424] ss:$8 sps:$4 sm:$0xff]   ;;  %v11809_v58 = vld [vmem:[#allocation10 + $0x420] ss:$8 sps:$4 sm:$0xff]  }
 0x4ff   :  { %9929 = vmatprep.subr.bf16.mxu0 %v11787_v49  ;;  %v11176_v11 = vcombine.high %v1497_v18, %v1505_v26  ;;  %v11802_v13 = vld [vmem:[#allocation10 + $0x3f4] ss:$8 sps:$4 sm:$0xff]   ;;  %v11175_v41 = vcombine.low %v1497_v18, %v1505_v26  ;;  %v11800_v61 = vld [vmem:[#allocation10 + $0x3f0] ss:$8 sps:$4 sm:$0xff]   ;;  %v10172_v49 = vcombine.high %v491_v38, %v499_v16  ;;  %v539_v62 = vld [vmem:[#allocation7 + $0x1b8] sm:$0xff] }
 0x500   :  { %v571_v21 = vld [vmem:[#allocation7 + $0x2b8] sm:$0xff]  ;;  %v11908_v45 = vld [vmem:[#allocation10 + $0x630] ss:$8 sps:$4 sm:$0xff]  }
 0x501   :  { %7722 = vmatpush1.bf16.msra.mxu1 %v11095_v57  ;;  %v515_v57 = vld [vmem:[#allocation7 + $0xf8] sm:$0xff] }
 0x502   :  { %9930 = vmatpush1.bf16.msra.mxu0 %v11785_v40  ;;  %7723 = vmatprep.subr.bf16.mxu1 %v11112_v63  ;;  %v10171_v40 = vcombine.low %v491_v38, %v499_v16  ;;  %v11803_v63 = vld [vmem:[#allocation10 + $0x400] ss:$8 sps:$4 sm:$0xff]  }
 0x503   :  { %9931 = vmatprep.subr.bf16.mxu0 %v11790_v17  ;;  %v10188_v17 = vcombine.high %v507_v3, %v515_v57  ;;  %v579_v24 = vld [vmem:[#allocation7 + $0x2f8] sm:$0xff] }
 0x504   :  { %v587_v18 = vld [vmem:[#allocation7 + $0x338] sm:$0xff] }
 0x505   :  { %7724 = vmatpush1.bf16.msra.mxu1 %v11111_v42  ;;  %v11808_v42 = vld [vmem:[#allocation10 + $0x414] ss:$8 sps:$4 sm:$0xff]   ;;  %v595_v26 = vld [vmem:[#allocation7 + $0x378] sm:$0xff] }
 0x506   :  { %9932 = vmatpush1.bf16.msra.mxu0 %v11788_v43  ;;  %7725 = vmatprep.subr.bf16.mxu1 %v11128_v6  ;;  %v10187_v43 = vcombine.low %v507_v3, %v515_v57  ;;  %v11806_v6 = vld [vmem:[#allocation10 + $0x410] ss:$8 sps:$4 sm:$0xff]   ;;  %v603_v38 = vld [vmem:[#allocation7 + $0x3b8] sm:$0xff] }
 0x507   :  { %9933 = vmatprep.subr.bf16.mxu0 %v11793_v20  ;;  %v10204_v20 = vcombine.high %v523_v8, %v531_v15  ;;  %v611_v16 = vld [vmem:[#allocation7 + $0x3f8] sm:$0xff] }
 0x508   :  { %v619_v3 = vld [vmem:[#allocation7 + $0x438] sm:$0xff] }
 0x509   :  { %7726 = vmatpush1.bf16.msra.mxu1 %v11127_v31  ;;  %v547_v31 = vld [vmem:[#allocation7 + $0x1f8] sm:$0xff] }
 0x50a   :  { %9934 = vmatpush1.bf16.msra.mxu0 %v11791_v51  ;;  %7727 = vmatprep.subr.bf16.mxu1 %v11144_v34  ;;  %v10203_v51 = vcombine.low %v523_v8, %v531_v15  ;;  %v10220_v0 = vcombine.high %v539_v62, %v547_v31  ;;  %v563_v34 = vld [vmem:[#allocation7 + $0x278] sm:$0xff] }
 0x50b   :  { %9935 = vmatprep.subr.bf16.mxu0 %v11796_v2  ;;  %v10219_v2 = vcombine.low %v539_v62, %v547_v31  ;;  %v627_v57 = vld [vmem:[#allocation7 + $0x478] sm:$0xff] }
 0x50c   :  { %v11829_v8 = vld [vmem:[#allocation10 + $0x484] ss:$8 sps:$4 sm:$0xff]   ;;  %v11965_v22 = vld [vmem:[#allocation10 + $0x760] ss:$8 sps:$4 sm:$0xff]  }
 0x50d   :  { %7728 = vmatpush1.bf16.msra.mxu1 %v11143_v10  ;;  %v635_v15 = vld [vmem:[#allocation7 + $0x4b8] sm:$0xff] }
 0x50e   :  { %9936 = vmatpush1.bf16.msra.mxu0 %v11794_v12  ;;  %7729 = vmatprep.subr.bf16.mxu1 %v11160_v7  ;;  %v11815_v12 = vld [vmem:[#allocation10 + $0x440] ss:$8 sps:$4 sm:$0xff]   ;;  %v10252_v7 = vcombine.high %v571_v21, %v579_v24 }
 0x50f   :  { %9937 = vmatprep.subr.bf16.mxu0 %v11799_v39  ;;  %v11820_v39 = vld [vmem:[#allocation10 + $0x454] ss:$8 sps:$4 sm:$0xff]   ;;  %v651_v62 = vld [vmem:[#allocation7 + $0x538] sm:$0xff] }
 0x510   :  { %v659_v31 = vld [vmem:[#allocation7 + $0x578] sm:$0xff] }
 0x511   :  { %7730 = vmatpush1.bf16.msra.mxu1 %v11159_v27  ;;  %v10251_v27 = vcombine.low %v571_v21, %v579_v24  ;;  %v683_v21 = vld [vmem:[#allocation7 + $0x638] sm:$0xff] }
 0x512   :  { %9938 = vmatpush1.bf16.msra.mxu0 %v11797_v29  ;;  %7731 = vmatprep.subr.bf16.mxu1 %v11176_v11  ;;  %v11818_v29 = vld [vmem:[#allocation10 + $0x450] ss:$8 sps:$4 sm:$0xff]   ;;  %v10268_v11 = vcombine.high %v587_v18, %v595_v26  ;;  %v691_v24 = vld [vmem:[#allocation7 + $0x678] sm:$0xff] }
 0x513   :  { %9939 = vmatprep.subr.bf16.mxu0 %v11802_v13  ;;  %v11823_v13 = vld [vmem:[#allocation10 + $0x464] ss:$8 sps:$4 sm:$0xff]  }
 0x514   :  { %v1459_v56 = vld [vmem:[#allocation7 + $0x1e78] sm:$0xff] }
 0x515   :  { %7732 = vmatpush1.bf16.msra.mxu1 %v11175_v41  ;;  %v10267_v41 = vcombine.low %v587_v18, %v595_v26  ;;  %v699_v18 = vld [vmem:[#allocation7 + $0x6b8] sm:$0xff] }
 0x516   :  { %9940 = vmatpush1.bf16.msra.mxu0 %v11800_v61  ;;  %7916 = vmatprep.subr.bf16.mxu1 %v10172_v49  ;;  %v11821_v61 = vld [vmem:[#allocation10 + $0x460] ss:$8 sps:$4 sm:$0xff]   ;;  %v10284_v49 = vcombine.high %v603_v38, %v611_v16 }
 0x517   :  { %9952 = vmatprep.subr.bf16.mxu0 %v11805_v59  ;;  %v11826_v59 = vld [vmem:[#allocation10 + $0x474] ss:$8 sps:$4 sm:$0xff]   ;;  %v707_v26 = vld [vmem:[#allocation7 + $0x6f8] sm:$0xff] }
 0x518   :  { %7734 = vmatmul.mubr.bf16.vlgmr.msra.gmra.mrb[20].mxu1 %v12396_v53 }
 0x519   :  { %9942 = vmatmul.mubr.bf16.vlgmr.msra.gmra.mrb[20].mxu0 %v8190_v1  ;;  %7917 = vmatpush1.bf16.msra.mxu1 %v10171_v40  ;;  %v555_v1 = vld [vmem:[#allocation7 + $0x238] sm:$0xff]  ;;  %v10283_v40 = vcombine.low %v603_v38, %v611_v16 }
 0x51a   :  { %7948 = vmatprep.mubr.bf16.mxu1 %v12345_v32  ;;  %9953 = vmatpush1.bf16.msra.mxu0 %v11803_v63  ;;  %v11814_v32 = vld [vmem:[#allocation10 + $0x434] ss:$8 sps:$4 sm:$0xff]   ;;  %v10236_v28 = vcombine.high %v555_v1, %v563_v34  ;;  %v10235_v10 = vcombine.low %v555_v1, %v563_v34  ;;  %v11824_v63 = vld [vmem:[#allocation10 + $0x470] ss:$8 sps:$4 sm:$0xff]   ;;  %v667_v1 = vld [vmem:[#allocation7 + $0x5b8] sm:$0xff] }
 0x51b   :  { %9984 = vmatprep.mubr.bf16.mxu0 %v8193_v37  ;;  %7918 = vmatprep.subr.bf16.mxu1 %v10188_v17  ;;  %v11817_v37 = vld [vmem:[#allocation10 + $0x444] ss:$8 sps:$4 sm:$0xff]   ;;  %v10300_v17 = vcombine.high %v619_v3, %v627_v57 }
 0x51c   :  { %9954 = vmatprep.subr.bf16.mxu0 %v11808_v42  ;;  %v643_v42 = vld [vmem:[#allocation7 + $0x4f8] sm:$0xff] }
 0x51d   :  { %7919 = vmatpush1.bf16.msra.mxu1 %v10187_v43  ;;  %v10299_v43 = vcombine.low %v619_v3, %v627_v57  ;;  %v675_v34 = vld [vmem:[#allocation7 + $0x5f8] sm:$0xff] }
 0x51e   :  { %9955 = vmatpush1.bf16.msra.mxu0 %v11806_v6  ;;  %7920 = vmatprep.subr.bf16.mxu1 %v10204_v20  ;;  %v11827_v6 = vld [vmem:[#allocation10 + $0x480] ss:$8 sps:$4 sm:$0xff]   ;;  %v10316_v20 = vcombine.high %v635_v15, %v643_v42 }
 0x51f   :  { %9956 = vmatprep.subr.bf16.mxu0 %v11811_v19  ;;  %v11832_v19 = vld [vmem:[#allocation10 + $0x494] ss:$8 sps:$4 sm:$0xff]   ;;  %v715_v38 = vld [vmem:[#allocation7 + $0x738] sm:$0xff] }
 0x520   :  { %v723_v16 = vld [vmem:[#allocation7 + $0x778] sm:$0xff] }
 0x521   :  { %7921 = vmatpush1.bf16.msra.mxu1 %v10203_v51  ;;  %v10315_v51 = vcombine.low %v635_v15, %v643_v42  ;;  %v731_v3 = vld [vmem:[#allocation7 + $0x7b8] sm:$0xff] }
 0x522   :  { %9957 = vmatpush1.bf16.msra.mxu0 %v11809_v58  ;;  %7922 = vmatprep.subr.bf16.mxu1 %v10220_v0  ;;  %v11830_v58 = vld [vmem:[#allocation10 + $0x490] ss:$8 sps:$4 sm:$0xff]   ;;  %v10332_v0 = vcombine.high %v651_v62, %v659_v31  ;;  %v739_v57 = vld [vmem:[#allocation7 + $0x7f8] sm:$0xff] }
 0x523   :  { %9958 = vmatprep.subr.bf16.mxu0 %v11814_v32  ;;  %v11835_v32 = vld [vmem:[#allocation10 + $0x4a4] ss:$8 sps:$4 sm:$0xff]  }
 0x524   :  { %v747_v15 = vld [vmem:[#allocation7 + $0x838] sm:$0xff] }
 0x525   :  { %7923 = vmatpush1.bf16.msra.mxu1 %v10219_v2  ;;  %v10331_v2 = vcombine.low %v651_v62, %v659_v31  ;;  %v755_v42 = vld [vmem:[#allocation7 + $0x878] sm:$0xff] }
 0x526   :  { %9959 = vmatpush1.bf16.msra.mxu0 %v11812_v23  ;;  %7924 = vmatprep.subr.bf16.mxu1 %v10236_v28  ;;  %v11833_v23 = vld [vmem:[#allocation10 + $0x4a0] ss:$8 sps:$4 sm:$0xff]   ;;  %v10348_v28 = vcombine.high %v667_v1, %v675_v34  ;;  %v11853_v31 = vld [vmem:[#allocation10 + $0x504] ss:$8 sps:$4 sm:$0xff]  }
 0x527   :  { %9960 = vmatprep.subr.bf16.mxu0 %v11817_v37  ;;  %v11838_v37 = vld [vmem:[#allocation10 + $0x4b4] ss:$8 sps:$4 sm:$0xff]   ;;  %v771_v62 = vld [vmem:[#allocation7 + $0x8f8] sm:$0xff] }
 0x529   :  { %7925 = vmatpush1.bf16.msra.mxu1 %v10235_v10  ;;  %v10347_v10 = vcombine.low %v667_v1, %v675_v34  ;;  %v11851_v1 = vld [vmem:[#allocation10 + $0x500] ss:$8 sps:$4 sm:$0xff]   ;;  %v11856_v34 = vld [vmem:[#allocation10 + $0x514] ss:$8 sps:$4 sm:$0xff]  }
 0x52a   :  { %9961 = vmatpush1.bf16.msra.mxu0 %v11815_v12  ;;  %7926 = vmatprep.subr.bf16.mxu1 %v10252_v7  ;;  %v11836_v12 = vld [vmem:[#allocation10 + $0x4b0] ss:$8 sps:$4 sm:$0xff]   ;;  %v10364_v7 = vcombine.high %v683_v21, %v691_v24 }
 0x52b   :  { %9962 = vmatprep.subr.bf16.mxu0 %v11820_v39  ;;  %v11841_v39 = vld [vmem:[#allocation10 + $0x4c4] ss:$8 sps:$4 sm:$0xff]  }
 0x52d   :  { %7927 = vmatpush1.bf16.msra.mxu1 %v10251_v27  ;;  %v10363_v27 = vcombine.low %v683_v21, %v691_v24  ;;  %v11854_v21 = vld [vmem:[#allocation10 + $0x510] ss:$8 sps:$4 sm:$0xff]   ;;  %v11859_v24 = vld [vmem:[#allocation10 + $0x524] ss:$8 sps:$4 sm:$0xff]  }
 0x52e   :  { %9963 = vmatpush1.bf16.msra.mxu0 %v11818_v29  ;;  %7928 = vmatprep.subr.bf16.mxu1 %v10268_v11  ;;  %v11839_v29 = vld [vmem:[#allocation10 + $0x4c0] ss:$8 sps:$4 sm:$0xff]   ;;  %v10380_v11 = vcombine.high %v699_v18, %v707_v26 }
 0x52f   :  { %9964 = vmatprep.subr.bf16.mxu0 %v11823_v13  ;;  %v11844_v13 = vld [vmem:[#allocation10 + $0x4d4] ss:$8 sps:$4 sm:$0xff]  }
 0x531   :  { %7929 = vmatpush1.bf16.msra.mxu1 %v10267_v41  ;;  %v10379_v41 = vcombine.low %v699_v18, %v707_v26  ;;  %v835_v18 = vld [vmem:[#allocation7 + $0xaf8] sm:$0xff]  ;;  %v11860_v26 = vld [vmem:[#allocation10 + $0x530] ss:$8 sps:$4 sm:$0xff]  }
 0x532   :  { %9965 = vmatpush1.bf16.msra.mxu0 %v11821_v61  ;;  %7930 = vmatprep.subr.bf16.mxu1 %v10284_v49  ;;  %v11842_v61 = vld [vmem:[#allocation10 + $0x4d0] ss:$8 sps:$4 sm:$0xff]   ;;  %v10396_v49 = vcombine.high %v715_v38, %v723_v16 }
 0x533   :  { %9966 = vmatprep.subr.bf16.mxu0 %v11826_v59  ;;  %v11847_v59 = vld [vmem:[#allocation10 + $0x4e4] ss:$8 sps:$4 sm:$0xff]  }
 0x535   :  { %7931 = vmatpush1.bf16.msra.mxu1 %v10283_v40  ;;  %v10395_v40 = vcombine.low %v715_v38, %v723_v16  ;;  %v851_v38 = vld [vmem:[#allocation7 + $0xb78] sm:$0xff] }
 0x536   :  { %9967 = vmatpush1.bf16.msra.mxu0 %v11824_v63  ;;  %7932 = vmatprep.subr.bf16.mxu1 %v10300_v17  ;;  %v11845_v63 = vld [vmem:[#allocation10 + $0x4e0] ss:$8 sps:$4 sm:$0xff]   ;;  %v10412_v17 = vcombine.high %v731_v3, %v739_v57 }
 0x537   :  { %9968 = vmatprep.subr.bf16.mxu0 %v11829_v8  ;;  %v11850_v8 = vld [vmem:[#allocation10 + $0x4f4] ss:$8 sps:$4 sm:$0xff]   ;;  %v11863_v16 = vld [vmem:[#allocation10 + $0x540] ss:$8 sps:$4 sm:$0xff]  }
 0x539   :  { %7933 = vmatpush1.bf16.msra.mxu1 %v10299_v43  ;;  %v10411_v43 = vcombine.low %v731_v3, %v739_v57  ;;  %v867_v3 = vld [vmem:[#allocation7 + $0xbf8] sm:$0xff]  ;;  %v11866_v57 = vld [vmem:[#allocation10 + $0x550] ss:$8 sps:$4 sm:$0xff]  }
 0x53a   :  { %9969 = vmatpush1.bf16.msra.mxu0 %v11827_v6  ;;  %7934 = vmatprep.subr.bf16.mxu1 %v10316_v20  ;;  %v11848_v6 = vld [vmem:[#allocation10 + $0x4f0] ss:$8 sps:$4 sm:$0xff]   ;;  %v10428_v20 = vcombine.high %v747_v15, %v755_v42 }
 0x53b   :  { %9970 = vmatprep.subr.bf16.mxu0 %v11832_v19  ;;  %v763_v19 = vld [vmem:[#allocation7 + $0x8b8] sm:$0xff] }
 0x53d   :  { %7935 = vmatpush1.bf16.msra.mxu1 %v10315_v51  ;;  %v10427_v51 = vcombine.low %v747_v15, %v755_v42  ;;  %v883_v15 = vld [vmem:[#allocation7 + $0xc78] sm:$0xff] }
 0x53e   :  { %9971 = vmatpush1.bf16.msra.mxu0 %v11830_v58  ;;  %7936 = vmatprep.subr.bf16.mxu1 %v10332_v0  ;;  %v10444_v58 = vcombine.high %v763_v19, %v771_v62  ;;  %v779_v0 = vld [vmem:[#allocation7 + $0x938] sm:$0xff] }
 0x53f   :  { %9972 = vmatprep.subr.bf16.mxu0 %v11835_v32  ;;  %v787_v32 = vld [vmem:[#allocation7 + $0x978] sm:$0xff] }
 0x540   :  { %v11869_v42 = vld [vmem:[#allocation10 + $0x560] ss:$8 sps:$4 sm:$0xff]  }
 0x541   :  { %7937 = vmatpush1.bf16.msra.mxu1 %v10331_v2  ;;  %v10443_v2 = vcombine.low %v763_v19, %v771_v62  ;;  %v891_v19 = vld [vmem:[#allocation7 + $0xcb8] sm:$0xff] }
 0x542   :  { %9973 = vmatpush1.bf16.msra.mxu0 %v11833_v23  ;;  %7938 = vmatprep.subr.bf16.mxu1 %v10348_v28  ;;  %v10460_v23 = vcombine.high %v779_v0, %v787_v32  ;;  %v795_v28 = vld [vmem:[#allocation7 + $0x9b8] sm:$0xff] }
 0x543   :  { %9974 = vmatprep.subr.bf16.mxu0 %v11838_v37  ;;  %v803_v37 = vld [vmem:[#allocation7 + $0x9f8] sm:$0xff] }
 0x544   :  { %v899_v62 = vld [vmem:[#allocation7 + $0xcf8] sm:$0xff] }
 0x545   :  { %7939 = vmatpush1.bf16.msra.mxu1 %v10347_v10  ;;  %v10459_v10 = vcombine.low %v779_v0, %v787_v32  ;;  %v10572_v0 = vcombine.high %v891_v19, %v899_v62  ;;  %v907_v32 = vld [vmem:[#allocation7 + $0xd38] sm:$0xff] }
 0x546   :  { %9975 = vmatpush1.bf16.msra.mxu0 %v11836_v12  ;;  %7940 = vmatprep.subr.bf16.mxu1 %v10364_v7  ;;  %v811_v12 = vld [vmem:[#allocation7 + $0xa38] sm:$0xff] }
 0x547   :  { %9976 = vmatprep.subr.bf16.mxu0 %v11841_v39  ;;  %v819_v7 = vld [vmem:[#allocation7 + $0xa78] sm:$0xff] }
 0x548   :  { %v827_v39 = vld [vmem:[#allocation7 + $0xab8] sm:$0xff] }
 0x549   :  { %7941 = vmatpush1.bf16.msra.mxu1 %v10363_v27  ;;  %v11865_v27 = vld [vmem:[#allocation10 + $0x544] ss:$8 sps:$4 sm:$0xff]  }
 0x54a   :  { %9977 = vmatpush1.bf16.msra.mxu0 %v11839_v29  ;;  %7942 = vmatprep.subr.bf16.mxu1 %v10380_v11  ;;  %v10491_v29 = vcombine.low %v811_v12, %v819_v7  ;;  %v10508_v11 = vcombine.high %v827_v39, %v835_v18 }
 0x54b   :  { %9978 = vmatprep.subr.bf16.mxu0 %v11844_v13  ;;  %v843_v13 = vld [vmem:[#allocation7 + $0xb38] sm:$0xff] }
 0x54d   :  { %7943 = vmatpush1.bf16.msra.mxu1 %v10379_v41  ;;  %v11868_v41 = vld [vmem:[#allocation10 + $0x554] ss:$8 sps:$4 sm:$0xff]  }
 0x54e   :  { %9979 = vmatpush1.bf16.msra.mxu0 %v11842_v61  ;;  %7944 = vmatprep.subr.bf16.mxu1 %v10396_v49  ;;  %v10507_v61 = vcombine.low %v827_v39, %v835_v18  ;;  %v10524_v49 = vcombine.high %v843_v13, %v851_v38  ;;  %v955_v18 = vld [vmem:[#allocation7 + $0xeb8] sm:$0xff] }
 0x54f   :  { %9980 = vmatprep.subr.bf16.mxu0 %v11847_v59  ;;  %v859_v59 = vld [vmem:[#allocation7 + $0xbb8] sm:$0xff] }
 0x551   :  { %7945 = vmatpush1.bf16.msra.mxu1 %v10395_v40  ;;  %v11871_v40 = vld [vmem:[#allocation10 + $0x564] ss:$8 sps:$4 sm:$0xff]  }
 0x552   :  { %9981 = vmatpush1.bf16.msra.mxu0 %v11845_v63  ;;  %7946 = vmatprep.subr.bf16.mxu1 %v10412_v17  ;;  %v10523_v63 = vcombine.low %v843_v13, %v851_v38  ;;  %v10540_v17 = vcombine.high %v859_v59, %v867_v3  ;;  %v971_v38 = vld [vmem:[#allocation7 + $0xf38] sm:$0xff] }
 0x553   :  { %9982 = vmatprep.subr.bf16.mxu0 %v11850_v8  ;;  %v875_v8 = vld [vmem:[#allocation7 + $0xc38] sm:$0xff] }
 0x555   :  { %7947 = vmatpush1.bf16.msra.mxu1 %v10411_v43  ;;  %v11874_v43 = vld [vmem:[#allocation10 + $0x574] ss:$8 sps:$4 sm:$0xff]  }
 0x556   :  { %9983 = vmatpush1.bf16.msra.mxu0 %v11848_v6  ;;  %7959 = vmatprep.subr.bf16.mxu1 %v10428_v20  ;;  %v10539_v6 = vcombine.low %v859_v59, %v867_v3  ;;  %v10556_v20 = vcombine.high %v875_v8, %v883_v15  ;;  %v987_v3 = vld [vmem:[#allocation7 + $0xfb8] sm:$0xff] }
 0x557   :  { %9995 = vmatprep.subr.bf16.mxu0 %v11853_v31  ;;  %v11872_v31 = vld [vmem:[#allocation10 + $0x570] ss:$8 sps:$4 sm:$0xff]  }
 0x558   :  { %7949 = vmatmul.mubr.bf16.vlgmr.msra.gmra.mrb[24].mxu1 %v12339_v25  ;;  %v10476_v25 = vcombine.high %v795_v28, %v803_v37 }
 0x559   :  { %9985 = vmatmul.mubr.bf16.vlgmr.msra.gmra.mrb[20].mxu0 %v8192_v60  ;;  %7960 = vmatpush1.bf16.msra.mxu1 %v10427_v51  ;;  %v10492_v60 = vcombine.high %v811_v12, %v819_v7  ;;  %v11877_v51 = vld [vmem:[#allocation10 + $0x584] ss:$8 sps:$4 sm:$0xff]  }
 0x55a   :  { %7991 = vmatprep.mubr.bf16.mxu1 %v12363_v5  ;;  %7961 = vmatprep.subr.bf16.mxu1 %v10444_v58  ;;  %v10475_v5 = vcombine.low %v795_v28, %v803_v37  ;;  %v10555_v58 = vcombine.low %v875_v8, %v883_v15  ;;  %v923_v37 = vld [vmem:[#allocation7 + $0xdb8] sm:$0xff] }
 0x55b   :  { %9996 = vmatpush1.bf16.msra.mxu0 %v11851_v1  ;;  %v915_v1 = vld [vmem:[#allocation7 + $0xd78] sm:$0xff] }
 0x55c   :  { %9997 = vmatprep.subr.bf16.mxu0 %v11856_v34  ;;  %v11875_v34 = vld [vmem:[#allocation10 + $0x580] ss:$8 sps:$4 sm:$0xff]   ;;  %v10588_v28 = vcombine.high %v907_v32, %v915_v1 }
 0x55d   :  { %7962 = vmatpush1.bf16.msra.mxu1 %v10443_v2  ;;  %v11880_v2 = vld [vmem:[#allocation10 + $0x594] ss:$8 sps:$4 sm:$0xff]   ;;  %v939_v7 = vld [vmem:[#allocation7 + $0xe38] sm:$0xff] }
 0x55e   :  { %7963 = vmatprep.subr.bf16.mxu1 %v10460_v23  ;;  %v10571_v23 = vcombine.low %v891_v19, %v899_v62  ;;  %v1003_v15 = vld [vmem:[#allocation7 + $0x1038] sm:$0xff] }
 0x55f   :  { %9998 = vmatpush1.bf16.msra.mxu0 %v11854_v21  ;;  %v931_v21 = vld [vmem:[#allocation7 + $0xdf8] sm:$0xff] }
 0x560   :  { %9999 = vmatprep.subr.bf16.mxu0 %v11859_v24  ;;  %v11878_v24 = vld [vmem:[#allocation10 + $0x590] ss:$8 sps:$4 sm:$0xff]   ;;  %v10604_v12 = vcombine.high %v923_v37, %v931_v21  ;;  %v1019_v62 = vld [vmem:[#allocation7 + $0x10b8] sm:$0xff] }
 0x561   :  { %7964 = vmatpush1.bf16.msra.mxu1 %v10459_v10  ;;  %v11883_v10 = vld [vmem:[#allocation10 + $0x5a4] ss:$8 sps:$4 sm:$0xff]  }
 0x562   :  { %7965 = vmatprep.subr.bf16.mxu1 %v10476_v25  ;;  %v10587_v25 = vcombine.low %v907_v32, %v915_v1  ;;  %v1035_v1 = vld [vmem:[#allocation7 + $0x1138] sm:$0xff] }
 0x563   :  { %10000 = vmatpush1.bf16.msra.mxu0 %v11857_v35  ;;  %v947_v35 = vld [vmem:[#allocation7 + $0xe78] sm:$0xff] }
 0x564   :  { %10001 = vmatprep.subr.bf16.mxu0 %v11862_v50  ;;  %v11881_v50 = vld [vmem:[#allocation10 + $0x5a0] ss:$8 sps:$4 sm:$0xff]   ;;  %v10620_v39 = vcombine.high %v939_v7, %v947_v35 }
 0x565   :  { %7966 = vmatpush1.bf16.msra.mxu1 %v10475_v5  ;;  %v11886_v5 = vld [vmem:[#allocation10 + $0x5b4] ss:$8 sps:$4 sm:$0xff]  }
 0x566   :  { %7967 = vmatprep.subr.bf16.mxu1 %v10492_v60  ;;  %v10603_v60 = vcombine.low %v923_v37, %v931_v21  ;;  %v1059_v37 = vld [vmem:[#allocation7 + $0x11f8] sm:$0xff] }
 0x567   :  { %10002 = vmatpush1.bf16.msra.mxu0 %v11860_v26  ;;  %v963_v26 = vld [vmem:[#allocation7 + $0xef8] sm:$0xff] }
 0x568   :  { %10003 = vmatprep.subr.bf16.mxu0 %v11865_v27  ;;  %v11884_v27 = vld [vmem:[#allocation10 + $0x5b0] ss:$8 sps:$4 sm:$0xff]   ;;  %v10636_v13 = vcombine.high %v955_v18, %v963_v26 }
 0x569   :  { %7968 = vmatpush1.bf16.msra.mxu1 %v10491_v29  ;;  %v11889_v29 = vld [vmem:[#allocation10 + $0x5c4] ss:$8 sps:$4 sm:$0xff]  }
 0x56a   :  { %7969 = vmatprep.subr.bf16.mxu1 %v10508_v11  ;;  %v10619_v11 = vcombine.low %v939_v7, %v947_v35  ;;  %v1091_v35 = vld [vmem:[#allocation7 + $0x12f8] sm:$0xff] }
 0x56b   :  { %10004 = vmatpush1.bf16.msra.mxu0 %v11863_v16  ;;  %v979_v16 = vld [vmem:[#allocation7 + $0xf78] sm:$0xff] }
 0x56c   :  { %10005 = vmatprep.subr.bf16.mxu0 %v11868_v41  ;;  %v11887_v41 = vld [vmem:[#allocation10 + $0x5c0] ss:$8 sps:$4 sm:$0xff]   ;;  %v10652_v59 = vcombine.high %v971_v38, %v979_v16 }
 0x56d   :  { %7970 = vmatpush1.bf16.msra.mxu1 %v10507_v61  ;;  %v11892_v61 = vld [vmem:[#allocation10 + $0x5d4] ss:$8 sps:$4 sm:$0xff]  }
 0x56e   :  { %7971 = vmatprep.subr.bf16.mxu1 %v10524_v49  ;;  %v10635_v49 = vcombine.low %v955_v18, %v963_v26  ;;  %v1115_v26 = vld [vmem:[#allocation7 + $0x13b8] sm:$0xff] }
 0x56f   :  { %10006 = vmatpush1.bf16.msra.mxu0 %v11866_v57  ;;  %v995_v57 = vld [vmem:[#allocation7 + $0xff8] sm:$0xff] }
 0x570   :  { %10007 = vmatprep.subr.bf16.mxu0 %v11871_v40  ;;  %v11890_v40 = vld [vmem:[#allocation10 + $0x5d0] ss:$8 sps:$4 sm:$0xff]   ;;  %v10668_v8 = vcombine.high %v987_v3, %v995_v57 }
 0x571   :  { %7972 = vmatpush1.bf16.msra.mxu1 %v10523_v63  ;;  %v11895_v63 = vld [vmem:[#allocation10 + $0x5e4] ss:$8 sps:$4 sm:$0xff]  }
 0x572   :  { %7973 = vmatprep.subr.bf16.mxu1 %v10540_v17  ;;  %v10651_v17 = vcombine.low %v971_v38, %v979_v16  ;;  %v1139_v38 = vld [vmem:[#allocation7 + $0x1478] sm:$0xff] }
 0x573   :  { %10008 = vmatpush1.bf16.msra.mxu0 %v11869_v42  ;;  %v1011_v42 = vld [vmem:[#allocation7 + $0x1078] sm:$0xff] }
 0x574   :  { %10009 = vmatprep.subr.bf16.mxu0 %v11874_v43  ;;  %v11893_v43 = vld [vmem:[#allocation10 + $0x5e0] ss:$8 sps:$4 sm:$0xff]   ;;  %v10684_v19 = vcombine.high %v1003_v15, %v1011_v42 }
 0x575   :  { %7974 = vmatpush1.bf16.msra.mxu1 %v10539_v6  ;;  %v11898_v6 = vld [vmem:[#allocation10 + $0x5f4] ss:$8 sps:$4 sm:$0xff]  }
 0x576   :  { %7975 = vmatprep.subr.bf16.mxu1 %v10556_v20  ;;  %v10667_v20 = vcombine.low %v987_v3, %v995_v57  ;;  %v1163_v57 = vld [vmem:[#allocation7 + $0x1538] sm:$0xff] }
 0x577   :  { %10010 = vmatpush1.bf16.msra.mxu0 %v11872_v31  ;;  %v1027_v31 = vld [vmem:[#allocation7 + $0x10f8] sm:$0xff] }
 0x578   :  { %10011 = vmatprep.subr.bf16.mxu0 %v11877_v51  ;;  %v11896_v51 = vld [vmem:[#allocation10 + $0x5f0] ss:$8 sps:$4 sm:$0xff]   ;;  %v10700_v32 = vcombine.high %v1019_v62, %v1027_v31 }
 0x579   :  { %7976 = vmatpush1.bf16.msra.mxu1 %v10555_v58  ;;  %v11901_v58 = vld [vmem:[#allocation10 + $0x604] ss:$8 sps:$4 sm:$0xff]  }
 0x57a   :  { %7977 = vmatprep.subr.bf16.mxu1 %v10572_v0  ;;  %v10683_v0 = vcombine.low %v1003_v15, %v1011_v42  ;;  %v1187_v15 = vld [vmem:[#allocation7 + $0x15f8] sm:$0xff] }
 0x57b   :  { %10012 = vmatpush1.bf16.msra.mxu0 %v11875_v34  ;;  %v1043_v34 = vld [vmem:[#allocation7 + $0x1178] sm:$0xff] }
 0x57c   :  { %10013 = vmatprep.subr.bf16.mxu0 %v11880_v2  ;;  %v10699_v2 = vcombine.low %v1019_v62, %v1027_v31  ;;  %v10715_v21 = vcombine.low %v1035_v1, %v1043_v34  ;;  %v1211_v31 = vld [vmem:[#allocation7 + $0x16b8] sm:$0xff] }
 0x57d   :  { %7978 = vmatpush1.bf16.msra.mxu1 %v10571_v23  ;;  %v10716_v23 = vcombine.high %v1035_v1, %v1043_v34  ;;  %v1235_v1 = vld [vmem:[#allocation7 + $0x1778] sm:$0xff] }
 0x57e   :  { %7979 = vmatprep.subr.bf16.mxu1 %v10588_v28  ;;  %v1051_v28 = vld [vmem:[#allocation7 + $0x11b8] sm:$0xff] }
 0x57f   :  { %10014 = vmatpush1.bf16.msra.mxu0 %v11878_v24  ;;  %v10732_v24 = vcombine.high %v1051_v28, %v1059_v37 }
 0x580   :  { %10015 = vmatprep.subr.bf16.mxu0 %v11883_v10  ;;  %v1067_v10 = vld [vmem:[#allocation7 + $0x1238] sm:$0xff] }
 0x581   :  { %7980 = vmatpush1.bf16.msra.mxu1 %v10587_v25  ;;  %v1075_v25 = vld [vmem:[#allocation7 + $0x1278] sm:$0xff] }
 0x582   :  { %7981 = vmatprep.subr.bf16.mxu1 %v10604_v12  ;;  %v10731_v12 = vcombine.low %v1051_v28, %v1059_v37  ;;  %v10748_v7 = vcombine.high %v1067_v10, %v1075_v25  ;;  %v1251_v28 = vld [vmem:[#allocation7 + $0x17f8] sm:$0xff] }
 0x583   :  { %10016 = vmatpush1.bf16.msra.mxu0 %v11881_v50  ;;  %v10747_v50 = vcombine.low %v1067_v10, %v1075_v25  ;;  %v1267_v10 = vld [vmem:[#allocation7 + $0x1878] sm:$0xff] }
 0x584   :  { %10017 = vmatprep.subr.bf16.mxu0 %v11886_v5  ;;  %v1099_v5 = vld [vmem:[#allocation7 + $0x1338] sm:$0xff] }
 0x585   :  { %7982 = vmatpush1.bf16.msra.mxu1 %v10603_v60  ;;  %v1107_v60 = vld [vmem:[#allocation7 + $0x1378] sm:$0xff] }
 0x586   :  { %7983 = vmatprep.subr.bf16.mxu1 %v10620_v39  ;;  %v10780_v18 = vcombine.high %v1099_v5, %v1107_v60 }
 0x587   :  { %10018 = vmatpush1.bf16.msra.mxu0 %v11884_v27  ;;  %v1123_v27 = vld [vmem:[#allocation7 + $0x13f8] sm:$0xff] }
 0x588   :  { %10019 = vmatprep.subr.bf16.mxu0 %v11889_v29  ;;  %v10779_v29 = vcombine.low %v1099_v5, %v1107_v60  ;;  %v10795_v16 = vcombine.low %v1115_v26, %v1123_v27  ;;  %v1299_v5 = vld [vmem:[#allocation7 + $0x1978] sm:$0xff] }
 0x589   :  { %7984 = vmatpush1.bf16.msra.mxu1 %v10619_v11  ;;  %v10796_v11 = vcombine.high %v1115_v26, %v1123_v27  ;;  %v1315_v26 = vld [vmem:[#allocation7 + $0x19f8] sm:$0xff] }
 0x58a   :  { %7985 = vmatprep.subr.bf16.mxu1 %v10636_v13  ;;  %v1131_v13 = vld [vmem:[#allocation7 + $0x1438] sm:$0xff] }
 0x58b   :  { %10020 = vmatpush1.bf16.msra.mxu0 %v11887_v41  ;;  %v10812_v41 = vcombine.high %v1131_v13, %v1139_v38 }
 0x58c   :  { %10021 = vmatprep.subr.bf16.mxu0 %v11892_v61  ;;  %v1147_v61 = vld [vmem:[#allocation7 + $0x14b8] sm:$0xff] }
 0x58d   :  { %7986 = vmatpush1.bf16.msra.mxu1 %v10635_v49  ;;  %v1155_v49 = vld [vmem:[#allocation7 + $0x14f8] sm:$0xff] }
 0x58e   :  { %7987 = vmatprep.subr.bf16.mxu1 %v10652_v59  ;;  %v10811_v59 = vcombine.low %v1131_v13, %v1139_v38  ;;  %v10828_v3 = vcombine.high %v1147_v61, %v1155_v49  ;;  %v1331_v13 = vld [vmem:[#allocation7 + $0x1a78] sm:$0xff] }
 0x58f   :  { %10022 = vmatpush1.bf16.msra.mxu0 %v11890_v40  ;;  %v1171_v40 = vld [vmem:[#allocation7 + $0x1578] sm:$0xff] }
 0x590   :  { %10023 = vmatprep.subr.bf16.mxu0 %v11895_v63  ;;  %v10827_v63 = vcombine.low %v1147_v61, %v1155_v49  ;;  %v10843_v42 = vcombine.low %v1163_v57, %v1171_v40  ;;  %v1355_v49 = vld [vmem:[#allocation7 + $0x1b38] sm:$0xff] }
 0x591   :  { %7988 = vmatpush1.bf16.msra.mxu1 %v10651_v17  ;;  %v10844_v17 = vcombine.high %v1163_v57, %v1171_v40 }
 0x592   :  { %7989 = vmatprep.subr.bf16.mxu1 %v10668_v8  ;;  %v1179_v8 = vld [vmem:[#allocation7 + $0x15b8] sm:$0xff] }
 0x593   :  { %10024 = vmatpush1.bf16.msra.mxu0 %v11893_v43  ;;  %v10860_v43 = vcombine.high %v1179_v8, %v1187_v15 }
 0x594   :  { %10025 = vmatprep.subr.bf16.mxu0 %v11898_v6  ;;  %v1195_v6 = vld [vmem:[#allocation7 + $0x1638] sm:$0xff] }
 0x595   :  { %7990 = vmatpush1.bf16.msra.mxu1 %v10667_v20  ;;  %v1203_v20 = vld [vmem:[#allocation7 + $0x1678] sm:$0xff] }
 0x596   :  { %8002 = vmatprep.subr.bf16.mxu1 %v10684_v19  ;;  %v10859_v19 = vcombine.low %v1179_v8, %v1187_v15  ;;  %v10876_v62 = vcombine.high %v1195_v6, %v1203_v20  ;;  %v1371_v15 = vld [vmem:[#allocation7 + $0x1bb8] sm:$0xff] }
 0x597   :  { %10026 = vmatpush1.bf16.msra.mxu0 %v11896_v51  ;;  %v1219_v51 = vld [vmem:[#allocation7 + $0x16f8] sm:$0xff] }
 0x598   :  { %7992 = vmatmul.mubr.bf16.vlgmr.msra.gmra.mrb[24].mxu1 %v12354_v4  ;;  %10038 = vmatprep.subr.bf16.mxu0 %v11901_v58  ;;  %v1083_v4 = vld [vmem:[#allocation7 + $0x12b8] sm:$0xff]  ;;  %v10875_v58 = vcombine.low %v1195_v6, %v1203_v20  ;;  %v10891_v34 = vcombine.low %v1211_v31, %v1219_v51 }
 0x599   :  { %8003 = vmatpush1.bf16.msra.mxu1 %v10683_v0  ;;  %8034 = vmatprep.mubr.bf16.mxu1 %v12384_v52  ;;  %v10764_v52 = vcombine.high %v1083_v4, %v1091_v35  ;;  %v10763_v39 = vcombine.low %v1083_v4, %v1091_v35  ;;  %v10892_v0 = vcombine.high %v1211_v31, %v1219_v51  ;;  %v1283_v4 = vld [vmem:[#allocation7 + $0x18f8] sm:$0xff] }
 0x59a   :  { %8004 = vmatprep.subr.bf16.mxu1 %v10700_v32  ;;  %v1227_v32 = vld [vmem:[#allocation7 + $0x1738] sm:$0xff] }
 0x59b   :  { %v10907_v37 = vcombine.low %v1227_v32, %v1235_v1 }
 0x59d   :  { %8005 = vmatpush1.bf16.msra.mxu1 %v10699_v2  ;;  %v10908_v2 = vcombine.high %v1227_v32, %v1235_v1  ;;  %v1387_v32 = vld [vmem:[#allocation7 + $0x1c38] sm:$0xff] }
 0x59e   :  { %8006 = vmatprep.subr.bf16.mxu1 %v10716_v23  ;;  %v1243_v23 = vld [vmem:[#allocation7 + $0x17b8] sm:$0xff] }
 0x59f   :  { %v10923_v25 = vcombine.low %v1243_v23, %v1251_v28  ;;  %v1395_v1 = vld [vmem:[#allocation7 + $0x1c78] sm:$0xff] }
 0x5a1   :  { %8007 = vmatpush1.bf16.msra.mxu1 %v10715_v21  ;;  %v10924_v21 = vcombine.high %v1243_v23, %v1251_v28 }
 0x5a2   :  { %8008 = vmatprep.subr.bf16.mxu1 %v10732_v24  ;;  %v1259_v24 = vld [vmem:[#allocation7 + $0x1838] sm:$0xff] }
 0x5a3   :  { %v10939_v35 = vcombine.low %v1259_v24, %v1267_v10 }
 0x5a5   :  { %8009 = vmatpush1.bf16.msra.mxu1 %v10731_v12  ;;  %v10940_v12 = vcombine.high %v1259_v24, %v1267_v10 }
 0x5a6   :  { %8010 = vmatprep.subr.bf16.mxu1 %v10748_v7  ;;  %v1275_v7 = vld [vmem:[#allocation7 + $0x18b8] sm:$0xff] }
 0x5a7   :  { %v10955_v60 = vcombine.low %v1275_v7, %v1283_v4 }
 0x5a9   :  { %8011 = vmatpush1.bf16.msra.mxu1 %v10747_v50  ;;  %v10956_v50 = vcombine.high %v1275_v7, %v1283_v4  ;;  %v1411_v7 = vld [vmem:[#allocation7 + $0x1cf8] sm:$0xff] }
 0x5aa   :  { %8012 = vmatprep.subr.bf16.mxu1 %v10764_v52  ;;  %v1291_v52 = vld [vmem:[#allocation7 + $0x1938] sm:$0xff] }
 0x5ab   :  { %v10971_v27 = vcombine.low %v1291_v52, %v1299_v5 }
 0x5ad   :  { %8013 = vmatpush1.bf16.msra.mxu1 %v10763_v39  ;;  %v10972_v39 = vcombine.high %v1291_v52, %v1299_v5  ;;  %v11904_v52 = vld [vmem:[#allocation10 + $0x614] ss:$8 sps:$4 sm:$0xff]  }
 0x5ae   :  { %8014 = vmatprep.subr.bf16.mxu1 %v10780_v18  ;;  %v1307_v18 = vld [vmem:[#allocation7 + $0x19b8] sm:$0xff] }
 0x5af   :  { %v10987_v38 = vcombine.low %v1307_v18, %v1315_v26 }
 0x5b1   :  { %8015 = vmatpush1.bf16.msra.mxu1 %v10779_v29  ;;  %v10988_v29 = vcombine.high %v1307_v18, %v1315_v26  ;;  %v11902_v18 = vld [vmem:[#allocation10 + $0x610] ss:$8 sps:$4 sm:$0xff]  }
 0x5b2   :  { %8016 = vmatprep.subr.bf16.mxu1 %v10796_v11  ;;  %v1323_v11 = vld [vmem:[#allocation7 + $0x1a38] sm:$0xff] }
 0x5b3   :  { %v11003_v61 = vcombine.low %v1323_v11, %v1331_v13 }
 0x5b5   :  { %8017 = vmatpush1.bf16.msra.mxu1 %v10795_v16  ;;  %v11004_v16 = vcombine.high %v1323_v11, %v1331_v13  ;;  %v1435_v11 = vld [vmem:[#allocation7 + $0x1db8] sm:$0xff] }
 0x5b6   :  { %8018 = vmatprep.subr.bf16.mxu1 %v10812_v41  ;;  %v1339_v41 = vld [vmem:[#allocation7 + $0x1ab8] sm:$0xff] }
 0x5b7   :  { %v1443_v13 = vld [vmem:[#allocation7 + $0x1df8] sm:$0xff] }
 0x5b9   :  { %8019 = vmatpush1.bf16.msra.mxu1 %v10811_v59  ;;  %v1363_v59 = vld [vmem:[#allocation7 + $0x1b78] sm:$0xff] }
 0x5ba   :  { %8020 = vmatprep.subr.bf16.mxu1 %v10828_v3  ;;  %v12651_v3 = vld [vmem:[#allocation8 + $0x8] sm:$0xff] }
 0x5bb   :  { %v1555_v57 = vrot.slane %v12651_v3, %v12298_v47  ;;  %v1559_v40 = vrot.slane %v12651_v3, %v12301_v48 }
 0x5bd   :  { %8021 = vmatpush1.bf16.msra.mxu1 %v10827_v63 }
 0x5be   :  { %8022 = vmatprep.subr.bf16.mxu1 %v10844_v17  ;;  %v11036_v17 = vcombine.high %v1355_v49, %v1363_v59 }
 0x5c1   :  { %8023 = vmatpush1.bf16.msra.mxu1 %v10843_v42  ;;  %v1379_v42 = vld [vmem:[#allocation7 + $0x1bf8] sm:$0xff] }
 0x5c2   :  { %8024 = vmatprep.subr.bf16.mxu1 %v10860_v43  ;;  %v11052_v47 = vcombine.high %v1371_v15, %v1379_v42  ;;  %v11051_v23 = vcombine.low %v1371_v15, %v1379_v42  ;;  %v1483_v15 = vld [vmem:[#allocation7 + $0x1f38] sm:$0xff] }
 0x5c3   :  { %v1491_v42 = vld [vmem:[#allocation7 + $0x1f78] sm:$0xff] }
 0x5c5   :  { %8025 = vmatpush1.bf16.msra.mxu1 %v10859_v19 }
 0x5c6   :  { %8026 = vmatprep.subr.bf16.mxu1 %v10876_v62  ;;  %v11035_v62 = vcombine.low %v1355_v49, %v1363_v59  ;;  %v1467_v59 = vld [vmem:[#allocation7 + $0x1eb8] sm:$0xff] }
 0x5c9   :  { %8027 = vmatpush1.bf16.msra.mxu1 %v10875_v58 }
 0x5ca   :  { %8028 = vmatprep.subr.bf16.mxu1 %v10892_v0 }
 0x5cd   :  { %8029 = vmatpush1.bf16.msra.mxu1 %v10891_v34 }
 0x5ce   :  { %8030 = vmatprep.subr.bf16.mxu1 %v10908_v2 }
 0x5d1   :  { %8031 = vmatpush1.bf16.msra.mxu1 %v10907_v37 }
 0x5d2   :  { %8032 = vmatprep.subr.bf16.mxu1 %v10924_v21  ;;  %v11068_v21 = vcombine.high %v1387_v32, %v1395_v1 }
 0x5d5   :  { %8033 = vmatpush1.bf16.msra.mxu1 %v10923_v25 }
 0x5d6   :  { %8045 = vmatprep.subr.bf16.mxu1 %v10940_v12  ;;  %v1403_v12 = vld [vmem:[#allocation7 + $0x1cb8] sm:$0xff] }
 0x5d7   :  { %v11084_v5 = vcombine.high %v1403_v12, %v1411_v7  ;;  %v11083_v26 = vcombine.low %v1403_v12, %v1411_v7  ;;  %v11940_v12 = vld [vmem:[#allocation10 + $0x6d4] ss:$8 sps:$4 sm:$0xff]   ;;  %v11938_v7 = vld [vmem:[#allocation10 + $0x6d0] ss:$8 sps:$4 sm:$0xff]  }
 0x5d8   :  { %8035 = vmatmul.mubr.bf16.vlgmr.msra.gmra.mrb[24].mxu1 %v12382_v14  ;;  %v1347_v14 = vld [vmem:[#allocation7 + $0x1af8] sm:$0xff] }
 0x5d9   :  { %8046 = vmatpush1.bf16.msra.mxu1 %v10939_v35  ;;  %8077 = vmatprep.mubr.bf16.mxu1 %v12398_v54  ;;  %v11020_v54 = vcombine.high %v1339_v41, %v1347_v14  ;;  %v11019_v63 = vcombine.low %v1339_v41, %v1347_v14  ;;  %v11899_v35 = vld [vmem:[#allocation10 + $0x600] ss:$8 sps:$4 sm:$0xff]   ;;  %v11910_v41 = vld [vmem:[#allocation10 + $0x634] ss:$8 sps:$4 sm:$0xff]   ;;  %v11116_v14 = vcombine.high %v1435_v11, %v1443_v13 }
 0x5da   :  { %8047 = vmatprep.subr.bf16.mxu1 %v10956_v50  ;;  %v11067_v50 = vcombine.low %v1387_v32, %v1395_v1  ;;  %v11925_v1 = vld [vmem:[#allocation10 + $0x684] ss:$8 sps:$4 sm:$0xff]  }
 0x5dd   :  { %8048 = vmatpush1.bf16.msra.mxu1 %v10955_v60  ;;  %v1419_v60 = vld [vmem:[#allocation7 + $0x1d38] sm:$0xff] }
 0x5de   :  { %8049 = vmatprep.subr.bf16.mxu1 %v10972_v39  ;;  %v1427_v39 = vld [vmem:[#allocation7 + $0x1d78] sm:$0xff] }
 0x5e1   :  { %8050 = vmatpush1.bf16.msra.mxu1 %v10971_v27  ;;  %v11907_v27 = vld [vmem:[#allocation10 + $0x624] ss:$8 sps:$4 sm:$0xff]  }
 0x5e2   :  { %8051 = vmatprep.subr.bf16.mxu1 %v10988_v29  ;;  %v11100_v29 = vcombine.high %v1419_v60, %v1427_v39 }
 0x5e5   :  { %8052 = vmatpush1.bf16.msra.mxu1 %v10987_v38  ;;  %v11905_v38 = vld [vmem:[#allocation10 + $0x620] ss:$8 sps:$4 sm:$0xff]  }
 0x5e6   :  { %8053 = vmatprep.subr.bf16.mxu1 %v11004_v16  ;;  %v11099_v16 = vcombine.low %v1419_v60, %v1427_v39  ;;  %v11952_v60 = vld [vmem:[#allocation10 + $0x714] ss:$8 sps:$4 sm:$0xff]   ;;  %v11950_v39 = vld [vmem:[#allocation10 + $0x710] ss:$8 sps:$4 sm:$0xff]  }
 0x5e9   :  { %8054 = vmatpush1.bf16.msra.mxu1 %v11003_v61  ;;  %v1451_v61 = vld [vmem:[#allocation7 + $0x1e38] sm:$0xff] }
 0x5ea   :  { %8055 = vmatprep.subr.bf16.mxu1 %v11020_v54  ;;  %v11913_v54 = vld [vmem:[#allocation10 + $0x644] ss:$8 sps:$4 sm:$0xff]   ;;  %v11132_v49 = vcombine.high %v1451_v61, %v1459_v56 }
 0x5eb   :  { %v7735_v8 = vpop.f32.mrb[20].mxu1 }
 0x5ec   :  { %v11457_v43 = vadd.f32 %v7735_v8, %v1555_v57  ;;  %v7737_v6 = vpop.f32.mrb[21].mxu1 }
 0x5ed   :  { %v11458_v20 = vadd.f32 %v7737_v6, %v1559_v40  ;;  %v7739_v19 = vpop.f32.mrb[22].mxu1  ;;  %8056 = vmatpush1.bf16.msra.mxu1 %v11019_v63  ;;  %v11131_v63 = vcombine.low %v1451_v61, %v1459_v56  ;;  %v11971_v61 = vld [vmem:[#allocation10 + $0x780] ss:$8 sps:$4 sm:$0xff]   ;;  %v11976_v56 = vld [vmem:[#allocation10 + $0x794] ss:$8 sps:$4 sm:$0xff]  }
 0x5ee   :  { %v8130_v31 = vmul.f32 0.01, %v11457_v43  ;;  %v11459_v51 = vadd.f32 %v7739_v19, %v1555_v57  ;;  %v7741_v58 = vpop.f32.mrb[23].mxu1  ;;  %8057 = vmatprep.subr.bf16.mxu1 %v11036_v17  ;;  %vm8098_vm9 = vcmp.gt.f32.partialorder %v11457_v43, 0.0  ;;  %v1475_v57 = vld [vmem:[#allocation7 + $0x1ef8] sm:$0xff]  ;;  %v11164_v19 = vcombine.high %v1483_v15, %v1491_v42 }
 0x5ef   :  { %v8131_v0 = vmul.f32 0.01, %v11458_v20  ;;  %v11460_v48 = vadd.f32 %v7741_v58, %v1559_v40  ;;  %vm8099_vm10 = vcmp.gt.f32.partialorder %v11458_v20, 0.0  ;;  %v11911_v40 = vld [vmem:[#allocation10 + $0x640] ss:$8 sps:$4 sm:$0xff]   ;;  %v11148_v8 = vcombine.high %v1467_v59, %v1475_v57 }
 0x5f0   :  { %vm8114_vm11 = vcmp.gt.f32.partialorder %v11459_v51, 0.0  ;;  %v8146_v34 = vmul.f32 0.01, %v11459_v51  ;;  %v8162_v28 = vsel %vm8098_vm9, %v11457_v43, %v8130_v31  ;;  %v11916_v17 = vld [vmem:[#allocation10 + $0x654] ss:$8 sps:$4 sm:$0xff]   ;;  %v11147_v6 = vcombine.low %v1467_v59, %v1475_v57  ;;  %v1507_v31 = vld [vmem:[#allocation7 + $0x1ff8] sm:$0xff] }
 0x5f1   :  { %vm8115_vm12 = vcmp.gt.f32.partialorder %v11460_v48, 0.0  ;;  %v8147_v2 = vmul.f32 0.01, %v11460_v48  ;;  %8058 = vmatpush1.bf16.msra.mxu1 %v11035_v62  ;;  %v8163_v10 = vsel %vm8099_vm10, %v11458_v20, %v8131_v0  ;;  %v11914_v43 = vld [vmem:[#allocation10 + $0x650] ss:$8 sps:$4 sm:$0xff]   ;;  %v1499_v62 = vld [vmem:[#allocation7 + $0x1fb8] sm:$0xff]  ;;  %v11163_v58 = vcombine.low %v1483_v15, %v1491_v42 }
 0x5f2   :  { %v8178_v37 = vsel %vm8114_vm11, %v11459_v51, %v8146_v34  ;;  %8059 = vmatprep.subr.bf16.mxu1 %v11052_v47  ;;  %v11919_v20 = vld [vmem:[#allocation10 + $0x664] ss:$8 sps:$4 sm:$0xff]   ;;  %v11917_v51 = vld [vmem:[#allocation10 + $0x660] ss:$8 sps:$4 sm:$0xff]   ;;  %v11922_v47 = vld [vmem:[#allocation10 + $0x674] ss:$8 sps:$4 sm:$0xff]   ;;  %v11180_v0 = vcombine.high %v1499_v62, %v1507_v31  ;;  %v11179_v32 = vcombine.low %v1499_v62, %v1507_v31 }
 0x5f3   :  { %v8194_v24 = vpack.c.bf16 %v8178_v37, %v8162_v28  ;;  %v8179_v25 = vsel %vm8115_vm12, %v11460_v48, %v8147_v2  ;;  %v11920_v48 = vld [vmem:[#allocation10 + $0x670] ss:$8 sps:$4 sm:$0xff]   ;;  %v11923_v34 = vld [vmem:[#allocation10 + $0x680] ss:$8 sps:$4 sm:$0xff]   ;;  %v11928_v2 = vld [vmem:[#allocation10 + $0x694] ss:$8 sps:$4 sm:$0xff]  }
 0x5f4   :  { %v8195_v4 = vpack.c.bf16 %v8179_v25, %v8163_v10  ;;  %v11931_v28 = vld [vmem:[#allocation10 + $0x6a4] ss:$8 sps:$4 sm:$0xff]   ;;  %v11929_v37 = vld [vmem:[#allocation10 + $0x6a0] ss:$8 sps:$4 sm:$0xff]   ;;  %v11980_v59 = vld [vmem:[#allocation10 + $0x7b0] ss:$8 sps:$4 sm:$0xff]  }
 0x5f5   :  { %8060 = vmatpush1.bf16.msra.mxu1 %v11051_v23  ;;  %v11926_v23 = vld [vmem:[#allocation10 + $0x690] ss:$8 sps:$4 sm:$0xff]   ;;  %v11937_v10 = vld [vmem:[#allocation10 + $0x6c4] ss:$8 sps:$4 sm:$0xff]   ;;  %v11935_v25 = vld [vmem:[#allocation10 + $0x6c0] ss:$8 sps:$4 sm:$0xff]  }
 0x5f6   :  { %10027 = vmatprep.mubr.bf16.mxu0 %v8195_v4  ;;  %8061 = vmatprep.subr.bf16.mxu1 %v11068_v21  ;;  %v11934_v21 = vld [vmem:[#allocation10 + $0x6b4] ss:$8 sps:$4 sm:$0xff]   ;;  %v11943_v4 = vld [vmem:[#allocation10 + $0x6e4] ss:$8 sps:$4 sm:$0xff]  }
 0x5f7   :  { %10028 = vmatmul.mubr.bf16.vlgmr.msra.gmra.mrb[20].mxu0 %v8194_v24  ;;  %v11932_v24 = vld [vmem:[#allocation10 + $0x6b0] ss:$8 sps:$4 sm:$0xff]   ;;  %v11985_v57 = vld [vmem:[#allocation10 + $0x7c4] ss:$8 sps:$4 sm:$0xff]   ;;  %v11994_v42 = vld [vmem:[#allocation10 + $0x7f4] ss:$8 sps:$4 sm:$0xff]  }
 0x5f8   :  { %10039 = vmatpush1.bf16.msra.mxu0 %v11899_v35  ;;  %10070 = vmatprep.mubr.bf16.mxu0 %v8197_v55  ;;  %v11115_v55 = vcombine.low %v1435_v11, %v1443_v13  ;;  %v11946_v35 = vld [vmem:[#allocation10 + $0x6f4] ss:$8 sps:$4 sm:$0xff]   ;;  %v11961_v11 = vld [vmem:[#allocation10 + $0x744] ss:$8 sps:$4 sm:$0xff]   ;;  %v11959_v13 = vld [vmem:[#allocation10 + $0x740] ss:$8 sps:$4 sm:$0xff]  }
 0x5f9   :  { %8062 = vmatpush1.bf16.msra.mxu1 %v11067_v50  ;;  %10040 = vmatprep.subr.bf16.mxu0 %v11904_v52  ;;  %v11944_v50 = vld [vmem:[#allocation10 + $0x6f0] ss:$8 sps:$4 sm:$0xff]   ;;  %v11949_v52 = vld [vmem:[#allocation10 + $0x704] ss:$8 sps:$4 sm:$0xff]  }
 0x5fa   :  { %8063 = vmatprep.subr.bf16.mxu1 %v11084_v5  ;;  %v11947_v5 = vld [vmem:[#allocation10 + $0x700] ss:$8 sps:$4 sm:$0xff]   ;;  %v11991_v15 = vld [vmem:[#allocation10 + $0x7e4] ss:$8 sps:$4 sm:$0xff]  }
 0x5fc   :  { %10041 = vmatpush1.bf16.msra.mxu0 %v11902_v18  ;;  %v11955_v18 = vld [vmem:[#allocation10 + $0x724] ss:$8 sps:$4 sm:$0xff]  }
 0x5fd   :  { %8064 = vmatpush1.bf16.msra.mxu1 %v11083_v26  ;;  %10042 = vmatprep.subr.bf16.mxu0 %v11907_v27  ;;  %v11953_v26 = vld [vmem:[#allocation10 + $0x720] ss:$8 sps:$4 sm:$0xff]   ;;  %v11958_v27 = vld [vmem:[#allocation10 + $0x734] ss:$8 sps:$4 sm:$0xff]  }
 0x5fe   :  { %8065 = vmatprep.subr.bf16.mxu1 %v11100_v29  ;;  %v11956_v29 = vld [vmem:[#allocation10 + $0x730] ss:$8 sps:$4 sm:$0xff]  }
 0x600   :  { %10043 = vmatpush1.bf16.msra.mxu0 %v11905_v38  ;;  %v11964_v38 = vld [vmem:[#allocation10 + $0x754] ss:$8 sps:$4 sm:$0xff]  }
 0x601   :  { %8066 = vmatpush1.bf16.msra.mxu1 %v11099_v16  ;;  %10044 = vmatprep.subr.bf16.mxu0 %v11910_v41  ;;  %v11962_v16 = vld [vmem:[#allocation10 + $0x750] ss:$8 sps:$4 sm:$0xff]  }
 0x602   :  { %8067 = vmatprep.subr.bf16.mxu1 %v11116_v14  ;;  %v11968_v41 = vld [vmem:[#allocation10 + $0x770] ss:$8 sps:$4 sm:$0xff]   ;;  %v11973_v14 = vld [vmem:[#allocation10 + $0x784] ss:$8 sps:$4 sm:$0xff]  }
 0x604   :  { %10045 = vmatpush1.bf16.msra.mxu0 %v11908_v45  ;;  %v11974_v45 = vld [vmem:[#allocation10 + $0x790] ss:$8 sps:$4 sm:$0xff]  }
 0x605   :  { %8068 = vmatpush1.bf16.msra.mxu1 %v11115_v55  ;;  %10046 = vmatprep.subr.bf16.mxu0 %v11913_v54  ;;  %v11979_v55 = vld [vmem:[#allocation10 + $0x7a4] ss:$8 sps:$4 sm:$0xff]   ;;  %v11977_v54 = vld [vmem:[#allocation10 + $0x7a0] ss:$8 sps:$4 sm:$0xff]  }
 0x606   :  { %8069 = vmatprep.subr.bf16.mxu1 %v11132_v49  ;;  %v11982_v49 = vld [vmem:[#allocation10 + $0x7b4] ss:$8 sps:$4 sm:$0xff]  }
 0x608   :  { %10047 = vmatpush1.bf16.msra.mxu0 %v11911_v40  ;;  %v11983_v40 = vld [vmem:[#allocation10 + $0x7c0] ss:$8 sps:$4 sm:$0xff]  }
 0x609   :  { %8070 = vmatpush1.bf16.msra.mxu1 %v11131_v63  ;;  %10048 = vmatprep.subr.bf16.mxu0 %v11916_v17  ;;  %v11988_v63 = vld [vmem:[#allocation10 + $0x7d4] ss:$8 sps:$4 sm:$0xff]   ;;  %v11986_v17 = vld [vmem:[#allocation10 + $0x7d0] ss:$8 sps:$4 sm:$0xff]  }
 0x60a   :  { %8071 = vmatprep.subr.bf16.mxu1 %v11148_v8  ;;  %v11989_v8 = vld [vmem:[#allocation10 + $0x7e0] ss:$8 sps:$4 sm:$0xff]  }
 0x60c   :  { %10049 = vmatpush1.bf16.msra.mxu0 %v11914_v43  ;;  %v11992_v43 = vld [vmem:[#allocation10 + $0x7f0] ss:$8 sps:$4 sm:$0xff]  }
 0x60d   :  { %8072 = vmatpush1.bf16.msra.mxu1 %v11147_v6  ;;  %10050 = vmatprep.subr.bf16.mxu0 %v11919_v20  ;;  %v1571_v6 = vrot.slane %v12651_v3, %v12387_v30  ;;  %v1575_v20 = vrot.slane %v12651_v3, %v12390_v33 }
 0x60e   :  { %8073 = vmatprep.subr.bf16.mxu1 %v11164_v19 }
 0x610   :  { %10051 = vmatpush1.bf16.msra.mxu0 %v11917_v51 }
 0x611   :  { %8074 = vmatpush1.bf16.msra.mxu1 %v11163_v58  ;;  %10052 = vmatprep.subr.bf16.mxu0 %v11922_v47 }
 0x612   :  { %8075 = vmatprep.subr.bf16.mxu1 %v11180_v0 }
 0x614   :  { %10053 = vmatpush1.bf16.msra.mxu0 %v11920_v48 }
 0x615   :  { %8076 = vmatpush1.bf16.msra.mxu1 %v11179_v32  ;;  %10054 = vmatprep.subr.bf16.mxu0 %v11925_v1 }
 0x618   :  { %10055 = vmatpush1.bf16.msra.mxu0 %v11923_v34  ;;  %8078 = vmatmul.mubr.bf16.vlgmr.msra.gmra.mrb[24].mxu1 %v12396_v53  ;;  %v11941_v53 = vld [vmem:[#allocation10 + $0x6e0] ss:$8 sps:$4 sm:$0xff]  }
 0x619   :  { %10056 = vmatprep.subr.bf16.mxu0 %v11928_v2 }
 0x61c   :  { %10057 = vmatpush1.bf16.msra.mxu0 %v11926_v23 }
 0x61d   :  { %10058 = vmatprep.subr.bf16.mxu0 %v11931_v28 }
 0x620   :  { %10059 = vmatpush1.bf16.msra.mxu0 %v11929_v37 }
 0x621   :  { %10060 = vmatprep.subr.bf16.mxu0 %v11934_v21  ;;  %v8488_v21 = vld [vmem:[#allocation11] sm:$0x3] }
 0x624   :  { %10061 = vmatpush1.bf16.msra.mxu0 %v11932_v24  ;;  %v8493_v24 = vrot.slane %v8488_v21, %v12290_v44 }
 0x625   :  { %10062 = vmatprep.subr.bf16.mxu0 %v11937_v10  ;;  %v8497_v10 = vrot.slane %v8488_v21, %v12295_v46 }
 0x628   :  { %10063 = vmatpush1.bf16.msra.mxu0 %v11935_v25 }
 0x629   :  { %10064 = vmatprep.subr.bf16.mxu0 %v11940_v12 }
 0x62c   :  { %10065 = vmatpush1.bf16.msra.mxu0 %v11938_v7 }
 0x62d   :  { %10066 = vmatprep.subr.bf16.mxu0 %v11943_v4 }
 0x630   :  { %10067 = vmatpush1.bf16.msra.mxu0 %v11941_v53 }
 0x631   :  { %10068 = vmatprep.subr.bf16.mxu0 %v11946_v35 }
 0x634   :  { %10069 = vmatpush1.bf16.msra.mxu0 %v11944_v50 }
 0x635   :  { %10081 = vmatprep.subr.bf16.mxu0 %v11949_v52 }
 0x637   :  { %10071 = vmatmul.mubr.bf16.vlgmr.msra.gmra.mrb[20].mxu0 %v8196_v36  ;;  %v11970_v36 = vld [vmem:[#allocation10 + $0x774] ss:$8 sps:$4 sm:$0xff]  }
 0x638   :  { %10082 = vmatpush1.bf16.msra.mxu0 %v11947_v5 }
 0x639   :  { %10083 = vmatprep.subr.bf16.mxu0 %v11952_v60 }
 0x63c   :  { %10084 = vmatpush1.bf16.msra.mxu0 %v11950_v39 }
 0x63d   :  { %10085 = vmatprep.subr.bf16.mxu0 %v11955_v18 }
 0x640   :  { %10086 = vmatpush1.bf16.msra.mxu0 %v11953_v26 }
 0x641   :  { %10087 = vmatprep.subr.bf16.mxu0 %v11958_v27 }
 0x644   :  { %10088 = vmatpush1.bf16.msra.mxu0 %v11956_v29 }
 0x645   :  { %10089 = vmatprep.subr.bf16.mxu0 %v11961_v11 }
 0x648   :  { %10090 = vmatpush1.bf16.msra.mxu0 %v11959_v13 }
 0x649   :  { %10091 = vmatprep.subr.bf16.mxu0 %v11964_v38 }
 0x64c   :  { %10092 = vmatpush1.bf16.msra.mxu0 %v11962_v16 }
 0x64d   :  { %10093 = vmatprep.subr.bf16.mxu0 %v11967_v9 }
 0x650   :  { %10094 = vmatpush1.bf16.msra.mxu0 %v11965_v22 }
 0x651   :  { %10095 = vmatprep.subr.bf16.mxu0 %v11970_v36 }
 0x654   :  { %10096 = vmatpush1.bf16.msra.mxu0 %v11968_v41 }
 0x655   :  { %10097 = vmatprep.subr.bf16.mxu0 %v11973_v14 }
 0x658   :  { %10098 = vmatpush1.bf16.msra.mxu0 %v11971_v61 }
 0x659   :  { %10099 = vmatprep.subr.bf16.mxu0 %v11976_v56 }
 0x65c   :  { %10100 = vmatpush1.bf16.msra.mxu0 %v11974_v45 }
 0x65d   :  { %10101 = vmatprep.subr.bf16.mxu0 %v11979_v55 }
 0x660   :  { %10102 = vmatpush1.bf16.msra.mxu0 %v11977_v54 }
 0x661   :  { %10103 = vmatprep.subr.bf16.mxu0 %v11982_v49 }
 0x664   :  { %10104 = vmatpush1.bf16.msra.mxu0 %v11980_v59 }
 0x665   :  { %10105 = vmatprep.subr.bf16.mxu0 %v11985_v57 }
 0x668   :  { %10106 = vmatpush1.bf16.msra.mxu0 %v11983_v40 }
 0x669   :  { %10107 = vmatprep.subr.bf16.mxu0 %v11988_v63 }
 0x66c   :  { %10108 = vmatpush1.bf16.msra.mxu0 %v11986_v17 }
 0x66d   :  { %10109 = vmatprep.subr.bf16.mxu0 %v11991_v15 }
 0x670   :  { %10110 = vmatpush1.bf16.msra.mxu0 %v11989_v8 }
 0x671   :  { %10111 = vmatprep.subr.bf16.mxu0 %v11994_v42 }
 0x674   :  { %10112 = vmatpush1.bf16.msra.mxu0 %v11992_v43 }
 0x6eb   :  { %v8079_v19 = vpop.f32.mrb[24].mxu1 }
 0x6ec   :  { %v11465_v62 = vadd.f32 %v8079_v19, %v1571_v6  ;;  %v8081_v31 = vpop.f32.mrb[25].mxu1 }
 0x6ed   :  { %v11466_v51 = vadd.f32 %v8081_v31, %v1575_v20  ;;  %v8083_v58 = vpop.f32.mrb[26].mxu1 }
 0x6ee   :  { %v8134_v47 = vmul.f32 0.01, %v11465_v62  ;;  %v11467_v0 = vadd.f32 %v8083_v58, %v1571_v6  ;;  %v8085_v48 = vpop.f32.mrb[27].mxu1  ;;  %vm8102_vm13 = vcmp.gt.f32.partialorder %v11465_v62, 0.0 }
 0x6ef   :  { %v8135_v32 = vmul.f32 0.01, %v11466_v51  ;;  %v11468_v1 = vadd.f32 %v8085_v48, %v1575_v20  ;;  %vm8103_vm14 = vcmp.gt.f32.partialorder %v11466_v51, 0.0 }
 0x6f0   :  { %vm8118_vm15 = vcmp.gt.f32.partialorder %v11467_v0, 0.0  ;;  %v8150_v34 = vmul.f32 0.01, %v11467_v0  ;;  %v8166_v30 = vsel %vm8102_vm13, %v11465_v62, %v8134_v47 }
 0x6f1   :  { %vm8119_vm0 = vcmp.gt.f32.partialorder %v11468_v1, 0.0  ;;  %v8151_v2 = vmul.f32 0.01, %v11468_v1  ;;  %v8167_v33 = vsel %vm8103_vm14, %v11466_v51, %v8135_v32 }
 0x6f2   :  { %v8182_v23 = vsel %vm8118_vm15, %v11467_v0, %v8150_v34 }
 0x6f3   :  { %v8198_v28 = vpack.c.bf16 %v8182_v23, %v8166_v30  ;;  %v8183_v3 = vsel %vm8119_vm0, %v11468_v1, %v8151_v2 }
 0x6f4   :  { %v8199_v37 = vpack.c.bf16 %v8183_v3, %v8167_v33 }
 0x6f6   :  { %10113 = vmatprep.mubr.bf16.mxu0 %v8199_v37 }
 0x6f7   :  { %10114 = vmatmul.mubr.bf16.vlgmr.msra.gmra.mrb[20].mxu0 %v8198_v28 }
 0x7ca   :  { %v10115_v25 = vpop.f32.mrb[20].mxu0 }
 0x7cb   :  { %v11469_v12 = vadd.f32 %v10115_v25, %v8493_v24  ;;  %v10117_v7 = vpop.f32.mrb[21].mxu0 }
 0x7cc   :  { %v11470_v4 = vadd.f32 %v10117_v7, %v8497_v10  ;;  %v10119_v53 = vpop.f32.mrb[22].mxu0 }
 0x7cd   :  { %10124 = vst [vmem:[%s12689_s7] sm:$0xff] %v11469_v12  ;;  %v11471_v35 = vadd.f32 %v10119_v53, %v8493_v24  ;;  %v10121_v50 = vpop.f32.mrb[23].mxu0 }
 0x7ce   :  { %10125 = vst [vmem:[%s12689_s7 + $0x8] sm:$0xff] %v11470_v4  ;;  %v11472_v52 = vadd.f32 %v10121_v50, %v8497_v10 }
 0x7cf   :  { %10126 = vst [vmem:[%s12689_s7 + $0x10] sm:$0xff] %v11471_v35 }
 0x7d0   :  { %10127 = vst [vmem:[%s12689_s7 + $0x18] sm:$0xff] %v11472_v52 }
 0x7d1   :  { %10132 = vsyncpa [#allocation4], 1 }
 0x7d2   :  { %10133 = vsyncpa [#allocation6], 1 }
 0x7d3   :  { %10134 = vsyncpa [#allocation9], 1 }
 0x7d4   :  { %10135 = vsyncpa [#allocation12], 1 }

</bundles_post_ra>
